<compile_context>
chip_gen: v5e
topology: v5e:2x2
jax: 0.10.0
libtpu: 0.0.40
codegen_flags: <defaults>
</compile_context>

<pallas_src>
import functools

import jax
import jax.numpy as jnp
from jax import lax
from jax.experimental import pallas as pl
from jax.experimental.pallas import tpu as pltpu

_HALO = 5          # 5 stacked 3x3 convs -> 5-row receptive-field halo per side
_NEG_SLOPE = 0.2   # LeakyReLU slope
_RES_SCALE = 0.2   # out = x5 * 0.2 + x


def _round_up(x, m):
    return (x + m - 1) // m * m


def _make_rdb_kernel(TH, W, Wp, nc, gc):
    """Builds the fused RDB kernel body (one (batch, row-tile) per grid step)."""
    R = TH + 2 * _HALO              # feature-buffer rows (output rows + halo)
    c_total = nc + 4 * gc

    def kernel(xp_ref, xc_ref, xn_ref,
               w1_ref, b1_ref, w2_ref, b2_ref, w3_ref, b3_ref,
               w4_ref, b4_ref, w5_ref, b5_ref,
               out_ref, feat_ref):
        t = pl.program_id(1)
        nt = pl.num_programs(1)
        fdt = feat_ref.dtype

        # (1) Zero ONLY the padding columns.  Everything else in the buffer is
        # fully rewritten before being read on every grid step, so no
        # full-buffer memset and no cross-step state.
        feat_ref[:, 0:1, :] = jnp.zeros((R, 1, c_total), fdt)
        feat_ref[:, W + 1:Wp, :] = jnp.zeros((R, Wp - W - 1, c_total), fdt)

        # (2) Stage x: TH output rows plus a 5-row halo taken from the
        # neighbouring row-blocks (zeros outside the image).
        feat_ref[_HALO:_HALO + TH, 1:1 + W, 0:nc] = xc_ref[0].astype(fdt)

        @pl.when(t > 0)
        def _halo_lo():
            feat_ref[0:_HALO, 1:1 + W, 0:nc] = xp_ref[0, TH - _HALO:TH].astype(fdt)

        @pl.when(t == 0)
        def _halo_lo_zero():
            feat_ref[0:_HALO, 1:1 + W, 0:nc] = jnp.zeros((_HALO, W, nc), fdt)

        @pl.when(t < nt - 1)
        def _halo_hi():
            feat_ref[_HALO + TH:R, 1:1 + W, 0:nc] = xn_ref[0, 0:_HALO].astype(fdt)

        @pl.when(t == nt - 1)
        def _halo_hi_zero():
            feat_ref[_HALO + TH:R, 1:1 + W, 0:nc] = jnp.zeros((_HALO, W, nc), fdt)

        def conv3x3(k, cin, w_ref, b_ref):
            """3x3 'same' conv over the first `cin` channels of the buffer.

            One MXU matmul (all 9 taps folded into N; weights pre-reshaped to
            (cin, 9*cout) in the wrapper), then 9 shifted adds of the small
            cout-wide result.  f32 accumulation throughout.
            """
            cout = w_ref.shape[-1] // 9
            rows = R - 2 * (k - 1)            # conv input rows needed
            e = rows - 2                      # valid conv output rows
            slab = feat_ref[k - 1:R - k + 1, :, 0:cin]            # (rows, Wp, cin)
            y = jnp.dot(slab.reshape(rows * Wp, cin), w_ref[...],
                        preferred_element_type=jnp.float32)
            y = y.reshape(rows, Wp, 9 * cout)
            acc = jnp.zeros((e, W, cout), jnp.float32)
            for dh in range(3):
                for dw in range(3):
                    tap = dh * 3 + dw
                    acc = acc + y[dh:dh + e, dw:dw + W,
                                  tap * cout:(tap + 1) * cout]
            return acc + b_ref[...].astype(jnp.float32).reshape(1, 1, cout)

        # conv1..conv4: conv -> bias -> LeakyReLU(0.2); result appended to the
        # VMEM feature buffer (dense concat, zero HBM traffic).  Halo rows that
        # fall outside the image (only possible on the first / last row tile)
        # are forced back to zero so deeper convs see proper zero padding.
        cin = nc
        for k, (w_ref, b_ref) in enumerate(
                ((w1_ref, b1_ref), (w2_ref, b2_ref),
                 (w3_ref, b3_ref), (w4_ref, b4_ref)), start=1):
            e = R - 2 * k
            yk = conv3x3(k, cin, w_ref, b_ref)
            yk = jnp.where(yk > 0, yk, _NEG_SLOPE * yk)
            feat_ref[k:k + e, 1:1 + W, cin:cin + gc] = yk.astype(fdt)

            nz = _HALO - k                       # rows possibly outside image
            lo_dst = k
            hi_dst = k + e - nz

            @pl.when(t == 0)
            def _mask_lo(lo_dst=lo_dst, nz=nz, cin=cin):
                feat_ref[lo_dst:lo_dst + nz, 1:1 + W, cin:cin + gc] = (
                    jnp.zeros((nz, W, gc), fdt))

            @pl.when(t == nt - 1)
            def _mask_hi(hi_dst=hi_dst, nz=nz, cin=cin):
                feat_ref[hi_dst:hi_dst + nz, 1:1 + W, cin:cin + gc] = (
                    jnp.zeros((nz, W, gc), fdt))

            cin += gc

        # conv5 (CNA mode: no activation) with fused x5*0.2 + x residual.  The
        # residual comes from the original-precision input block, not the
        # (possibly bf16) feature buffer.
        y5 = conv3x3(5, cin, w5_ref, b5_ref)                    # (TH, W, nc) f32
        res = xc_ref[0].astype(jnp.float32)
        out_ref[0] = (y5 * _RES_SCALE + res).astype(out_ref.dtype)

    return kernel


def _vmem_limit_bytes(TH, W, Wp, nc, gc, feat_dtype, x_itemsize):
    """Rough scoped-VMEM budget for the fused kernel, capped per generation."""
    c_total = nc + 4 * gc
    R = TH + 2 * _HALO
    fb = jnp.finfo(feat_dtype).bits // 8
    feat = R * Wp * c_total * fb                           # feature scratch
    io = 2 * 4 * TH * W * nc * x_itemsize                  # 2x-buffered 3 x-blocks + out
    cins = [nc + i * gc for i in range(5)]
    couts = [gc] * 4 + [nc]
    wts = 2 * sum(ci * 9 * co * fb + co * 4 for ci, co in zip(cins, couts))
    work = max((R - 2 * (k - 1)) * Wp * (ci * fb + 9 * co * 4)   # slab + folded y
               + (R - 2 * k) * W * co * 4                        # accumulator
               for k, (ci, co) in enumerate(zip(cins, couts), start=1))
    est = int(1.5 * (feat + io + wts + work)) + (8 << 20)
    try:
        cap = int(pltpu.get_tpu_info().vmem_capacity_bytes)  # 128 MiB v5e/v6e, 64 MiB v7x
    except Exception:
        cap = 64 << 20
    return int(max(32 << 20, min(est, int(0.9 * cap))))


def _pick_row_tile(H):
    # Largest power-of-two row tile <= 32 that divides H (>= 5 rows needed for
    # the halo); otherwise fall back to the whole image.
    # TODO(synk): size the row tile per TPU generation (v7x's 64 MiB VMEM wants
    # ~half the v5e/v6e tile at production channel counts).
    for th in (32, 16, 8):
        if H % th == 0:
            return th
    return H


def residual_dense_block_5c_nhwc(x_nhwc, params, *, row_tile=None,
                                 feat_dtype=jnp.bfloat16):
    """Fused RDB forward on NHWC input: one pallas_call, grid = (N, H // TH)."""
    N, H, W, nc = x_nhwc.shape
    gc = params["conv1"][0].shape[-1]
    c_total = nc + 4 * gc

    TH = int(row_tile) if row_tile is not None else _pick_row_tile(H)
    assert H % TH == 0, "row_tile must divide H"
    assert TH >= _HALO, "row tile must be >= 5 rows (5-conv receptive field)"
    T = H // TH
    Wp = _round_up(W + 2, 16)        # sublane-aligned padded width

    args = [x_nhwc, x_nhwc, x_nhwc]  # prev / current / next row-blocks of x
    in_specs = [
        pl.BlockSpec((1, TH, W, nc), lambda n, t: (n, jnp.maximum(t - 1, 0), 0, 0)),
        pl.BlockSpec((1, TH, W, nc), lambda n, t: (n, t, 0, 0)),
        pl.BlockSpec((1, TH, W, nc), lambda n, t: (n, jnp.minimum(t + 1, T - 1), 0, 0)),
    ]
    # Weights are pre-folded to (cin, 9*cout): each conv is ONE MXU matmul with
    # all 9 taps in the N dimension; weights are cast to the feature dtype
    # (bf16 by default) so the MXU runs bf16 x bf16 -> f32.
    for i in range(1, 6):
        w, b = params[f"conv{i}"]
        ci, co = w.shape[2], w.shape[3]
        wf = jnp.transpose(w, (2, 0, 1, 3)).reshape(ci, 9 * co).astype(feat_dtype)
        args.append(wf)
        in_specs.append(pl.BlockSpec((ci, 9 * co), lambda n, t: (0, 0)))
        args.append(b.reshape(1, co).astype(jnp.float32))
        in_specs.append(pl.BlockSpec((1, co), lambda n, t: (0, 0)))

    kernel = _make_rdb_kernel(TH, W, Wp, nc, gc)

    return pl.pallas_call(
        kernel,
        out_shape=jax.ShapeDtypeStruct((N, H, W, nc), x_nhwc.dtype),
        grid_spec=pltpu.PrefetchScalarGridSpec(
            num_scalar_prefetch=0,
            grid=(N, T),
            in_specs=in_specs,
            out_specs=pl.BlockSpec((1, TH, W, nc), lambda n, t: (n, t, 0, 0)),
            scratch_shapes=[pltpu.VMEM((TH + 2 * _HALO, Wp, c_total), feat_dtype)],
        ),
        # Every grid step is independent (the scratch is fully rewritten each
        # step), so both axes are safe to mark parallel.
        compiler_params=pltpu.CompilerParams(
            dimension_semantics=("parallel", "parallel"),
            vmem_limit_bytes=_vmem_limit_bytes(TH, W, Wp, nc, gc, feat_dtype,
                                               x_nhwc.dtype.itemsize)),
    )(*args)


def residual_dense_block_5c(x_nchw, params, *, row_tile=None,
                            feat_dtype=jnp.bfloat16):
    """Forward pass matching ResidualDenseBlock_5C (CNA mode, LeakyReLU 0.2)."""
    x = jnp.transpose(x_nchw, (0, 2, 3, 1))       # NCHW -> NHWC (once per block)
    out = residual_dense_block_5c_nhwc(x, params, row_tile=row_tile,
                                       feat_dtype=feat_dtype)
    return jnp.transpose(out, (0, 3, 1, 2))       # NHWC -> NCHW


def init_rdb_params(key, nc, gc, dtype=jnp.float32):
    """Deterministic synthetic parameters; weights in HWIO layout."""
    params = {}
    in_chs = [nc, nc + gc, nc + 2 * gc, nc + 3 * gc, nc + 4 * gc]
    out_chs = [gc, gc, gc, gc, nc]
    for i, (ci, co) in enumerate(zip(in_chs, out_chs), start=1):
        key, kw, kb = jax.random.split(key, 3)
        fan_in = ci * 9
        w = jax.random.normal(kw, (3, 3, ci, co), dtype) * (2.0 / fan_in) ** 0.5
        b = jax.random.normal(kb, (co,), dtype) * 0.01
        params[f"conv{i}"] = (w, b)
    return params


# ---------------------------------------------------------------------------
# Pure-JAX reference (correctness check only).
# ---------------------------------------------------------------------------
def _conv_ref(x_nhwc, w_hwio, b):
    y = lax.conv_general_dilated(
        x_nhwc, w_hwio, window_strides=(1, 1), padding="SAME",
        dimension_numbers=("NHWC", "HWIO", "NHWC"))
    return y + b.reshape(1, 1, 1, -1)


def residual_dense_block_5c_ref(x_nchw, params):
    x = jnp.transpose(x_nchw, (0, 2, 3, 1))
    lrelu = lambda v: jnp.where(v > 0, v, 0.2 * v)
    x1 = lrelu(_conv_ref(x, *params["conv1"]))
    x2 = lrelu(_conv_ref(jnp.concatenate((x, x1), -1), *params["conv2"]))
    x3 = lrelu(_conv_ref(jnp.concatenate((x, x1, x2), -1), *params["conv3"]))
    x4 = lrelu(_conv_ref(jnp.concatenate((x, x1, x2, x3), -1), *params["conv4"]))
    x5 = _conv_ref(jnp.concatenate((x, x1, x2, x3, x4), -1), *params["conv5"])
    out = x5 * 0.2 + x
    return jnp.transpose(out, (0, 3, 1, 2))


if __name__ == "__main__":
    key = jax.random.PRNGKey(0)
    k_x, k_p = jax.random.split(key)

    N, NC, H, W = 2, 4, 16, 16
    GC = 8

    x = jax.random.normal(k_x, (N, NC, H, W), jnp.float32)
    params = init_rdb_params(k_p, NC, GC)
    ref = residual_dense_block_5c_ref(x, params)

    # Exact path (f32 features): row tiling (2 tiles of 8 rows, 5-row halo)
    # must reproduce the untiled reference up to f32 rounding.
    fwd_f32 = jax.jit(functools.partial(residual_dense_block_5c, params=params,
                                        row_tile=8, feat_dtype=jnp.float32))
    out_f32 = fwd_f32(x)
    jax.block_until_ready(out_f32)
    assert out_f32.shape == (N, NC, H, W)
    assert jnp.allclose(out_f32, ref, atol=1e-4, rtol=1e-4), (
        float(jnp.max(jnp.abs(out_f32 - ref))))

    # Fast path (bf16 features/weights, f32 MXU accumulation, f32 residual):
    # small activation-storage rounding only.
    fwd_bf16 = jax.jit(functools.partial(residual_dense_block_5c, params=params,
                                         row_tile=8, feat_dtype=jnp.bfloat16))
    out_bf16 = fwd_bf16(x)
    jax.block_until_ready(out_bf16)
    diff = (out_bf16 - ref).astype(jnp.float32)
    rel = jnp.sqrt(jnp.sum(diff * diff) / jnp.sum(ref.astype(jnp.float32) ** 2))
    assert float(rel) < 1e-2, float(rel)

    print("KERNEL_OK")
</pallas_src>

<mosaic_0001>
module attributes {stable_mosaic.version = 11 : i64} {
  func.func @kernel(%arg0: i32, %arg1: i32, %arg2: memref<1x8x16x4xf32, #tpu.memory_space<vmem>>, %arg3: memref<1x8x16x4xf32, #tpu.memory_space<vmem>>, %arg4: memref<1x8x16x4xf32, #tpu.memory_space<vmem>>, %arg5: memref<4x72xf32, #tpu.memory_space<vmem>>, %arg6: memref<1x8xf32, #tpu.memory_space<vmem>>, %arg7: memref<12x72xf32, #tpu.memory_space<vmem>>, %arg8: memref<1x8xf32, #tpu.memory_space<vmem>>, %arg9: memref<20x72xf32, #tpu.memory_space<vmem>>, %arg10: memref<1x8xf32, #tpu.memory_space<vmem>>, %arg11: memref<28x72xf32, #tpu.memory_space<vmem>>, %arg12: memref<1x8xf32, #tpu.memory_space<vmem>>, %arg13: memref<36x36xf32, #tpu.memory_space<vmem>>, %arg14: memref<1x4xf32, #tpu.memory_space<vmem>>, %arg15: memref<1x8x16x4xf32, #tpu.memory_space<vmem>>, %arg16: memref<18x32x36xf32, #tpu.memory_space<vmem>>) attributes {dimension_semantics = [#tpu.dimension_semantics<parallel>, #tpu.dimension_semantics<parallel>], iteration_bounds = array<i64: 2, 2>, scalar_prefetch = 0 : i64, scratch_operands = 1 : i64, tpu.core_type = #tpu.core_type<tc>, window_params = [{transform_indices = @transform_0, window_bounds = array<i64: 1, 8, 16, 4>}, {transform_indices = @transform_1, window_bounds = array<i64: 1, 8, 16, 4>}, {transform_indices = @transform_2, window_bounds = array<i64: 1, 8, 16, 4>}, {pipeline_mode = #tpu.pipeline_mode<synchronous>, transform_indices = @transform_3, window_bounds = array<i64: 4, 72>}, {pipeline_mode = #tpu.pipeline_mode<synchronous>, transform_indices = @transform_4, window_bounds = array<i64: 1, 8>}, {pipeline_mode = #tpu.pipeline_mode<synchronous>, transform_indices = @transform_5, window_bounds = array<i64: 12, 72>}, {pipeline_mode = #tpu.pipeline_mode<synchronous>, transform_indices = @transform_6, window_bounds = array<i64: 1, 8>}, {pipeline_mode = #tpu.pipeline_mode<synchronous>, transform_indices = @transform_7, window_bounds = array<i64: 20, 72>}, {pipeline_mode = #tpu.pipeline_mode<synchronous>, transform_indices = @transform_8, window_bounds = array<i64: 1, 8>}, {pipeline_mode = #tpu.pipeline_mode<synchronous>, transform_indices = @transform_9, window_bounds = array<i64: 28, 72>}, {pipeline_mode = #tpu.pipeline_mode<synchronous>, transform_indices = @transform_10, window_bounds = array<i64: 1, 8>}, {pipeline_mode = #tpu.pipeline_mode<synchronous>, transform_indices = @transform_11, window_bounds = array<i64: 36, 36>}, {pipeline_mode = #tpu.pipeline_mode<synchronous>, transform_indices = @transform_12, window_bounds = array<i64: 1, 4>}, {transform_indices = @transform_13, window_bounds = array<i64: 1, 8, 16, 4>}]} {
    %cst = arith.constant 0.000000e+00 : f32
    %0 = vector.broadcast %cst : f32 to vector<18x1x36xf32>
    %c0 = arith.constant 0 : index
    %c0_0 = arith.constant 0 : index
    %c0_1 = arith.constant 0 : index
    %1 = vector.load %arg16[%c0, %c0_0, %c0_1] : memref<18x32x36xf32, #tpu.memory_space<vmem>>, vector<18x1x36xf32>
    tpu.vector_store %arg16[%c0, %c0_0, %c0_1], %0 {strides = array<i32>} : memref<18x32x36xf32, #tpu.memory_space<vmem>>, vector<18x1x36xf32>,
    %cst_2 = arith.constant 0.000000e+00 : f32
    %2 = vector.broadcast %cst_2 : f32 to vector<18x15x36xf32>
    %c0_3 = arith.constant 0 : index
    %c17 = arith.constant 17 : index
    %c0_4 = arith.constant 0 : index
    %3 = vector.load %arg16[%c0_3, %c17, %c0_4] : memref<18x32x36xf32, #tpu.memory_space<vmem>>, vector<18x15x36xf32>
    tpu.vector_store %arg16[%c0_3, %c17, %c0_4], %2 {strides = array<i32>} : memref<18x32x36xf32, #tpu.memory_space<vmem>>, vector<18x15x36xf32>,
    %c0_5 = arith.constant 0 : index
    %c0_6 = arith.constant 0 : index
    %c0_7 = arith.constant 0 : index
    %c0_8 = arith.constant 0 : index
    %4 = vector.load %arg3[%c0_5, %c0_6, %c0_7, %c0_8] : memref<1x8x16x4xf32, #tpu.memory_space<vmem>>, vector<1x8x16x4xf32>
    %5 = vector.shape_cast %4 : vector<1x8x16x4xf32> to vector<8x16x4xf32>
    %c5 = arith.constant 5 : index
    %c1 = arith.constant 1 : index
    %c0_9 = arith.constant 0 : index
    %6 = vector.load %arg16[%c5, %c1, %c0_9] : memref<18x32x36xf32, #tpu.memory_space<vmem>>, vector<8x16x4xf32>
    tpu.vector_store %arg16[%c5, %c1, %c0_9], %5 {strides = array<i32>} : memref<18x32x36xf32, #tpu.memory_space<vmem>>, vector<8x16x4xf32>,
    %c0_i32 = arith.constant 0 : i32
    %7 = arith.cmpi sgt, %arg1, %c0_i32 : i32
    %8 = arith.extui %7 : i1 to i32
    %c0_i32_10 = arith.constant 0 : i32
    %9 = arith.cmpi ne, %8, %c0_i32_10 : i32
    scf.if %9 {
      %c0_100 = arith.constant 0 : index
      %c3_101 = arith.constant 3 : index
      %c0_102 = arith.constant 0 : index
      %c0_103 = arith.constant 0 : index
      %215 = vector.load %arg2[%c0_100, %c3_101, %c0_102, %c0_103] : memref<1x8x16x4xf32, #tpu.memory_space<vmem>>, vector<1x5x16x4xf32>
      %216 = vector.shape_cast %215 : vector<1x5x16x4xf32> to vector<5x16x4xf32>
      %c0_104 = arith.constant 0 : index
      %c1_105 = arith.constant 1 : index
      %c0_106 = arith.constant 0 : index
      %217 = vector.load %arg16[%c0_104, %c1_105, %c0_106] : memref<18x32x36xf32, #tpu.memory_space<vmem>>, vector<5x16x4xf32>
      tpu.vector_store %arg16[%c0_104, %c1_105, %c0_106], %216 {strides = array<i32>} : memref<18x32x36xf32, #tpu.memory_space<vmem>>, vector<5x16x4xf32>,
    } else {
    }
    %c0_i32_11 = arith.constant 0 : i32
    %10 = arith.cmpi eq, %arg1, %c0_i32_11 : i32
    %11 = arith.extui %10 : i1 to i32
    %c0_i32_12 = arith.constant 0 : i32
    %12 = arith.cmpi ne, %11, %c0_i32_12 : i32
    scf.if %12 {
      %cst_100 = arith.constant 0.000000e+00 : f32
      %215 = vector.broadcast %cst_100 : f32 to vector<5x16x4xf32>
      %c0_101 = arith.constant 0 : index
      %c1_102 = arith.constant 1 : index
      %c0_103 = arith.constant 0 : index
      %216 = vector.load %arg16[%c0_101, %c1_102, %c0_103] : memref<18x32x36xf32, #tpu.memory_space<vmem>>, vector<5x16x4xf32>
      tpu.vector_store %arg16[%c0_101, %c1_102, %c0_103], %215 {strides = array<i32>} : memref<18x32x36xf32, #tpu.memory_space<vmem>>, vector<5x16x4xf32>,
    } else {
    }
    %c1_i32 = arith.constant 1 : i32
    %13 = arith.cmpi slt, %arg1, %c1_i32 : i32
    %14 = arith.extui %13 : i1 to i32
    %c0_i32_13 = arith.constant 0 : i32
    %15 = arith.cmpi ne, %14, %c0_i32_13 : i32
    scf.if %15 {
      %c0_100 = arith.constant 0 : index
      %c0_101 = arith.constant 0 : index
      %c0_102 = arith.constant 0 : index
      %c0_103 = arith.constant 0 : index
      %215 = vector.load %arg4[%c0_100, %c0_101, %c0_102, %c0_103] : memref<1x8x16x4xf32, #tpu.memory_space<vmem>>, vector<1x5x16x4xf32>
      %216 = vector.shape_cast %215 : vector<1x5x16x4xf32> to vector<5x16x4xf32>
      %c13 = arith.constant 13 : index
      %c1_104 = arith.constant 1 : index
      %c0_105 = arith.constant 0 : index
      %217 = vector.load %arg16[%c13, %c1_104, %c0_105] : memref<18x32x36xf32, #tpu.memory_space<vmem>>, vector<5x16x4xf32>
      tpu.vector_store %arg16[%c13, %c1_104, %c0_105], %216 {strides = array<i32>} : memref<18x32x36xf32, #tpu.memory_space<vmem>>, vector<5x16x4xf32>,
    } else {
    }
    %c1_i32_14 = arith.constant 1 : i32
    %16 = arith.cmpi eq, %arg1, %c1_i32_14 : i32
    %17 = arith.extui %16 : i1 to i32
    %c0_i32_15 = arith.constant 0 : i32
    %18 = arith.cmpi ne, %17, %c0_i32_15 : i32
    scf.if %18 {
      %cst_100 = arith.constant 0.000000e+00 : f32
      %215 = vector.broadcast %cst_100 : f32 to vector<5x16x4xf32>
      %c13 = arith.constant 13 : index
      %c1_101 = arith.constant 1 : index
      %c0_102 = arith.constant 0 : index
      %216 = vector.load %arg16[%c13, %c1_101, %c0_102] : memref<18x32x36xf32, #tpu.memory_space<vmem>>, vector<5x16x4xf32>
      tpu.vector_store %arg16[%c13, %c1_101, %c0_102], %215 {strides = array<i32>} : memref<18x32x36xf32, #tpu.memory_space<vmem>>, vector<5x16x4xf32>,
    } else {
    }
    %c0_16 = arith.constant 0 : index
    %c0_17 = arith.constant 0 : index
    %c0_18 = arith.constant 0 : index
    %19 = vector.load %arg16[%c0_16, %c0_17, %c0_18] : memref<18x32x36xf32, #tpu.memory_space<vmem>>, vector<18x32x4xf32>
    %20 = vector.shape_cast %19 : vector<18x32x4xf32> to vector<576x4xf32>
    %c0_19 = arith.constant 0 : index
    %c0_20 = arith.constant 0 : index
    %21 = vector.load %arg5[%c0_19, %c0_20] : memref<4x72xf32, #tpu.memory_space<vmem>>, vector<4x72xf32>
    %cst_21 = arith.constant dense<0.000000e+00> : vector<576x72xf32>
    %22 = tpu.matmul %20, %21, %cst_21 {dimension_numbers = #tpu.dot_dimension_numbers<[1], [0], [0], [1], [0, 0, 1, 1], [], []>} : vector<576x4xf32>, vector<4x72xf32>, vector<576x72xf32> -> vector<576x72xf32>
    %23 = vector.shape_cast %22 : vector<576x72xf32> to vector<18x32x72xf32>
    %cst_22 = arith.constant 0.000000e+00 : f32
    %24 = vector.broadcast %cst_22 : f32 to vector<16x16x8xf32>
    %25 = vector.extract_strided_slice %23 {offsets = [0, 0, 0], sizes = [16, 16, 8], strides = [1, 1, 1]} : vector<18x32x72xf32> to vector<16x16x8xf32>
    %26 = arith.addf %24, %25 : vector<16x16x8xf32>
    %27 = vector.extract_strided_slice %23 {offsets = [0, 1, 8], sizes = [16, 16, 8], strides = [1, 1, 1]} : vector<18x32x72xf32> to vector<16x16x8xf32>
    %28 = arith.addf %26, %27 : vector<16x16x8xf32>
    %29 = vector.extract_strided_slice %23 {offsets = [0, 2, 16], sizes = [16, 16, 8], strides = [1, 1, 1]} : vector<18x32x72xf32> to vector<16x16x8xf32>
    %30 = arith.addf %28, %29 : vector<16x16x8xf32>
    %31 = vector.extract_strided_slice %23 {offsets = [1, 0, 24], sizes = [16, 16, 8], strides = [1, 1, 1]} : vector<18x32x72xf32> to vector<16x16x8xf32>
    %32 = arith.addf %30, %31 : vector<16x16x8xf32>
    %33 = vector.extract_strided_slice %23 {offsets = [1, 1, 32], sizes = [16, 16, 8], strides = [1, 1, 1]} : vector<18x32x72xf32> to vector<16x16x8xf32>
    %34 = arith.addf %32, %33 : vector<16x16x8xf32>
    %35 = vector.extract_strided_slice %23 {offsets = [1, 2, 40], sizes = [16, 16, 8], strides = [1, 1, 1]} : vector<18x32x72xf32> to vector<16x16x8xf32>
    %36 = arith.addf %34, %35 : vector<16x16x8xf32>
    %37 = vector.extract_strided_slice %23 {offsets = [2, 0, 48], sizes = [16, 16, 8], strides = [1, 1, 1]} : vector<18x32x72xf32> to vector<16x16x8xf32>
    %38 = arith.addf %36, %37 : vector<16x16x8xf32>
    %39 = vector.extract_strided_slice %23 {offsets = [2, 1, 56], sizes = [16, 16, 8], strides = [1, 1, 1]} : vector<18x32x72xf32> to vector<16x16x8xf32>
    %40 = arith.addf %38, %39 : vector<16x16x8xf32>
    %41 = vector.extract_strided_slice %23 {offsets = [2, 2, 64], sizes = [16, 16, 8], strides = [1, 1, 1]} : vector<18x32x72xf32> to vector<16x16x8xf32>
    %42 = arith.addf %40, %41 : vector<16x16x8xf32>
    %c0_23 = arith.constant 0 : index
    %c0_24 = arith.constant 0 : index
    %43 = vector.load %arg6[%c0_23, %c0_24] : memref<1x8xf32, #tpu.memory_space<vmem>>, vector<1x8xf32>
    %44 = vector.shape_cast %43 : vector<1x8xf32> to vector<1x1x8xf32>
    %45 = vector.broadcast %44 : vector<1x1x8xf32> to vector<16x16x8xf32>
    %46 = arith.addf %42, %45 : vector<16x16x8xf32>
    %cst_25 = arith.constant 0.000000e+00 : f32
    %47 = vector.broadcast %cst_25 : f32 to vector<16x16x8xf32>
    %48 = arith.cmpf ogt, %46, %47 : vector<16x16x8xf32>
    %cst_26 = arith.constant 2.000000e-01 : f32
    %49 = vector.broadcast %cst_26 : f32 to vector<16x16x8xf32>
    %50 = arith.mulf %49, %46 : vector<16x16x8xf32>
    %51 = arith.select %48, %46, %50 : vector<16x16x8xi1>, vector<16x16x8xf32>
    %c1_27 = arith.constant 1 : index
    %c1_28 = arith.constant 1 : index
    %c4 = arith.constant 4 : index
    %52 = vector.load %arg16[%c1_27, %c1_28, %c4] : memref<18x32x36xf32, #tpu.memory_space<vmem>>, vector<16x16x8xf32>
    tpu.vector_store %arg16[%c1_27, %c1_28, %c4], %51 {strides = array<i32>} : memref<18x32x36xf32, #tpu.memory_space<vmem>>, vector<16x16x8xf32>,
    %c0_i32_29 = arith.constant 0 : i32
    %53 = arith.cmpi eq, %arg1, %c0_i32_29 : i32
    %54 = arith.extui %53 : i1 to i32
    %c0_i32_30 = arith.constant 0 : i32
    %55 = arith.cmpi ne, %54, %c0_i32_30 : i32
    scf.if %55 {
      %cst_100 = arith.constant 0.000000e+00 : f32
      %215 = vector.broadcast %cst_100 : f32 to vector<4x16x8xf32>
      %c1_101 = arith.constant 1 : index
      %c1_102 = arith.constant 1 : index
      %c4_103 = arith.constant 4 : index
      %216 = vector.load %arg16[%c1_101, %c1_102, %c4_103] : memref<18x32x36xf32, #tpu.memory_space<vmem>>, vector<4x16x8xf32>
      tpu.vector_store %arg16[%c1_101, %c1_102, %c4_103], %215 {strides = array<i32>} : memref<18x32x36xf32, #tpu.memory_space<vmem>>, vector<4x16x8xf32>,
    } else {
    }
    %c1_i32_31 = arith.constant 1 : i32
    %56 = arith.cmpi eq, %arg1, %c1_i32_31 : i32
    %57 = arith.extui %56 : i1 to i32
    %c0_i32_32 = arith.constant 0 : i32
    %58 = arith.cmpi ne, %57, %c0_i32_32 : i32
    scf.if %58 {
      %cst_100 = arith.constant 0.000000e+00 : f32
      %215 = vector.broadcast %cst_100 : f32 to vector<4x16x8xf32>
      %c13 = arith.constant 13 : index
      %c1_101 = arith.constant 1 : index
      %c4_102 = arith.constant 4 : index
      %216 = vector.load %arg16[%c13, %c1_101, %c4_102] : memref<18x32x36xf32, #tpu.memory_space<vmem>>, vector<4x16x8xf32>
      tpu.vector_store %arg16[%c13, %c1_101, %c4_102], %215 {strides = array<i32>} : memref<18x32x36xf32, #tpu.memory_space<vmem>>, vector<4x16x8xf32>,
    } else {
    }
    %c1_33 = arith.constant 1 : index
    %c0_34 = arith.constant 0 : index
    %c0_35 = arith.constant 0 : index
    %59 = vector.load %arg16[%c1_33, %c0_34, %c0_35] : memref<18x32x36xf32, #tpu.memory_space<vmem>>, vector<16x32x12xf32>
    %60 = vector.shape_cast %59 : vector<16x32x12xf32> to vector<512x12xf32>
    %c0_36 = arith.constant 0 : index
    %c0_37 = arith.constant 0 : index
    %61 = vector.load %arg7[%c0_36, %c0_37] : memref<12x72xf32, #tpu.memory_space<vmem>>, vector<12x72xf32>
    %cst_38 = arith.constant dense<0.000000e+00> : vector<512x72xf32>
    %62 = tpu.matmul %60, %61, %cst_38 {dimension_numbers = #tpu.dot_dimension_numbers<[1], [0], [0], [1], [0, 0, 1, 1], [], []>} : vector<512x12xf32>, vector<12x72xf32>, vector<512x72xf32> -> vector<512x72xf32>
    %63 = vector.shape_cast %62 : vector<512x72xf32> to vector<16x32x72xf32>
    %cst_39 = arith.constant 0.000000e+00 : f32
    %64 = vector.broadcast %cst_39 : f32 to vector<14x16x8xf32>
    %65 = vector.extract_strided_slice %63 {offsets = [0, 0, 0], sizes = [14, 16, 8], strides = [1, 1, 1]} : vector<16x32x72xf32> to vector<14x16x8xf32>
    %66 = arith.addf %64, %65 : vector<14x16x8xf32>
    %67 = vector.extract_strided_slice %63 {offsets = [0, 1, 8], sizes = [14, 16, 8], strides = [1, 1, 1]} : vector<16x32x72xf32> to vector<14x16x8xf32>
    %68 = arith.addf %66, %67 : vector<14x16x8xf32>
    %69 = vector.extract_strided_slice %63 {offsets = [0, 2, 16], sizes = [14, 16, 8], strides = [1, 1, 1]} : vector<16x32x72xf32> to vector<14x16x8xf32>
    %70 = arith.addf %68, %69 : vector<14x16x8xf32>
    %71 = vector.extract_strided_slice %63 {offsets = [1, 0, 24], sizes = [14, 16, 8], strides = [1, 1, 1]} : vector<16x32x72xf32> to vector<14x16x8xf32>
    %72 = arith.addf %70, %71 : vector<14x16x8xf32>
    %73 = vector.extract_strided_slice %63 {offsets = [1, 1, 32], sizes = [14, 16, 8], strides = [1, 1, 1]} : vector<16x32x72xf32> to vector<14x16x8xf32>
    %74 = arith.addf %72, %73 : vector<14x16x8xf32>
    %75 = vector.extract_strided_slice %63 {offsets = [1, 2, 40], sizes = [14, 16, 8], strides = [1, 1, 1]} : vector<16x32x72xf32> to vector<14x16x8xf32>
    %76 = arith.addf %74, %75 : vector<14x16x8xf32>
    %77 = vector.extract_strided_slice %63 {offsets = [2, 0, 48], sizes = [14, 16, 8], strides = [1, 1, 1]} : vector<16x32x72xf32> to vector<14x16x8xf32>
    %78 = arith.addf %76, %77 : vector<14x16x8xf32>
    %79 = vector.extract_strided_slice %63 {offsets = [2, 1, 56], sizes = [14, 16, 8], strides = [1, 1, 1]} : vector<16x32x72xf32> to vector<14x16x8xf32>
    %80 = arith.addf %78, %79 : vector<14x16x8xf32>
    %81 = vector.extract_strided_slice %63 {offsets = [2, 2, 64], sizes = [14, 16, 8], strides = [1, 1, 1]} : vector<16x32x72xf32> to vector<14x16x8xf32>
    %82 = arith.addf %80, %81 : vector<14x16x8xf32>
    %c0_40 = arith.constant 0 : index
    %c0_41 = arith.constant 0 : index
    %83 = vector.load %arg8[%c0_40, %c0_41] : memref<1x8xf32, #tpu.memory_space<vmem>>, vector<1x8xf32>
    %84 = vector.shape_cast %83 : vector<1x8xf32> to vector<1x1x8xf32>
    %85 = vector.broadcast %84 : vector<1x1x8xf32> to vector<14x16x8xf32>
    %86 = arith.addf %82, %85 : vector<14x16x8xf32>
    %cst_42 = arith.constant 0.000000e+00 : f32
    %87 = vector.broadcast %cst_42 : f32 to vector<14x16x8xf32>
    %88 = arith.cmpf ogt, %86, %87 : vector<14x16x8xf32>
    %cst_43 = arith.constant 2.000000e-01 : f32
    %89 = vector.broadcast %cst_43 : f32 to vector<14x16x8xf32>
    %90 = arith.mulf %89, %86 : vector<14x16x8xf32>
    %91 = arith.select %88, %86, %90 : vector<14x16x8xi1>, vector<14x16x8xf32>
    %c2 = arith.constant 2 : index
    %c1_44 = arith.constant 1 : index
    %c12 = arith.constant 12 : index
    %92 = vector.load %arg16[%c2, %c1_44, %c12] : memref<18x32x36xf32, #tpu.memory_space<vmem>>, vector<14x16x8xf32>
    tpu.vector_store %arg16[%c2, %c1_44, %c12], %91 {strides = array<i32>} : memref<18x32x36xf32, #tpu.memory_space<vmem>>, vector<14x16x8xf32>,
    %c0_i32_45 = arith.constant 0 : i32
    %93 = arith.cmpi eq, %arg1, %c0_i32_45 : i32
    %94 = arith.extui %93 : i1 to i32
    %c0_i32_46 = arith.constant 0 : i32
    %95 = arith.cmpi ne, %94, %c0_i32_46 : i32
    scf.if %95 {
      %cst_100 = arith.constant 0.000000e+00 : f32
      %215 = vector.broadcast %cst_100 : f32 to vector<3x16x8xf32>
      %c2_101 = arith.constant 2 : index
      %c1_102 = arith.constant 1 : index
      %c12_103 = arith.constant 12 : index
      %216 = vector.load %arg16[%c2_101, %c1_102, %c12_103] : memref<18x32x36xf32, #tpu.memory_space<vmem>>, vector<3x16x8xf32>
      tpu.vector_store %arg16[%c2_101, %c1_102, %c12_103], %215 {strides = array<i32>} : memref<18x32x36xf32, #tpu.memory_space<vmem>>, vector<3x16x8xf32>,
    } else {
    }
    %c1_i32_47 = arith.constant 1 : i32
    %96 = arith.cmpi eq, %arg1, %c1_i32_47 : i32
    %97 = arith.extui %96 : i1 to i32
    %c0_i32_48 = arith.constant 0 : i32
    %98 = arith.cmpi ne, %97, %c0_i32_48 : i32
    scf.if %98 {
      %cst_100 = arith.constant 0.000000e+00 : f32
      %215 = vector.broadcast %cst_100 : f32 to vector<3x16x8xf32>
      %c13 = arith.constant 13 : index
      %c1_101 = arith.constant 1 : index
      %c12_102 = arith.constant 12 : index
      %216 = vector.load %arg16[%c13, %c1_101, %c12_102] : memref<18x32x36xf32, #tpu.memory_space<vmem>>, vector<3x16x8xf32>
      tpu.vector_store %arg16[%c13, %c1_101, %c12_102], %215 {strides = array<i32>} : memref<18x32x36xf32, #tpu.memory_space<vmem>>, vector<3x16x8xf32>,
    } else {
    }
    %c2_49 = arith.constant 2 : index
    %c0_50 = arith.constant 0 : index
    %c0_51 = arith.constant 0 : index
    %99 = vector.load %arg16[%c2_49, %c0_50, %c0_51] : memref<18x32x36xf32, #tpu.memory_space<vmem>>, vector<14x32x20xf32>
    %100 = vector.shape_cast %99 : vector<14x32x20xf32> to vector<448x20xf32>
    %c0_52 = arith.constant 0 : index
    %c0_53 = arith.constant 0 : index
    %101 = vector.load %arg9[%c0_52, %c0_53] : memref<20x72xf32, #tpu.memory_space<vmem>>, vector<20x72xf32>
    %cst_54 = arith.constant dense<0.000000e+00> : vector<448x72xf32>
    %102 = tpu.matmul %100, %101, %cst_54 {dimension_numbers = #tpu.dot_dimension_numbers<[1], [0], [0], [1], [0, 0, 1, 1], [], []>} : vector<448x20xf32>, vector<20x72xf32>, vector<448x72xf32> -> vector<448x72xf32>
    %103 = vector.shape_cast %102 : vector<448x72xf32> to vector<14x32x72xf32>
    %cst_55 = arith.constant 0.000000e+00 : f32
    %104 = vector.broadcast %cst_55 : f32 to vector<12x16x8xf32>
    %105 = vector.extract_strided_slice %103 {offsets = [0, 0, 0], sizes = [12, 16, 8], strides = [1, 1, 1]} : vector<14x32x72xf32> to vector<12x16x8xf32>
    %106 = arith.addf %104, %105 : vector<12x16x8xf32>
    %107 = vector.extract_strided_slice %103 {offsets = [0, 1, 8], sizes = [12, 16, 8], strides = [1, 1, 1]} : vector<14x32x72xf32> to vector<12x16x8xf32>
    %108 = arith.addf %106, %107 : vector<12x16x8xf32>
    %109 = vector.extract_strided_slice %103 {offsets = [0, 2, 16], sizes = [12, 16, 8], strides = [1, 1, 1]} : vector<14x32x72xf32> to vector<12x16x8xf32>
    %110 = arith.addf %108, %109 : vector<12x16x8xf32>
    %111 = vector.extract_strided_slice %103 {offsets = [1, 0, 24], sizes = [12, 16, 8], strides = [1, 1, 1]} : vector<14x32x72xf32> to vector<12x16x8xf32>
    %112 = arith.addf %110, %111 : vector<12x16x8xf32>
    %113 = vector.extract_strided_slice %103 {offsets = [1, 1, 32], sizes = [12, 16, 8], strides = [1, 1, 1]} : vector<14x32x72xf32> to vector<12x16x8xf32>
    %114 = arith.addf %112, %113 : vector<12x16x8xf32>
    %115 = vector.extract_strided_slice %103 {offsets = [1, 2, 40], sizes = [12, 16, 8], strides = [1, 1, 1]} : vector<14x32x72xf32> to vector<12x16x8xf32>
    %116 = arith.addf %114, %115 : vector<12x16x8xf32>
    %117 = vector.extract_strided_slice %103 {offsets = [2, 0, 48], sizes = [12, 16, 8], strides = [1, 1, 1]} : vector<14x32x72xf32> to vector<12x16x8xf32>
    %118 = arith.addf %116, %117 : vector<12x16x8xf32>
    %119 = vector.extract_strided_slice %103 {offsets = [2, 1, 56], sizes = [12, 16, 8], strides = [1, 1, 1]} : vector<14x32x72xf32> to vector<12x16x8xf32>
    %120 = arith.addf %118, %119 : vector<12x16x8xf32>
    %121 = vector.extract_strided_slice %103 {offsets = [2, 2, 64], sizes = [12, 16, 8], strides = [1, 1, 1]} : vector<14x32x72xf32> to vector<12x16x8xf32>
    %122 = arith.addf %120, %121 : vector<12x16x8xf32>
    %c0_56 = arith.constant 0 : index
    %c0_57 = arith.constant 0 : index
    %123 = vector.load %arg10[%c0_56, %c0_57] : memref<1x8xf32, #tpu.memory_space<vmem>>, vector<1x8xf32>
    %124 = vector.shape_cast %123 : vector<1x8xf32> to vector<1x1x8xf32>
    %125 = vector.broadcast %124 : vector<1x1x8xf32> to vector<12x16x8xf32>
    %126 = arith.addf %122, %125 : vector<12x16x8xf32>
    %cst_58 = arith.constant 0.000000e+00 : f32
    %127 = vector.broadcast %cst_58 : f32 to vector<12x16x8xf32>
    %128 = arith.cmpf ogt, %126, %127 : vector<12x16x8xf32>
    %cst_59 = arith.constant 2.000000e-01 : f32
    %129 = vector.broadcast %cst_59 : f32 to vector<12x16x8xf32>
    %130 = arith.mulf %129, %126 : vector<12x16x8xf32>
    %131 = arith.select %128, %126, %130 : vector<12x16x8xi1>, vector<12x16x8xf32>
    %c3 = arith.constant 3 : index
    %c1_60 = arith.constant 1 : index
    %c20 = arith.constant 20 : index
    %132 = vector.load %arg16[%c3, %c1_60, %c20] : memref<18x32x36xf32, #tpu.memory_space<vmem>>, vector<12x16x8xf32>
    tpu.vector_store %arg16[%c3, %c1_60, %c20], %131 {strides = array<i32>} : memref<18x32x36xf32, #tpu.memory_space<vmem>>, vector<12x16x8xf32>,
    %c0_i32_61 = arith.constant 0 : i32
    %133 = arith.cmpi eq, %arg1, %c0_i32_61 : i32
    %134 = arith.extui %133 : i1 to i32
    %c0_i32_62 = arith.constant 0 : i32
    %135 = arith.cmpi ne, %134, %c0_i32_62 : i32
    scf.if %135 {
      %cst_100 = arith.constant 0.000000e+00 : f32
      %215 = vector.broadcast %cst_100 : f32 to vector<2x16x8xf32>
      %c3_101 = arith.constant 3 : index
      %c1_102 = arith.constant 1 : index
      %c20_103 = arith.constant 20 : index
      %216 = vector.load %arg16[%c3_101, %c1_102, %c20_103] : memref<18x32x36xf32, #tpu.memory_space<vmem>>, vector<2x16x8xf32>
      tpu.vector_store %arg16[%c3_101, %c1_102, %c20_103], %215 {strides = array<i32>} : memref<18x32x36xf32, #tpu.memory_space<vmem>>, vector<2x16x8xf32>,
    } else {
    }
    %c1_i32_63 = arith.constant 1 : i32
    %136 = arith.cmpi eq, %arg1, %c1_i32_63 : i32
    %137 = arith.extui %136 : i1 to i32
    %c0_i32_64 = arith.constant 0 : i32
    %138 = arith.cmpi ne, %137, %c0_i32_64 : i32
    scf.if %138 {
      %cst_100 = arith.constant 0.000000e+00 : f32
      %215 = vector.broadcast %cst_100 : f32 to vector<2x16x8xf32>
      %c13 = arith.constant 13 : index
      %c1_101 = arith.constant 1 : index
      %c20_102 = arith.constant 20 : index
      %216 = vector.load %arg16[%c13, %c1_101, %c20_102] : memref<18x32x36xf32, #tpu.memory_space<vmem>>, vector<2x16x8xf32>
      tpu.vector_store %arg16[%c13, %c1_101, %c20_102], %215 {strides = array<i32>} : memref<18x32x36xf32, #tpu.memory_space<vmem>>, vector<2x16x8xf32>,
    } else {
    }
    %c3_65 = arith.constant 3 : index
    %c0_66 = arith.constant 0 : index
    %c0_67 = arith.constant 0 : index
    %139 = vector.load %arg16[%c3_65, %c0_66, %c0_67] : memref<18x32x36xf32, #tpu.memory_space<vmem>>, vector<12x32x28xf32>
    %140 = vector.shape_cast %139 : vector<12x32x28xf32> to vector<384x28xf32>
    %c0_68 = arith.constant 0 : index
    %c0_69 = arith.constant 0 : index
    %141 = vector.load %arg11[%c0_68, %c0_69] : memref<28x72xf32, #tpu.memory_space<vmem>>, vector<28x72xf32>
    %cst_70 = arith.constant dense<0.000000e+00> : vector<384x72xf32>
    %142 = tpu.matmul %140, %141, %cst_70 {dimension_numbers = #tpu.dot_dimension_numbers<[1], [0], [0], [1], [0, 0, 1, 1], [], []>} : vector<384x28xf32>, vector<28x72xf32>, vector<384x72xf32> -> vector<384x72xf32>
    %143 = vector.shape_cast %142 : vector<384x72xf32> to vector<12x32x72xf32>
    %cst_71 = arith.constant 0.000000e+00 : f32
    %144 = vector.broadcast %cst_71 : f32 to vector<10x16x8xf32>
    %145 = vector.extract_strided_slice %143 {offsets = [0, 0, 0], sizes = [10, 16, 8], strides = [1, 1, 1]} : vector<12x32x72xf32> to vector<10x16x8xf32>
    %146 = arith.addf %144, %145 : vector<10x16x8xf32>
    %147 = vector.extract_strided_slice %143 {offsets = [0, 1, 8], sizes = [10, 16, 8], strides = [1, 1, 1]} : vector<12x32x72xf32> to vector<10x16x8xf32>
    %148 = arith.addf %146, %147 : vector<10x16x8xf32>
    %149 = vector.extract_strided_slice %143 {offsets = [0, 2, 16], sizes = [10, 16, 8], strides = [1, 1, 1]} : vector<12x32x72xf32> to vector<10x16x8xf32>
    %150 = arith.addf %148, %149 : vector<10x16x8xf32>
    %151 = vector.extract_strided_slice %143 {offsets = [1, 0, 24], sizes = [10, 16, 8], strides = [1, 1, 1]} : vector<12x32x72xf32> to vector<10x16x8xf32>
    %152 = arith.addf %150, %151 : vector<10x16x8xf32>
    %153 = vector.extract_strided_slice %143 {offsets = [1, 1, 32], sizes = [10, 16, 8], strides = [1, 1, 1]} : vector<12x32x72xf32> to vector<10x16x8xf32>
    %154 = arith.addf %152, %153 : vector<10x16x8xf32>
    %155 = vector.extract_strided_slice %143 {offsets = [1, 2, 40], sizes = [10, 16, 8], strides = [1, 1, 1]} : vector<12x32x72xf32> to vector<10x16x8xf32>
    %156 = arith.addf %154, %155 : vector<10x16x8xf32>
    %157 = vector.extract_strided_slice %143 {offsets = [2, 0, 48], sizes = [10, 16, 8], strides = [1, 1, 1]} : vector<12x32x72xf32> to vector<10x16x8xf32>
    %158 = arith.addf %156, %157 : vector<10x16x8xf32>
    %159 = vector.extract_strided_slice %143 {offsets = [2, 1, 56], sizes = [10, 16, 8], strides = [1, 1, 1]} : vector<12x32x72xf32> to vector<10x16x8xf32>
    %160 = arith.addf %158, %159 : vector<10x16x8xf32>
    %161 = vector.extract_strided_slice %143 {offsets = [2, 2, 64], sizes = [10, 16, 8], strides = [1, 1, 1]} : vector<12x32x72xf32> to vector<10x16x8xf32>
    %162 = arith.addf %160, %161 : vector<10x16x8xf32>
    %c0_72 = arith.constant 0 : index
    %c0_73 = arith.constant 0 : index
    %163 = vector.load %arg12[%c0_72, %c0_73] : memref<1x8xf32, #tpu.memory_space<vmem>>, vector<1x8xf32>
    %164 = vector.shape_cast %163 : vector<1x8xf32> to vector<1x1x8xf32>
    %165 = vector.broadcast %164 : vector<1x1x8xf32> to vector<10x16x8xf32>
    %166 = arith.addf %162, %165 : vector<10x16x8xf32>
    %cst_74 = arith.constant 0.000000e+00 : f32
    %167 = vector.broadcast %cst_74 : f32 to vector<10x16x8xf32>
    %168 = arith.cmpf ogt, %166, %167 : vector<10x16x8xf32>
    %cst_75 = arith.constant 2.000000e-01 : f32
    %169 = vector.broadcast %cst_75 : f32 to vector<10x16x8xf32>
    %170 = arith.mulf %169, %166 : vector<10x16x8xf32>
    %171 = arith.select %168, %166, %170 : vector<10x16x8xi1>, vector<10x16x8xf32>
    %c4_76 = arith.constant 4 : index
    %c1_77 = arith.constant 1 : index
    %c28 = arith.constant 28 : index
    %172 = vector.load %arg16[%c4_76, %c1_77, %c28] : memref<18x32x36xf32, #tpu.memory_space<vmem>>, vector<10x16x8xf32>
    tpu.vector_store %arg16[%c4_76, %c1_77, %c28], %171 {strides = array<i32>} : memref<18x32x36xf32, #tpu.memory_space<vmem>>, vector<10x16x8xf32>,
    %c0_i32_78 = arith.constant 0 : i32
    %173 = arith.cmpi eq, %arg1, %c0_i32_78 : i32
    %174 = arith.extui %173 : i1 to i32
    %c0_i32_79 = arith.constant 0 : i32
    %175 = arith.cmpi ne, %174, %c0_i32_79 : i32
    scf.if %175 {
      %cst_100 = arith.constant 0.000000e+00 : f32
      %215 = vector.broadcast %cst_100 : f32 to vector<1x16x8xf32>
      %c4_101 = arith.constant 4 : index
      %c1_102 = arith.constant 1 : index
      %c28_103 = arith.constant 28 : index
      %216 = vector.load %arg16[%c4_101, %c1_102, %c28_103] : memref<18x32x36xf32, #tpu.memory_space<vmem>>, vector<1x16x8xf32>
      tpu.vector_store %arg16[%c4_101, %c1_102, %c28_103], %215 {strides = array<i32>} : memref<18x32x36xf32, #tpu.memory_space<vmem>>, vector<1x16x8xf32>,
    } else {
    }
    %c1_i32_80 = arith.constant 1 : i32
    %176 = arith.cmpi eq, %arg1, %c1_i32_80 : i32
    %177 = arith.extui %176 : i1 to i32
    %c0_i32_81 = arith.constant 0 : i32
    %178 = arith.cmpi ne, %177, %c0_i32_81 : i32
    scf.if %178 {
      %cst_100 = arith.constant 0.000000e+00 : f32
      %215 = vector.broadcast %cst_100 : f32 to vector<1x16x8xf32>
      %c13 = arith.constant 13 : index
      %c1_101 = arith.constant 1 : index
      %c28_102 = arith.constant 28 : index
      %216 = vector.load %arg16[%c13, %c1_101, %c28_102] : memref<18x32x36xf32, #tpu.memory_space<vmem>>, vector<1x16x8xf32>
      tpu.vector_store %arg16[%c13, %c1_101, %c28_102], %215 {strides = array<i32>} : memref<18x32x36xf32, #tpu.memory_space<vmem>>, vector<1x16x8xf32>,
    } else {
    }
    %c4_82 = arith.constant 4 : index
    %c0_83 = arith.constant 0 : index
    %c0_84 = arith.constant 0 : index
    %179 = vector.load %arg16[%c4_82, %c0_83, %c0_84] : memref<18x32x36xf32, #tpu.memory_space<vmem>>, vector<10x32x36xf32>
    %180 = vector.shape_cast %179 : vector<10x32x36xf32> to vector<320x36xf32>
    %c0_85 = arith.constant 0 : index
    %c0_86 = arith.constant 0 : index
    %181 = vector.load %arg13[%c0_85, %c0_86] : memref<36x36xf32, #tpu.memory_space<vmem>>, vector<36x36xf32>
    %cst_87 = arith.constant dense<0.000000e+00> : vector<320x36xf32>
    %182 = tpu.matmul %180, %181, %cst_87 {dimension_numbers = #tpu.dot_dimension_numbers<[1], [0], [0], [1], [0, 0, 1, 1], [], []>} : vector<320x36xf32>, vector<36x36xf32>, vector<320x36xf32> -> vector<320x36xf32>
    %183 = vector.shape_cast %182 : vector<320x36xf32> to vector<10x32x36xf32>
    %cst_88 = arith.constant 0.000000e+00 : f32
    %184 = vector.broadcast %cst_88 : f32 to vector<8x16x4xf32>
    %185 = vector.extract_strided_slice %183 {offsets = [0, 0, 0], sizes = [8, 16, 4], strides = [1, 1, 1]} : vector<10x32x36xf32> to vector<8x16x4xf32>
    %186 = arith.addf %184, %185 : vector<8x16x4xf32>
    %187 = vector.extract_strided_slice %183 {offsets = [0, 1, 4], sizes = [8, 16, 4], strides = [1, 1, 1]} : vector<10x32x36xf32> to vector<8x16x4xf32>
    %188 = arith.addf %186, %187 : vector<8x16x4xf32>
    %189 = vector.extract_strided_slice %183 {offsets = [0, 2, 8], sizes = [8, 16, 4], strides = [1, 1, 1]} : vector<10x32x36xf32> to vector<8x16x4xf32>
    %190 = arith.addf %188, %189 : vector<8x16x4xf32>
    %191 = vector.extract_strided_slice %183 {offsets = [1, 0, 12], sizes = [8, 16, 4], strides = [1, 1, 1]} : vector<10x32x36xf32> to vector<8x16x4xf32>
    %192 = arith.addf %190, %191 : vector<8x16x4xf32>
    %193 = vector.extract_strided_slice %183 {offsets = [1, 1, 16], sizes = [8, 16, 4], strides = [1, 1, 1]} : vector<10x32x36xf32> to vector<8x16x4xf32>
    %194 = arith.addf %192, %193 : vector<8x16x4xf32>
    %195 = vector.extract_strided_slice %183 {offsets = [1, 2, 20], sizes = [8, 16, 4], strides = [1, 1, 1]} : vector<10x32x36xf32> to vector<8x16x4xf32>
    %196 = arith.addf %194, %195 : vector<8x16x4xf32>
    %197 = vector.extract_strided_slice %183 {offsets = [2, 0, 24], sizes = [8, 16, 4], strides = [1, 1, 1]} : vector<10x32x36xf32> to vector<8x16x4xf32>
    %198 = arith.addf %196, %197 : vector<8x16x4xf32>
    %199 = vector.extract_strided_slice %183 {offsets = [2, 1, 28], sizes = [8, 16, 4], strides = [1, 1, 1]} : vector<10x32x36xf32> to vector<8x16x4xf32>
    %200 = arith.addf %198, %199 : vector<8x16x4xf32>
    %201 = vector.extract_strided_slice %183 {offsets = [2, 2, 32], sizes = [8, 16, 4], strides = [1, 1, 1]} : vector<10x32x36xf32> to vector<8x16x4xf32>
    %202 = arith.addf %200, %201 : vector<8x16x4xf32>
    %c0_89 = arith.constant 0 : index
    %c0_90 = arith.constant 0 : index
    %203 = vector.load %arg14[%c0_89, %c0_90] : memref<1x4xf32, #tpu.memory_space<vmem>>, vector<1x4xf32>
    %204 = vector.shape_cast %203 : vector<1x4xf32> to vector<1x1x4xf32>
    %205 = vector.broadcast %204 : vector<1x1x4xf32> to vector<8x16x4xf32>
    %206 = arith.addf %202, %205 : vector<8x16x4xf32>
    %c0_91 = arith.constant 0 : index
    %c0_92 = arith.constant 0 : index
    %c0_93 = arith.constant 0 : index
    %c0_94 = arith.constant 0 : index
    %207 = vector.load %arg3[%c0_91, %c0_92, %c0_93, %c0_94] : memref<1x8x16x4xf32, #tpu.memory_space<vmem>>, vector<1x8x16x4xf32>
    %208 = vector.shape_cast %207 : vector<1x8x16x4xf32> to vector<8x16x4xf32>
    %cst_95 = arith.constant 2.000000e-01 : f32
    %209 = vector.broadcast %cst_95 : f32 to vector<8x16x4xf32>
    %210 = arith.mulf %206, %209 : vector<8x16x4xf32>
    %211 = arith.addf %210, %208 : vector<8x16x4xf32>
    %c0_96 = arith.constant 0 : index
    %c0_97 = arith.constant 0 : index
    %c0_98 = arith.constant 0 : index
    %c0_99 = arith.constant 0 : index
    %212 = vector.load %arg15[%c0_96, %c0_97, %c0_98, %c0_99] : memref<1x8x16x4xf32, #tpu.memory_space<vmem>>, vector<1x8x16x4xf32>
    %213 = vector.shape_cast %212 : vector<1x8x16x4xf32> to vector<8x16x4xf32>
    %214 = vector.shape_cast %211 : vector<8x16x4xf32> to vector<1x8x16x4xf32>
    tpu.vector_store %arg15[%c0_96, %c0_97, %c0_98, %c0_99], %214 {strides = array<i32>} : memref<1x8x16x4xf32, #tpu.memory_space<vmem>>, vector<1x8x16x4xf32>,
    return
  }
  func.func @transform_0(%arg0: i32, %arg1: i32) -> (i32, i32, i32, i32) {
    %c1_i32 = arith.constant 1 : i32
    %0 = arith.subi %arg1, %c1_i32 : i32
    %c0_i32 = arith.constant 0 : i32
    %1 = arith.maxsi %0, %c0_i32 : i32
    %c0_i32_0 = arith.constant 0 : i32
    %c0_i32_1 = arith.constant 0 : i32
    %c0_i32_2 = arith.constant 0 : i32
    return %arg0, %1, %c0_i32_0, %c0_i32_1 : i32, i32, i32, i32
  }
  func.func @transform_1(%arg0: i32, %arg1: i32) -> (i32, i32, i32, i32) {
    %c0_i32 = arith.constant 0 : i32
    %c0_i32_0 = arith.constant 0 : i32
    %c0_i32_1 = arith.constant 0 : i32
    return %arg0, %arg1, %c0_i32, %c0_i32_0 : i32, i32, i32, i32
  }
  func.func @transform_2(%arg0: i32, %arg1: i32) -> (i32, i32, i32, i32) {
    %c1_i32 = arith.constant 1 : i32
    %0 = arith.addi %arg1, %c1_i32 : i32
    %c1_i32_0 = arith.constant 1 : i32
    %1 = arith.minsi %0, %c1_i32_0 : i32
    %c0_i32 = arith.constant 0 : i32
    %c0_i32_1 = arith.constant 0 : i32
    %c0_i32_2 = arith.constant 0 : i32
    return %arg0, %1, %c0_i32, %c0_i32_1 : i32, i32, i32, i32
  }
  func.func @transform_3(%arg0: i32, %arg1: i32) -> (i32, i32) {
    %c0_i32 = arith.constant 0 : i32
    %c0_i32_0 = arith.constant 0 : i32
    %c0_i32_1 = arith.constant 0 : i32
    return %c0_i32, %c0_i32_0 : i32, i32
  }
  func.func @transform_4(%arg0: i32, %arg1: i32) -> (i32, i32) {
    %c0_i32 = arith.constant 0 : i32
    %c0_i32_0 = arith.constant 0 : i32
    %c0_i32_1 = arith.constant 0 : i32
    return %c0_i32, %c0_i32_0 : i32, i32
  }
  func.func @transform_5(%arg0: i32, %arg1: i32) -> (i32, i32) {
    %c0_i32 = arith.constant 0 : i32
    %c0_i32_0 = arith.constant 0 : i32
    %c0_i32_1 = arith.constant 0 : i32
    return %c0_i32, %c0_i32_0 : i32, i32
  }
  func.func @transform_6(%arg0: i32, %arg1: i32) -> (i32, i32) {
    %c0_i32 = arith.constant 0 : i32
    %c0_i32_0 = arith.constant 0 : i32
    %c0_i32_1 = arith.constant 0 : i32
    return %c0_i32, %c0_i32_0 : i32, i32
  }
  func.func @transform_7(%arg0: i32, %arg1: i32) -> (i32, i32) {
    %c0_i32 = arith.constant 0 : i32
    %c0_i32_0 = arith.constant 0 : i32
    %c0_i32_1 = arith.constant 0 : i32
    return %c0_i32, %c0_i32_0 : i32, i32
  }
  func.func @transform_8(%arg0: i32, %arg1: i32) -> (i32, i32) {
    %c0_i32 = arith.constant 0 : i32
    %c0_i32_0 = arith.constant 0 : i32
    %c0_i32_1 = arith.constant 0 : i32
    return %c0_i32, %c0_i32_0 : i32, i32
  }
  func.func @transform_9(%arg0: i32, %arg1: i32) -> (i32, i32) {
    %c0_i32 = arith.constant 0 : i32
    %c0_i32_0 = arith.constant 0 : i32
    %c0_i32_1 = arith.constant 0 : i32
    return %c0_i32, %c0_i32_0 : i32, i32
  }
  func.func @transform_10(%arg0: i32, %arg1: i32) -> (i32, i32) {
    %c0_i32 = arith.constant 0 : i32
    %c0_i32_0 = arith.constant 0 : i32
    %c0_i32_1 = arith.constant 0 : i32
    return %c0_i32, %c0_i32_0 : i32, i32
  }
  func.func @transform_11(%arg0: i32, %arg1: i32) -> (i32, i32) {
    %c0_i32 = arith.constant 0 : i32
    %c0_i32_0 = arith.constant 0 : i32
    %c0_i32_1 = arith.constant 0 : i32
    return %c0_i32, %c0_i32_0 : i32, i32
  }
  func.func @transform_12(%arg0: i32, %arg1: i32) -> (i32, i32) {
    %c0_i32 = arith.constant 0 : i32
    %c0_i32_0 = arith.constant 0 : i32
    %c0_i32_1 = arith.constant 0 : i32
    return %c0_i32, %c0_i32_0 : i32, i32
  }
  func.func @transform_13(%arg0: i32, %arg1: i32) -> (i32, i32, i32, i32) {
    %c0_i32 = arith.constant 0 : i32
    %c0_i32_0 = arith.constant 0 : i32
    %c0_i32_1 = arith.constant 0 : i32
    return %arg0, %arg1, %c0_i32, %c0_i32_0 : i32, i32, i32, i32
  }
}

</mosaic_0001>

<bundles_post_ra>
// kernel: residual_dense_block_5c.1
= control target key start
LH: loop header
LB: loop body
LE: loop exit
PB: predicated region body
PF: predicated region fallthrough
CT: control target
= control target key end

     0   :  { %s9460_s25 = smov 0   ;;  %s9462_s26 = smov 0   ;;  %s14561_s0 = inlined_call_operand.vmem [shape: f32[2,16,16,4], index: 0, kind: input, shape index: {}, may-alias: {0,1,2}]   ;;  %s14562_s1 = inlined_call_operand.vmem [shape: f32[2,16,16,4], index: 1, kind: input, shape index: {}, may-alias: {0,1,2}]   ;;  %s14563_s2 = inlined_call_operand.vmem [shape: f32[2,16,16,4], index: 2, kind: input, shape index: {}, may-alias: {0,1,2}]   ;;  %s14564_s3 = inlined_call_operand.vmem [shape: f32[4,72], index: 3, kind: input, shape index: {}]   ;;  %s14565_s4 = inlined_call_operand.vmem [shape: f32[1,8], index: 4, kind: input, shape index: {}]   ;;  %s14566_s5 = inlined_call_operand.vmem [shape: f32[12,72], index: 5, kind: input, shape index: {}]   ;;  %s14567_s6 = inlined_call_operand.vmem [shape: f32[1,8], index: 6, kind: input, shape index: {}]   ;;  %s14568_s7 = inlined_call_operand.vmem [shape: f32[20,72], index: 7, kind: input, shape index: {}]   ;;  %s14569_s8 = inlined_call_operand.vmem [shape: f32[1,8], index: 8, kind: input, shape index: {}]   ;;  %s14570_s9 = inlined_call_operand.vmem [shape: f32[28,72], index: 9, kind: input, shape index: {}]   ;;  %s14571_s10 = inlined_call_operand.vmem [shape: f32[1,8], index: 10, kind: input, shape index: {}]   ;;  %s14572_s11 = inlined_call_operand.vmem [shape: f32[36,36], index: 11, kind: input, shape index: {}]   ;;  %s14573_s12 = inlined_call_operand.vmem [shape: f32[1,4], index: 12, kind: input, shape index: {}]   ;;  %s14574_s13 = inlined_call_operand.vmem [shape: f32[2,16,16,4], index: 13, kind: output, shape index: {}]  }
   0x1   :  { %s9464_s27 = smov 0   ;;  %s9466_s28 = smov 0  }
   0x2   :  { %s9468_s29 = smov 0  }
   0x3 LB: > { %s32_s30 = sadd.s32 1, %s9353_s27  ;;  %s35_s14 = sadd.s32 1, %s9357_s28  ;;  %s9361_s29 = sphi %s9468_s29, %s23_s29   ;;  %s9357_s28 = sphi %s9466_s28, %s15013_s28   ;;  %s9353_s27 = sphi %s9464_s27, %s15012_s27   ;;  %s9349_s26 = sphi %s9462_s26, %s15011_s26   ;;  %s9345_s25 = sphi %s9460_s25, %s15010_s25  }
   0x4   : > { %p33_p0 = scmp.ge.s32.totalorder %s32_s30, 2  ;;  %p8915_p1 = scmp.ge.s32.totalorder %s9361_s29, 1 }
   0x5   : > { %p469_p2 = scmp.lt.s32.totalorder %s9361_s29, 5 }
   0x6   : > { %s15015_s30 = smov (%p33_p0, %s32_s30), 0  ;;  %s15017_s14 = smov (!%p33_p0, %s35_s14), %s9357_s28 }
   0x7   : > { %14615 = sst [smem:[#allocation3_spill]] %s15015_s30  ;;  %p470_p3 = pnand %p8915_p1, %p469_p2 }
   0x8   : > { %p37_p4 = scmp.ge.s32.totalorder %s15017_s14, 2 }
   0x9   : > { %473 = sbr.rel (%p470_p3) target bundleno = 4661 (0x1235), region = 72 }
   0xa   : > { %s15019_s14 = smov (%p37_p4, %s15017_s14), 0 }
   0xb   : > { %14616 = sst [smem:[#allocation4_spill]] %s15019_s14 }
   0xe   : > { %vm605_vm0 = vcmask 286720   ;;  %s8916_s15 = sadd.s32 4294967295, %s9345_s25  ;;  %p553_p5 = scmp.lt.s32.totalorder %s9349_s26, 1  ;;  %v9363_v0 = vmov 0.0   ;;  %vm624_vm1 = vcmask 293888   ;;  %vm626_vm2 = vcmask 292864  }
   0xf   : > { %606 = vst.msk [vmem:[#allocation2] sm:$0x1] %vm605_vm0, %v9363_v0  ;;  %p550_p6 = scmp.gt.s32.totalorder %s8916_s15, 0  ;;  %s8921_s16 = sshll.u32 %s9345_s25, 3  ;;  %vm679_vm3 = vcmask 31744  }
  0x10   : > { %607 = vst.msk [vmem:[#allocation2 + $0x20] sm:$0x1] %vm605_vm0, %v9363_v0  ;;  %s15021_s26 = smov (!%p553_p5, %s9349_s26), 1  ;;  %p569_p7 = scmp.lt.s32.totalorder %s8921_s16, 15 }
  0x11   : > { %608 = vst.msk [vmem:[#allocation2 + $0x40] sm:$0x1] %vm605_vm0, %v9363_v0  ;;  %s15023_s15 = smov (!%p550_p6, %s8916_s15), 0  ;;  %s9504_s18 = sshll.u32 %s15021_s26, 5 }
  0x12   : > { %609 = vst.msk [vmem:[#allocation2 + $0x60] sm:$0x1] %vm605_vm0, %v9363_v0  ;;  %s8917_s17 = sshll.u32 %s15023_s15, 3  ;;  %s577_s19 = sadd.s32 1, %s9345_s25 }
  0x13   : > { %610 = vst.msk [vmem:[#allocation2 + $0x80] sm:$0x1] %vm605_vm0, %v9363_v0  ;;  %p555_p8 = scmp.lt.s32.totalorder %s8917_s17, 15  ;;  %s15025_s16 = smov (!%p569_p7, %s8921_s16), 15 }
  0x14   : > { %611 = vst.msk [vmem:[#allocation2 + $0xa0] sm:$0x1] %vm605_vm0, %v9363_v0  ;;  %s8922_s20 = sshll.u32 %s15025_s16, 1  ;;  %p578_p9 = scmp.lt.s32.totalorder %s577_s19, 1 }
  0x15   : > { %612 = vst.msk [vmem:[#allocation2 + $0xc0] sm:$0x1] %vm605_vm0, %v9363_v0  ;;  %s15027_s17 = smov (!%p555_p8, %s8917_s17), 15  ;;  %s9518_s22 = sadd.s32 %s8922_s20, %s9504_s18 }
  0x16   : > { %613 = vst.msk [vmem:[#allocation2 + $0xe0] sm:$0x1] %vm605_vm0, %v9363_v0  ;;  %s8918_s21 = sshll.u32 %s15027_s17, 1  ;;  %s8924_s26 = sshll.u32 %s9518_s22, 3 }
  0x17   : > { %614 = vst.msk [vmem:[#allocation2 + $0x100] sm:$0x1] %vm605_vm0, %v9363_v0  ;;  %s559_s23 = sadd.s32 %s9504_s18, %s8918_s21  ;;  %s9538_s30 = scalar_lea.vmem %s14574_s13, %s8924_s26 }
  0x18   : > { %615 = vst.msk [vmem:[#allocation2 + $0x120] sm:$0x1] %vm605_vm0, %v9363_v0  ;;  %s8920_s24 = sshll.u32 %s559_s23, 3  ;;  %s15029_s19 = smov (!%p578_p9, %s577_s19), 1 }
  0x19   : > { %616 = vst.msk [vmem:[#allocation2 + $0x140] sm:$0x1] %vm605_vm0, %v9363_v0  ;;  %s9531_s17 = scalar_lea.vmem %s14561_s0, %s8920_s24  ;;  %s8925_s21 = sshll.u32 %s15029_s19, 3 }
  0x1a   : > { %617 = vst.msk [vmem:[#allocation2 + $0x160] sm:$0x1] %vm605_vm0, %v9363_v0  ;;  %p583_p10 = scmp.lt.s32.totalorder %s8925_s21, 15  ;;  %p8933_p11 = scmp.le.s32.totalorder %s9345_s25, 0 }
  0x1b   : > { %618 = vst.msk [vmem:[#allocation2 + $0x180] sm:$0x1] %vm605_vm0, %v9363_v0 }
  0x1c   : > { %619 = vst.msk [vmem:[#allocation2 + $0x1a0] sm:$0x1] %vm605_vm0, %v9363_v0  ;;  %s15031_s21 = smov (!%p583_p10, %s8925_s21), 15 }
  0x1d   : > { %620 = vst.msk [vmem:[#allocation2 + $0x1c0] sm:$0x1] %vm605_vm0, %v9363_v0  ;;  %s8926_s14 = sshll.u32 %s15031_s21, 1  ;;  %s9623_s21 = scalar_lea.vmem %s14562_s1, %s8924_s26 }
  0x1e   : > { %621 = vst.msk [vmem:[#allocation2 + $0x1e0] sm:$0x1] %vm605_vm0, %v9363_v0  ;;  %s587_s19 = sadd.s32 %s8926_s14, %s9504_s18  ;;  %v662_v1 = vld [vmem:[%s9623_s21] sm:$0xff]  ;;  %v663_v2 = vld [vmem:[%s9623_s21 + $0x8] sm:$0xff]  ;;  %v664_v3 = vld [vmem:[%s9623_s21 + $0x10] sm:$0xff] }
  0x1f   : > { %622 = vst.msk [vmem:[#allocation2 + $0x200] sm:$0x1] %vm605_vm0, %v9363_v0  ;;  %s8928_s23 = sshll.u32 %s587_s19, 3  ;;  %v665_v4 = vld [vmem:[%s9623_s21 + $0x18] sm:$0xff]  ;;  %v666_v5 = vld [vmem:[%s9623_s21 + $0x20] sm:$0xff]  ;;  %v667_v6 = vld [vmem:[%s9623_s21 + $0x28] sm:$0xff] }
  0x20   : > { %623 = vst.msk [vmem:[#allocation2 + $0x220] sm:$0x1] %vm605_vm0, %v9363_v0  ;;  %s9566_s16 = scalar_lea.vmem %s14563_s2, %s8928_s23  ;;  %v668_v7 = vld [vmem:[%s9623_s21 + $0x30] sm:$0xff]  ;;  %v669_v8 = vld [vmem:[%s9623_s21 + $0x38] sm:$0xff]  ;;  %v670_v9 = vld [vmem:[%s9623_s21 + $0x40] sm:$0xff] }
  0x21   : > { %625 = vst.msk [vmem:[#allocation2 + $0x11] sm:$0xff] %vm624_vm1, %v9363_v0  ;;  %v671_v10 = vld [vmem:[%s9623_s21 + $0x48] sm:$0xff]  ;;  %v672_v11 = vld [vmem:[%s9623_s21 + $0x50] sm:$0xff]  ;;  %v673_v12 = vld [vmem:[%s9623_s21 + $0x58] sm:$0xff] }
  0x22   : > { %628 = vst.msk [vmem:[#allocation2 + $0x31] sm:$0xff] %vm624_vm1, %v9363_v0  ;;  %v674_v13 = vld [vmem:[%s9623_s21 + $0x60] sm:$0xff]  ;;  %v675_v14 = vld [vmem:[%s9623_s21 + $0x68] sm:$0xff]  ;;  %v676_v15 = vld [vmem:[%s9623_s21 + $0x70] sm:$0xff] }
  0x23   : > { %630 = vst.msk [vmem:[#allocation2 + $0x51] sm:$0xff] %vm624_vm1, %v9363_v0  ;;  %v677_v16 = vld [vmem:[%s9623_s21 + $0x78] sm:$0xff] }
  0x24   : > { %632 = vst.msk [vmem:[#allocation2 + $0x71] sm:$0xff] %vm624_vm1, %v9363_v0 }
  0x25   : > { %634 = vst.msk [vmem:[#allocation2 + $0x91] sm:$0xff] %vm624_vm1, %v9363_v0 }
  0x26   : > { %636 = vst.msk [vmem:[#allocation2 + $0xb1] sm:$0xff] %vm624_vm1, %v9363_v0 }
  0x27   : > { %638 = vst.msk [vmem:[#allocation2 + $0xd1] sm:$0xff] %vm624_vm1, %v9363_v0 }
  0x28   : > { %640 = vst.msk [vmem:[#allocation2 + $0xf1] sm:$0xff] %vm624_vm1, %v9363_v0 }
  0x29   : > { %642 = vst.msk [vmem:[#allocation2 + $0x111] sm:$0xff] %vm624_vm1, %v9363_v0 }
  0x2a   : > { %644 = vst.msk [vmem:[#allocation2 + $0x131] sm:$0xff] %vm624_vm1, %v9363_v0 }
  0x2b   : > { %646 = vst.msk [vmem:[#allocation2 + $0x151] sm:$0xff] %vm624_vm1, %v9363_v0 }
  0x2c   : > { %648 = vst.msk [vmem:[#allocation2 + $0x171] sm:$0xff] %vm624_vm1, %v9363_v0 }
  0x2d   : > { %650 = vst.msk [vmem:[#allocation2 + $0x191] sm:$0xff] %vm624_vm1, %v9363_v0 }
  0x2e   : > { %652 = vst.msk [vmem:[#allocation2 + $0x1b1] sm:$0xff] %vm624_vm1, %v9363_v0 }
  0x2f   : > { %654 = vst.msk [vmem:[#allocation2 + $0x1d1] sm:$0xff] %vm624_vm1, %v9363_v0 }
  0x30   : > { %656 = vst.msk [vmem:[#allocation2 + $0x1f1] sm:$0xff] %vm624_vm1, %v9363_v0 }
  0x31   : > { %658 = vst.msk [vmem:[#allocation2 + $0x211] sm:$0xff] %vm624_vm1, %v9363_v0 }
  0x32   : > { %660 = vst.msk [vmem:[#allocation2 + $0x231] sm:$0xff] %vm624_vm1, %v9363_v0 }
  0x33   : > { %627 = vst.msk [vmem:[#allocation2 + $0x19] sm:$0x7f] %vm626_vm2, %v9363_v0 }
  0x34   : > { %629 = vst.msk [vmem:[#allocation2 + $0x39] sm:$0x7f] %vm626_vm2, %v9363_v0 }
  0x35   : > { %631 = vst.msk [vmem:[#allocation2 + $0x59] sm:$0x7f] %vm626_vm2, %v9363_v0 }
  0x36   : > { %633 = vst.msk [vmem:[#allocation2 + $0x79] sm:$0x7f] %vm626_vm2, %v9363_v0 }
  0x37   : > { %635 = vst.msk [vmem:[#allocation2 + $0x99] sm:$0x7f] %vm626_vm2, %v9363_v0 }
  0x38   : > { %637 = vst.msk [vmem:[#allocation2 + $0xb9] sm:$0x7f] %vm626_vm2, %v9363_v0 }
  0x39   : > { %639 = vst.msk [vmem:[#allocation2 + $0xd9] sm:$0x7f] %vm626_vm2, %v9363_v0 }
  0x3a   : > { %641 = vst.msk [vmem:[#allocation2 + $0xf9] sm:$0x7f] %vm626_vm2, %v9363_v0 }
  0x3b   : > { %643 = vst.msk [vmem:[#allocation2 + $0x119] sm:$0x7f] %vm626_vm2, %v9363_v0 }
  0x3c   : > { %645 = vst.msk [vmem:[#allocation2 + $0x139] sm:$0x7f] %vm626_vm2, %v9363_v0 }
  0x3d   : > { %647 = vst.msk [vmem:[#allocation2 + $0x159] sm:$0x7f] %vm626_vm2, %v9363_v0 }
  0x3e   : > { %649 = vst.msk [vmem:[#allocation2 + $0x179] sm:$0x7f] %vm626_vm2, %v9363_v0 }
  0x3f   : > { %651 = vst.msk [vmem:[#allocation2 + $0x199] sm:$0x7f] %vm626_vm2, %v9363_v0 }
  0x40   : > { %653 = vst.msk [vmem:[#allocation2 + $0x1b9] sm:$0x7f] %vm626_vm2, %v9363_v0 }
  0x41   : > { %655 = vst.msk [vmem:[#allocation2 + $0x1d9] sm:$0x7f] %vm626_vm2, %v9363_v0 }
  0x42   : > { %657 = vst.msk [vmem:[#allocation2 + $0x1f9] sm:$0x7f] %vm626_vm2, %v9363_v0 }
  0x43   : > { %659 = vst.msk [vmem:[#allocation2 + $0x219] sm:$0x7f] %vm626_vm2, %v9363_v0 }
  0x44   : > { %661 = vst.msk [vmem:[#allocation2 + $0x239] sm:$0x7f] %vm626_vm2, %v9363_v0 }
  0x45   : > { %680 = vst.msk [vmem:[#allocation2 + $0xa1] sm:$0xff] %vm679_vm3, %v662_v1 }
  0x46   : > { %681 = vst.msk [vmem:[#allocation2 + $0xa9] sm:$0xff] %vm679_vm3, %v663_v2 }
  0x47   : > { %682 = vst.msk [vmem:[#allocation2 + $0xc1] sm:$0xff] %vm679_vm3, %v664_v3 }
  0x48   : > { %683 = vst.msk [vmem:[#allocation2 + $0xc9] sm:$0xff] %vm679_vm3, %v665_v4 }
  0x49   : > { %684 = vst.msk [vmem:[#allocation2 + $0xe1] sm:$0xff] %vm679_vm3, %v666_v5 }
  0x4a   : > { %685 = vst.msk [vmem:[#allocation2 + $0xe9] sm:$0xff] %vm679_vm3, %v667_v6 }
  0x4b   : > { %686 = vst.msk [vmem:[#allocation2 + $0x101] sm:$0xff] %vm679_vm3, %v668_v7 }
  0x4c   : > { %687 = vst.msk [vmem:[#allocation2 + $0x109] sm:$0xff] %vm679_vm3, %v669_v8 }
  0x4d   : > { %688 = vst.msk [vmem:[#allocation2 + $0x121] sm:$0xff] %vm679_vm3, %v670_v9 }
  0x4e   : > { %689 = vst.msk [vmem:[#allocation2 + $0x129] sm:$0xff] %vm679_vm3, %v671_v10 }
  0x4f   : > { %690 = vst.msk [vmem:[#allocation2 + $0x141] sm:$0xff] %vm679_vm3, %v672_v11 }
  0x50   : > { %691 = vst.msk [vmem:[#allocation2 + $0x149] sm:$0xff] %vm679_vm3, %v673_v12  ;;  %699 = sbr.rel (%p8933_p11) target bundleno = 96 (0x60), region = 76 }
  0x51   : > { %692 = vst.msk [vmem:[#allocation2 + $0x161] sm:$0xff] %vm679_vm3, %v674_v13 }
  0x52   : > { %693 = vst.msk [vmem:[#allocation2 + $0x169] sm:$0xff] %vm679_vm3, %v675_v14 }
  0x53   : > { %694 = vst.msk [vmem:[#allocation2 + $0x181] sm:$0xff] %vm679_vm3, %v676_v15 }
  0x54   : > { %695 = vst.msk [vmem:[#allocation2 + $0x189] sm:$0xff] %vm679_vm3, %v677_v16 }
  0x55   : > { %v8934_v17 = vld [vmem:[%s9531_s17 + $0x30] sm:$0xff]  ;;  %v8935_v18 = vld [vmem:[%s9531_s17 + $0x38] sm:$0xff]  ;;  %v8936_v19 = vld [vmem:[%s9531_s17 + $0x40] sm:$0xff] }
  0x56   : > { %711 = vst.msk [vmem:[#allocation2 + $0x1] sm:$0xff] %vm679_vm3, %v8934_v17  ;;  %v8937_v20 = vld [vmem:[%s9531_s17 + $0x48] sm:$0xff]  ;;  %v8938_v21 = vld [vmem:[%s9531_s17 + $0x50] sm:$0xff]  ;;  %v8939_v22 = vld [vmem:[%s9531_s17 + $0x58] sm:$0xff] }
  0x57   : > { %712 = vst.msk [vmem:[#allocation2 + $0x9] sm:$0xff] %vm679_vm3, %v8935_v18  ;;  %v8940_v23 = vld [vmem:[%s9531_s17 + $0x60] sm:$0xff]  ;;  %v8941_v24 = vld [vmem:[%s9531_s17 + $0x68] sm:$0xff]  ;;  %v8942_v25 = vld [vmem:[%s9531_s17 + $0x70] sm:$0xff] }
  0x58   : > { %713 = vst.msk [vmem:[#allocation2 + $0x21] sm:$0xff] %vm679_vm3, %v8936_v19  ;;  %v8943_v26 = vld [vmem:[%s9531_s17 + $0x78] sm:$0xff] }
  0x59   : > { %714 = vst.msk [vmem:[#allocation2 + $0x29] sm:$0xff] %vm679_vm3, %v8937_v20 }
  0x5a   : > { %715 = vst.msk [vmem:[#allocation2 + $0x41] sm:$0xff] %vm679_vm3, %v8938_v21 }
  0x5b   : > { %716 = vst.msk [vmem:[#allocation2 + $0x49] sm:$0xff] %vm679_vm3, %v8939_v22 }
  0x5c   : > { %717 = vst.msk [vmem:[#allocation2 + $0x61] sm:$0xff] %vm679_vm3, %v8940_v23 }
  0x5d   : > { %718 = vst.msk [vmem:[#allocation2 + $0x69] sm:$0xff] %vm679_vm3, %v8941_v24 }
  0x5e   : > { %719 = vst.msk [vmem:[#allocation2 + $0x81] sm:$0xff] %vm679_vm3, %v8942_v25 }
  0x5f   : > { %720 = vst.msk [vmem:[#allocation2 + $0x89] sm:$0xff] %vm679_vm3, %v8943_v26 }
  0x60 PF: > { %p8944_p12 = scmp.ne.s32.totalorder %s9345_s25, 0 }
  0x62   : > { %724 = sbr.rel (%p8944_p12) target bundleno = 114 (0x72), region = 80 }
  0x67   : > { %v9364_v27 = vmov 0.0  }
  0x68   : > { %725 = vst.msk [vmem:[#allocation2 + $0x1] sm:$0xff] %vm679_vm3, %v9364_v27 }
  0x69   : > { %726 = vst.msk [vmem:[#allocation2 + $0x9] sm:$0xff] %vm679_vm3, %v9364_v27 }
  0x6a   : > { %727 = vst.msk [vmem:[#allocation2 + $0x21] sm:$0xff] %vm679_vm3, %v9364_v27 }
  0x6b   : > { %728 = vst.msk [vmem:[#allocation2 + $0x29] sm:$0xff] %vm679_vm3, %v9364_v27 }
  0x6c   : > { %729 = vst.msk [vmem:[#allocation2 + $0x41] sm:$0xff] %vm679_vm3, %v9364_v27 }
  0x6d   : > { %730 = vst.msk [vmem:[#allocation2 + $0x49] sm:$0xff] %vm679_vm3, %v9364_v27 }
  0x6e   : > { %731 = vst.msk [vmem:[#allocation2 + $0x61] sm:$0xff] %vm679_vm3, %v9364_v27 }
  0x6f   : > { %732 = vst.msk [vmem:[#allocation2 + $0x69] sm:$0xff] %vm679_vm3, %v9364_v27 }
  0x70   : > { %733 = vst.msk [vmem:[#allocation2 + $0x81] sm:$0xff] %vm679_vm3, %v9364_v27 }
  0x71   : > { %734 = vst.msk [vmem:[#allocation2 + $0x89] sm:$0xff] %vm679_vm3, %v9364_v27 }
  0x72 PF: > { %p8945_p13 = scmp.ge.s32.totalorder %s9345_s25, 1 }
  0x74   : > { %738 = sbr.rel (%p8945_p13) target bundleno = 132 (0x84), region = 84 }
  0x79   : > { %v739_v28 = vld [vmem:[%s9566_s16] sm:$0xff]  ;;  %v740_v29 = vld [vmem:[%s9566_s16 + $0x8] sm:$0xff]  ;;  %v741_v30 = vld [vmem:[%s9566_s16 + $0x10] sm:$0xff] }
  0x7a   : > { %750 = vst.msk [vmem:[#allocation2 + $0x1a1] sm:$0xff] %vm679_vm3, %v739_v28  ;;  %v742_v31 = vld [vmem:[%s9566_s16 + $0x18] sm:$0xff]  ;;  %v743_v32 = vld [vmem:[%s9566_s16 + $0x20] sm:$0xff]  ;;  %v744_v33 = vld [vmem:[%s9566_s16 + $0x28] sm:$0xff] }
  0x7b   : > { %751 = vst.msk [vmem:[#allocation2 + $0x1a9] sm:$0xff] %vm679_vm3, %v740_v29  ;;  %v745_v34 = vld [vmem:[%s9566_s16 + $0x30] sm:$0xff]  ;;  %v746_v35 = vld [vmem:[%s9566_s16 + $0x38] sm:$0xff]  ;;  %v747_v36 = vld [vmem:[%s9566_s16 + $0x40] sm:$0xff] }
  0x7c   : > { %752 = vst.msk [vmem:[#allocation2 + $0x1c1] sm:$0xff] %vm679_vm3, %v741_v30  ;;  %v748_v37 = vld [vmem:[%s9566_s16 + $0x48] sm:$0xff] }
  0x7d   : > { %753 = vst.msk [vmem:[#allocation2 + $0x1c9] sm:$0xff] %vm679_vm3, %v742_v31 }
  0x7e   : > { %754 = vst.msk [vmem:[#allocation2 + $0x1e1] sm:$0xff] %vm679_vm3, %v743_v32 }
  0x7f   : > { %755 = vst.msk [vmem:[#allocation2 + $0x1e9] sm:$0xff] %vm679_vm3, %v744_v33 }
  0x80   : > { %756 = vst.msk [vmem:[#allocation2 + $0x201] sm:$0xff] %vm679_vm3, %v745_v34 }
  0x81   : > { %757 = vst.msk [vmem:[#allocation2 + $0x209] sm:$0xff] %vm679_vm3, %v746_v35 }
  0x82   : > { %758 = vst.msk [vmem:[#allocation2 + $0x221] sm:$0xff] %vm679_vm3, %v747_v36 }
  0x83   : > { %759 = vst.msk [vmem:[#allocation2 + $0x229] sm:$0xff] %vm679_vm3, %v748_v37 }
  0x84 PF: > { %p8946_p0 = scmp.ne.s32.totalorder %s9345_s25, 1 }
  0x86   : > { %763 = sbr.rel (%p8946_p0) target bundleno = 150 (0x96), region = 88 }
  0x8b   : > { %v9365_v38 = vmov 0.0  }
  0x8c   : > { %765 = vst.msk [vmem:[#allocation2 + $0x1a1] sm:$0xff] %vm679_vm3, %v9365_v38 }
  0x8d   : > { %766 = vst.msk [vmem:[#allocation2 + $0x1a9] sm:$0xff] %vm679_vm3, %v9365_v38 }
  0x8e   : > { %767 = vst.msk [vmem:[#allocation2 + $0x1c1] sm:$0xff] %vm679_vm3, %v9365_v38 }
  0x8f   : > { %768 = vst.msk [vmem:[#allocation2 + $0x1c9] sm:$0xff] %vm679_vm3, %v9365_v38 }
  0x90   : > { %769 = vst.msk [vmem:[#allocation2 + $0x1e1] sm:$0xff] %vm679_vm3, %v9365_v38 }
  0x91   : > { %770 = vst.msk [vmem:[#allocation2 + $0x1e9] sm:$0xff] %vm679_vm3, %v9365_v38 }
  0x92   : > { %771 = vst.msk [vmem:[#allocation2 + $0x201] sm:$0xff] %vm679_vm3, %v9365_v38 }
  0x93   : > { %772 = vst.msk [vmem:[#allocation2 + $0x209] sm:$0xff] %vm679_vm3, %v9365_v38 }
  0x94   : > { %773 = vst.msk [vmem:[#allocation2 + $0x221] sm:$0xff] %vm679_vm3, %v9365_v38 }
  0x95   : > { %774 = vst.msk [vmem:[#allocation2 + $0x229] sm:$0xff] %vm679_vm3, %v9365_v38 }
  0x96 PF: > { %v847_v39 = vld [vmem:[%s14564_s3] sm:$0xf]  ;;  %vm1064_vm4 = vcmask 1043456   ;;  %v776_v41 = vld [vmem:[#allocation2 + $0x8] sm:$0xff]  ;;  %v777_v42 = vld [vmem:[#allocation2 + $0x10] sm:$0xff]  ;;  %vm1572_vm5 = vcmask 1045504  }
  0x97   : > { %v775_v40 = vld [vmem:[#allocation2] sm:$0xff]  ;;  %8947 = vmatpush.msk.msra.mxu0 %vm1064_vm4, %v847_v39  ;;  %9242 = vmatpush.msk.msra.mxu1 %vm1064_vm4, %v847_v39  ;;  %v778_v43 = vld [vmem:[#allocation2 + $0x18] sm:$0xff]  ;;  %v780_v45 = vld [vmem:[#allocation2 + $0x28] sm:$0xff]  ;;  %vm1363_vm6 = vcmask 1046528   ;;  %s9366_s17 = smov 112   ;;  %s9367_s14 = smov 120  }
  0x98   : > { %8948 = vmatmul.msk.f32.vlgmr.msra.gmra.mxu0 %vm679_vm3, %v775_v40  ;;  %v779_v44 = vld [vmem:[#allocation2 + $0x20] sm:$0xff]  ;;  %v781_v46 = vld [vmem:[#allocation2 + $0x30] sm:$0xff]  ;;  %v782_v47 = vld [vmem:[#allocation2 + $0x38] sm:$0xff]  ;;  %s14613_s19 = smov 104   ;;  %s14601_s23 = smov 96  }
  0x99   : > { %v783_v48 = vld [vmem:[#allocation2 + $0x40] sm:$0xff]  ;;  %v784_v49 = vld [vmem:[#allocation2 + $0x48] sm:$0xff]  ;;  %v785_v50 = vld [vmem:[#allocation2 + $0x50] sm:$0xff]  ;;  %s14599_s24 = smov 88   ;;  %s14594_s15 = smov 80  }
  0x9a   : > { %v786_v51 = vld [vmem:[#allocation2 + $0x58] sm:$0xff]  ;;  %v787_v52 = vld [vmem:[#allocation2 + $0x60] sm:$0xff]  ;;  %v788_v53 = vld [vmem:[#allocation2 + $0x68] sm:$0xff]  ;;  %s14591_s16 = smov 72   ;;  %s14587_s18 = smov 64  }
  0x9b   : > { %v789_v54 = vld [vmem:[#allocation2 + $0x70] sm:$0xff]  ;;  %v790_v55 = vld [vmem:[#allocation2 + $0x78] sm:$0xff]  ;;  %v791_v57 = vld [vmem:[#allocation2 + $0x80] sm:$0xff]  ;;  %s9374_s26 = smov 4  }
  0x9c   : > { %v792_v59 = vld [vmem:[#allocation2 + $0x88] sm:$0xff]  ;;  %v793_v3 = vld [vmem:[#allocation2 + $0x90] sm:$0xff]  ;;  %v794_v8 = vld [vmem:[#allocation2 + $0x98] sm:$0xff] }
  0x9d   : > { %v795_v11 = vld [vmem:[#allocation2 + $0xa0] sm:$0xff]  ;;  %v796_v13 = vld [vmem:[#allocation2 + $0xa8] sm:$0xff]  ;;  %v797_v21 = vld [vmem:[#allocation2 + $0xb0] sm:$0xff] }
  0x9e   : > { %v798_v27 = vld [vmem:[#allocation2 + $0xb8] sm:$0xff]  ;;  %v799_v29 = vld [vmem:[#allocation2 + $0xc0] sm:$0xff]  ;;  %v800_v35 = vld [vmem:[#allocation2 + $0xc8] sm:$0xff] }
  0x9f   : > { %v801_v39 = vld [vmem:[#allocation2 + $0xd0] sm:$0xff] }
  0xa0   : > { %8949 = vmatmul.msk.f32.gmra.mxu0 %vm679_vm3, %v776_v41 }
  0xa8   : > { %8950 = vmatmul.msk.f32.gmra.mxu0 %vm679_vm3, %v777_v42 }
  0xb0   : > { %8951 = vmatmul.msk.f32.gmra.mxu0 %vm679_vm3, %v778_v43 }
  0xb8   : > { %8952 = vmatmul.msk.f32.gmra.mxu0 %vm679_vm3, %v779_v44 }
  0xc0   : > { %8953 = vmatmul.msk.f32.gmra.mxu0 %vm679_vm3, %v780_v45 }
  0xc8   : > { %8954 = vmatmul.msk.f32.gmra.mxu0 %vm679_vm3, %v781_v46  ;;  %v802_v46 = vld [vmem:[#allocation2 + $0xd8] sm:$0xff] }
  0xd0   : > { %8955 = vmatmul.msk.f32.gmra.mxu0 %vm679_vm3, %v782_v47 }
  0xd8   : > { %8956 = vmatmul.msk.f32.gmra.mxu0 %vm679_vm3, %v783_v48  ;;  %v803_v48 = vld [vmem:[#allocation2 + $0xe0] sm:$0xff] }
  0xe0   : > { %8957 = vmatmul.msk.f32.gmra.mxu0 %vm679_vm3, %v784_v49 }
  0xe8   : > { %8958 = vmatmul.msk.f32.gmra.mxu0 %vm679_vm3, %v785_v50  ;;  %v804_v50 = vld [vmem:[#allocation2 + $0xe8] sm:$0xff] }
  0xf0   : > { %8959 = vmatmul.msk.f32.gmra.mxu0 %vm679_vm3, %v786_v51 }
  0xf8   : > { %8960 = vmatmul.msk.f32.gmra.mxu0 %vm679_vm3, %v787_v52 }
 0x100   : > { %8961 = vmatmul.msk.f32.gmra.mxu0 %vm679_vm3, %v788_v53 }
 0x108   : > { %8962 = vmatmul.msk.f32.gmra.mxu0 %vm679_vm3, %v789_v54 }
 0x110   : > { %8963 = vmatmul.msk.f32.gmra.mxu0 %vm679_vm3, %v790_v55 }
 0x115   : > { %v9756_v56 = vpop.f32.mrf.mxu0 }
 0x116   : > { %v1573_v60 = vrot.slane %v9756_v56, 2  ;;  %v1364_v62 = vrot.slane %v9756_v56, 1 }
 0x118   : > { %8964 = vmatmul.msk.f32.gmra.mxu0 %vm679_vm3, %v791_v57 }
 0x11d   : > { %v9759_v58 = vpop.f32.mrf.mxu0 }
 0x11e   : > { %v1574_v61 = vrot.slane %v9759_v58, 2  ;;  %v1365_v63 = vrot.slane %v9759_v58, 1 }
 0x120   : > { %v1575_v0 = vsel %vm1572_vm5, %v1573_v60, %v1574_v61  ;;  %v1366_v1 = vsel %vm1363_vm6, %v1364_v62, %v1365_v63  ;;  %8965 = vmatmul.msk.f32.gmra.mxu0 %vm679_vm3, %v792_v59  ;;  %v805_v60 = vld [vmem:[#allocation2 + $0xf0] sm:$0xff] }
 0x121   : > { %1653 = vrot.lane.b32.xlu2 %v1575_v0, %s9366_s17  ;;  %1444 = vrot.lane.b32.xlu0 %v1366_v1, %s9367_s14 }
 0x125   : > { %v1091_v2 = vpop.f32.mrf.mxu0 }
 0x126   : > { %v1367_v4 = vrot.slane %v1091_v2, 1  ;;  %v1576_v6 = vrot.slane %v1091_v2, 2 }
 0x128   : > { %v1368_v5 = vsel %vm1363_vm6, %v1365_v63, %v1367_v4  ;;  %8966 = vmatmul.msk.f32.gmra.mxu0 %vm679_vm3, %v793_v3  ;;  %v1577_v9 = vsel %vm1572_vm5, %v1574_v61, %v1576_v6 }
 0x129   : > { %1446 = vrot.lane.b32.xlu0 %v1368_v5, %s9367_s14 }
 0x12d   : > { %v1094_v7 = vpop.f32.mrf.mxu0 }
 0x130   : > { %8967 = vmatmul.msk.f32.gmra.mxu0 %vm679_vm3, %v794_v8 }
 0x131   : > { %1655 = vrot.lane.b32.xlu0 %v1577_v9, %s9366_s17  ;;  %v806_v9 = vld [vmem:[#allocation2 + $0xf8] sm:$0xff] }
 0x135   : > { %v9776_v10 = vpop.f32.mrf.mxu0 }
 0x136   : > { %1783 = vrot.lane.b32.xlu1 %v9776_v10, %s14613_s19  ;;  %v1369_v14 = vrot.slane %v9776_v10, 1  ;;  %v1578_v18 = vrot.slane %v9776_v10, 2 }
 0x138   : > { %8968 = vmatmul.msk.f32.gmra.mxu0 %vm679_vm3, %v795_v11 }
 0x13d   : > { %v9781_v12 = vpop.f32.mrf.mxu0 }
 0x13e   : > { %1785 = vrot.lane.b32.xlu2 %v9781_v12, %s14613_s19  ;;  %v1370_v15 = vrot.slane %v9781_v12, 1  ;;  %v1579_v17 = vrot.slane %v9781_v12, 2 }
 0x140   : > { %v1371_v16 = vsel %vm1363_vm6, %v1369_v14, %v1370_v15  ;;  %8969 = vmatmul.msk.f32.gmra.mxu0 %vm679_vm3, %v796_v13  ;;  %v1580_v20 = vsel %vm1572_vm5, %v1578_v18, %v1579_v17 }
 0x141   : > { %1917 = vrot.lane.b32.xlu0 %v1371_v16, %s14601_s23  ;;  %1448 = vrot.lane.b32.xlu1 %v1371_v16, %s9367_s14  ;;  %v807_v16 = vld [vmem:[#allocation2 + $0x100] sm:$0xff] }
 0x145   : > { %v1102_v19 = vpop.f32.mrf.mxu0 }
 0x146   : > { %v1581_v22 = vrot.slane %v1102_v19, 2  ;;  %2050 = vrot.lane.b32.xlu2 %v1580_v20, %s14599_s24  ;;  %v1372_v24 = vrot.slane %v1102_v19, 1 }
 0x148   : > { %v1582_v23 = vsel %vm1572_vm5, %v1579_v17, %v1581_v22  ;;  %8970 = vmatmul.msk.f32.gmra.mxu0 %vm679_vm3, %v797_v21  ;;  %v1373_v26 = vsel %vm1363_vm6, %v1370_v15, %v1372_v24 }
 0x149   : > { %1657 = vrot.lane.b32.xlu1 %v1580_v20, %s9366_s17  ;;  %2052 = vrot.lane.b32.xlu0 %v1582_v23, %s14599_s24 }
 0x14d   : > { %v1105_v25 = vpop.f32.mrf.mxu0 }
 0x14e   : > { %1659 = vrot.lane.b32.xlu2 %v1582_v23, %s9366_s17 }
 0x150   : > { %8971 = vmatmul.msk.f32.gmra.mxu0 %vm679_vm3, %v798_v27  ;;  %v808_v27 = vld [vmem:[#allocation2 + $0x108] sm:$0xff] }
 0x151   : > { %1450 = vrot.lane.b32.xlu1 %v1373_v26, %s9367_s14 }
 0x155   : > { %v9803_v28 = vpop.f32.mrf.mxu0 }
 0x156   : > { %14617 = vst [vmem:[#allocation5_spill] sm:$0xff] %v9803_v28  ;;  %1787 = vrot.lane.b32.xlu0 %v9803_v28, %s14613_s19  ;;  %v1583_v31 = vrot.slane %v9803_v28, 2  ;;  %v1374_v36 = vrot.slane %v9803_v28, 1 }
 0x158   : > { %8972 = vmatmul.msk.f32.gmra.mxu0 %vm679_vm3, %v799_v29 }
 0x159   : > { %1919 = vrot.lane.b32.xlu1 %v1373_v26, %s14601_s23 }
 0x15d   : > { %v9809_v30 = vpop.f32.mrf.mxu0 }
 0x15e   : > { %14618 = vst [vmem:[#allocation6_spill] sm:$0xff] %v9809_v30  ;;  %2182 = vrot.lane.b32.xlu2 %v9809_v30, %s14594_s15  ;;  %v1584_v32 = vrot.slane %v9809_v30, 2  ;;  %v1375_v34 = vrot.slane %v9809_v30, 1 }
 0x160   : > { %v1585_v33 = vsel %vm1572_vm5, %v1583_v31, %v1584_v32  ;;  %8973 = vmatmul.msk.f32.gmra.mxu0 %vm679_vm3, %v800_v35  ;;  %v1376_v38 = vsel %vm1363_vm6, %v1374_v36, %v1375_v34 }
 0x161   : > { %2180 = vrot.lane.b32.xlu1 %v9803_v28, %s14594_s15  ;;  %1661 = vrot.lane.b32.xlu0 %v1585_v33, %s9366_s17  ;;  %v841_v28 = vld [vmem:[#allocation2 + $0x210] sm:$0xff] }
 0x165   : > { %v1113_v37 = vpop.f32.mrf.mxu0 }
 0x166   : > { %1452 = vrot.lane.b32.xlu2 %v1376_v38, %s9367_s14  ;;  %v1377_v40 = vrot.slane %v1113_v37, 1  ;;  %v1586_v43 = vrot.slane %v1113_v37, 2 }
 0x168   : > { %8974 = vmatmul.msk.f32.gmra.mxu0 %vm679_vm3, %v801_v39  ;;  %v1378_v42 = vsel %vm1363_vm6, %v1375_v34, %v1377_v40  ;;  %v1587_v45 = vsel %vm1572_vm5, %v1584_v32, %v1586_v43 }
 0x169   : > { %1789 = vrot.lane.b32.xlu1 %v9809_v30, %s14613_s19  ;;  %2314 = vrot.lane.b32.xlu0 %v1376_v38, %s14591_s16 }
 0x16d   : > { %v1116_v41 = vpop.f32.mrf.mxu0 }
 0x16e   : > { %1921 = vrot.lane.b32.xlu2 %v1376_v38, %s14601_s23 }
 0x170   : > { %8975 = vmatmul.msk.f32.gmra.mxu0 %vm679_vm3, %v802_v46 }
 0x171   : > { %2054 = vrot.lane.b32.xlu1 %v1585_v33, %s14599_s24  ;;  %1923 = vrot.lane.b32.xlu0 %v1378_v42, %s14601_s23 }
 0x175   : > { %v9832_v44 = vpop.f32.mrf.mxu0 }
 0x176   : > { %14619 = vst [vmem:[#allocation7_spill] sm:$0xff] %v9832_v44  ;;  %2447 = vrot.lane.b32.xlu2 %v1585_v33, %s14587_s18  ;;  %v1379_v51 = vrot.slane %v9832_v44, 1  ;;  %v1588_v55 = vrot.slane %v9832_v44, 2  ;;  %v809_v33 = vld [vmem:[#allocation2 + $0x110] sm:$0xff] }
 0x178   : > { %8976 = vmatmul.msk.f32.gmra.mxu0 %vm679_vm3, %v803_v48  ;;  %v810_v48 = vld [vmem:[#allocation2 + $0x118] sm:$0xff] }
 0x179   : > { %1663 = vrot.lane.b32.xlu1 %v1587_v45, %s9366_s17  ;;  %2449 = vrot.lane.b32.xlu0 %v1587_v45, %s14587_s18 }
 0x17b   : > { %v9861_v59 = vpop.permute.xlu2 %1653 }
 0x17d   : > { %v9838_v47 = vpop.f32.mrf.mxu0 }
 0x17e   : > { %14620 = vst [vmem:[#allocation8_spill] sm:$0xff] %v9838_v47  ;;  %1454 = vrot.lane.b32.xlu2 %v1378_v42, %s9367_s14  ;;  %v1380_v52 = vrot.slane %v9838_v47, 1  ;;  %v1589_v57 = vrot.slane %v9838_v47, 2 }
 0x180   : > { %8977 = vmatmul.msk.f32.gmra.mxu0 %vm679_vm3, %v804_v50  ;;  %v1381_v54 = vsel %vm1363_vm6, %v1379_v51, %v1380_v52  ;;  %v1590_v61 = vsel %vm1572_vm5, %v1588_v55, %v1589_v57 }
 0x181   : > { %2316 = vrot.lane.b32.xlu1 %v1378_v42, %s14591_s16  ;;  %2184 = vrot.lane.b32.xlu0 %v9832_v44, %s14594_s15 }
 0x185   : > { %v1124_v49 = vpop.f32.mrf.mxu0 }
 0x186   : > { %2056 = vrot.lane.b32.xlu2 %v1587_v45, %s14599_s24  ;;  %v1382_v63 = vrot.slane %v1124_v49, 1  ;;  %v1591_v0 = vrot.slane %v1124_v49, 2 }
 0x188   : > { %8978 = vmatmul.msk.f32.gmra.mxu0 %vm679_vm3, %v805_v60  ;;  %v1592_v4 = vsel %vm1572_vm5, %v1589_v57, %v1591_v0  ;;  %v1383_v5 = vsel %vm1363_vm6, %v1380_v52, %v1382_v63  ;;  %v811_v52 = vld [vmem:[#allocation2 + $0x120] sm:$0xff]  ;;  %v812_v0 = vld [vmem:[#allocation2 + $0x128] sm:$0xff] }
 0x189   : > { %2186 = vrot.lane.b32.xlu1 %v9838_v47, %s14594_s15  ;;  %1793 = vrot.lane.b32.xlu0 %v9838_v47, %s14613_s19 }
 0x18d   : > { %v1127_v53 = vpop.f32.mrf.mxu0 }
 0x18e   : > { %1791 = vrot.lane.b32.xlu2 %v9832_v44, %s14613_s19 }
 0x190   : > { %8979 = vmatmul.msk.f32.gmra.mxu0 %vm679_vm3, %v806_v9 }
 0x191   : > { %1925 = vrot.lane.b32.xlu1 %v1381_v54, %s14601_s23  ;;  %1456 = vrot.lane.b32.xlu0 %v1381_v54, %s9367_s14 }
 0x193   : > { %v9872_v2 = vpop.permute.xlu0 %1444 }
 0x195   : > { %v9864_v62 = vpop.f32.mrf.mxu0 }
 0x196   : > { %14621 = vst [vmem:[#allocation9_spill] sm:$0xff] %v9864_v62  ;;  %1665 = vrot.lane.b32.xlu2 %v1590_v61, %s9366_s17  ;;  %v1593_v18 = vrot.slane %v9864_v62, 2  ;;  %v1384_v20 = vrot.slane %v9864_v62, 1 }
 0x198   : > { %v9870_v1 = vpop.permute.xlu2 %1785  ;;  %8980 = vmatmul.msk.f32.gmra.mxu0 %vm679_vm3, %v807_v16 }
 0x199   : > { %2451 = vrot.lane.b32.xlu1 %v1590_v61, %s14587_s18  ;;  %2058 = vrot.lane.b32.xlu0 %v1590_v61, %s14599_s24 }
 0x19b   : > { %v9884_v8 = vpop.permute.xlu0 %1446 }
 0x19d   : > { %v9874_v3 = vpop.f32.mrf.mxu0 }
 0x19e   : > { %14622 = vst [vmem:[#allocation10_spill] sm:$0xff] %v9874_v3  ;;  %2318 = vrot.lane.b32.xlu2 %v1381_v54, %s14591_s16  ;;  %v1594_v19 = vrot.slane %v9874_v3, 2  ;;  %v1385_v21 = vrot.slane %v9874_v3, 1 }
 0x1a0   : > { %v9881_v7 = vpop.permute.xlu2 %2050  ;;  %v1595_v24 = vsel %vm1572_vm5, %v1593_v18, %v1594_v19  ;;  %v1386_v25 = vsel %vm1363_vm6, %v1384_v20, %v1385_v21  ;;  %8981 = vmatmul.msk.f32.gmra.mxu0 %vm679_vm3, %v808_v27 }
 0x1a1   : > { %1667 = vrot.lane.b32.xlu0 %v1592_v4, %s9366_s17  ;;  %1458 = vrot.lane.b32.xlu1 %v1383_v5, %s9367_s14 }
 0x1a3   : > { %v9894_v15 = vpop.permute.xlu0 %1655 }
 0x1a5   : > { %v1135_v6 = vpop.f32.mrf.mxu0 }
 0x1a6   : > { %1927 = vrot.lane.b32.xlu2 %v1383_v5, %s14601_s23  ;;  %v1387_v36 = vrot.slane %v1135_v6, 1  ;;  %v1596_v42 = vrot.slane %v1135_v6, 2 }
 0x1a8   : > { %v9889_v11 = vpop.permute.xlu1 %1783  ;;  %v9892_v14 = vpop.permute.xlu2 %1659  ;;  %8982 = vmatmul.msk.f32.gmra.mxu0 %vm679_vm3, %v809_v33  ;;  %v1388_v39 = vsel %vm1363_vm6, %v1385_v21, %v1387_v36  ;;  %v1597_v46 = vsel %vm1572_vm5, %v1594_v19, %v1596_v42  ;;  %v813_v19 = vld [vmem:[#allocation2 + $0x130] sm:$0xff] }
 0x1a9   : > { %2320 = vrot.lane.b32.xlu0 %v1383_v5, %s14591_s16  ;;  %2060 = vrot.lane.b32.xlu1 %v1592_v4, %s14599_s24  ;;  %14623 = vst [vmem:[#allocation11_spill] sm:$0xff] %v9892_v14 }
 0x1ad   : > { %v1138_v13 = vpop.f32.mrf.mxu0 }
 0x1ae   : > { %2453 = vrot.lane.b32.xlu2 %v1592_v4, %s14587_s18 }
 0x1b0   : > { %8983 = vmatmul.msk.f32.gmra.mxu0 %vm679_vm3, %v810_v48 }
 0x1b1   : > { %1795 = vrot.lane.b32.xlu1 %v9864_v62, %s14613_s19  ;;  %2190 = vrot.lane.b32.xlu0 %v9874_v3, %s14594_s15 }
 0x1b3   : > { %v9901_v17 = vpop.permute.xlu1 %1448  ;;  %v9915_v26 = vpop.permute.xlu0 %1917 }
 0x1b5   : > { %v9907_v22 = vpop.f32.mrf.mxu0 }
 0x1b6   : > { %14624 = vst [vmem:[#allocation12_spill] sm:$0xff] %v9907_v22  ;;  %2188 = vrot.lane.b32.xlu2 %v9864_v62, %s14594_s15  ;;  %v1598_v55 = vrot.slane %v9907_v22, 2  ;;  %v1389_v6 = vrot.slane %v9907_v22, 1 }
 0x1b8   : > { %v9911_v23 = vpop.permute.xlu2 %2182  ;;  %8984 = vmatmul.msk.f32.gmra.mxu0 %vm679_vm3, %v811_v52 }
 0x1b9   : > { %14625 = vst [vmem:[#allocation13_spill] sm:$0xff] %v9911_v23  ;;  %1669 = vrot.lane.b32.xlu1 %v1595_v24, %s9366_s17  ;;  %1929 = vrot.lane.b32.xlu0 %v1386_v25, %s14601_s23  ;;  %v842_v23 = vld [vmem:[#allocation2 + $0x218] sm:$0xff] }
 0x1bb   : > { %v9920_v29 = vpop.permute.xlu1 %1657  ;;  %v9931_v34 = vpop.permute.xlu0 %2052 }
 0x1bd   : > { %v9922_v31 = vpop.f32.mrf.mxu0 }
 0x1be   : > { %14626 = vst [vmem:[#allocation14_spill] sm:$0xff] %v9922_v31  ;;  %1797 = vrot.lane.b32.xlu2 %v9874_v3, %s14613_s19  ;;  %v1599_v57 = vrot.slane %v9922_v31, 2  ;;  %v1390_v9 = vrot.slane %v9922_v31, 1 }
 0x1c0   : > { %v9926_v32 = vpop.permute.xlu2 %1452  ;;  %v1600_v63 = vsel %vm1572_vm5, %v1598_v55, %v1599_v57  ;;  %8985 = vmatmul.msk.f32.gmra.mxu0 %vm679_vm3, %v812_v0  ;;  %v1391_v16 = vsel %vm1363_vm6, %v1389_v6, %v1390_v9  ;;  %v814_v0 = vld [vmem:[#allocation2 + $0x138] sm:$0xff]  ;;  %v815_v6 = vld [vmem:[#allocation2 + $0x140] sm:$0xff] }
 0x1c1   : > { %14627 = vst [vmem:[#allocation15_spill] sm:$0xff] %v9926_v32  ;;  %2322 = vrot.lane.b32.xlu1 %v1386_v25, %s14591_s16  ;;  %2455 = vrot.lane.b32.xlu0 %v1595_v24, %s14587_s18 }
 0x1c3   : > { %v9933_v35 = vpop.permute.xlu1 %1450 }
 0x1c5   : > { %v9936_v37 = vpop.f32.mrf.mxu0 }
 0x1c6   : > { %1460 = vrot.lane.b32.xlu2 %v1386_v25, %s9367_s14  ;;  %v1601_v42 = vrot.slane %v9936_v37, 2 }
 0x1c8   : > { %v9938_v38 = vpop.permute.xlu2 %1921  ;;  %v9943_v40 = vpop.permute.xlu0 %1787  ;;  %8986 = vmatmul.msk.f32.gmra.mxu0 %vm679_vm3, %v813_v19 }
 0x1c9   : > { %1931 = vrot.lane.b32.xlu1 %v1388_v39, %s14601_s23  ;;  %1462 = vrot.lane.b32.xlu0 %v1388_v39, %s9367_s14 }
 0x1cb   : > { %v9945_v41 = vpop.permute.xlu1 %1919 }
 0x1cd   : > { %v1149_v43 = vpop.f32.mrf.mxu0 }
 0x1ce   : > { %2062 = vrot.lane.b32.xlu2 %v1595_v24, %s14599_s24  ;;  %v1392_v24 = vrot.slane %v9936_v37, 1 }
 0x1d0   : > { %v9948_v45 = vpop.permute.xlu2 %2447  ;;  %v1393_v27 = vsel %vm1363_vm6, %v1390_v9, %v1392_v24  ;;  %8987 = vmatmul.msk.f32.gmra.mxu0 %vm679_vm3, %v814_v0 }
 0x1d1   : > { %14628 = vst [vmem:[#allocation16_spill] sm:$0xff] %v9948_v45  ;;  %2457 = vrot.lane.b32.xlu1 %v1597_v46, %s14587_s18  ;;  %2064 = vrot.lane.b32.xlu0 %v1597_v46, %s14599_s24 }
 0x1d3   : > { %v9953_v49 = vpop.permute.xlu1 %2180  ;;  %v9955_v50 = vpop.permute.xlu0 %1661 }
 0x1d4   : > { %14629 = vst [vmem:[#allocation17_spill] sm:$0xff] %v9955_v50  ;;  %v838_v50 = vld [vmem:[#allocation2 + $0x1f8] sm:$0xff] }
 0x1d5   : > { %v9973_v60 = vpop.f32.mrf.mxu0 }
 0x1d6   : > { %1671 = vrot.lane.b32.xlu2 %v1597_v46, %s9366_s17  ;;  %14632 = vst [vmem:[#allocation20_spill] sm:$0xff] %v9973_v60  ;;  %v1602_v46 = vsel %vm1572_vm5, %v1599_v57, %v1601_v42 }
 0x1d8   : > { %v9959_v51 = vpop.permute.xlu2 %1454  ;;  %8988 = vmatmul.msk.f32.gmra.mxu0 %vm679_vm3, %v815_v6  ;;  %v1603_v6 = vrot.slane %v9973_v60, 2 }
 0x1d9   : > { %14630 = vst [vmem:[#allocation18_spill] sm:$0xff] %v9959_v51  ;;  %2192 = vrot.lane.b32.xlu1 %v9907_v22, %s14594_s15  ;;  %1799 = vrot.lane.b32.xlu0 %v9907_v22, %s14613_s19 }
 0x1db   : > { %v9965_v53 = vpop.permute.xlu1 %1789  ;;  %v9967_v54 = vpop.permute.xlu0 %2314 }
 0x1dc   : > { %14631 = vst [vmem:[#allocation19_spill] sm:$0xff] %v9965_v53 }
 0x1dd   : > { %v9993_v18 = vpop.f32.mrf.mxu0 }
 0x1de   : > { %2324 = vrot.lane.b32.xlu2 %v1388_v39, %s14591_s16  ;;  %14637 = vst [vmem:[#allocation25_spill] sm:$0xff] %v9993_v18  ;;  %v1395_v42 = vrot.slane %v9993_v18, 1  ;;  %v1604_v22 = vrot.slane %v9993_v18, 2 }
 0x1e0   : > { %v9975_v61 = vpop.permute.xlu2 %2056  ;;  %v1605_v62 = vsel %vm1572_vm5, %v1603_v6, %v1604_v22 }
 0x1e1   : > { %14633 = vst [vmem:[#allocation21_spill] sm:$0xff] %v9975_v61  ;;  %1801 = vrot.lane.b32.xlu1 %v9922_v31, %s14613_s19  ;;  %1673 = vrot.lane.b32.xlu0 %v1600_v63, %s9366_s17 }
 0x1e3   : > { %v9981_v4 = vpop.permute.xlu1 %2054  ;;  %v9983_v5 = vpop.permute.xlu0 %1923 }
 0x1e4   : > { %14634 = vst [vmem:[#allocation22_spill] sm:$0xff] %v9981_v4 }
 0x1e5   : > { %14635 = vst [vmem:[#allocation23_spill] sm:$0xff] %v9983_v5  ;;  %v1157_v33 = vpop.f32.mrf.mxu0 }
 0x1e6   : > { %2194 = vrot.lane.b32.xlu2 %v9922_v31, %s14594_s15 }
 0x1e8   : > { %v9990_v13 = vpop.permute.xlu2 %1791 }
 0x1e9   : > { %14636 = vst [vmem:[#allocation24_spill] sm:$0xff] %v9990_v13  ;;  %2326 = vrot.lane.b32.xlu0 %v1391_v16, %s14591_s16  ;;  %1464 = vrot.lane.b32.xlu1 %v1391_v16, %s9367_s14 }
 0x1eb   : > { %v9997_v20 = vpop.permute.xlu1 %1663  ;;  %v9999_v21 = vpop.permute.xlu0 %2449 }
 0x1ec   : > { %14638 = vst [vmem:[#allocation26_spill] sm:$0xff] %v9997_v20 }
 0x1ed   : > { %14639 = vst [vmem:[#allocation27_spill] sm:$0xff] %v9999_v21  ;;  %v1160_v48 = vpop.f32.mrf.mxu0 }
 0x1ee   : > { %1933 = vrot.lane.b32.xlu2 %v1391_v16, %s14601_s23  ;;  %v816_v48 = vld [vmem:[#allocation2 + $0x148] sm:$0xff] }
 0x1ef   : > { %8989 = vmatmul.msk.f32.gmra.mxu0 %vm679_vm3, %v816_v48  ;;  %v817_v48 = vld [vmem:[#allocation2 + $0x150] sm:$0xff] }
 0x1f0   : > { %v10004_v25 = vpop.permute.xlu2 %1665 }
 0x1f1   : > { %14640 = vst [vmem:[#allocation28_spill] sm:$0xff] %v10004_v25  ;;  %2066 = vrot.lane.b32.xlu1 %v1600_v63, %s14599_s24  ;;  %1935 = vrot.lane.b32.xlu0 %v1393_v27, %s14601_s23 }
 0x1f3   : > { %v10009_v36 = vpop.permute.xlu1 %2316  ;;  %v10011_v39 = vpop.permute.xlu0 %2184 }
 0x1f4   : > { %14641 = vst [vmem:[#allocation29_spill] sm:$0xff] %v10009_v36 }
 0x1f5   : > { %14642 = vst [vmem:[#allocation30_spill] sm:$0xff] %v10011_v39  ;;  %v10043_v16 = vpop.f32.mrf.mxu0 }
 0x1f6   : > { %2459 = vrot.lane.b32.xlu2 %v1600_v63, %s14587_s18  ;;  %14650 = vst [vmem:[#allocation38_spill] sm:$0xff] %v10043_v16 }
 0x1f7   : > { %8990 = vmatmul.msk.f32.gmra.mxu0 %vm679_vm3, %v817_v48 }
 0x1f8   : > { %v10015_v43 = vpop.permute.xlu2 %2318 }
 0x1f9   : > { %14643 = vst [vmem:[#allocation31_spill] sm:$0xff] %v10015_v43  ;;  %1675 = vrot.lane.b32.xlu1 %v1602_v46, %s9366_s17  ;;  %2461 = vrot.lane.b32.xlu0 %v1602_v46, %s14587_s18 }
 0x1fb   : > { %v10020_v52 = vpop.permute.xlu1 %2186  ;;  %v10022_v55 = vpop.permute.xlu0 %1793 }
 0x1fc   : > { %14644 = vst [vmem:[#allocation32_spill] sm:$0xff] %v10020_v52 }
 0x1fd   : > { %14645 = vst [vmem:[#allocation33_spill] sm:$0xff] %v10022_v55 }
 0x1fe   : > { %1466 = vrot.lane.b32.xlu2 %v1393_v27, %s9367_s14 }
 0x200   : > { %v10026_v37 = vpop.permute.xlu2 %1927 }
 0x201   : > { %14646 = vst [vmem:[#allocation34_spill] sm:$0xff] %v10026_v37  ;;  %2328 = vrot.lane.b32.xlu1 %v1393_v27, %s14591_s16  ;;  %2196 = vrot.lane.b32.xlu0 %v9973_v60, %s14594_s15  ;;  %v1394_v27 = vrot.slane %v9973_v60, 1 }
 0x203   : > { %v10031_v57 = vpop.permute.xlu1 %1925  ;;  %v10033_v63 = vpop.permute.xlu0 %1456  ;;  %v1396_v0 = vsel %vm1363_vm6, %v1394_v27, %v1395_v42 }
 0x204   : > { %14647 = vst [vmem:[#allocation35_spill] sm:$0xff] %v10031_v57 }
 0x205   : > { %14648 = vst [vmem:[#allocation36_spill] sm:$0xff] %v10033_v63 }
 0x206   : > { %2068 = vrot.lane.b32.xlu2 %v1602_v46, %s14599_s24 }
 0x208   : > { %v10037_v9 = vpop.permute.xlu2 %2453 }
 0x209   : > { %14649 = vst [vmem:[#allocation37_spill] sm:$0xff] %v10037_v9  ;;  %2198 = vrot.lane.b32.xlu1 %v9993_v18, %s14594_s15  ;;  %1805 = vrot.lane.b32.xlu0 %v9993_v18, %s14613_s19  ;;  %v10066_v9 = vpop.f32.mrf.mxu0 }
 0x20a   : > { %14656 = vst [vmem:[#allocation44_spill] sm:$0xff] %v10066_v9 }
 0x20b   : > { %v10045_v19 = vpop.permute.xlu1 %2451  ;;  %v10047_v24 = vpop.permute.xlu0 %2058 }
 0x20c   : > { %14651 = vst [vmem:[#allocation39_spill] sm:$0xff] %v10045_v19 }
 0x20d   : > { %14652 = vst [vmem:[#allocation40_spill] sm:$0xff] %v10047_v24 }
 0x20e   : > { %1803 = vrot.lane.b32.xlu2 %v9973_v60, %s14613_s19 }
 0x210   : > { %v10054_v46 = vpop.permute.xlu2 %2188 }
 0x211   : > { %14653 = vst [vmem:[#allocation41_spill] sm:$0xff] %v10054_v46  ;;  %1937 = vrot.lane.b32.xlu1 %v1396_v0, %s14601_s23  ;;  %1468 = vrot.lane.b32.xlu0 %v1396_v0, %s9367_s14  ;;  %v1606_v46 = vrot.slane %v1157_v33, 2  ;;  %v10079_v6 = vpop.f32.mrf.mxu0 }
 0x213   : > { %v10061_v31 = vpop.permute.xlu0 %1667  ;;  %v10063_v3 = vpop.permute.xlu1 %1458  ;;  %v1607_v48 = vsel %vm1572_vm5, %v1604_v22, %v1606_v46  ;;  %v818_v22 = vld [vmem:[#allocation2 + $0x158] sm:$0xff] }
 0x214   : > { %14654 = vst [vmem:[#allocation42_spill] sm:$0xff] %v10061_v31  ;;  %v1397_v31 = vrot.slane %v1157_v33, 1  ;;  %8991 = vmatmul.msk.f32.gmra.mxu0 %vm679_vm3, %v818_v22 }
 0x215   : > { %14655 = vst [vmem:[#allocation43_spill] sm:$0xff] %v10063_v3 }
 0x216   : > { %1677 = vrot.lane.b32.xlu2 %v1605_v62, %s9366_s17 }
 0x218   : > { %v10070_v27 = vpop.permute.xlu2 %1797 }
 0x219   : > { %14657 = vst [vmem:[#allocation45_spill] sm:$0xff] %v10070_v27  ;;  %2463 = vrot.lane.b32.xlu1 %v1605_v62, %s14587_s18  ;;  %2070 = vrot.lane.b32.xlu0 %v1605_v62, %s14599_s24  ;;  %v1398_v27 = vsel %vm1363_vm6, %v1395_v42, %v1397_v31  ;;  %v1171_v33 = vpop.f32.mrf.mxu0 }
 0x21b   : > { %v10074_v18 = vpop.permute.xlu0 %2320  ;;  %v10076_v60 = vpop.permute.xlu1 %2060 }
 0x21c   : > { %14658 = vst [vmem:[#allocation46_spill] sm:$0xff] %v10074_v18 }
 0x21d   : > { %14659 = vst [vmem:[#allocation47_spill] sm:$0xff] %v10076_v60 }
 0x21e   : > { %2330 = vrot.lane.b32.xlu2 %v1396_v0, %s14591_s16 }
 0x220   : > { %v10081_v24 = vpop.permute.xlu2 %1460 }
 0x221   : > { %14660 = vst [vmem:[#allocation48_spill] sm:$0xff] %v10081_v24  ;;  %1679 = vrot.lane.b32.xlu0 %v1607_v48, %s9366_s17  ;;  %1470 = vrot.lane.b32.xlu1 %v1398_v27, %s9367_s14 }
 0x223   : > { %v10087_v62 = vpop.permute.xlu1 %1795  ;;  %v10089_v37 = vpop.permute.xlu0 %2190 }
 0x224   : > { %14661 = vst [vmem:[#allocation49_spill] sm:$0xff] %v10087_v62 }
 0x225   : > { %14662 = vst [vmem:[#allocation50_spill] sm:$0xff] %v10089_v37  ;;  %v10117_v37 = vpop.f32.mrf.mxu0 }
 0x226   : > { %1939 = vrot.lane.b32.xlu2 %v1398_v27, %s14601_s23 }
 0x228   : > { %v10092_v0 = vpop.permute.xlu2 %2062 }
 0x229   : > { %14663 = vst [vmem:[#allocation51_spill] sm:$0xff] %v10092_v0  ;;  %2332 = vrot.lane.b32.xlu0 %v1398_v27, %s14591_s16  ;;  %2072 = vrot.lane.b32.xlu1 %v1607_v48, %s14599_s24  ;;  %v819_v27 = vld [vmem:[#allocation2 + $0x160] sm:$0xff]  ;;  %v1608_v0 = vrot.slane %v10043_v16, 2 }
 0x22a   : > { %8992 = vmatmul.msk.f32.gmra.mxu0 %vm679_vm3, %v819_v27 }
 0x22b   : > { %v10097_v31 = vpop.permute.xlu1 %1669  ;;  %v10099_v42 = vpop.permute.xlu0 %1929 }
 0x22c   : > { %14664 = vst [vmem:[#allocation52_spill] sm:$0xff] %v10097_v31  ;;  %v1609_v31 = vrot.slane %v10066_v9, 2 }
 0x22d   : > { %14665 = vst [vmem:[#allocation53_spill] sm:$0xff] %v10099_v42 }
 0x22e   : > { %2465 = vrot.lane.b32.xlu2 %v1607_v48, %s14587_s18  ;;  %v1399_v48 = vrot.slane %v10043_v16, 1  ;;  %v1610_v27 = vsel %vm1572_vm5, %v1608_v0, %v1609_v31  ;;  %v821_v0 = vld [vmem:[#allocation2 + $0x170] sm:$0xff] }
 0x230   : > { %v10102_v46 = vpop.permute.xlu2 %1671 }
 0x231   : > { %14666 = vst [vmem:[#allocation54_spill] sm:$0xff] %v10102_v46  ;;  %1807 = vrot.lane.b32.xlu1 %v10043_v16, %s14613_s19  ;;  %2202 = vrot.lane.b32.xlu0 %v10066_v9, %s14594_s15  ;;  %v1400_v46 = vrot.slane %v10066_v9, 1 }
 0x233   : > { %v10109_v33 = vpop.permute.xlu1 %2322  ;;  %v10111_v22 = vpop.permute.xlu0 %2455 }
 0x234   : > { %14667 = vst [vmem:[#allocation55_spill] sm:$0xff] %v10109_v33  ;;  %v1401_v33 = vsel %vm1363_vm6, %v1399_v48, %v1400_v46 }
 0x235   : > { %14668 = vst [vmem:[#allocation56_spill] sm:$0xff] %v10111_v22  ;;  %v820_v22 = vld [vmem:[#allocation2 + $0x168] sm:$0xff] }
 0x236   : > { %2200 = vrot.lane.b32.xlu2 %v10043_v16, %s14594_s15  ;;  %8993 = vmatmul.msk.f32.gmra.mxu0 %vm679_vm3, %v820_v22  ;;  %v10134_v16 = vpop.f32.mrf.mxu0 }
 0x238   : > { %v10121_v24 = vpop.permute.xlu2 %2324 }
 0x239   : > { %14669 = vst [vmem:[#allocation57_spill] sm:$0xff] %v10121_v24  ;;  %1681 = vrot.lane.b32.xlu1 %v1610_v27, %s9366_s17  ;;  %1941 = vrot.lane.b32.xlu0 %v1401_v33, %s14601_s23 }
 0x23b   : > { %v10128_v42 = vpop.permute.xlu1 %1931  ;;  %v10130_v60 = vpop.permute.xlu0 %1462 }
 0x23c   : > { %14670 = vst [vmem:[#allocation58_spill] sm:$0xff] %v10128_v42  ;;  %v1402_v42 = vrot.slane %v10079_v6, 1 }
 0x23d   : > { %14671 = vst [vmem:[#allocation59_spill] sm:$0xff] %v10130_v60 }
 0x23e   : > { %1809 = vrot.lane.b32.xlu2 %v10066_v9, %s14613_s19  ;;  %8994 = vmatmul.msk.f32.gmra.mxu0 %vm679_vm3, %v821_v0  ;;  %v1403_v60 = vsel %vm1363_vm6, %v1400_v46, %v1402_v42  ;;  %v822_v42 = vld [vmem:[#allocation2 + $0x178] sm:$0xff] }
 0x240   : > { %v10136_v24 = vpop.permute.xlu2 %2194 }
 0x241   : > { %14672 = vst [vmem:[#allocation60_spill] sm:$0xff] %v10136_v24  ;;  %2334 = vrot.lane.b32.xlu1 %v1401_v33, %s14591_s16  ;;  %2467 = vrot.lane.b32.xlu0 %v1610_v27, %s14587_s18  ;;  %v1179_v24 = vpop.f32.mrf.mxu0 }
 0x243   : > { %v10141_v48 = vpop.permute.xlu1 %2457  ;;  %v10143_v22 = vpop.permute.xlu0 %2064 }
 0x244   : > { %14673 = vst [vmem:[#allocation61_spill] sm:$0xff] %v10141_v48  ;;  %v1611_v48 = vrot.slane %v10079_v6, 2 }
 0x245   : > { %14674 = vst [vmem:[#allocation62_spill] sm:$0xff] %v10143_v22 }
 0x246   : > { %1472 = vrot.lane.b32.xlu2 %v1401_v33, %s9367_s14  ;;  %v1612_v33 = vsel %vm1572_vm5, %v1609_v31, %v1611_v48  ;;  %8995 = vmatmul.msk.f32.gmra.mxu0 %vm679_vm3, %v822_v42  ;;  %v1613_v48 = vrot.slane %v10117_v37, 2  ;;  %v1614_v42 = vrot.slane %v10134_v16, 2 }
 0x248   : > { %v10147_v9 = vpop.permute.xlu2 %1933 }
 0x249   : > { %14675 = vst [vmem:[#allocation63_spill] sm:$0xff] %v10147_v9  ;;  %1943 = vrot.lane.b32.xlu1 %v1403_v60, %s14601_s23  ;;  %1474 = vrot.lane.b32.xlu0 %v1403_v60, %s9367_s14  ;;  %v1182_v9 = vpop.f32.mrf.mxu0 }
 0x24a   : > { %v823_v9 = vld [vmem:[#allocation2 + $0x180] sm:$0xff] }
 0x24b   : > { %v10152_v62 = vpop.permute.xlu1 %2192  ;;  %v10154_v0 = vpop.permute.xlu0 %1799 }
 0x24c   : > { %14676 = vst [vmem:[#allocation64_spill] sm:$0xff] %v10152_v62  ;;  %v1407_v62 = vrot.slane %v1179_v24, 1 }
 0x24d   : > { %14677 = vst [vmem:[#allocation65_spill] sm:$0xff] %v10154_v0 }
 0x24e   : > { %2074 = vrot.lane.b32.xlu2 %v1610_v27, %s14599_s24  ;;  %8996 = vmatmul.msk.f32.gmra.mxu0 %vm679_vm3, %v823_v9 }
 0x250   : > { %v10158_v22 = vpop.permute.xlu2 %2459 }
 0x251   : > { %14678 = vst [vmem:[#allocation66_spill] sm:$0xff] %v10158_v22  ;;  %2469 = vrot.lane.b32.xlu1 %v1612_v33, %s14587_s18  ;;  %2076 = vrot.lane.b32.xlu0 %v1612_v33, %s14599_s24  ;;  %v1615_v22 = vsel %vm1572_vm5, %v1613_v48, %v1614_v42 }
 0x253   : > { %v10163_v46 = vpop.permute.xlu1 %1801  ;;  %v10165_v18 = vpop.permute.xlu0 %1673 }
 0x254   : > { %14679 = vst [vmem:[#allocation67_spill] sm:$0xff] %v10163_v46  ;;  %v1405_v46 = vrot.slane %v10134_v16, 1 }
 0x255   : > { %14680 = vst [vmem:[#allocation68_spill] sm:$0xff] %v10165_v18 }
 0x256   : > { %1683 = vrot.lane.b32.xlu2 %v1612_v33, %s9366_s17  ;;  %v10183_v33 = vpop.f32.mrf.mxu0 }
 0x258   : > { %v10169_v6 = vpop.permute.xlu2 %1466 }
 0x259   : > { %14681 = vst [vmem:[#allocation69_spill] sm:$0xff] %v10169_v6  ;;  %2204 = vrot.lane.b32.xlu1 %v10117_v37, %s14594_s15  ;;  %1811 = vrot.lane.b32.xlu0 %v10117_v37, %s14613_s19 }
 0x25b   : > { %v10175_v31 = vpop.permute.xlu0 %2326  ;;  %v10177_v27 = vpop.permute.xlu1 %1464 }
 0x25c   : > { %14682 = vst [vmem:[#allocation70_spill] sm:$0xff] %v10175_v31 }
 0x25d   : > { %14683 = vst [vmem:[#allocation71_spill] sm:$0xff] %v10177_v27  ;;  %v824_v27 = vld [vmem:[#allocation2 + $0x188] sm:$0xff] }
 0x25e   : > { %2336 = vrot.lane.b32.xlu2 %v1403_v60, %s14591_s16  ;;  %8997 = vmatmul.msk.f32.gmra.mxu0 %vm679_vm3, %v824_v27  ;;  %v1404_v60 = vrot.slane %v10117_v37, 1  ;;  %v10203_v31 = vpop.f32.mrf.mxu0 }
 0x260   : > { %v10185_v18 = vpop.permute.xlu2 %2068 }
 0x261   : > { %14684 = vst [vmem:[#allocation72_spill] sm:$0xff] %v10185_v18  ;;  %1813 = vrot.lane.b32.xlu1 %v10134_v16, %s14613_s19  ;;  %1685 = vrot.lane.b32.xlu0 %v1615_v22, %s9366_s17  ;;  %v1406_v18 = vsel %vm1363_vm6, %v1404_v60, %v1405_v46  ;;  %v1408_v60 = vsel %vm1363_vm6, %v1405_v46, %v1407_v62 }
 0x263   : > { %v10191_v6 = vpop.permute.xlu1 %2066  ;;  %v10193_v9 = vpop.permute.xlu0 %1935 }
 0x264   : > { %14685 = vst [vmem:[#allocation73_spill] sm:$0xff] %v10191_v6 }
 0x265   : > { %14686 = vst [vmem:[#allocation74_spill] sm:$0xff] %v10193_v9  ;;  %v825_v9 = vld [vmem:[#allocation2 + $0x190] sm:$0xff] }
 0x266   : > { %2206 = vrot.lane.b32.xlu2 %v10134_v16, %s14594_s15  ;;  %8998 = vmatmul.msk.f32.gmra.mxu0 %vm679_vm3, %v825_v9 }
 0x268   : > { %v10200_v48 = vpop.permute.xlu2 %1803 }
 0x269   : > { %14687 = vst [vmem:[#allocation75_spill] sm:$0xff] %v10200_v48  ;;  %2338 = vrot.lane.b32.xlu0 %v1406_v18, %s14591_s16  ;;  %1476 = vrot.lane.b32.xlu1 %v1406_v18, %s9367_s14  ;;  %v1190_v48 = vpop.f32.mrf.mxu0 }
 0x26b   : > { %v10207_v6 = vpop.permute.xlu1 %1675  ;;  %v10209_v27 = vpop.permute.xlu0 %2461 }
 0x26c   : > { %14688 = vst [vmem:[#allocation76_spill] sm:$0xff] %v10207_v6  ;;  %v1616_v6 = vrot.slane %v1179_v24, 2 }
 0x26d   : > { %14689 = vst [vmem:[#allocation77_spill] sm:$0xff] %v10209_v27 }
 0x26e   : > { %1945 = vrot.lane.b32.xlu2 %v1406_v18, %s14601_s23  ;;  %v1617_v18 = vsel %vm1572_vm5, %v1614_v42, %v1616_v6  ;;  %v827_v42 = vld [vmem:[#allocation2 + $0x1a0] sm:$0xff] }
 0x270   : > { %v10213_v0 = vpop.permute.xlu2 %1677 }
 0x271   : > { %14690 = vst [vmem:[#allocation78_spill] sm:$0xff] %v10213_v0  ;;  %2078 = vrot.lane.b32.xlu1 %v1615_v22, %s14599_s24  ;;  %1947 = vrot.lane.b32.xlu0 %v1408_v60, %s14601_s23  ;;  %v1193_v62 = vpop.f32.mrf.mxu0  ;;  %v826_v0 = vld [vmem:[#allocation2 + $0x198] sm:$0xff] }
 0x272   : > { %8999 = vmatmul.msk.f32.gmra.mxu0 %vm679_vm3, %v826_v0 }
 0x273   : > { %v10218_v3 = vpop.permute.xlu1 %2328  ;;  %v10220_v47 = vpop.permute.xlu0 %2196 }
 0x274   : > { %14691 = vst [vmem:[#allocation79_spill] sm:$0xff] %v10218_v3  ;;  %v828_v3 = vld [vmem:[#allocation2 + $0x1a8] sm:$0xff] }
 0x275   : > { %14692 = vst [vmem:[#allocation80_spill] sm:$0xff] %v10220_v47  ;;  %v1621_v47 = vrot.slane %v1190_v48, 2 }
 0x276   : > { %2471 = vrot.lane.b32.xlu2 %v1615_v22, %s14587_s18 }
 0x278   : > { %v10223_v9 = vpop.permute.xlu2 %2330 }
 0x279   : > { %14693 = vst [vmem:[#allocation81_spill] sm:$0xff] %v10223_v9  ;;  %1687 = vrot.lane.b32.xlu1 %v1617_v18, %s9366_s17  ;;  %2473 = vrot.lane.b32.xlu0 %v1617_v18, %s14587_s18  ;;  %v10251_v0 = vpop.f32.mrf.mxu0 }
 0x27a   : > { %9000 = vmatmul.msk.f32.gmra.mxu0 %vm679_vm3, %v827_v42  ;;  %v1410_v42 = vrot.slane %v10203_v31, 1 }
 0x27b   : > { %v10228_v46 = vpop.permute.xlu1 %2198  ;;  %v10230_v27 = vpop.permute.xlu0 %1805 }
 0x27c   : > { %14694 = vst [vmem:[#allocation82_spill] sm:$0xff] %v10228_v46  ;;  %v1409_v46 = vrot.slane %v10183_v33, 1 }
 0x27d   : > { %14695 = vst [vmem:[#allocation83_spill] sm:$0xff] %v10230_v27 }
 0x27e   : > { %1478 = vrot.lane.b32.xlu2 %v1408_v60, %s9367_s14 }
 0x280   : > { %v10234_v24 = vpop.permute.xlu2 %1939 }
 0x281   : > { %14696 = vst [vmem:[#allocation84_spill] sm:$0xff] %v10234_v24  ;;  %2340 = vrot.lane.b32.xlu1 %v1408_v60, %s14591_s16  ;;  %2208 = vrot.lane.b32.xlu0 %v10183_v33, %s14594_s15  ;;  %v1619_v24 = vrot.slane %v10203_v31, 2 }
 0x282   : > { %9001 = vmatmul.msk.f32.gmra.mxu0 %vm679_vm3, %v828_v3  ;;  %v829_v3 = vld [vmem:[#allocation2 + $0x1b0] sm:$0xff] }
 0x283   : > { %v10239_v22 = vpop.permute.xlu1 %1937  ;;  %v10241_v6 = vpop.permute.xlu0 %1468 }
 0x284   : > { %14697 = vst [vmem:[#allocation85_spill] sm:$0xff] %v10239_v22 }
 0x285   : > { %14698 = vst [vmem:[#allocation86_spill] sm:$0xff] %v10241_v6  ;;  %v10274_v6 = vpop.f32.mrf.mxu0 }
 0x286   : > { %2080 = vrot.lane.b32.xlu2 %v1617_v18, %s14599_s24 }
 0x288   : > { %v10245_v62 = vpop.permute.xlu2 %2465 }
 0x289   : > { %14699 = vst [vmem:[#allocation87_spill] sm:$0xff] %v10245_v62  ;;  %2210 = vrot.lane.b32.xlu1 %v10203_v31, %s14594_s15  ;;  %1817 = vrot.lane.b32.xlu0 %v10203_v31, %s14613_s19  ;;  %v1411_v62 = vsel %vm1363_vm6, %v1409_v46, %v1410_v42 }
 0x28a   : > { %9002 = vmatmul.msk.f32.gmra.mxu0 %vm679_vm3, %v829_v3  ;;  %v1622_v3 = vsel %vm1572_vm5, %v1619_v24, %v1621_v47  ;;  %v830_v47 = vld [vmem:[#allocation2 + $0x1b8] sm:$0xff] }
 0x28b   : > { %v10253_v60 = vpop.permute.xlu1 %2463  ;;  %v10255_v22 = vpop.permute.xlu0 %2070 }
 0x28c   : > { %14700 = vst [vmem:[#allocation88_spill] sm:$0xff] %v10253_v60 }
 0x28d   : > { %14701 = vst [vmem:[#allocation89_spill] sm:$0xff] %v10255_v22  ;;  %v1618_v22 = vrot.slane %v10183_v33, 2 }
 0x28e   : > { %1815 = vrot.lane.b32.xlu2 %v10183_v33, %s14613_s19 }
 0x28f   : > { %v1620_v9 = vsel %vm1572_vm5, %v1618_v22, %v1619_v24  ;;  %v10287_v22 = vpop.f32.mrf.mxu0 }
 0x290   : > { %v10262_v18 = vpop.permute.xlu2 %2200 }
 0x291   : > { %14702 = vst [vmem:[#allocation90_spill] sm:$0xff] %v10262_v18  ;;  %1949 = vrot.lane.b32.xlu1 %v1411_v62, %s14601_s23  ;;  %1480 = vrot.lane.b32.xlu0 %v1411_v62, %s9367_s14 }
 0x292   : > { %9003 = vmatmul.msk.f32.gmra.mxu0 %vm679_vm3, %v830_v47 }
 0x293   : > { %v10269_v60 = vpop.permute.xlu0 %1679  ;;  %v10271_v27 = vpop.permute.xlu1 %1470 }
 0x294   : > { %14703 = vst [vmem:[#allocation91_spill] sm:$0xff] %v10269_v60 }
 0x295   : > { %14704 = vst [vmem:[#allocation92_spill] sm:$0xff] %v10271_v27  ;;  %v1412_v27 = vrot.slane %v1190_v48, 1 }
 0x296   : > { %1689 = vrot.lane.b32.xlu2 %v1620_v9, %s9366_s17 }
 0x297   : > { %v1204_v48 = vpop.f32.mrf.mxu0 }
 0x298   : > { %v10278_v46 = vpop.permute.xlu2 %1809 }
 0x299   : > { %14705 = vst [vmem:[#allocation93_spill] sm:$0xff] %v10278_v46  ;;  %2475 = vrot.lane.b32.xlu1 %v1620_v9, %s14587_s18  ;;  %2082 = vrot.lane.b32.xlu0 %v1620_v9, %s14599_s24  ;;  %v1413_v46 = vsel %vm1363_vm6, %v1410_v42, %v1412_v27 }
 0x29b   : > { %v10282_v18 = vpop.permute.xlu0 %2332  ;;  %v10284_v60 = vpop.permute.xlu1 %2072 }
 0x29c   : > { %14706 = vst [vmem:[#allocation94_spill] sm:$0xff] %v10282_v18 }
 0x29d   : > { %14707 = vst [vmem:[#allocation95_spill] sm:$0xff] %v10284_v60 }
 0x29e   : > { %2342 = vrot.lane.b32.xlu2 %v1411_v62, %s14591_s16 }
 0x2a0   : > { %v10289_v25 = vpop.permute.xlu2 %1472 }
 0x2a1   : > { %14708 = vst [vmem:[#allocation96_spill] sm:$0xff] %v10289_v25  ;;  %1691 = vrot.lane.b32.xlu0 %v1622_v3, %s9366_s17  ;;  %1482 = vrot.lane.b32.xlu1 %v1413_v46, %s9367_s14 }
 0x2a3   : > { %v10295_v9 = vpop.permute.xlu1 %1807  ;;  %v10297_v18 = vpop.permute.xlu0 %2202 }
 0x2a4   : > { %14709 = vst [vmem:[#allocation97_spill] sm:$0xff] %v10295_v9 }
 0x2a5   : > { %14710 = vst [vmem:[#allocation98_spill] sm:$0xff] %v10297_v18  ;;  %v1624_v18 = vrot.slane %v10274_v6, 2 }
 0x2a6   : > { %1951 = vrot.lane.b32.xlu2 %v1413_v46, %s14601_s23 }
 0x2a8   : > { %v10300_v62 = vpop.permute.xlu2 %2074 }
 0x2a9   : > { %14711 = vst [vmem:[#allocation99_spill] sm:$0xff] %v10300_v62  ;;  %2344 = vrot.lane.b32.xlu0 %v1413_v46, %s14591_s16  ;;  %2084 = vrot.lane.b32.xlu1 %v1622_v3, %s14599_s24  ;;  %v831_v46 = vld [vmem:[#allocation2 + $0x1c0] sm:$0xff]  ;;  %v1623_v62 = vrot.slane %v10251_v0, 2 }
 0x2aa   : > { %9004 = vmatmul.msk.f32.gmra.mxu0 %vm679_vm3, %v831_v46 }
 0x2ab   : > { %v10305_v27 = vpop.permute.xlu1 %1681  ;;  %v10307_v24 = vpop.permute.xlu0 %1941  ;;  %v1625_v46 = vsel %vm1572_vm5, %v1623_v62, %v1624_v18  ;;  %v833_v62 = vld [vmem:[#allocation2 + $0x1d0] sm:$0xff] }
 0x2ac   : > { %14712 = vst [vmem:[#allocation100_spill] sm:$0xff] %v10305_v27 }
 0x2ad   : > { %14713 = vst [vmem:[#allocation101_spill] sm:$0xff] %v10307_v24  ;;  %v10325_v24 = vpop.f32.mrf.mxu0 }
 0x2ae   : > { %2477 = vrot.lane.b32.xlu2 %v1622_v3, %s14587_s18  ;;  %v1414_v3 = vrot.slane %v10251_v0, 1  ;;  %v1419_v52 = vrot.slane %v10325_v24, 1 }
 0x2b0   : > { %v10310_v42 = vpop.permute.xlu2 %1683 }
 0x2b1   : > { %14714 = vst [vmem:[#allocation102_spill] sm:$0xff] %v10310_v42  ;;  %1819 = vrot.lane.b32.xlu1 %v10251_v0, %s14613_s19  ;;  %2214 = vrot.lane.b32.xlu0 %v10274_v6, %s14594_s15  ;;  %v1415_v42 = vrot.slane %v10274_v6, 1 }
 0x2b3   : > { %v10317_v48 = vpop.permute.xlu1 %2334  ;;  %v10319_v47 = vpop.permute.xlu0 %2467 }
 0x2b4   : > { %14715 = vst [vmem:[#allocation103_spill] sm:$0xff] %v10317_v48  ;;  %v1416_v48 = vsel %vm1363_vm6, %v1414_v3, %v1415_v42 }
 0x2b5   : > { %14716 = vst [vmem:[#allocation104_spill] sm:$0xff] %v10319_v47  ;;  %v832_v47 = vld [vmem:[#allocation2 + $0x1c8] sm:$0xff]  ;;  %v10342_v25 = vpop.f32.mrf.mxu0 }
 0x2b6   : > { %2212 = vrot.lane.b32.xlu2 %v10251_v0, %s14594_s15  ;;  %9005 = vmatmul.msk.f32.gmra.mxu0 %vm679_vm3, %v832_v47 }
 0x2b8   : > { %v10329_v27 = vpop.permute.xlu2 %2336 }
 0x2b9   : > { %14717 = vst [vmem:[#allocation105_spill] sm:$0xff] %v10329_v27  ;;  %1693 = vrot.lane.b32.xlu1 %v1625_v46, %s9366_s17  ;;  %1953 = vrot.lane.b32.xlu0 %v1416_v48, %s14601_s23 }
 0x2bb   : > { %v10336_v60 = vpop.permute.xlu1 %1943  ;;  %v10338_v9 = vpop.permute.xlu0 %1474 }
 0x2bc   : > { %14718 = vst [vmem:[#allocation106_spill] sm:$0xff] %v10336_v60  ;;  %v1417_v60 = vrot.slane %v10287_v22, 1 }
 0x2bd   : > { %14719 = vst [vmem:[#allocation107_spill] sm:$0xff] %v10338_v9 }
 0x2be   : > { %1821 = vrot.lane.b32.xlu2 %v10274_v6, %s14613_s19  ;;  %9006 = vmatmul.msk.f32.gmra.mxu0 %vm679_vm3, %v833_v62  ;;  %v1418_v57 = vsel %vm1363_vm6, %v1415_v42, %v1417_v60 }
 0x2c0   : > { %v10344_v27 = vpop.permute.xlu2 %2206 }
 0x2c1   : > { %14720 = vst [vmem:[#allocation108_spill] sm:$0xff] %v10344_v27  ;;  %2346 = vrot.lane.b32.xlu1 %v1416_v48, %s14591_s16  ;;  %2479 = vrot.lane.b32.xlu0 %v1625_v46, %s14587_s18  ;;  %v1212_v27 = vpop.f32.mrf.mxu0 }
 0x2c2   : > { %v1422_v13 = vrot.slane %v1212_v27, 1  ;;  %v1631_v51 = vrot.slane %v1212_v27, 2 }
 0x2c3   : > { %v10349_v3 = vpop.permute.xlu1 %2469  ;;  %v10351_v47 = vpop.permute.xlu0 %2076 }
 0x2c4   : > { %14721 = vst [vmem:[#allocation109_spill] sm:$0xff] %v10349_v3  ;;  %v1626_v3 = vrot.slane %v10287_v22, 2 }
 0x2c5   : > { %14722 = vst [vmem:[#allocation110_spill] sm:$0xff] %v10351_v47  ;;  %v834_v47 = vld [vmem:[#allocation2 + $0x1d8] sm:$0xff] }
 0x2c6   : > { %1484 = vrot.lane.b32.xlu2 %v1416_v48, %s9367_s14  ;;  %9007 = vmatmul.msk.f32.gmra.mxu0 %vm679_vm3, %v834_v47  ;;  %v1627_v60 = vsel %vm1572_vm5, %v1624_v18, %v1626_v3  ;;  %v1628_v3 = vrot.slane %v10325_v24, 2  ;;  %v1629_v47 = vrot.slane %v10342_v25, 2 }
 0x2c8   : > { %v10355_v9 = vpop.permute.xlu2 %1945 }
 0x2c9   : > { %14723 = vst [vmem:[#allocation111_spill] sm:$0xff] %v10355_v9  ;;  %1955 = vrot.lane.b32.xlu1 %v1418_v57, %s14601_s23  ;;  %1486 = vrot.lane.b32.xlu0 %v1418_v57, %s9367_s14  ;;  %v1215_v42 = vpop.f32.mrf.mxu0 }
 0x2ca   : > { %v836_v42 = vld [vmem:[#allocation2 + $0x1e8] sm:$0xff] }
 0x2cb   : > { %v10360_v55 = vpop.permute.xlu1 %2204  ;;  %v10362_v62 = vpop.permute.xlu0 %1811 }
 0x2cc   : > { %14724 = vst [vmem:[#allocation112_spill] sm:$0xff] %v10360_v55 }
 0x2cd   : > { %14725 = vst [vmem:[#allocation113_spill] sm:$0xff] %v10362_v62  ;;  %v835_v62 = vld [vmem:[#allocation2 + $0x1e0] sm:$0xff] }
 0x2ce   : > { %2086 = vrot.lane.b32.xlu2 %v1625_v46, %s14599_s24  ;;  %9008 = vmatmul.msk.f32.gmra.mxu0 %vm679_vm3, %v835_v62 }
 0x2d0   : > { %v10367_v48 = vpop.permute.xlu2 %2471 }
 0x2d1   : > { %14726 = vst [vmem:[#allocation114_spill] sm:$0xff] %v10367_v48  ;;  %2481 = vrot.lane.b32.xlu1 %v1627_v60, %s14587_s18  ;;  %2088 = vrot.lane.b32.xlu0 %v1627_v60, %s14599_s24  ;;  %v10392_v62 = vpop.f32.mrf.mxu0  ;;  %v1630_v48 = vsel %vm1572_vm5, %v1628_v3, %v1629_v47 }
 0x2d3   : > { %v10372_v9 = vpop.permute.xlu1 %1813  ;;  %v10374_v55 = vpop.permute.xlu0 %1685 }
 0x2d4   : > { %14727 = vst [vmem:[#allocation115_spill] sm:$0xff] %v10372_v9 }
 0x2d6   : > { %1695 = vrot.lane.b32.xlu2 %v1627_v60, %s9366_s17  ;;  %9009 = vmatmul.msk.f32.gmra.mxu0 %vm679_vm3, %v836_v42  ;;  %v1420_v42 = vrot.slane %v10342_v25, 1 }
 0x2d8   : > { %v10378_v22 = vpop.permute.xlu2 %1478  ;;  %v1423_v61 = vsel %vm1363_vm6, %v1420_v42, %v1422_v13 }
 0x2d9   : > { %2216 = vrot.lane.b32.xlu1 %v10325_v24, %s14594_s15  ;;  %1823 = vrot.lane.b32.xlu0 %v10325_v24, %s14613_s19 }
 0x2db   : > { %v10384_v18 = vpop.permute.xlu0 %2338  ;;  %v10386_v46 = vpop.permute.xlu1 %1476 }
 0x2dc   : > { %14728 = vst [vmem:[#allocation116_spill] sm:$0xff] %v10384_v18  ;;  %v10412_v20 = vpop.f32.mrf.mxu0 }
 0x2de   : > { %2348 = vrot.lane.b32.xlu2 %v1418_v57, %s14591_s16  ;;  %v837_v57 = vld [vmem:[#allocation2 + $0x1f0] sm:$0xff] }
 0x2df   : > { %9010 = vmatmul.msk.f32.gmra.mxu0 %vm679_vm3, %v837_v57 }
 0x2e0   : > { %v10394_v60 = vpop.permute.xlu2 %2080 }
 0x2e1   : > { %14729 = vst [vmem:[#allocation117_spill] sm:$0xff] %v10394_v60  ;;  %1825 = vrot.lane.b32.xlu1 %v10342_v25, %s14613_s19  ;;  %1697 = vrot.lane.b32.xlu0 %v1630_v48, %s9366_s17  ;;  %v1421_v60 = vsel %vm1363_vm6, %v1419_v52, %v1420_v42 }
 0x2e3   : > { %v10400_v18 = vpop.permute.xlu1 %2078  ;;  %v10402_v9 = vpop.permute.xlu0 %1947 }
 0x2e4   : > { %14730 = vst [vmem:[#allocation118_spill] sm:$0xff] %v10400_v18  ;;  %v1223_v52 = vpop.f32.mrf.mxu0 }
 0x2e5   : > { %14731 = vst [vmem:[#allocation119_spill] sm:$0xff] %v10402_v9  ;;  %v1427_v36 = vrot.slane %v1223_v52, 1  ;;  %v1636_v43 = vrot.slane %v1223_v52, 2 }
 0x2e6   : > { %2218 = vrot.lane.b32.xlu2 %v10342_v25, %s14594_s15 }
 0x2e7   : > { %9011 = vmatmul.msk.f32.gmra.mxu0 %vm679_vm3, %v838_v50 }
 0x2e8   : > { %v10409_v3 = vpop.permute.xlu2 %1815 }
 0x2e9   : > { %2350 = vrot.lane.b32.xlu0 %v1421_v60, %s14591_s16  ;;  %1488 = vrot.lane.b32.xlu1 %v1421_v60, %s9367_s14 }
 0x2eb   : > { %v10416_v9 = vpop.permute.xlu1 %1687  ;;  %v10418_v18 = vpop.permute.xlu0 %2473 }
 0x2ec   : > { %14732 = vst [vmem:[#allocation120_spill] sm:$0xff] %v10418_v18 }
 0x2ee   : > { %1957 = vrot.lane.b32.xlu2 %v1421_v60, %s14601_s23  ;;  %v1632_v60 = vsel %vm1572_vm5, %v1629_v47, %v1631_v51  ;;  %v839_v47 = vld [vmem:[#allocation2 + $0x200] sm:$0xff] }
 0x2ef   : > { %v1226_v13 = vpop.f32.mrf.mxu0  ;;  %9012 = vmatmul.msk.f32.gmra.mxu0 %vm679_vm3, %v839_v47  ;;  %v840_v47 = vld [vmem:[#allocation2 + $0x208] sm:$0xff] }
 0x2f0   : > { %v10421_v57 = vpop.permute.xlu2 %1689 }
 0x2f1   : > { %2090 = vrot.lane.b32.xlu1 %v1630_v48, %s14599_s24  ;;  %1959 = vrot.lane.b32.xlu0 %v1423_v61, %s14601_s23 }
 0x2f3   : > { %v10426_v63 = vpop.permute.xlu1 %2340  ;;  %v10428_v44 = vpop.permute.xlu0 %2208 }
 0x2f4   : > { %14733 = vst [vmem:[#allocation121_spill] sm:$0xff] %v10426_v63  ;;  %v1424_v63 = vrot.slane %v10392_v62, 1 }
 0x2f5   : > { %14734 = vst [vmem:[#allocation122_spill] sm:$0xff] %v10428_v44  ;;  %v1634_v44 = vrot.slane %v10412_v20, 2 }
 0x2f6   : > { %2483 = vrot.lane.b32.xlu2 %v1630_v48, %s14587_s18 }
 0x2f7   : > { %v10457_v50 = vpop.f32.mrf.mxu0  ;;  %9013 = vmatmul.msk.f32.gmra.mxu0 %vm679_vm3, %v840_v47 }
 0x2f8   : > { %v10431_v18 = vpop.permute.xlu2 %2342 }
 0x2f9   : > { %14735 = vst [vmem:[#allocation123_spill] sm:$0xff] %v10431_v18  ;;  %1699 = vrot.lane.b32.xlu1 %v1632_v60, %s9366_s17  ;;  %2485 = vrot.lane.b32.xlu0 %v1632_v60, %s14587_s18  ;;  %v1425_v18 = vrot.slane %v10412_v20, 1 }
 0x2fb   : > { %v10436_v42 = vpop.permute.xlu1 %2210  ;;  %v10438_v30 = vpop.permute.xlu0 %1817  ;;  %v1428_v14 = vsel %vm1363_vm6, %v1425_v18, %v1427_v36 }
 0x2fc   : > { %14736 = vst [vmem:[#allocation124_spill] sm:$0xff] %v10436_v42 }
 0x2fe   : > { %1490 = vrot.lane.b32.xlu2 %v1423_v61, %s9367_s14 }
 0x2ff   : > { %v10474_v5 = vpop.f32.mrf.mxu0  ;;  %9014 = vmatmul.msk.f32.gmra.mxu0 %vm679_vm3, %v841_v28  ;;  %v1637_v28 = vsel %vm1572_vm5, %v1634_v44, %v1636_v43  ;;  %v843_v43 = vld [vmem:[#allocation2 + $0x220] sm:$0xff] }
 0x300   : > { %v10442_v27 = vpop.permute.xlu2 %1951 }
 0x301   : > { %2352 = vrot.lane.b32.xlu1 %v1423_v61, %s14591_s16  ;;  %2220 = vrot.lane.b32.xlu0 %v10392_v62, %s14594_s15 }
 0x303   : > { %v10447_v51 = vpop.permute.xlu1 %1949  ;;  %v1481_v48 = vpop.permute.xlu0 %1480 }
 0x304   : > { %v1558_v52 = vadd.f32 %v1481_v48, %v10183_v33 }
 0x306   : > { %2092 = vrot.lane.b32.xlu2 %v1632_v60, %s14599_s24 }
 0x307   : > { %9015 = vmatmul.msk.f32.gmra.mxu0 %vm679_vm3, %v842_v23 }
 0x308   : > { %v10451_v13 = vpop.permute.xlu2 %2477 }
 0x309   : > { %14737 = vst [vmem:[#allocation125_spill] sm:$0xff] %v10451_v13  ;;  %2222 = vrot.lane.b32.xlu1 %v10412_v20, %s14594_s15  ;;  %1829 = vrot.lane.b32.xlu0 %v10412_v20, %s14613_s19  ;;  %v1426_v13 = vsel %vm1363_vm6, %v1424_v63, %v1425_v18 }
 0x30b   : > { %v10459_v61 = vpop.permute.xlu1 %2475  ;;  %v2083_v42 = vpop.permute.xlu0 %2082 }
 0x30c   : > { %14738 = vst [vmem:[#allocation126_spill] sm:$0xff] %v10459_v61  ;;  %v1633_v61 = vrot.slane %v10392_v62, 2 }
 0x30e   : > { %1827 = vrot.lane.b32.xlu2 %v10392_v62, %s14613_s19  ;;  %v1635_v47 = vsel %vm1572_vm5, %v1633_v61, %v1634_v44  ;;  %v10485_v61 = vpop.f32.mrf.mxu0  ;;  %v1767_v44 = vadd.f32 %v10421_v57, %v1558_v52 }
 0x30f   : > { %9016 = vmatmul.msk.f32.gmra.mxu0 %vm679_vm3, %v843_v43 }
 0x310   : > { %v2213_v60 = vpop.permute.xlu2 %2212 }
 0x311   : > { %1961 = vrot.lane.b32.xlu1 %v1426_v13, %s14601_s23  ;;  %1492 = vrot.lane.b32.xlu0 %v1426_v13, %s9367_s14 }
 0x313   : > { %v10471_v21 = vpop.permute.xlu0 %1691  ;;  %v1483_v32 = vpop.permute.xlu1 %1482 }
 0x316   : > { %1701 = vrot.lane.b32.xlu2 %v1635_v47, %s9366_s17  ;;  %v1237_v39 = vpop.f32.mrf.mxu0 }
 0x318   : > { %v10478_v63 = vpop.permute.xlu2 %1821 }
 0x319   : > { %2487 = vrot.lane.b32.xlu1 %v1635_v47, %s14587_s18  ;;  %2094 = vrot.lane.b32.xlu0 %v1635_v47, %s14599_s24 }
 0x31b   : > { %v10482_v19 = vpop.permute.xlu0 %2344  ;;  %v2085_v53 = vpop.permute.xlu1 %2084 }
 0x31c   : > { %14739 = vst [vmem:[#allocation127_spill] sm:$0xff] %v10482_v19 }
 0x31e   : > { %2354 = vrot.lane.b32.xlu2 %v1426_v13, %s14591_s16  ;;  %v1556_v13 = vadd.f32 %v10386_v46, %v10117_v37 }
 0x320   : > { %v1485_v45 = vpop.permute.xlu2 %1484  ;;  %v1765_v23 = vadd.f32 %v10374_v55, %v1556_v13 }
 0x321   : > { %1703 = vrot.lane.b32.xlu0 %v1637_v28, %s9366_s17  ;;  %1494 = vrot.lane.b32.xlu1 %v1428_v14, %s9367_s14  ;;  %v1560_v18 = vadd.f32 %v1485_v45, %v10251_v0 }
 0x322   : > { %v1895_v46 = vadd.f32 %v10409_v3, %v1765_v23 }
 0x323   : > { %v1820_v47 = vpop.permute.xlu1 %1819  ;;  %v2215_v19 = vpop.permute.xlu0 %2214 }
 0x324   : > { %v1897_v4 = vadd.f32 %v1820_v47, %v1767_v44  ;;  %v2029_v48 = vadd.f32 %v10447_v51, %v1895_v46  ;;  %v1429_v44 = vrot.slane %v10457_v50, 1 }
 0x326   : > { %1963 = vrot.lane.b32.xlu2 %v1428_v14, %s14601_s23  ;;  %v2162_v47 = vadd.f32 %v2083_v42, %v2029_v48  ;;  %v1638_v42 = vrot.slane %v10457_v50, 2 }
 0x327   : > { %v10510_v0 = vpop.f32.mrf.mxu0 }
 0x328   : > { %v2087_v36 = vpop.permute.xlu2 %2086 }
 0x329   : > { %2356 = vrot.lane.b32.xlu0 %v1428_v14, %s14591_s16  ;;  %2096 = vrot.lane.b32.xlu1 %v1637_v28, %s14599_s24  ;;  %v1557_v14 = vadd.f32 %v10378_v22, %v10134_v16  ;;  %v2292_v16 = vadd.f32 %v2213_v60, %v2162_v47  ;;  %v1559_v22 = vadd.f32 %v1483_v32, %v10203_v31 }
 0x32b   : > { %v1694_v33 = vpop.permute.xlu1 %1693  ;;  %v1954_v37 = vpop.permute.xlu0 %1953  ;;  %v1766_v45 = vadd.f32 %v10416_v9, %v1557_v14  ;;  %v1768_v60 = vadd.f32 %v10471_v21, %v1559_v22 }
 0x32c   : > { %v10503_v39 = vadd.f32 %v1694_v33, %v1560_v18  ;;  %v2031_v57 = vadd.f32 %v1954_v37, %v1897_v4  ;;  %v844_v4 = vld [vmem:[#allocation2 + $0x228] sm:$0xff] }
 0x32d   : > { %v1896_v13 = vadd.f32 %v10438_v30, %v1766_v45  ;;  %9017 = vmatmul.msk.f32.gmra.mxu0 %vm679_vm3, %v844_v4  ;;  %v1639_v30 = vrot.slane %v10474_v5, 2  ;;  %v1898_v21 = vadd.f32 %v10478_v63, %v1768_v60  ;;  %v1432_v4 = vrot.slane %v10485_v61, 1 }
 0x32e   : > { %2489 = vrot.lane.b32.xlu2 %v1637_v28, %s14587_s18  ;;  %v2164_v55 = vadd.f32 %v2087_v36, %v2031_v57  ;;  %v1430_v36 = vrot.slane %v10474_v5, 1 }
 0x32f   : > { %v2030_v9 = vadd.f32 %v10442_v27, %v1896_v13  ;;  %v1640_v27 = vsel %vm1572_vm5, %v1638_v42, %v1639_v30 }
 0x330   : > { %v1696_v52 = vpop.permute.xlu2 %1695  ;;  %v1431_v18 = vsel %vm1363_vm6, %v1429_v44, %v1430_v36 }
 0x331   : > { %1831 = vrot.lane.b32.xlu1 %v10457_v50, %s14613_s19  ;;  %2226 = vrot.lane.b32.xlu0 %v10474_v5, %s14594_s15  ;;  %v2163_v43 = vadd.f32 %v2085_v53, %v2030_v9  ;;  %v845_v53 = vld [vmem:[#allocation2 + $0x230] sm:$0xff] }
 0x333   : > { %v2347_v3 = vpop.permute.xlu1 %2346  ;;  %v2480_v51 = vpop.permute.xlu0 %2479  ;;  %v2293_v32 = vadd.f32 %v2215_v19, %v2163_v43 }
 0x334   : > { %v2426_v28 = vadd.f32 %v2347_v3, %v2292_v16  ;;  %v10531_v33 = vpop.f32.mrf.mxu0 }
 0x335   : > { %9018 = vmatmul.msk.f32.gmra.mxu0 %vm679_vm3, %v845_v53 }
 0x336   : > { %v10525_v23 = vadd.f32 %v2480_v51, %v2426_v28  ;;  %2224 = vrot.lane.b32.xlu2 %v10457_v50, %s14594_s15  ;;  %v1641_v28 = vrot.slane %v10485_v61, 2 }
 0x338   : > { %v2349_v31 = vpop.permute.xlu2 %2348 }
 0x339   : > { %v2427_v37 = vadd.f32 %v2349_v31, %v2293_v32  ;;  %1705 = vrot.lane.b32.xlu1 %v1640_v27, %s9366_s17  ;;  %1965 = vrot.lane.b32.xlu0 %v1431_v18, %s14601_s23  ;;  %v1642_v31 = vsel %vm1572_vm5, %v1639_v30, %v1641_v28 }
 0x33b   : > { %v1956_v46 = vpop.permute.xlu1 %1955  ;;  %v1487_v57 = vpop.permute.xlu0 %1486 }
 0x33c   : > { %v2032_v19 = vadd.f32 %v1956_v46, %v1898_v21  ;;  %v1561_v14 = vadd.f32 %v1487_v57, %v10274_v6  ;;  %v10542_v47 = vpop.f32.mrf.mxu0  ;;  %v1644_v21 = vrot.slane %v10531_v33, 2 }
 0x33e   : > { %1833 = vrot.lane.b32.xlu2 %v10474_v5, %s14613_s19  ;;  %v1770_v48 = vadd.f32 %v1696_v52, %v1561_v14  ;;  %v1433_v52 = vsel %vm1363_vm6, %v1430_v36, %v1432_v4  ;;  %v1434_v4 = vrot.slane %v10510_v0, 1 }
 0x340   : > { %v2219_v45 = vpop.permute.xlu2 %2218 }
 0x341   : > { %2358 = vrot.lane.b32.xlu1 %v1431_v18, %s14591_s16  ;;  %2491 = vrot.lane.b32.xlu0 %v1640_v27, %s14587_s18 }
 0x343   : > { %v2482_v13 = vpop.permute.xlu1 %2481  ;;  %v2089_v63 = vpop.permute.xlu0 %2088 }
 0x344   : > { %v10545_v16 = vadd.f32 %v2482_v13, %v2427_v37  ;;  %v2165_v22 = vadd.f32 %v2089_v63, %v2032_v19  ;;  %v1248_v3 = vpop.f32.mrf.mxu0 }
 0x346   : > { %1496 = vrot.lane.b32.xlu2 %v1431_v18, %s9367_s14  ;;  %v10548_v6 = vadd.f32 %v2219_v45, %v2165_v22  ;;  %v1435_v22 = vrot.slane %v10531_v33, 1 }
 0x348   : > { %v1958_v9 = vpop.permute.xlu2 %1957  ;;  %v1436_v3 = vsel %vm1363_vm6, %v1434_v4, %v1435_v22 }
 0x349   : > { %1967 = vrot.lane.b32.xlu1 %v1433_v52, %s14601_s23  ;;  %1498 = vrot.lane.b32.xlu0 %v1433_v52, %s9367_s14 }
 0x34b   : > { %v2217_v51 = vpop.permute.xlu1 %2216  ;;  %v1824_v42 = vpop.permute.xlu0 %1823 }
 0x34c   : > { %v2294_v44 = vadd.f32 %v2217_v51, %v2164_v55  ;;  %v1899_v43 = vadd.f32 %v1824_v42, %v10503_v39  ;;  %v10570_v19 = vpop.f32.mrf.mxu0 }
 0x34e   : > { %2098 = vrot.lane.b32.xlu2 %v1640_v27, %s14599_s24  ;;  %v2033_v60 = vadd.f32 %v1958_v9, %v1899_v43  ;;  %v1643_v27 = vrot.slane %v10510_v0, 2 }
 0x350   : > { %v2484_v32 = vpop.permute.xlu2 %2483 }
 0x351   : > { %2493 = vrot.lane.b32.xlu1 %v1642_v31, %s14587_s18  ;;  %2100 = vrot.lane.b32.xlu0 %v1642_v31, %s14599_s24 }
 0x353   : > { %v1826_v36 = vpop.permute.xlu1 %1825  ;;  %v1698_v18 = vpop.permute.xlu0 %1697 }
 0x354   : > { %v1900_v37 = vadd.f32 %v1826_v36, %v1770_v48  ;;  %v1645_v48 = vsel %vm1572_vm5, %v1643_v27, %v1644_v21  ;;  %v10581_v51 = vpop.f32.mrf.mxu0 }
 0x356   : > { %1707 = vrot.lane.b32.xlu2 %v1642_v31, %s9366_s17 }
 0x358   : > { %v1491_v53 = vpop.permute.xlu2 %1490 }
 0x359   : > { %2228 = vrot.lane.b32.xlu1 %v10510_v0, %s14594_s15  ;;  %1835 = vrot.lane.b32.xlu0 %v10510_v0, %s14613_s19  ;;  %v1563_v28 = vadd.f32 %v1491_v53, %v10342_v25 }
 0x35b   : > { %v2351_v61 = vpop.permute.xlu0 %2350  ;;  %v1489_v39 = vpop.permute.xlu1 %1488 }
 0x35c   : > { %v2428_v55 = vadd.f32 %v2351_v61, %v2294_v44  ;;  %v1562_v30 = vadd.f32 %v1489_v39, %v10325_v24  ;;  %v1646_v39 = vrot.slane %v10542_v47, 2 }
 0x35e   : > { %v10567_v46 = vadd.f32 %v2484_v32, %v2428_v55  ;;  %2360 = vrot.lane.b32.xlu2 %v1433_v52, %s14591_s16  ;;  %v1771_v57 = vadd.f32 %v1698_v18, %v1562_v30  ;;  %v1256_v18 = vpop.f32.mrf.mxu0  ;;  %v10597_v27 = vsel %vm1572_vm5, %v1644_v21, %v1646_v39 }
 0x360   : > { %v2093_v14 = vpop.permute.xlu2 %2092 }
 0x361   : > { %1837 = vrot.lane.b32.xlu1 %v10531_v33, %s14613_s19  ;;  %1709 = vrot.lane.b32.xlu0 %v1645_v48, %s9366_s17 }
 0x363   : > { %v2091_v24 = vpop.permute.xlu1 %2090  ;;  %v1960_v45 = vpop.permute.xlu0 %1959 }
 0x364   : > { %v2166_v13 = vadd.f32 %v2091_v24, %v2033_v60  ;;  %v2034_v63 = vadd.f32 %v1960_v45, %v1900_v37  ;;  %v1437_v60 = vrot.slane %v10542_v47, 1 }
 0x366   : > { %2230 = vrot.lane.b32.xlu2 %v10531_v33, %s14594_s15  ;;  %v2167_v9 = vadd.f32 %v2093_v14, %v2034_v63  ;;  %v1438_v36 = vsel %vm1363_vm6, %v1435_v22, %v1437_v60  ;;  %v1259_v14 = vpop.f32.mrf.mxu0 }
 0x367   : > { %v1651_v14 = vrot.slane %v1256_v18, 2 }
 0x368   : > { %v1828_v52 = vpop.permute.xlu2 %1827 }
 0x369   : > { %v1901_v42 = vadd.f32 %v1828_v52, %v1771_v57  ;;  %2362 = vrot.lane.b32.xlu0 %v1436_v3, %s14591_s16  ;;  %1500 = vrot.lane.b32.xlu1 %v1436_v3, %s9367_s14 }
 0x36b   : > { %v1700_v44 = vpop.permute.xlu1 %1699  ;;  %v2486_v43 = vpop.permute.xlu0 %2485 }
 0x36c   : > { %v1772_v32 = vadd.f32 %v1700_v44, %v1563_v28 }
 0x36e   : > { %1969 = vrot.lane.b32.xlu2 %v1436_v3, %s14601_s23  ;;  %v10607_v21 = vpop.f32.mrf.mxu0  ;;  %v1439_v3 = vrot.slane %v10570_v19, 1 }
 0x370   : > { %v1702_v31 = vpop.permute.xlu2 %1701 }
 0x371   : > { %2102 = vrot.lane.b32.xlu1 %v1645_v48, %s14599_s24  ;;  %1971 = vrot.lane.b32.xlu0 %v1438_v36, %s14601_s23 }
 0x373   : > { %v2353_v37 = vpop.permute.xlu1 %2352  ;;  %v2221_v61 = vpop.permute.xlu0 %2220 }
 0x374   : > { %v2429_v25 = vadd.f32 %v2353_v37, %v10548_v6  ;;  %v2296_v53 = vadd.f32 %v2221_v61, %v2166_v13  ;;  %v1649_v37 = vrot.slane %v10581_v51, 2 }
 0x376   : > { %v10593_v55 = vadd.f32 %v2486_v43, %v2429_v25  ;;  %2495 = vrot.lane.b32.xlu2 %v1645_v48, %s14587_s18  ;;  %v10622_v61 = vpop.f32.mrf.mxu0 }
 0x378   : > { %v2355_v30 = vpop.permute.xlu2 %2354 }
 0x379   : > { %v2430_v57 = vadd.f32 %v2355_v30, %v2296_v53  ;;  %1711 = vrot.lane.b32.xlu1 %v10597_v27, %s9366_s17  ;;  %2232 = vrot.lane.b32.xlu0 %v10570_v19, %s14594_s15 }
 0x37b   : > { %v2223_v47 = vpop.permute.xlu1 %2222  ;;  %v1830_v24 = vpop.permute.xlu0 %1829 }
 0x37c   : > { %v2297_v6 = vadd.f32 %v2223_v47, %v2167_v9  ;;  %v1902_v45 = vadd.f32 %v1830_v24, %v1772_v32  ;;  %v1440_v9 = vrot.slane %v10581_v51, 1 }
 0x37e   : > { %1502 = vrot.lane.b32.xlu2 %v1438_v36, %s9367_s14  ;;  %v1441_v43 = vsel %vm1363_vm6, %v1439_v3, %v1440_v9 }
 0x380   : > { %v1964_v13 = vpop.permute.xlu2 %1963 }
 0x381   : > { %v2036_v48 = vadd.f32 %v1964_v13, %v1902_v45  ;;  %2364 = vrot.lane.b32.xlu1 %v1438_v36, %s14591_s16  ;;  %1841 = vrot.lane.b32.xlu0 %v10581_v51, %s14613_s19  ;;  %v1648_v36 = vrot.slane %v10570_v19, 2  ;;  %v10631_v45 = vpop.f32.mrf.mxu0 }
 0x383   : > { %v1962_v63 = vpop.permute.xlu1 %1961  ;;  %v1493_v4 = vpop.permute.xlu0 %1492  ;;  %v1650_v39 = vsel %vm1572_vm5, %v1648_v36, %v1649_v37 }
 0x384   : > { %v2035_v22 = vadd.f32 %v1962_v63, %v1901_v42  ;;  %v1564_v52 = vadd.f32 %v1493_v4, %v10392_v62  ;;  %v1652_v63 = vsel %vm1572_vm5, %v1649_v37, %v1651_v14 }
 0x386   : > { %2104 = vrot.lane.b32.xlu2 %v10597_v27, %s14599_s24  ;;  %v1773_v28 = vadd.f32 %v1702_v31, %v1564_v52 }
 0x388   : > { %v2490_v44 = vpop.permute.xlu2 %2489 }
 0x389   : > { %2234 = vrot.lane.b32.xlu1 %v10581_v51, %s14594_s15  ;;  %1504 = vrot.lane.b32.xlu0 %v1441_v43, %s9367_s14 }
 0x38b   : > { %v2488_v60 = vpop.permute.xlu1 %2487  ;;  %v2095_v42 = vpop.permute.xlu0 %2094 }
 0x38c   : > { %v10618_v32 = vadd.f32 %v2488_v60, %v2430_v57  ;;  %v2168_v62 = vadd.f32 %v2095_v42, %v2035_v22  ;;  %v1442_v57 = vrot.slane %v1256_v18, 1  ;;  %v1270_v42 = vpop.f32.mrf.mxu0 }
 0x38e   : > { %1839 = vrot.lane.b32.xlu2 %v10570_v19, %s14613_s19  ;;  %v1443_v4 = vsel %vm1363_vm6, %v1440_v9, %v1442_v57  ;;  %v1540_v57 = vadd.f32 %v9872_v2, %v9756_v56  ;;  %v1542_v2 = vadd.f32 %v9901_v17, %v9776_v10 }
 0x390   : > { %v2225_v31 = vpop.permute.xlu2 %2224 }
 0x391   : > { %v2298_v25 = vadd.f32 %v2225_v31, %v2168_v62  ;;  %1973 = vrot.lane.b32.xlu1 %v1441_v43, %s14601_s23  ;;  %2106 = vrot.lane.b32.xlu0 %v1650_v39, %s14599_s24 }
 0x393   : > { %v1704_v53 = vpop.permute.xlu0 %1703  ;;  %v1495_v30 = vpop.permute.xlu1 %1494 }
 0x394   : > { %v1565_v47 = vadd.f32 %v1495_v30, %v10412_v20 }
 0x396   : > { %1713 = vrot.lane.b32.xlu2 %v1650_v39, %s9366_s17  ;;  %v1774_v24 = vadd.f32 %v1704_v53, %v1565_v47 }
 0x398   : > { %v1834_v13 = vpop.permute.xlu2 %1833 }
 0x399   : > { %v1904_v22 = vadd.f32 %v1834_v13, %v1774_v24  ;;  %1715 = vrot.lane.b32.xlu0 %v1652_v63, %s9366_s17  ;;  %1506 = vrot.lane.b32.xlu1 %v1443_v4, %s9367_s14  ;;  %v1912_v13 = vrot.slane %v10607_v21, 1 }
 0x39b   : > { %v2357_v52 = vpop.permute.xlu0 %2356  ;;  %v2097_v3 = vpop.permute.xlu1 %2096 }
 0x39c   : > { %v2431_v18 = vadd.f32 %v2357_v52, %v2297_v6  ;;  %v2169_v60 = vadd.f32 %v2097_v3, %v2036_v48 }
 0x39e   : > { %v10637_v20 = vadd.f32 %v2490_v44, %v2431_v18  ;;  %2366 = vrot.lane.b32.xlu2 %v1441_v43, %s14591_s16 }
 0x3a0   : > { %v1497_v62 = vpop.permute.xlu2 %1496 }
 0x3a1   : > { %2368 = vrot.lane.b32.xlu0 %v1443_v4, %s14591_s16  ;;  %2108 = vrot.lane.b32.xlu1 %v1652_v63, %s14599_s24  ;;  %v1566_v6 = vadd.f32 %v1497_v62, %v10457_v50 }
 0x3a3   : > { %v1832_v9 = vpop.permute.xlu1 %1831  ;;  %v2227_v36 = vpop.permute.xlu0 %2226 }
 0x3a4   : > { %v1903_v37 = vadd.f32 %v1832_v9, %v1773_v28  ;;  %v2299_v31 = vadd.f32 %v2227_v36, %v2169_v60  ;;  %v2048_v60 = vrot.slane %v10631_v45, 2  ;;  %v14740_v36 = vld [vmem:[#allocation22_spill] sm:$0xff] }
 0x3a6   : > { %1975 = vrot.lane.b32.xlu2 %v1443_v4, %s14601_s23 }
 0x3a8   : > { %v2099_v53 = vpop.permute.xlu2 %2098 }
 0x3a9   : > { %2497 = vrot.lane.b32.xlu0 %v10597_v27, %s14587_s18  ;;  %2499 = vrot.lane.b32.xlu1 %v1650_v39, %s14587_s18  ;;  %v1541_v27 = vadd.f32 %v9884_v8, %v9759_v58  ;;  %v1749_v39 = vadd.f32 %v9861_v59, %v1540_v57  ;;  %v1913_v58 = vrot.slane %v10622_v61, 1 }
 0x3ab   : > { %v1706_v48 = vpop.permute.xlu1 %1705  ;;  %v1966_v44 = vpop.permute.xlu0 %1965  ;;  %v1750_v50 = vadd.f32 %v9894_v15, %v1541_v27  ;;  %v1879_v56 = vadd.f32 %v9889_v11, %v1749_v39  ;;  %v1914_v17 = vsel %vm1363_vm6, %v1912_v13, %v1913_v58 }
 0x3ac   : > { %v10647_v43 = vadd.f32 %v1706_v48, %v1566_v6  ;;  %v2037_v30 = vadd.f32 %v1966_v44, %v1903_v37  ;;  %v14744_v48 = vld [vmem:[#allocation16_spill] sm:$0xff] }
 0x3ad   : > { %v2013_v8 = vadd.f32 %v9915_v26, %v1879_v56  ;;  %v1880_v10 = vadd.f32 %v9870_v1, %v1750_v50  ;;  %v1915_v1 = vrot.slane %v10631_v45, 1  ;;  %v14741_v45 = vld [vmem:[#allocation30_spill] sm:$0xff] }
 0x3ae   : > { %2501 = vrot.lane.b32.xlu2 %v1652_v63, %s14587_s18  ;;  %v10652_v28 = vadd.f32 %v2099_v53, %v2037_v30  ;;  %v1751_v63 = vadd.f32 %v9920_v29, %v1542_v2  ;;  %v14743_v53 = vld [vmem:[#allocation11_spill] sm:$0xff] }
 0x3af   : > { %v2014_v52 = vadd.f32 %v9945_v41, %v1880_v10  ;;  %v14745_v30 = vld [vmem:[#allocation31_spill] sm:$0xff] }
 0x3b0   : > { %v1708_v14 = vpop.permute.xlu2 %1707  ;;  %v1881_v11 = vadd.f32 %v9943_v40, %v1751_v63  ;;  %v14748_v2 = vld [vmem:[#allocation39_spill] sm:$0xff] }
 0x3b1   : > { %1843 = vrot.lane.b32.xlu1 %v10607_v21, %s14613_s19  ;;  %2238 = vrot.lane.b32.xlu0 %v10622_v61, %s14594_s15  ;;  %v2147_v62 = vadd.f32 %v9931_v34, %v2014_v52  ;;  %v14749_v63 = vld [vmem:[#allocation23_spill] sm:$0xff] }
 0x3b2   : > { %v2015_v26 = vadd.f32 %v9938_v38, %v1881_v11 }
 0x3b3   : > { %v2359_v47 = vpop.permute.xlu1 %2358  ;;  %v2492_v24 = vpop.permute.xlu0 %2491 }
 0x3b4   : > { %v2432_v59 = vadd.f32 %v2359_v47, %v2298_v25  ;;  %v2146_v25 = vadd.f32 %v9881_v7, %v2013_v8  ;;  %v1543_v7 = vadd.f32 %v9933_v35, %v9781_v12  ;;  %v2148_v38 = vadd.f32 %v14740_v36, %v2015_v26  ;;  %v14742_v35 = vld [vmem:[#allocation13_spill] sm:$0xff] }
 0x3b5   : > { %v1916_v12 = vsel %vm1363_vm6, %v1913_v58, %v1915_v1  ;;  %v2277_v34 = vadd.f32 %v14742_v35, %v2147_v62  ;;  %v14754_v1 = vld [vmem:[#allocation6_spill] sm:$0xff] }
 0x3b6   : > { %v10669_v4 = vadd.f32 %v2492_v24, %v2432_v59  ;;  %2236 = vrot.lane.b32.xlu2 %v10607_v21, %s14594_s15  ;;  %v2276_v29 = vadd.f32 %v9953_v49, %v2146_v25  ;;  %v2046_v49 = vrot.slane %v10622_v61, 2  ;;  %v1752_v6 = vadd.f32 %v14743_v53, %v1543_v7  ;;  %v10716_v59 = vpop.f32.mrf.mxu0  ;;  %v14752_v25 = vld [vmem:[#allocation27_spill] sm:$0xff]  ;;  %v14757_v7 = vld [vmem:[#allocation36_spill] sm:$0xff] }
 0x3b7   : > { %v14761_v53 = vld [vmem:[#allocation32_spill] sm:$0xff] }
 0x3b8   : > { %v2361_v15 = vpop.permute.xlu2 %2360  ;;  %v2410_v9 = vadd.f32 %v9967_v54, %v2276_v29  ;;  %v2045_v54 = vrot.slane %v10607_v21, 2  ;;  %v14747_v21 = vld [vmem:[#allocation19_spill] sm:$0xff] }
 0x3b9   : > { %v2433_v3 = vadd.f32 %v2361_v15, %v2299_v31  ;;  %2370 = vrot.lane.b32.xlu1 %v1914_v17, %s14591_s16  ;;  %1977 = vrot.lane.b32.xlu0 %v1914_v17, %s14601_s23  ;;  %v1882_v56 = vadd.f32 %v14747_v21, %v1752_v6  ;;  %v14750_v15 = vld [vmem:[#allocation5_spill] sm:$0xff]  ;;  %v14751_v17 = vld [vmem:[#allocation15_spill] sm:$0xff]  ;;  %v14765_v21 = vld [vmem:[#allocation8_spill] sm:$0xff] }
 0x3ba   : > { %v2543_v44 = vadd.f32 %v14744_v48, %v2410_v9  ;;  %v2047_v58 = vsel %vm1572_vm5, %v2045_v54, %v2046_v49  ;;  %v1544_v52 = vadd.f32 %v14751_v17, %v14750_v15  ;;  %v14758_v9 = vld [vmem:[#allocation21_spill] sm:$0xff] }
 0x3bb   : > { %v1968_v18 = vpop.permute.xlu1 %1967  ;;  %v1499_v40 = vpop.permute.xlu0 %1498  ;;  %v2016_v11 = vadd.f32 %v14749_v63, %v1882_v56  ;;  %v14766_v56 = vld [vmem:[#allocation43_spill] sm:$0xff]  ;;  %v14770_v15 = vld [vmem:[#allocation49_spill] sm:$0xff] }
 0x3bc   : > { %v2038_v42 = vadd.f32 %v1968_v18, %v1904_v22  ;;  %v1567_v41 = vadd.f32 %v1499_v40, %v10474_v5  ;;  %v2278_v22 = vadd.f32 %v14741_v45, %v2148_v38  ;;  %v2049_v5 = vsel %vm1572_vm5, %v2046_v49, %v2048_v60  ;;  %v14753_v18 = vld [vmem:[#allocation17_spill] sm:$0xff]  ;;  %v14755_v60 = vld [vmem:[#allocation18_spill] sm:$0xff]  ;;  %v14759_v38 = vld [vmem:[#allocation24_spill] sm:$0xff] }
 0x3bd   : > { %v1753_v40 = vadd.f32 %v14753_v18, %v1544_v52  ;;  %v2149_v36 = vadd.f32 %v14758_v9, %v2016_v11  ;;  %v14760_v45 = vld [vmem:[#allocation26_spill] sm:$0xff]  ;;  %v14775_v9 = vld [vmem:[#allocation37_spill] sm:$0xff] }
 0x3be   : > { %1845 = vrot.lane.b32.xlu2 %v10622_v61, %s14613_s19  ;;  %v10693_v37 = vadd.f32 %v1708_v14, %v1567_v41  ;;  %v10706_v61 = vld [vmem:[%s14565_s4] ss:$0 sm:$0xff]  ;;  %v2412_v57 = vadd.f32 %v14745_v30, %v2278_v22  ;;  %v14756_v41 = vld [vmem:[#allocation7_spill] sm:$0xff]  ;;  %v10755_v52 = vpop.f32.mrf.mxu0 }
 0x3bf   : > { %v14746_v14 = vld [vmem:[#allocation29_spill] sm:$0xff]  ;;  %v2579_v8 = vadd.f32 %v10706_v61, %v2543_v44  ;;  %v1546_v62 = vadd.f32 %v14757_v7, %v14756_v41  ;;  %v1883_v49 = vadd.f32 %v14759_v38, %v1753_v40  ;;  %v2279_v6 = vadd.f32 %v14761_v53, %v2149_v36  ;;  %v14774_v7 = vld [vmem:[#allocation42_spill] sm:$0xff]  ;;  %v14780_v53 = vld [vmem:[#allocation52_spill] sm:$0xff] }
 0x3c0   : > { %v2231_v31 = vpop.permute.xlu2 %2230  ;;  %v2411_v27 = vadd.f32 %v14746_v14, %v2277_v34  ;;  %v2545_v47 = vadd.f32 %v14748_v2, %v2412_v57  ;;  %v14762_v30 = vld [vmem:[#allocation33_spill] sm:$0xff]  ;;  %v14763_v14 = vld [vmem:[#allocation35_spill] sm:$0xff]  ;;  %v1547_v2 = vadd.f32 %v14766_v56, %v14765_v21 }
 0x3c1   : > { %2112 = vrot.lane.b32.xlu0 %v2049_v5, %s14599_s24  ;;  %1979 = vrot.lane.b32.xlu1 %v1916_v12, %s14601_s23  ;;  %vm2611_vm7 = vcmp.gt.f32.partialorder %v2579_v8, 0.0  ;;  %v2643_v54 = vmul.f32 0.2, %v2579_v8  ;;  %v14771_v40 = vld [vmem:[#allocation41_spill] sm:$0xff] }
 0x3c2   : > { %v2544_v26 = vadd.f32 %v14752_v25, %v2411_v27  ;;  %v2017_v27 = vadd.f32 %v14763_v14, %v1883_v49  ;;  %v14773_v41 = vld [vmem:[#allocation53_spill] sm:$0xff] }
 0x3c3   : > { %v2494_v39 = vpop.permute.xlu1 %2493  ;;  %v2101_v50 = vpop.permute.xlu0 %2100  ;;  %v2675_v18 = vsel %vm2611_vm7, %v2579_v8, %v2643_v54  ;;  %v14776_v38 = vld [vmem:[#allocation9_spill] sm:$0xff]  ;;  %v14778_v8 = vld [vmem:[#allocation50_spill] sm:$0xff] }
 0x3c4   : > { %v10713_v24 = vadd.f32 %v2494_v39, %v2433_v3  ;;  %v2171_v13 = vadd.f32 %v2101_v50, %v2038_v42  ;;  %v2581_v3 = vadd.f32 %v10706_v61, %v2545_v47  ;;  %v1545_v42 = vadd.f32 %v14755_v60, %v14754_v1  ;;  %v14764_v39 = vld [vmem:[#allocation28_spill] sm:$0xff]  ;;  %v14767_v47 = vld [vmem:[#allocation46_spill] sm:$0xff]  ;;  %v14772_v60 = vld [vmem:[#allocation47_spill] sm:$0xff] }
 0x3c5   : > { %v1755_v50 = vadd.f32 %v14764_v39, %v1546_v62  ;;  %v1756_v62 = vadd.f32 %v14774_v7, %v1547_v2  ;;  %v14783_v21 = vld [vmem:[#allocation45_spill] sm:$0xff] }
 0x3c6   : > { %2110 = vrot.lane.b32.xlu2 %v2047_v58, %s14599_s24  ;;  %v10721_v10 = vadd.f32 %v2231_v31, %v2171_v13  ;;  %v1754_v22 = vadd.f32 %v14760_v45, %v1545_v42  ;;  %v2580_v31 = vadd.f32 %v10706_v61, %v2544_v26  ;;  %vm2613_vm8 = vcmp.gt.f32.partialorder %v2581_v3, 0.0 }
 0x3c7   : > { %v2413_v13 = vadd.f32 %v14767_v47, %v2279_v6  ;;  %v1885_v17 = vadd.f32 %v14770_v15, %v1755_v50  ;;  %v1886_v56 = vadd.f32 %v14783_v21, %v1756_v62  ;;  %v14784_v47 = vld [vmem:[#allocation65_spill] sm:$0xff]  ;;  %v14799_v21 = vld [vmem:[#allocation66_spill] sm:$0xff] }
 0x3c8   : > { %v1970_v29 = vpop.permute.xlu2 %1969  ;;  %v1884_v57 = vadd.f32 %v14762_v30, %v1754_v22  ;;  %vm2612_vm9 = vcmp.gt.f32.partialorder %v2580_v31, 0.0  ;;  %v14779_v22 = vld [vmem:[#allocation55_spill] sm:$0xff] }
 0x3c9   : > { %2503 = vrot.lane.b32.xlu0 %v2047_v58, %s14587_s18  ;;  %2505 = vrot.lane.b32.xlu1 %v2049_v5, %s14587_s18  ;;  %v2645_v5 = vmul.f32 0.2, %v2581_v3  ;;  %v2546_v36 = vadd.f32 %v14775_v9, %v2413_v13 }
 0x3cb   : > { %v2229_v35 = vpop.permute.xlu1 %2228  ;;  %v1836_v34 = vpop.permute.xlu0 %1835  ;;  %v2677_v26 = vsel %vm2613_vm8, %v2581_v3, %v2645_v5  ;;  %v14777_v3 = vld [vmem:[#allocation48_spill] sm:$0xff]  ;;  %v2310_v5 = vrot.slane %v10755_v52, 1  ;;  %v2582_v2 = vadd.f32 %v10706_v61, %v2546_v36 }
 0x3cc   : > { %v10740_v48 = vadd.f32 %v2229_v35, %v10652_v28  ;;  %v1905_v44 = vadd.f32 %v1836_v34, %v10647_v43  ;;  %v14768_v28 = vld [vmem:[#allocation34_spill] sm:$0xff]  ;;  %v14769_v43 = vld [vmem:[#allocation40_spill] sm:$0xff]  ;;  %v1548_v49 = vadd.f32 %v14777_v3, %v14776_v38 }
 0x3cd   : > { %v2018_v63 = vadd.f32 %v14768_v28, %v1884_v57  ;;  %v2150_v11 = vadd.f32 %v14769_v43, %v2017_v27  ;;  %v14781_v57 = vld [vmem:[#allocation57_spill] sm:$0xff]  ;;  %v14782_v27 = vld [vmem:[#allocation51_spill] sm:$0xff]  ;;  %v14785_v28 = vld [vmem:[#allocation56_spill] sm:$0xff]  ;;  %vm2614_vm10 = vcmp.gt.f32.partialorder %v2582_v2, 0.0  ;;  %v2646_v62 = vmul.f32 0.2, %v2582_v2 }
 0x3ce   : > { %2372 = vrot.lane.b32.xlu2 %v1916_v12, %s14591_s16  ;;  %v10750_v58 = vadd.f32 %v1970_v29, %v1905_v44  ;;  %v2019_v12 = vadd.f32 %v14773_v41, %v1885_v17  ;;  %v2644_v29 = vmul.f32 0.2, %v2580_v31  ;;  %v1757_v6 = vadd.f32 %v14780_v53, %v1548_v49  ;;  %v14786_v43 = vld [vmem:[#allocation10_spill] sm:$0xff] }
 0x3cf   : > { %v2280_v1 = vadd.f32 %v14771_v40, %v2150_v11  ;;  %v2151_v42 = vadd.f32 %v14772_v60, %v2018_v63  ;;  %v2309_v44 = vrot.slane %v10716_v59, 1  ;;  %v14787_v11 = vld [vmem:[#allocation59_spill] sm:$0xff]  ;;  %v14793_v38 = vld [vmem:[#allocation62_spill] sm:$0xff] }
 0x3d0   : > { %v2496_v25 = vpop.permute.xlu2 %2495  ;;  %v2152_v39 = vadd.f32 %v14782_v27, %v2019_v12  ;;  %v2676_v50 = vsel %vm2612_vm9, %v2580_v31, %v2644_v29  ;;  %v1887_v13 = vadd.f32 %v14784_v47, %v1757_v6  ;;  %v1549_v15 = vadd.f32 %v14787_v11, %v14786_v43  ;;  %v10793_v12 = vpop.f32.mrf.mxu0  ;;  %v14792_v29 = vld [vmem:[#allocation63_spill] sm:$0xff]  ;;  %v14794_v49 = vld [vmem:[#allocation54_spill] sm:$0xff]  ;;  %v14800_v47 = vld [vmem:[#allocation12_spill] sm:$0xff] }
 0x3d1   : > { %2743 = vrot.lane.b32.xlu0 %v2677_v26, %s9374_s26  ;;  %2739 = vrot.lane.b32.xlu1 %v2675_v18, %s9374_s26  ;;  %v2281_v45 = vadd.f32 %v14778_v8, %v2151_v42  ;;  %v2414_v35 = vadd.f32 %v14779_v22, %v2280_v1  ;;  %v14789_v26 = vld [vmem:[#allocation64_spill] sm:$0xff]  ;;  %v2311_v31 = vsel %vm1363_vm6, %v2309_v44, %v2310_v5  ;;  %v14790_v1 = vld [vmem:[#allocation58_spill] sm:$0xff]  ;;  %v2445_v53 = vrot.slane %v10793_v12, 2 }
 0x3d2   : > { %v2282_v18 = vadd.f32 %v14789_v26, %v2152_v39  ;;  %v2020_v60 = vadd.f32 %v14790_v1, %v1886_v56  ;;  %v14791_v42 = vld [vmem:[#allocation70_spill] sm:$0xff]  ;;  %v2021_v7 = vadd.f32 %v14792_v29, %v1887_v13  ;;  %v1758_v8 = vadd.f32 %v14794_v49, %v1549_v15  ;;  %v14798_v39 = vld [vmem:[#allocation69_spill] sm:$0xff]  ;;  %v14801_v13 = vld [vmem:[#allocation71_spill] sm:$0xff] }
 0x3d3   : > { %v1838_v34 = vpop.permute.xlu1 %1837  ;;  %v1710_v54 = vpop.permute.xlu0 %1709  ;;  %v2415_v14 = vadd.f32 %v14781_v57, %v2281_v45  ;;  %v2547_v63 = vadd.f32 %v14785_v28, %v2414_v35  ;;  %v14795_v35 = vld [vmem:[#allocation73_spill] sm:$0xff]  ;;  %v14796_v57 = vld [vmem:[#allocation67_spill] sm:$0xff]  ;;  %v14797_v27 = vld [vmem:[#allocation14_spill] sm:$0xff]  ;;  %v1550_v28 = vadd.f32 %v14801_v13, %v14800_v47  ;;  %v2443_v11 = vrot.slane %v10755_v52, 2 }
 0x3d4   : > { %v10773_v30 = vadd.f32 %v1838_v34, %v10693_v37  ;;  %v14788_v37 = vld [vmem:[#allocation61_spill] sm:$0xff]  ;;  %v2416_v41 = vadd.f32 %v14791_v42, %v2282_v18  ;;  %v2153_v3 = vadd.f32 %v14793_v38, %v2020_v60  ;;  %v2154_v34 = vadd.f32 %v14795_v35, %v2021_v7  ;;  %v14805_v26 = vld [vmem:[#allocation86_spill] sm:$0xff]  ;;  %v14806_v60 = vld [vmem:[#allocation76_spill] sm:$0xff] }
 0x3d5   : > { %v2548_v17 = vadd.f32 %v14788_v37, %v2415_v14  ;;  %v10800_v9 = vadd.f32 %v10706_v61, %v2547_v63  ;;  %v1888_v14 = vadd.f32 %v14796_v57, %v1758_v8  ;;  %v14802_v63 = vld [vmem:[#allocation80_spill] sm:$0xff] }
 0x3d6   : > { %2741 = vrot.lane.b32.xlu2 %v2676_v50, %s9374_s26  ;;  %v1551_v50 = vadd.f32 %v14798_v39, %v14797_v27  ;;  %v2549_v56 = vadd.f32 %v14799_v21, %v2416_v41  ;;  %v2284_v43 = vadd.f32 %v14802_v63, %v2154_v34  ;;  %v14807_v41 = vld [vmem:[#allocation81_spill] sm:$0xff]  ;;  %v14808_v38 = vld [vmem:[#allocation60_spill] sm:$0xff]  ;;  %v14818_v63 = vld [vmem:[#allocation38_spill] sm:$0xff] }
 0x3d7   : > { %v2584_v36 = vadd.f32 %v10706_v61, %v2548_v17  ;;  %v14804_v17 = vld [vmem:[#allocation20_spill] sm:$0xff]  ;;  %v2283_v49 = vadd.f32 %v14808_v38, %v2153_v3  ;;  %vm2615_vm12 = vcmp.gt.f32.partialorder %v10800_v9, 0.0 }
 0x3d8   : > { %v10786_v40 = vpop.permute.xlu2 %1502  ;;  %v1552_v18 = vadd.f32 %v14805_v26, %v14804_v17  ;;  %v1760_v42 = vadd.f32 %v14806_v60, %v1551_v50  ;;  %v2418_v29 = vadd.f32 %v14807_v41, %v2284_v43  ;;  %v14809_v8 = vld [vmem:[#allocation68_spill] sm:$0xff]  ;;  %v14820_v17 = vld [vmem:[#allocation79_spill] sm:$0xff] }
 0x3d9   : > { %2240 = vrot.lane.b32.xlu1 %v10716_v59, %s14594_s15  ;;  %2374 = vrot.lane.b32.xlu0 %v2311_v31, %s14591_s16  ;;  %v2678_v31 = vsel %vm2614_vm10, %v2582_v2, %v2646_v62  ;;  %v2648_v1 = vmul.f32 0.2, %v2584_v36  ;;  %vm2616_vm11 = vcmp.gt.f32.partialorder %v2584_v36, 0.0  ;;  %v2647_v2 = vmul.f32 0.2, %v10800_v9  ;;  %v14811_v34 = vld [vmem:[#allocation88_spill] sm:$0xff] }
 0x3da   : > { %v10836_v62 = vadd.f32 %v10706_v61, %v2549_v56  ;;  %v14812_v3 = vld [vmem:[#allocation72_spill] sm:$0xff]  ;;  %v14816_v56 = vld [vmem:[#allocation75_spill] sm:$0xff]  ;;  %v2417_v26 = vadd.f32 %v14820_v17, %v2283_v49 }
 0x3db   : > { %v2363_v45 = vpop.permute.xlu0 %2362  ;;  %v1501_v22 = vpop.permute.xlu1 %1500  ;;  %v2680_v21 = vsel %vm2616_vm11, %v2584_v36, %v2648_v1  ;;  %v14817_v13 = vld [vmem:[#allocation84_spill] sm:$0xff]  ;;  %v14823_v36 = vld [vmem:[#allocation95_spill] sm:$0xff] }
 0x3dc   : > { %v2434_v6 = vadd.f32 %v2363_v45, %v10740_v48  ;;  %v1568_v44 = vadd.f32 %v1501_v22, %v10510_v0  ;;  %v14803_v48 = vld [vmem:[#allocation74_spill] sm:$0xff]  ;;  %v1759_v45 = vadd.f32 %v14809_v8, %v1550_v28  ;;  %v14810_v22 = vld [vmem:[#allocation83_spill] sm:$0xff]  ;;  %v14819_v43 = vld [vmem:[#allocation96_spill] sm:$0xff]  ;;  %vm2617_vm13 = vcmp.gt.f32.partialorder %v10836_v62, 0.0 }
 0x3dd   : > { %v2022_v37 = vadd.f32 %v14803_v48, %v1888_v14  ;;  %v1890_v35 = vadd.f32 %v14810_v22, %v1760_v42  ;;  %v14815_v14 = vld [vmem:[#allocation78_spill] sm:$0xff]  ;;  %v1554_v48 = vadd.f32 %v14819_v43, %v14818_v63  ;;  %v14825_v8 = vld [vmem:[#allocation85_spill] sm:$0xff]  ;;  %v2649_v43 = vmul.f32 0.2, %v10836_v62 }
 0x3de   : > { %v10817_v15 = vadd.f32 %v2496_v25, %v2434_v6  ;;  %2242 = vrot.lane.b32.xlu2 %v10755_v52, %s14594_s15  ;;  %v1777_v0 = vadd.f32 %v1710_v54, %v1568_v44  ;;  %v2446_v25 = vsel %vm1572_vm5, %v2443_v11, %v2445_v53  ;;  %v2442_v54 = vrot.slane %v10716_v59, 2  ;;  %v14813_v59 = vld [vmem:[#allocation25_spill] sm:$0xff]  ;;  %v14814_v44 = vld [vmem:[#allocation92_spill] sm:$0xff]  ;;  %v14827_v22 = vld [vmem:[#allocation94_spill] sm:$0xff] }
 0x3df   : > { %v2551_v53 = vadd.f32 %v14811_v34, %v2418_v29  ;;  %v2155_v6 = vadd.f32 %v14812_v3, %v2022_v37  ;;  %v1553_v57 = vadd.f32 %v14814_v44, %v14813_v59  ;;  %v1761_v27 = vadd.f32 %v14815_v14, %v1552_v18  ;;  %v14822_v18 = vld [vmem:[#allocation97_spill] sm:$0xff] }
 0x3e0   : > { %v10827_v7 = vpop.permute.xlu2 %2104  ;;  %v1889_v47 = vadd.f32 %v14816_v56, %v1759_v45  ;;  %v2024_v28 = vadd.f32 %v14817_v13, %v1890_v35  ;;  %v2312_v37 = vrot.slane %v10793_v12, 1  ;;  %v2444_v41 = vsel %vm1572_vm5, %v2442_v54, %v2443_v11  ;;  %v14826_v45 = vld [vmem:[#allocation91_spill] sm:$0xff]  ;;  %v14828_v34 = vld [vmem:[#allocation101_spill] sm:$0xff]  ;;  %v14830_v54 = vld [vmem:[#allocation44_spill] sm:$0xff] }
 0x3e1   : > { %2745 = vrot.lane.b32.xlu1 %v2678_v31, %s9374_s26  ;;  %2509 = vrot.lane.b32.xlu0 %v2446_v25, %s14587_s18  ;;  %v14821_v31 = vld [vmem:[#allocation82_spill] sm:$0xff]  ;;  %v1891_v42 = vadd.f32 %v14822_v18, %v1761_v27  ;;  %v2587_v29 = vadd.f32 %v10706_v61, %v2551_v53  ;;  %v14824_v25 = vld [vmem:[#allocation100_spill] sm:$0xff]  ;;  %v1762_v49 = vadd.f32 %v14826_v45, %v1553_v57  ;;  %v14831_v53 = vld [vmem:[#allocation107_spill] sm:$0xff] }
 0x3e2   : > { %v2285_v60 = vadd.f32 %v14821_v31, %v2155_v6  ;;  %v2157_v1 = vadd.f32 %v14823_v36, %v2024_v28  ;;  %v1763_v38 = vadd.f32 %v14824_v25, %v1554_v48  ;;  %v2023_v12 = vadd.f32 %v14825_v8, %v1889_v47  ;;  %v14829_v6 = vld [vmem:[#allocation98_spill] sm:$0xff]  ;;  %v14832_v44 = vld [vmem:[#allocation113_spill] sm:$0xff]  ;;  %v14838_v18 = vld [vmem:[#allocation87_spill] sm:$0xff] }
 0x3e3   : > { %v10846_v39 = vpop.permute.xlu1 %2102  ;;  %v10848_v50 = vpop.permute.xlu0 %1971  ;;  %v2025_v3 = vadd.f32 %v14828_v34, %v1891_v42  ;;  %v1555_v59 = vadd.f32 %v14831_v53, %v14830_v54  ;;  %v2313_v56 = vsel %vm1363_vm6, %v2310_v5, %v2312_v37  ;;  %v14833_v13 = vld [vmem:[#allocation77_spill] sm:$0xff]  ;;  %v1569_v31 = vadd.f32 %v10786_v40, %v10531_v33  ;;  %v14836_v5 = vld [vmem:[#allocation90_spill] sm:$0xff]  ;;  %v14839_v42 = vld [vmem:[#allocation99_spill] sm:$0xff] }
 0x3e4   : > { %v2419_v35 = vadd.f32 %v14827_v22, %v2285_v60  ;;  %v2287_v11 = vadd.f32 %v14829_v6, %v2157_v1  ;;  %v1893_v14 = vadd.f32 %v14832_v44, %v1763_v38  ;;  %v2550_v47 = vadd.f32 %v14833_v13, %v2417_v26  ;;  %v14834_v28 = vld [vmem:[#allocation89_spill] sm:$0xff]  ;;  %v14841_v38 = vld [vmem:[#allocation102_spill] sm:$0xff]  ;;  %v14843_v22 = vld [vmem:[#allocation103_spill] sm:$0xff] }
 0x3e5   : > { %v2156_v57 = vadd.f32 %v14834_v28, %v2023_v12  ;;  %v14835_v48 = vld [vmem:[#allocation105_spill] sm:$0xff]  ;;  %vm2619_vm14 = vcmp.gt.f32.partialorder %v2587_v29, 0.0  ;;  %v2651_v52 = vmul.f32 0.2, %v2587_v29  ;;  %v1764_v8 = vadd.f32 %v14841_v38, %v1555_v59  ;;  %v14842_v12 = vld [vmem:[#allocation111_spill] sm:$0xff]  ;;  %v14847_v44 = vld [vmem:[#allocation118_spill] sm:$0xff] }
 0x3e6   : > { %2507 = vrot.lane.b32.xlu2 %v2444_v41, %s14587_s18  ;;  %v2421_v17 = vadd.f32 %v14835_v48, %v2287_v11  ;;  %v14837_v26 = vld [vmem:[#allocation93_spill] sm:$0xff]  ;;  %v2158_v41 = vadd.f32 %v14839_v42, %v2025_v3  ;;  %v2027_v45 = vadd.f32 %v14842_v12, %v1893_v14  ;;  %v2586_v40 = vadd.f32 %v10706_v61, %v2550_v47  ;;  %v14845_v3 = vld [vmem:[#allocation112_spill] sm:$0xff]  ;;  %v14846_v54 = vld [vmem:[#allocation115_spill] sm:$0xff] }
 0x3e7   : > { %v2286_v37 = vadd.f32 %v14836_v5, %v2156_v57  ;;  %v1892_v60 = vadd.f32 %v14837_v26, %v1762_v49  ;;  %v14840_v1 = vld [vmem:[#allocation109_spill] sm:$0xff]  ;;  %v14844_v49 = vld [vmem:[#allocation106_spill] sm:$0xff]  ;;  %v1894_v53 = vadd.f32 %v14846_v54, %v1764_v8  ;;  %v2683_v13 = vsel %vm2619_vm14, %v2587_v29, %v2651_v52  ;;  %v14850_v57 = vld [vmem:[#allocation119_spill] sm:$0xff] }
 0x3e8   : > { %v1840_v27 = vpop.permute.xlu2 %1839  ;;  %v2554_v25 = vadd.f32 %v14840_v1, %v2421_v17  ;;  %v2288_v11 = vadd.f32 %v14845_v3, %v2158_v41  ;;  %v2160_v59 = vadd.f32 %v14847_v44, %v2027_v45  ;;  %v2681_v47 = vsel %vm2617_vm13, %v10836_v62, %v2649_v43  ;;  %v14851_v17 = vld [vmem:[#allocation122_spill] sm:$0xff]  ;;  %v14853_v52 = vld [vmem:[#allocation123_spill] sm:$0xff]  ;;  %v14854_v62 = vld [vmem:[#allocation108_spill] sm:$0xff] }
 0x3e9   : > { %v10878_v63 = vadd.f32 %v1840_v27, %v1777_v0  ;;  %2749 = vrot.lane.b32.xlu0 %v2680_v21, %s9374_s26  ;;  %2376 = vrot.lane.b32.xlu1 %v2313_v56, %s14591_s16  ;;  %v2552_v0 = vadd.f32 %v14838_v18, %v2419_v35  ;;  %v2420_v34 = vadd.f32 %v14843_v22, %v2286_v37  ;;  %v14848_v27 = vld [vmem:[#allocation110_spill] sm:$0xff]  ;;  %v14852_v37 = vld [vmem:[#allocation104_spill] sm:$0xff]  ;;  %v2650_v29 = vmul.f32 0.2, %v2586_v40  ;;  %v14856_v1 = vld [vmem:[#allocation117_spill] sm:$0xff] }
 0x3ea   : > { %v2026_v6 = vadd.f32 %v14844_v49, %v1892_v60  ;;  %v2679_v35 = vsel %vm2615_vm12, %v10800_v9, %v2647_v2  ;;  %v2590_v9 = vadd.f32 %v10706_v61, %v2554_v25  ;;  %v14849_v2 = vld [vmem:[#allocation116_spill] sm:$0xff]  ;;  %v2028_v48 = vadd.f32 %v14850_v57, %v1894_v53  ;;  %v14855_v41 = vld [vmem:[#allocation114_spill] sm:$0xff]  ;;  %v14858_v22 = vld [vmem:[#allocation121_spill] sm:$0xff] }
 0x3eb   : > { %v1712_v21 = vpop.permute.xlu1 %1711  ;;  %v10890_v36 = vpop.permute.xlu0 %2232  ;;  %v2588_v14 = vadd.f32 %v10706_v61, %v2552_v0  ;;  %v2422_v28 = vadd.f32 %v14849_v2, %v2288_v11  ;;  %v2553_v26 = vadd.f32 %v14852_v37, %v2420_v34  ;;  %vm2618_vm15 = vcmp.gt.f32.partialorder %v2586_v40, 0.0  ;;  %v14857_v38 = vld [vmem:[#allocation126_spill] sm:$0xff]  ;;  %v14860_v53 = vld [vmem:[#allocation127_spill] sm:$0xff]  ;;  %v14862_v2 = vld [vmem:[#allocation125_spill] sm:$0xff] }
 0x3ec   : > { %v10895_v33 = vadd.f32 %v1712_v21, %v1569_v31  ;;  %v2159_v56 = vadd.f32 %v14848_v27, %v2026_v6  ;;  %v2290_v31 = vadd.f32 %v14851_v17, %v2160_v59  ;;  %v2161_v25 = vadd.f32 %v14856_v1, %v2028_v48  ;;  %v14859_v6 = vld [vmem:[#allocation124_spill] sm:$0xff] }
 0x3ed   : > { %vm2620_vm0 = vcmp.gt.f32.partialorder %v2588_v14, 0.0  ;;  %v2652_v42 = vmul.f32 0.2, %v2588_v14  ;;  %v2555_v21 = vadd.f32 %v14855_v41, %v2422_v28  ;;  %v2654_v12 = vmul.f32 0.2, %v2590_v9 }
 0x3ee   : > { %2747 = vrot.lane.b32.xlu2 %v2679_v35, %s9374_s26  ;;  %v2424_v60 = vadd.f32 %v14853_v52, %v2290_v31  ;;  %v2289_v43 = vadd.f32 %v14854_v62, %v2159_v56  ;;  %v2589_v45 = vadd.f32 %v10706_v61, %v2553_v26  ;;  %v2682_v49 = vsel %vm2618_vm15, %v2586_v40, %v2650_v29  ;;  %v14861_v56 = vld [vmem:[#allocation120_spill] sm:$0xff] }
 0x3ef   : > { %vm2622_vm2 = vcmp.gt.f32.partialorder %v2590_v9, 0.0  ;;  %v2291_v35 = vadd.f32 %v14859_v6, %v2161_v25  ;;  %v2684_v3 = vsel %vm2620_vm0, %v2588_v14, %v2652_v42  ;;  %v2591_v11 = vadd.f32 %v10706_v61, %v2555_v21 }
 0x3f0   : > { %v1714_v5 = vpop.permute.xlu2 %1713  ;;  %v2557_v8 = vadd.f32 %v14857_v38, %v2424_v60  ;;  %v2423_v34 = vadd.f32 %v14858_v22, %v2289_v43  ;;  %v2686_v27 = vsel %vm2622_vm2, %v2590_v9, %v2654_v12  ;;  %v2653_v40 = vmul.f32 0.2, %v2589_v45 }
 0x3f1   : > { %2755 = vrot.lane.b32.xlu0 %v2683_v13, %s9374_s26  ;;  %2751 = vrot.lane.b32.xlu1 %v2681_v47, %s9374_s26  ;;  %v2425_v44 = vadd.f32 %v14860_v53, %v2291_v35  ;;  %vm2621_vm7 = vcmp.gt.f32.partialorder %v2589_v45, 0.0  ;;  %v2655_v17 = vmul.f32 0.2, %v2591_v11  ;;  %vm2623_vm9 = vcmp.gt.f32.partialorder %v2591_v11, 0.0 }
 0x3f2   : > { %v2593_v54 = vadd.f32 %v10706_v61, %v2557_v8  ;;  %v2556_v13 = vadd.f32 %v14861_v56, %v2423_v34  ;;  %v2685_v9 = vsel %vm2621_vm7, %v2589_v45, %v2653_v40  ;;  %v2596_v29 = vadd.f32 %v10706_v61, %v10545_v16 }
 0x3f3   : > { %v10922_v18 = vpop.permute.xlu1 %2364  ;;  %v10924_v0 = vpop.permute.xlu0 %1841  ;;  %v2558_v28 = vadd.f32 %v14862_v2, %v2425_v44  ;;  %v2595_v21 = vadd.f32 %v10706_v61, %v10525_v23  ;;  %v2597_v1 = vadd.f32 %v10706_v61, %v10567_v46  ;;  %v2599_v25 = vadd.f32 %v10706_v61, %v10618_v32 }
 0x3f4   : > { %v2657_v48 = vmul.f32 0.2, %v2593_v54  ;;  %v2592_v31 = vadd.f32 %v10706_v61, %v2556_v13  ;;  %vm2625_vm8 = vcmp.gt.f32.partialorder %v2593_v54, 0.0  ;;  %vm2628_vm11 = vcmp.gt.f32.partialorder %v2596_v29, 0.0 }
 0x3f5   : > { %v2594_v26 = vadd.f32 %v10706_v61, %v2558_v28  ;;  %v2659_v45 = vmul.f32 0.2, %v2595_v21  ;;  %vm2627_vm13 = vcmp.gt.f32.partialorder %v2595_v21, 0.0  ;;  %v2663_v34 = vmul.f32 0.2, %v2599_v25 }
 0x3f6   : > { %2753 = vrot.lane.b32.xlu2 %v2682_v49, %s9374_s26  ;;  %v2689_v60 = vsel %vm2625_vm8, %v2593_v54, %v2657_v48  ;;  %v2656_v62 = vmul.f32 0.2, %v2592_v31  ;;  %vm2624_vm10 = vcmp.gt.f32.partialorder %v2592_v31, 0.0  ;;  %v2661_v6 = vmul.f32 0.2, %v2597_v1 }
 0x3f7   : > { %v2658_v41 = vmul.f32 0.2, %v2594_v26  ;;  %vm2626_vm12 = vcmp.gt.f32.partialorder %v2594_v26, 0.0  ;;  %v2598_v46 = vadd.f32 %v10706_v61, %v10593_v55  ;;  %v2691_v35 = vsel %vm2627_vm13, %v2595_v21, %v2659_v45 }
 0x3f8   : > { %v10936_v59 = vpop.permute.xlu2 %2366  ;;  %v2688_v16 = vsel %vm2624_vm10, %v2592_v31, %v2656_v62  ;;  %vm2631_vm14 = vcmp.gt.f32.partialorder %v2599_v25, 0.0  ;;  %vm2629_vm15 = vcmp.gt.f32.partialorder %v2597_v1, 0.0  ;;  %v2172_v40 = vadd.f32 %v10846_v39, %v10750_v58 }
 0x3f9   : > { %2761 = vrot.lane.b32.xlu0 %v2686_v27, %s9374_s26  ;;  %2757 = vrot.lane.b32.xlu1 %v2684_v3, %s9374_s26  ;;  %v2690_v12 = vsel %vm2626_vm12, %v2594_v26, %v2658_v41  ;;  %v2600_v3 = vadd.f32 %v10706_v61, %v10637_v20  ;;  %v2695_v53 = vsel %vm2631_vm14, %v2599_v25, %v2663_v34  ;;  %v2662_v44 = vmul.f32 0.2, %v2598_v46 }
 0x3fa   : > { %v2693_v55 = vsel %vm2629_vm15, %v2597_v1, %v2661_v6  ;;  %vm2630_vm0 = vcmp.gt.f32.partialorder %v2598_v46, 0.0  ;;  %v2603_v28 = vadd.f32 %v10706_v61, %v10817_v15  ;;  %v2435_v58 = vadd.f32 %v10922_v18, %v10721_v10 }
 0x3fb   : > { %v10941_v47 = vpop.permute.xlu1 %2234  ;;  %v1505_v14 = vpop.permute.xlu0 %1504  ;;  %v2664_v20 = vmul.f32 0.2, %v2600_v3  ;;  %vm2632_vm2 = vcmp.gt.f32.partialorder %v2600_v3, 0.0  ;;  %vm2836_vm13 = vcmask 97312   ;;  %v1908_v34 = vadd.f32 %v10924_v0, %v10895_v33 }
 0x3fc   : > { %v1570_v57 = vadd.f32 %v1505_v14, %v10570_v19  ;;  %v2687_v19 = vsel %vm2623_vm9, %v2591_v11, %v2655_v17  ;;  %v2602_v11 = vadd.f32 %v10706_v61, %v10713_v24  ;;  %v2667_v26 = vmul.f32 0.2, %v2603_v28 }
 0x3fd   : > { %v2696_v2 = vsel %vm2632_vm2, %v2600_v3, %v2664_v20  ;;  %vm2635_vm9 = vcmp.gt.f32.partialorder %v2603_v28, 0.0 }
 0x3fe   : > { %2759 = vrot.lane.b32.xlu2 %v2685_v9, %s9374_s26  ;;  %v10947_v37 = vadd.f32 %v1714_v5, %v1570_v57  ;;  %v2660_v5 = vmul.f32 0.2, %v2596_v29  ;;  %v2666_v13 = vmul.f32 0.2, %v2602_v11  ;;  %vm2634_vm7 = vcmp.gt.f32.partialorder %v2602_v11, 0.0 }
 0x3ff   : > { %v2302_v57 = vadd.f32 %v10890_v36, %v2172_v40 }
 0x400   : > { %v10952_v52 = vpop.permute.xlu2 %1975  ;;  %v2692_v8 = vsel %vm2628_vm11, %v2596_v29, %v2660_v5  ;;  %v2698_v17 = vsel %vm2634_vm7, %v2602_v11, %v2666_v13 }
 0x401   : > { %2767 = vrot.lane.b32.xlu0 %v2689_v60, %s9374_s26  ;;  %2763 = vrot.lane.b32.xlu1 %v2687_v19, %s9374_s26  ;;  %v2436_v39 = vadd.f32 %v10936_v59, %v2302_v57  ;;  %v2699_v59 = vsel %vm2635_vm9, %v2603_v28, %v2667_v26 }
 0x403   : > { %v10956_v43 = vpop.permute.xlu1 %1973  ;;  %v10958_v42 = vpop.permute.xlu0 %2106 }
 0x406   : > { %2765 = vrot.lane.b32.xlu2 %v2688_v16, %s9374_s26 }
 0x408   : > { %v2502_v38 = vpop.permute.xlu2 %2501 }
 0x409   : > { %2773 = vrot.lane.b32.xlu0 %v2692_v8, %s9374_s26  ;;  %2769 = vrot.lane.b32.xlu1 %v2690_v12, %s9374_s26 }
 0x40b   : > { %v1716_v23 = vpop.permute.xlu0 %1715  ;;  %v1507_v22 = vpop.permute.xlu1 %1506 }
 0x40c   : > { %v1571_v49 = vadd.f32 %v1507_v22, %v10581_v51  ;;  %v2040_v51 = vadd.f32 %v10848_v50, %v10773_v30  ;;  %v2601_v30 = vadd.f32 %v10706_v61, %v10669_v4  ;;  %v2694_v50 = vsel %vm2630_vm0, %v2598_v46, %v2662_v44 }
 0x40e   : > { %2771 = vrot.lane.b32.xlu2 %v2691_v35, %s9374_s26  ;;  %v10973_v32 = vadd.f32 %v1716_v23, %v1571_v49  ;;  %v2173_v24 = vadd.f32 %v10827_v7, %v2040_v51  ;;  %v2665_v4 = vmul.f32 0.2, %v2601_v30  ;;  %vm2633_vm8 = vcmp.gt.f32.partialorder %v2601_v30, 0.0  ;;  %v846_v23 = vld [vmem:[#allocation2 + $0x238] sm:$0xff] }
 0x40f   : > { %9019 = vmatmul.msk.f32.vlgmr.msra.gmra.mxu1 %vm679_vm3, %v846_v23  ;;  %v2041_v49 = vadd.f32 %v10956_v43, %v10878_v63  ;;  %v2042_v35 = vadd.f32 %v10952_v52, %v1908_v34 }
 0x410   : > { %v10981_v54 = vpop.permute.xlu2 %2236  ;;  %v2303_v14 = vadd.f32 %v10941_v47, %v2173_v24  ;;  %v2697_v29 = vsel %vm2633_vm8, %v2601_v30, %v2665_v4 }
 0x411   : > { %2779 = vrot.lane.b32.xlu0 %v2695_v53, %s9374_s26  ;;  %2775 = vrot.lane.b32.xlu1 %v2693_v55, %s9374_s26  ;;  %v2174_v3 = vadd.f32 %v10958_v42, %v2041_v49 }
 0x413   : > { %v2369_v27 = vpop.permute.xlu0 %2368  ;;  %v10985_v56 = vpop.permute.xlu1 %2108  ;;  %v2304_v51 = vadd.f32 %v10981_v54, %v2174_v3 }
 0x414   : > { %v2437_v7 = vadd.f32 %v2369_v27, %v2303_v14  ;;  %v2175_v11 = vadd.f32 %v10985_v56, %v2042_v35 }
 0x416   : > { %2777 = vrot.lane.b32.xlu2 %v2694_v50, %s9374_s26  ;;  %v2570_v15 = vadd.f32 %v2502_v38, %v2437_v7 }
 0x418   : > { %v10997_v48 = vpop.permute.xlu2 %1845  ;;  %v2606_v62 = vadd.f32 %v10706_v61, %v2570_v15 }
 0x419   : > { %2785 = vrot.lane.b32.xlu0 %v2698_v17, %s9374_s26  ;;  %2781 = vrot.lane.b32.xlu1 %v2696_v2, %s9374_s26 }
 0x41a   : > { %v2670_v1 = vmul.f32 0.2, %v2606_v62  ;;  %vm2638_vm12 = vcmp.gt.f32.partialorder %v2606_v62, 0.0 }
 0x41b   : > { %v2498_v47 = vpop.permute.xlu0 %2497  ;;  %v2500_v31 = vpop.permute.xlu1 %2499 }
 0x41c   : > { %v2568_v9 = vadd.f32 %v2498_v47, %v2435_v58  ;;  %v2569_v36 = vadd.f32 %v2500_v31, %v2436_v39  ;;  %v2702_v8 = vsel %vm2638_vm12, %v2606_v62, %v2670_v1  ;;  %v1910_v58 = vadd.f32 %v10997_v48, %v10973_v32 }
 0x41e   : > { %v2604_v60 = vadd.f32 %v10706_v61, %v2568_v9  ;;  %v2605_v19 = vadd.f32 %v10706_v61, %v2569_v36  ;;  %2783 = vrot.lane.b32.xlu2 %v2697_v29, %s9374_s26 }
 0x420   : > { %v2669_v10 = vmul.f32 0.2, %v2605_v19  ;;  %v2111_v18 = vpop.permute.xlu2 %2110  ;;  %vm2637_vm10 = vcmp.gt.f32.partialorder %v2605_v19, 0.0  ;;  %v2668_v5 = vmul.f32 0.2, %v2604_v60  ;;  %vm2636_vm11 = vcmp.gt.f32.partialorder %v2604_v60, 0.0 }
 0x421   : > { %2787 = vrot.lane.b32.xlu1 %v2699_v59, %s9374_s26 }
 0x422   : > { %v2701_v41 = vsel %vm2637_vm10, %v2605_v19, %v2669_v10  ;;  %v2700_v25 = vsel %vm2636_vm11, %v2604_v60, %v2668_v5 }
 0x423   : > { %v1844_v21 = vpop.permute.xlu1 %1843  ;;  %v2239_v16 = vpop.permute.xlu0 %2238  ;;  %2791 = vrot.lane.b32.xlu0 %v2701_v41, %s9374_s26 }
 0x424   : > { %v2305_v53 = vadd.f32 %v2239_v16, %v2175_v11  ;;  %v1909_v40 = vadd.f32 %v1844_v21, %v10947_v37 }
 0x426   : > { %2789 = vrot.lane.b32.xlu2 %v2700_v25, %s9374_s26 }
 0x428   : > { %v2373_v38 = vpop.permute.xlu2 %2372 }
 0x429   : > { %2793 = vrot.lane.b32.xlu1 %v2702_v8, %s9374_s26  ;;  %v2439_v44 = vadd.f32 %v2373_v38, %v2305_v53 }
 0x42b   : > { %v2371_v12 = vpop.permute.xlu1 %2370  ;;  %v1978_v45 = vpop.permute.xlu0 %1977 }
 0x42c   : > { %v2438_v27 = vadd.f32 %v2371_v12, %v2304_v51  ;;  %v2043_v14 = vadd.f32 %v1978_v45, %v1909_v40 }
 0x42e   : > { %v2176_v28 = vadd.f32 %v2111_v18, %v2043_v14 }
 0x430   : > { %v2742_v22 = vpop.permute.xlu2 %2741 }
 0x431   : > { %2838 = vst.msk [vmem:[#allocation2 + $0x29] sm:$0xff] %vm2836_vm13, %v2742_v22 }
 0x433   : > { %v2113_v6 = vpop.permute.xlu0 %2112  ;;  %v1980_v46 = vpop.permute.xlu1 %1979 }
 0x434   : > { %v2044_v37 = vadd.f32 %v1980_v46, %v1910_v58 }
 0x436   : > { %v2177_v26 = vadd.f32 %v2113_v6, %v2044_v37 }
 0x438   : > { %v2243_v55 = vpop.permute.xlu2 %2242 }
 0x439   : > { %v2307_v32 = vadd.f32 %v2243_v55, %v2177_v26 }
 0x43b   : > { %v2504_v20 = vpop.permute.xlu0 %2503  ;;  %v2506_v13 = vpop.permute.xlu1 %2505 }
 0x43c   : > { %v2571_v33 = vadd.f32 %v2504_v20, %v2438_v27  ;;  %v2572_v0 = vadd.f32 %v2506_v13, %v2439_v44 }
 0x43e   : > { %v2607_v63 = vadd.f32 %v10706_v61, %v2571_v33  ;;  %v2608_v43 = vadd.f32 %v10706_v61, %v2572_v0 }
 0x440   : > { %v2671_v24 = vmul.f32 0.2, %v2607_v63  ;;  %v2672_v52 = vmul.f32 0.2, %v2608_v43  ;;  %v2508_v30 = vpop.permute.xlu2 %2507  ;;  %vm2639_vm14 = vcmp.gt.f32.partialorder %v2607_v63, 0.0  ;;  %vm2640_vm15 = vcmp.gt.f32.partialorder %v2608_v43, 0.0 }
 0x442   : > { %v2703_v42 = vsel %vm2639_vm14, %v2607_v63, %v2671_v24  ;;  %v2704_v56 = vsel %vm2640_vm15, %v2608_v43, %v2672_v52 }
 0x443   : > { %v2744_v54 = vpop.permute.xlu0 %2743  ;;  %v2740_v50 = vpop.permute.xlu1 %2739  ;;  %2795 = vrot.lane.b32.xlu2 %v2703_v42, %s9374_s26  ;;  %2797 = vrot.lane.b32.xlu0 %v2704_v56, %s9374_s26 }
 0x444   : > { %2839 = vst.msk [vmem:[#allocation2 + $0x41] sm:$0xff] %vm2836_vm13, %v2744_v54 }
 0x445   : > { %2837 = vst.msk [vmem:[#allocation2 + $0x21] sm:$0xff] %vm2836_vm13, %v2740_v50 }
 0x448   : > { %v2748_v2 = vpop.permute.xlu2 %2747 }
 0x449   : > { %2841 = vst.msk [vmem:[#allocation2 + $0x61] sm:$0xff] %vm2836_vm13, %v2748_v2 }
 0x44b   : > { %v2241_v57 = vpop.permute.xlu1 %2240  ;;  %v2375_v7 = vpop.permute.xlu0 %2374 }
 0x44c   : > { %v2306_v17 = vadd.f32 %v2241_v57, %v2176_v28 }
 0x44e   : > { %v2440_v4 = vadd.f32 %v2375_v7, %v2306_v17 }
 0x450   : > { %v2573_v39 = vadd.f32 %v2508_v30, %v2440_v4  ;;  %v2754_v47 = vpop.permute.xlu2 %2753 }
 0x451   : > { %2844 = vst.msk [vmem:[#allocation2 + $0x89] sm:$0xff] %vm2836_vm13, %v2754_v47 }
 0x452   : > { %v2609_v31 = vadd.f32 %v10706_v61, %v2573_v39 }
 0x453   : > { %v2746_v15 = vpop.permute.xlu1 %2745  ;;  %v2510_v9 = vpop.permute.xlu0 %2509 }
 0x454   : > { %2840 = vst.msk [vmem:[#allocation2 + $0x49] sm:$0xff] %vm2836_vm13, %v2746_v15  ;;  %vm2641_vm0 = vcmp.gt.f32.partialorder %v2609_v31, 0.0  ;;  %v2673_v36 = vmul.f32 0.2, %v2609_v31 }
 0x456   : > { %v2705_v29 = vsel %vm2641_vm0, %v2609_v31, %v2673_v36 }
 0x457   : > { %2799 = vrot.lane.b32.xlu1 %v2705_v29, %s9374_s26 }
 0x458   : > { %v2760_v60 = vpop.permute.xlu2 %2759 }
 0x459   : > { %2847 = vst.msk [vmem:[#allocation2 + $0xc1] sm:$0xff] %vm2836_vm13, %v2760_v60 }
 0x45b   : > { %v2750_v48 = vpop.permute.xlu0 %2749  ;;  %v2377_v19 = vpop.permute.xlu1 %2376 }
 0x45c   : > { %2842 = vst.msk [vmem:[#allocation2 + $0x69] sm:$0xff] %vm2836_vm13, %v2750_v48  ;;  %v2441_v62 = vadd.f32 %v2377_v19, %v2307_v32 }
 0x45e   : > { %v2574_v10 = vadd.f32 %v2510_v9, %v2441_v62 }
 0x460   : > { %v2610_v18 = vadd.f32 %v10706_v61, %v2574_v10  ;;  %v2766_v59 = vpop.permute.xlu2 %2765 }
 0x461   : > { %2850 = vst.msk [vmem:[#allocation2 + $0xe9] sm:$0xff] %vm2836_vm13, %v2766_v59 }
 0x462   : > { %vm2642_vm2 = vcmp.gt.f32.partialorder %v2610_v18, 0.0  ;;  %v2674_v5 = vmul.f32 0.2, %v2610_v18 }
 0x463   : > { %v2756_v41 = vpop.permute.xlu0 %2755  ;;  %v2752_v21 = vpop.permute.xlu1 %2751 }
 0x464   : > { %2845 = vst.msk [vmem:[#allocation2 + $0xa1] sm:$0xff] %vm2836_vm13, %v2756_v41  ;;  %v2706_v16 = vsel %vm2642_vm2, %v2610_v18, %v2674_v5 }
 0x465   : > { %2843 = vst.msk [vmem:[#allocation2 + $0x81] sm:$0xff] %vm2836_vm13, %v2752_v21  ;;  %2801 = vrot.lane.b32.xlu2 %v2706_v16, %s9374_s26 }
 0x468   : > { %v2772_v1 = vpop.permute.xlu2 %2771 }
 0x469   : > { %2853 = vst.msk [vmem:[#allocation2 + $0x121] sm:$0xff] %vm2836_vm13, %v2772_v1 }
 0x46b   : > { %v2762_v25 = vpop.permute.xlu0 %2761  ;;  %v2758_v38 = vpop.permute.xlu1 %2757 }
 0x46c   : > { %2848 = vst.msk [vmem:[#allocation2 + $0xc9] sm:$0xff] %vm2836_vm13, %v2762_v25 }
 0x46d   : > { %2846 = vst.msk [vmem:[#allocation2 + $0xa9] sm:$0xff] %vm2836_vm13, %v2758_v38 }
 0x470   : > { %v2778_v61 = vpop.permute.xlu2 %2777 }
 0x471   : > { %2856 = vst.msk [vmem:[#allocation2 + $0x149] sm:$0xff] %vm2836_vm13, %v2778_v61 }
 0x473   : > { %v2768_v8 = vpop.permute.xlu0 %2767  ;;  %v2764_v12 = vpop.permute.xlu1 %2763 }
 0x474   : > { %2851 = vst.msk [vmem:[#allocation2 + $0x101] sm:$0xff] %vm2836_vm13, %v2768_v8 }
 0x475   : > { %2849 = vst.msk [vmem:[#allocation2 + $0xe1] sm:$0xff] %vm2836_vm13, %v2764_v12 }
 0x478   : > { %v2784_v45 = vpop.permute.xlu2 %2783 }
 0x479   : > { %2859 = vst.msk [vmem:[#allocation2 + $0x181] sm:$0xff] %vm2836_vm13, %v2784_v45 }
 0x47b   : > { %v2774_v23 = vpop.permute.xlu0 %2773  ;;  %v2770_v22 = vpop.permute.xlu1 %2769 }
 0x47c   : > { %2854 = vst.msk [vmem:[#allocation2 + $0x129] sm:$0xff] %vm2836_vm13, %v2774_v23 }
 0x47d   : > { %2852 = vst.msk [vmem:[#allocation2 + $0x109] sm:$0xff] %vm2836_vm13, %v2770_v22 }
 0x480   : > { %v2790_v34 = vpop.permute.xlu2 %2789 }
 0x481   : > { %2862 = vst.msk [vmem:[#allocation2 + $0x1a9] sm:$0xff] %vm2836_vm13, %v2790_v34 }
 0x483   : > { %v2780_v49 = vpop.permute.xlu0 %2779  ;;  %v2776_v6 = vpop.permute.xlu1 %2775 }
 0x484   : > { %2857 = vst.msk [vmem:[#allocation2 + $0x161] sm:$0xff] %vm2836_vm13, %v2780_v49 }
 0x485   : > { %2855 = vst.msk [vmem:[#allocation2 + $0x141] sm:$0xff] %vm2836_vm13, %v2776_v6 }
 0x48b   : > { %v2786_v46 = vpop.permute.xlu0 %2785  ;;  %v2782_v35 = vpop.permute.xlu1 %2781 }
 0x48c   : > { %2860 = vst.msk [vmem:[#allocation2 + $0x189] sm:$0xff] %vm2836_vm13, %v2786_v46  ;;  %v1281_v55 = vpop.f32.mrf.mxu1 }
 0x48d   : > { %2858 = vst.msk [vmem:[#allocation2 + $0x169] sm:$0xff] %vm2836_vm13, %v2782_v35 }
 0x493   : > { %v2788_v3 = vpop.permute.xlu1 %2787 }
 0x494   : > { %2861 = vst.msk [vmem:[#allocation2 + $0x1a1] sm:$0xff] %vm2836_vm13, %v2788_v3 }
 0x495   : > { %v2792_v11 = vpop.permute.xlu0 %2791 }
 0x496   : > { %2863 = vst.msk [vmem:[#allocation2 + $0x1c1] sm:$0xff] %vm2836_vm13, %v2792_v11 }
 0x49b   : > { %v2794_v51 = vpop.permute.xlu1 %2793 }
 0x49c   : > { %2864 = vst.msk [vmem:[#allocation2 + $0x1c9] sm:$0xff] %vm2836_vm13, %v2794_v51 }
 0x49d   : > { %v2796_v53 = vpop.permute.xlu2 %2795 }
 0x49e   : > { %2865 = vst.msk [vmem:[#allocation2 + $0x1e1] sm:$0xff] %vm2836_vm13, %v2796_v53 }
 0x4b5   : > { %v2798_v44 = vpop.permute.xlu0 %2797 }
 0x4b6   : > { %2866 = vst.msk [vmem:[#allocation2 + $0x1e9] sm:$0xff] %vm2836_vm13, %v2798_v44 }
 0x4bf   : > { %v2802_v27 = vpop.permute.xlu2 %2801 }
 0x4c0   : > { %2868 = vst.msk [vmem:[#allocation2 + $0x209] sm:$0xff] %vm2836_vm13, %v2802_v27 }
 0x4c6   : > { %2871 = sbr.rel (%p8944_p12) target bundleno = 1236 (0x4d4), region = 92 }
 0x4c9   : > { %v2800_v20 = vpop.permute.xlu1 %2799 }
 0x4ca   : > { %2867 = vst.msk [vmem:[#allocation2 + $0x201] sm:$0xff] %vm2836_vm13, %v2800_v20 }
 0x4cb   : > { %v9375_v13 = vmov 0.0  }
 0x4cc   : > { %2872 = vst.msk [vmem:[#allocation2 + $0x21] sm:$0xff] %vm2836_vm13, %v9375_v13 }
 0x4cd   : > { %2873 = vst.msk [vmem:[#allocation2 + $0x29] sm:$0xff] %vm2836_vm13, %v9375_v13 }
 0x4ce   : > { %2874 = vst.msk [vmem:[#allocation2 + $0x41] sm:$0xff] %vm2836_vm13, %v9375_v13 }
 0x4cf   : > { %2875 = vst.msk [vmem:[#allocation2 + $0x49] sm:$0xff] %vm2836_vm13, %v9375_v13 }
 0x4d0   : > { %2876 = vst.msk [vmem:[#allocation2 + $0x61] sm:$0xff] %vm2836_vm13, %v9375_v13 }
 0x4d1   : > { %2877 = vst.msk [vmem:[#allocation2 + $0x69] sm:$0xff] %vm2836_vm13, %v9375_v13 }
 0x4d2   : > { %2878 = vst.msk [vmem:[#allocation2 + $0x81] sm:$0xff] %vm2836_vm13, %v9375_v13 }
 0x4d3   : > { %2879 = vst.msk [vmem:[#allocation2 + $0x89] sm:$0xff] %vm2836_vm13, %v9375_v13 }
 0x4d4 PF: > { %2882 = sbr.rel (%p8946_p0) target bundleno = 1250 (0x4e2), region = 96 }
 0x4d9   : > { %v9376_v33 = vmov 0.0  }
 0x4da   : > { %2884 = vst.msk [vmem:[#allocation2 + $0x1a1] sm:$0xff] %vm2836_vm13, %v9376_v33 }
 0x4db   : > { %2885 = vst.msk [vmem:[#allocation2 + $0x1a9] sm:$0xff] %vm2836_vm13, %v9376_v33 }
 0x4dc   : > { %2886 = vst.msk [vmem:[#allocation2 + $0x1c1] sm:$0xff] %vm2836_vm13, %v9376_v33 }
 0x4dd   : > { %2887 = vst.msk [vmem:[#allocation2 + $0x1c9] sm:$0xff] %vm2836_vm13, %v9376_v33 }
 0x4de   : > { %2888 = vst.msk [vmem:[#allocation2 + $0x1e1] sm:$0xff] %vm2836_vm13, %v9376_v33 }
 0x4df   : > { %2889 = vst.msk [vmem:[#allocation2 + $0x1e9] sm:$0xff] %vm2836_vm13, %v9376_v33 }
 0x4e0   : > { %2890 = vst.msk [vmem:[#allocation2 + $0x201] sm:$0xff] %vm2836_vm13, %v9376_v33 }
 0x4e1   : > { %2891 = vst.msk [vmem:[#allocation2 + $0x209] sm:$0xff] %vm2836_vm13, %v9376_v33 }
 0x4e2 PF: > { %v2957_v0 = vld [vmem:[%s14566_s5 + $0x8] sm:$0xf]  ;;  %v2956_v63 = vld [vmem:[%s14566_s5] sm:$0xff]  ;;  %vm2958_vm7 = vcmask 97280   ;;  %v2894_v52 = vld [vmem:[#allocation2 + $0x30] sm:$0xff]  ;;  %s14863_s18 = smov 64  }
 0x4e3   : > { %9022 = vmatpush.msk.msrb.mxu1 %vm1064_vm4, %v2957_v0  ;;  %v2892_v43 = vld [vmem:[#allocation2 + $0x20] sm:$0xff]  ;;  %v2893_v24 = vld [vmem:[#allocation2 + $0x28] sm:$0xff]  ;;  %v2895_v30 = vld [vmem:[#allocation2 + $0x38] sm:$0xff]  ;;  %s9377_s26 = smov 12   ;;  %vm4708_vm13 = vcmask 162912  }
 0x4e4   : > { %v2896_v42 = vld [vmem:[#allocation2 + $0x40] sm:$0xff]  ;;  %v2897_v56 = vld [vmem:[#allocation2 + $0x48] sm:$0xff]  ;;  %v2898_v54 = vld [vmem:[#allocation2 + $0x50] sm:$0xff] }
 0x4e5   : > { %3169 = vmatpush.msrb.mxu1 %v2956_v63  ;;  %v2899_v50 = vld [vmem:[#allocation2 + $0x58] sm:$0xff]  ;;  %v2900_v40 = vld [vmem:[#allocation2 + $0x60] sm:$0xff]  ;;  %v2901_v14 = vld [vmem:[#allocation2 + $0x68] sm:$0xff] }
 0x4e6   : > { %9023 = vmatmul.msk.f32.vlgmr.msrb.gmra.mxu1 %vm2958_vm7, %v2892_v43  ;;  %v2902_v2 = vld [vmem:[#allocation2 + $0x70] sm:$0xff]  ;;  %v2903_v28 = vld [vmem:[#allocation2 + $0x78] sm:$0xff]  ;;  %v2904_v57 = vld [vmem:[#allocation2 + $0x80] sm:$0xff] }
 0x4e7   : > { %v2905_v7 = vld [vmem:[#allocation2 + $0x88] sm:$0xff]  ;;  %v2906_v17 = vld [vmem:[#allocation2 + $0x90] sm:$0xff]  ;;  %v2907_v4 = vld [vmem:[#allocation2 + $0x98] sm:$0xff] }
 0x4e8   : > { %v2908_v39 = vld [vmem:[#allocation2 + $0xa0] sm:$0xff]  ;;  %v2909_v37 = vld [vmem:[#allocation2 + $0xa8] sm:$0xff]  ;;  %v2910_v32 = vld [vmem:[#allocation2 + $0xb0] sm:$0xff] }
 0x4e9   : > { %v2911_v59 = vld [vmem:[#allocation2 + $0xb8] sm:$0xff]  ;;  %v2912_v41 = vld [vmem:[#allocation2 + $0xc0] sm:$0xff]  ;;  %v2913_v25 = vld [vmem:[#allocation2 + $0xc8] sm:$0xff] }
 0x4ea   : > { %v2914_v22 = vld [vmem:[#allocation2 + $0xd0] sm:$0xff]  ;;  %v2915_v3 = vld [vmem:[#allocation2 + $0xd8] sm:$0xff]  ;;  %v2916_v27 = vld [vmem:[#allocation2 + $0xe0] sm:$0xff] }
 0x4eb   : > { %v2917_v0 = vld [vmem:[#allocation2 + $0xe8] sm:$0xff] }
 0x4ee   : > { %9024 = vmatmul.msk.f32.gmra.mxu1 %vm2958_vm7, %v2893_v24  ;;  %v2918_v24 = vld [vmem:[#allocation2 + $0xf0] sm:$0xff] }
 0x4f6   : > { %9025 = vmatmul.msk.f32.gmra.mxu1 %vm2958_vm7, %v2894_v52 }
 0x4fe   : > { %9026 = vmatmul.msk.f32.gmra.mxu1 %vm2958_vm7, %v2895_v30 }
 0x506   : > { %9027 = vmatmul.msk.f32.gmra.mxu1 %vm2958_vm7, %v2896_v42 }
 0x50e   : > { %9028 = vmatmul.msk.f32.gmra.mxu1 %vm2958_vm7, %v2897_v56 }
 0x516   : > { %9029 = vmatmul.msk.f32.gmra.mxu1 %vm2958_vm7, %v2898_v54 }
 0x51e   : > { %9030 = vmatmul.msk.f32.gmra.mxu1 %vm2958_vm7, %v2899_v50 }
 0x526   : > { %9031 = vmatmul.msk.f32.gmra.mxu1 %vm2958_vm7, %v2900_v40 }
 0x52e   : > { %9032 = vmatmul.msk.f32.gmra.mxu1 %vm2958_vm7, %v2901_v14 }
 0x536   : > { %9033 = vmatmul.msk.f32.gmra.mxu1 %vm2958_vm7, %v2902_v2  ;;  %v2919_v2 = vld [vmem:[#allocation2 + $0xf8] sm:$0xff] }
 0x53e   : > { %9034 = vmatmul.msk.f32.gmra.mxu1 %vm2958_vm7, %v2903_v28 }
 0x546   : > { %9035 = vmatmul.msk.f32.gmra.mxu1 %vm2958_vm7, %v2904_v57 }
 0x54e   : > { %9036 = vmatmul.msk.f32.gmra.mxu1 %vm2958_vm7, %v2905_v7 }
 0x556   : > { %9037 = vmatmul.msk.f32.gmra.mxu1 %vm2958_vm7, %v2906_v17 }
 0x55e   : > { %9038 = vmatmul.msk.f32.gmra.mxu1 %vm2958_vm7, %v2907_v4  ;;  %v2920_v4 = vld [vmem:[#allocation2 + $0x100] sm:$0xff] }
 0x563   : > { %v11107_v58 = vpop.f32.mrf.mxu1 }
 0x564   : > { %v3599_v31 = vrot.slane %v11107_v58, 2  ;;  %v3417_v9 = vrot.slane %v11107_v58, 1 }
 0x566   : > { %9039 = vmatmul.msk.f32.gmra.mxu1 %vm2958_vm7, %v2908_v39 }
 0x56b   : > { %v11110_v47 = vpop.f32.mrf.mxu1 }
 0x56c   : > { %v3600_v15 = vrot.slane %v11110_v47, 2  ;;  %v3418_v36 = vrot.slane %v11110_v47, 1 }
 0x56e   : > { %v3601_v26 = vsel %vm1572_vm5, %v3599_v31, %v3600_v15  ;;  %v3419_v29 = vsel %vm1363_vm6, %v3417_v9, %v3418_v36  ;;  %9040 = vmatmul.msk.f32.gmra.mxu1 %vm2958_vm7, %v2909_v37  ;;  %v2921_v9 = vld [vmem:[#allocation2 + $0x108] sm:$0xff] }
 0x56f   : > { %3669 = vrot.lane.b32.xlu1 %v3601_v26, %s9366_s17  ;;  %3487 = vrot.lane.b32.xlu0 %v3419_v29, %s9367_s14 }
 0x573   : > { %v3177_v60 = vpop.f32.mrf.mxu1 }
 0x574   : > { %v3602_v48 = vrot.slane %v3177_v60, 2  ;;  %v3420_v19 = vrot.slane %v3177_v60, 1 }
 0x576   : > { %v3603_v62 = vsel %vm1572_vm5, %v3600_v15, %v3602_v48  ;;  %v3421_v10 = vsel %vm1363_vm6, %v3418_v36, %v3420_v19  ;;  %9041 = vmatmul.msk.f32.gmra.mxu1 %vm2958_vm7, %v2910_v32  ;;  %v2922_v48 = vld [vmem:[#allocation2 + $0x110] sm:$0xff] }
 0x577   : > { %3671 = vrot.lane.b32.xlu2 %v3603_v62, %s9366_s17  ;;  %3489 = vrot.lane.b32.xlu0 %v3421_v10, %s9367_s14 }
 0x57b   : > { %v3180_v18 = vpop.f32.mrf.mxu1 }
 0x57e   : > { %9042 = vmatmul.msk.f32.gmra.mxu1 %vm2958_vm7, %v2911_v59 }
 0x583   : > { %v11127_v5 = vpop.f32.mrf.mxu1 }
 0x584   : > { %3783 = vrot.lane.b32.xlu2 %v11127_v5, %s14613_s19  ;;  %v3422_v16 = vrot.slane %v11127_v5, 1  ;;  %v3604_v8 = vrot.slane %v11127_v5, 2 }
 0x586   : > { %9043 = vmatmul.msk.f32.gmra.mxu1 %vm2958_vm7, %v2912_v41 }
 0x58b   : > { %v11132_v21 = vpop.f32.mrf.mxu1 }
 0x58c   : > { %3785 = vrot.lane.b32.xlu0 %v11132_v21, %s14613_s19  ;;  %v3423_v1 = vrot.slane %v11132_v21, 1  ;;  %v3605_v61 = vrot.slane %v11132_v21, 2 }
 0x58e   : > { %v3424_v38 = vsel %vm1363_vm6, %v3422_v16, %v3423_v1  ;;  %9044 = vmatmul.msk.f32.gmra.mxu1 %vm2958_vm7, %v2913_v25  ;;  %v3606_v45 = vsel %vm1572_vm5, %v3604_v8, %v3605_v61 }
 0x58f   : > { %3491 = vrot.lane.b32.xlu1 %v3424_v38, %s9367_s14 }
 0x593   : > { %v3188_v12 = vpop.f32.mrf.mxu1 }
 0x594   : > { %3673 = vrot.lane.b32.xlu0 %v3606_v45, %s9366_s17  ;;  %v3607_v23 = vrot.slane %v3188_v12, 2  ;;  %v3425_v49 = vrot.slane %v3188_v12, 1 }
 0x596   : > { %v3608_v34 = vsel %vm1572_vm5, %v3605_v61, %v3607_v23  ;;  %9045 = vmatmul.msk.f32.gmra.mxu1 %vm2958_vm7, %v2914_v22  ;;  %v3426_v46 = vsel %vm1363_vm6, %v3423_v1, %v3425_v49 }
 0x597   : > { %4018 = vrot.lane.b32.xlu1 %v3606_v45, %s14599_s24  ;;  %4020 = vrot.lane.b32.xlu2 %v3608_v34, %s14599_s24 }
 0x59b   : > { %v3191_v6 = vpop.f32.mrf.mxu1 }
 0x59c   : > { %3901 = vrot.lane.b32.xlu0 %v3424_v38, %s14601_s23  ;;  %v2923_v38 = vld [vmem:[#allocation2 + $0x118] sm:$0xff] }
 0x59e   : > { %9046 = vmatmul.msk.f32.gmra.mxu1 %vm2958_vm7, %v2915_v3  ;;  %v2924_v3 = vld [vmem:[#allocation2 + $0x120] sm:$0xff] }
 0x59f   : > { %3493 = vrot.lane.b32.xlu1 %v3426_v46, %s9367_s14 }
 0x5a3   : > { %v11152_v35 = vpop.f32.mrf.mxu1 }
 0x5a4   : > { %4132 = vrot.lane.b32.xlu2 %v11152_v35, %s14594_s15  ;;  %v3609_v51 = vrot.slane %v11152_v35, 2  ;;  %v3427_v55 = vrot.slane %v11152_v35, 1 }
 0x5a6   : > { %9047 = vmatmul.msk.f32.gmra.mxu1 %vm2958_vm7, %v2916_v27 }
 0x5a7   : > { %3675 = vrot.lane.b32.xlu1 %v3608_v34, %s9366_s17 }
 0x5ab   : > { %v11158_v11 = vpop.f32.mrf.mxu1 }
 0x5ac   : > { %4134 = vrot.lane.b32.xlu0 %v11158_v11, %s14594_s15  ;;  %3789 = vrot.lane.b32.xlu2 %v11158_v11, %s14613_s19  ;;  %v3610_v53 = vrot.slane %v11158_v11, 2  ;;  %v3428_v44 = vrot.slane %v11158_v11, 1 }
 0x5ae   : > { %v3611_v13 = vsel %vm1572_vm5, %v3609_v51, %v3610_v53  ;;  %v3429_v33 = vsel %vm1363_vm6, %v3427_v55, %v3428_v44  ;;  %9048 = vmatmul.msk.f32.gmra.mxu1 %vm2958_vm7, %v2917_v0 }
 0x5af   : > { %3903 = vrot.lane.b32.xlu1 %v3426_v46, %s14601_s23 }
 0x5b3   : > { %v3199_v20 = vpop.f32.mrf.mxu1 }
 0x5b4   : > { %4022 = vrot.lane.b32.xlu0 %v3611_v13, %s14599_s24  ;;  %3495 = vrot.lane.b32.xlu2 %v3429_v33, %s9367_s14  ;;  %v3612_v43 = vrot.slane %v3199_v20, 2  ;;  %v3430_v42 = vrot.slane %v3199_v20, 1 }
 0x5b6   : > { %9049 = vmatmul.msk.f32.gmra.mxu1 %vm2958_vm7, %v2918_v24  ;;  %v3613_v52 = vsel %vm1572_vm5, %v3610_v53, %v3612_v43  ;;  %v3431_v56 = vsel %vm1363_vm6, %v3428_v44, %v3430_v42  ;;  %v2925_v44 = vld [vmem:[#allocation2 + $0x128] sm:$0xff] }
 0x5b7   : > { %3787 = vrot.lane.b32.xlu1 %v11152_v35, %s14613_s19 }
 0x5bb   : > { %v3202_v63 = vpop.f32.mrf.mxu1 }
 0x5bc   : > { %4250 = vrot.lane.b32.xlu0 %v3429_v33, %s14591_s16  ;;  %3677 = vrot.lane.b32.xlu2 %v3611_v13, %s9366_s17 }
 0x5be   : > { %9050 = vmatmul.msk.f32.gmra.mxu1 %vm2958_vm7, %v2919_v2 }
 0x5bf   : > { %4367 = vrot.lane.b32.xlu1 %v3611_v13, %s14863_s18 }
 0x5c3   : > { %v11182_v30 = vpop.f32.mrf.mxu1 }
 0x5c4   : > { %3905 = vrot.lane.b32.xlu2 %v3429_v33, %s14601_s23  ;;  %3679 = vrot.lane.b32.xlu0 %v3613_v52, %s9366_s17  ;;  %v3432_v40 = vrot.slane %v11182_v30, 1  ;;  %v3614_v7 = vrot.slane %v11182_v30, 2 }
 0x5c6   : > { %9051 = vmatmul.msk.f32.gmra.mxu1 %vm2958_vm7, %v2920_v4 }
 0x5c7   : > { %4024 = vrot.lane.b32.xlu1 %v3613_v52, %s14599_s24 }
 0x5cb   : > { %v11188_v54 = vpop.f32.mrf.mxu1 }
 0x5cc   : > { %3907 = vrot.lane.b32.xlu0 %v3431_v56, %s14601_s23  ;;  %3497 = vrot.lane.b32.xlu2 %v3431_v56, %s9367_s14  ;;  %v3433_v14 = vrot.slane %v11188_v54, 1  ;;  %v3615_v17 = vrot.slane %v11188_v54, 2 }
 0x5ce   : > { %v3434_v28 = vsel %vm1363_vm6, %v3432_v40, %v3433_v14  ;;  %v3616_v39 = vsel %vm1572_vm5, %v3614_v7, %v3615_v17  ;;  %9052 = vmatmul.msk.f32.gmra.mxu1 %vm2958_vm7, %v2921_v9 }
 0x5cf   : > { %4252 = vrot.lane.b32.xlu1 %v3431_v56, %s14591_s16 }
 0x5d1   : > { %v11215_v31 = vpop.permute.xlu2 %3671 }
 0x5d3   : > { %v3210_v50 = vpop.f32.mrf.mxu1 }
 0x5d4   : > { %4369 = vrot.lane.b32.xlu2 %v3613_v52, %s14863_s18  ;;  %3791 = vrot.lane.b32.xlu0 %v11182_v30, %s14613_s19  ;;  %v3617_v15 = vrot.slane %v3210_v50, 2  ;;  %v3435_v60 = vrot.slane %v3210_v50, 1  ;;  %v2926_v52 = vld [vmem:[#allocation2 + $0x130] sm:$0xff] }
 0x5d6   : > { %v3618_v36 = vsel %vm1572_vm5, %v3615_v17, %v3617_v15  ;;  %9053 = vmatmul.msk.f32.gmra.mxu1 %vm2958_vm7, %v2922_v48  ;;  %v3436_v19 = vsel %vm1363_vm6, %v3433_v14, %v3435_v60 }
 0x5d7   : > { %4136 = vrot.lane.b32.xlu1 %v11182_v30, %s14594_s15 }
 0x5db   : > { %v3213_v57 = vpop.f32.mrf.mxu1 }
 0x5dc   : > { %4138 = vrot.lane.b32.xlu2 %v11188_v54, %s14594_s15  ;;  %3499 = vrot.lane.b32.xlu0 %v3434_v28, %s9367_s14 }
 0x5de   : > { %v11224_v29 = vpop.permute.xlu2 %3783  ;;  %9054 = vmatmul.msk.f32.gmra.mxu1 %vm2958_vm7, %v2923_v38 }
 0x5df   : > { %3793 = vrot.lane.b32.xlu1 %v11188_v54, %s14613_s19 }
 0x5e1   : > { %v11227_v32 = vpop.permute.xlu0 %3487  ;;  %v11236_v18 = vpop.permute.xlu1 %3669 }
 0x5e3   : > { %v11211_v37 = vpop.f32.mrf.mxu1 }
 0x5e4   : > { %4026 = vrot.lane.b32.xlu2 %v3616_v39, %s14599_s24  ;;  %4371 = vrot.lane.b32.xlu0 %v3616_v39, %s14863_s18  ;;  %v3619_v8 = vrot.slane %v11211_v37, 2  ;;  %v3437_v45 = vrot.slane %v11211_v37, 1 }
 0x5e6   : > { %9055 = vmatmul.msk.f32.gmra.mxu1 %vm2958_vm7, %v2924_v3 }
 0x5e7   : > { %3681 = vrot.lane.b32.xlu1 %v3616_v39, %s9366_s17 }
 0x5e9   : > { %v11238_v59 = vpop.permute.xlu0 %3489 }
 0x5eb   : > { %v11220_v26 = vpop.f32.mrf.mxu1 }
 0x5ec   : > { %4254 = vrot.lane.b32.xlu2 %v3434_v28, %s14591_s16  ;;  %4028 = vrot.lane.b32.xlu0 %v3618_v36, %s14599_s24  ;;  %v3620_v12 = vrot.slane %v11220_v26, 2  ;;  %v3438_v23 = vrot.slane %v11220_v26, 1 }
 0x5ee   : > { %v3621_v49 = vsel %vm1572_vm5, %v3619_v8, %v3620_v12  ;;  %v3439_v6 = vsel %vm1363_vm6, %v3437_v45, %v3438_v23  ;;  %9056 = vmatmul.msk.f32.gmra.mxu1 %vm2958_vm7, %v2925_v44 }
 0x5ef   : > { %3909 = vrot.lane.b32.xlu1 %v3434_v28, %s14601_s23 }
 0x5f1   : > { %v11233_v10 = vpop.permute.xlu2 %4020 }
 0x5f3   : > { %v3221_v62 = vpop.f32.mrf.mxu1 }
 0x5f4   : > { %3683 = vrot.lane.b32.xlu2 %v3618_v36, %s9366_s17  ;;  %4256 = vrot.lane.b32.xlu0 %v3436_v19, %s14591_s16  ;;  %v3440_v13 = vrot.slane %v3221_v62, 1  ;;  %v3622_v33 = vrot.slane %v3221_v62, 2  ;;  %v3571_v62 = vadd.f32 %v11227_v32, %v11107_v58 }
 0x5f6   : > { %v3623_v63 = vsel %vm1572_vm5, %v3620_v12, %v3622_v33  ;;  %v3441_v43 = vsel %vm1363_vm6, %v3438_v23, %v3440_v13  ;;  %9057 = vmatmul.msk.f32.gmra.mxu1 %vm2958_vm7, %v2926_v52  ;;  %v3753_v12 = vadd.f32 %v11236_v18, %v3571_v62 }
 0x5f7   : > { %3501 = vrot.lane.b32.xlu1 %v3436_v19, %s9367_s14 }
 0x5f8   : > { %v3867_v58 = vadd.f32 %v11224_v29, %v3753_v12 }
 0x5fb   : > { %v3224_v41 = vpop.f32.mrf.mxu1 }
 0x5fc   : > { %3911 = vrot.lane.b32.xlu2 %v3436_v19, %s14601_s23  ;;  %4140 = vrot.lane.b32.xlu0 %v11211_v37, %s14594_s15  ;;  %v2927_v41 = vld [vmem:[#allocation2 + $0x138] sm:$0xff] }
 0x5fe   : > { %v11243_v16 = vpop.permute.xlu2 %4132  ;;  %v11248_v25 = vpop.permute.xlu0 %3785  ;;  %9058 = vmatmul.msk.f32.gmra.mxu1 %vm2958_vm7, %v2927_v41 }
 0x5ff   : > { %4373 = vrot.lane.b32.xlu1 %v3618_v36, %s14863_s18 }
 0x601   : > { %v11246_v1 = vpop.permute.xlu1 %3491 }
 0x603   : > { %v11265_v34 = vpop.f32.mrf.mxu1 }
 0x604   : > { %3795 = vrot.lane.b32.xlu2 %v11211_v37, %s14613_s19  ;;  %3797 = vrot.lane.b32.xlu0 %v11220_v26, %s14613_s19  ;;  %v3624_v17 = vrot.slane %v11265_v34, 2  ;;  %v3442_v15 = vrot.slane %v11265_v34, 1 }
 0x606   : > { %v11255_v61 = vpop.permute.xlu2 %3789  ;;  %v11269_v46 = vpop.permute.xlu0 %3673 }
 0x607   : > { %4142 = vrot.lane.b32.xlu1 %v11220_v26, %s14594_s15 }
 0x609   : > { %v11263_v22 = vpop.permute.xlu1 %4018 }
 0x60b   : > { %v11279_v55 = vpop.f32.mrf.mxu1 }
 0x60c   : > { %3685 = vrot.lane.b32.xlu0 %v3621_v49, %s9366_s17  ;;  %3503 = vrot.lane.b32.xlu2 %v3439_v6, %s9367_s14  ;;  %v3625_v4 = vrot.slane %v11279_v55, 2  ;;  %v3443_v9 = vrot.slane %v11279_v55, 1 }
 0x60e   : > { %v11274_v51 = vpop.permute.xlu2 %3495  ;;  %v3902_v27 = vpop.permute.xlu0 %3901  ;;  %v3626_v36 = vsel %vm1572_vm5, %v3624_v17, %v3625_v4  ;;  %v3444_v19 = vsel %vm1363_vm6, %v3442_v15, %v3443_v9 }
 0x60f   : > { %4030 = vrot.lane.b32.xlu1 %v3621_v49, %s14599_s24 }
 0x611   : > { %v11277_v53 = vpop.permute.xlu1 %3493 }
 0x613   : > { %v11293_v24 = vpop.f32.mrf.mxu1 }
 0x614   : > { %3913 = vrot.lane.b32.xlu0 %v3439_v6, %s14601_s23  ;;  %4375 = vrot.lane.b32.xlu2 %v3621_v49, %s14863_s18  ;;  %v3627_v32 = vrot.slane %v11293_v24, 2  ;;  %v2928_v49 = vld [vmem:[#allocation2 + $0x140] sm:$0xff] }
 0x615   : > { %9059 = vmatmul.msk.f32.gmra.mxu1 %vm2958_vm7, %v2928_v49 }
 0x616   : > { %v11284_v20 = vpop.permute.xlu2 %3677  ;;  %v3628_v18 = vsel %vm1572_vm5, %v3625_v4, %v3627_v32 }
 0x617   : > { %4258 = vrot.lane.b32.xlu1 %v3439_v6, %s14591_s16  ;;  %v3985_v6 = vadd.f32 %v3902_v27, %v3867_v58  ;;  %v2929_v27 = vld [vmem:[#allocation2 + $0x148] sm:$0xff] }
 0x619   : > { %v11287_v0 = vpop.permute.xlu1 %3675  ;;  %v4102_v13 = vadd.f32 %v11263_v22, %v3985_v6 }
 0x61b   : > { %v3235_v40 = vpop.f32.mrf.mxu1  ;;  %v4216_v52 = vadd.f32 %v11243_v16, %v4102_v13  ;;  %v11384_v16 = vld [vmem:[%s14567_s6] ss:$0 sm:$0xff] }
 0x61c   : > { %4032 = vrot.lane.b32.xlu2 %v3623_v63, %s14599_s24  ;;  %3505 = vrot.lane.b32.xlu0 %v3441_v43, %s9367_s14 }
 0x61d   : > { %9060 = vmatmul.msk.f32.gmra.mxu1 %vm2958_vm7, %v2929_v27 }
 0x61e   : > { %v11295_v42 = vpop.permute.xlu0 %4134  ;;  %v11297_v56 = vpop.permute.xlu2 %3905 }
 0x61f   : > { %3687 = vrot.lane.b32.xlu1 %v3623_v63, %s9366_s17 }
 0x621   : > { %v11301_v50 = vpop.permute.xlu1 %3903 }
 0x623   : > { %v11338_v8 = vpop.f32.mrf.mxu1 }
 0x624   : > { %4260 = vrot.lane.b32.xlu2 %v3441_v43, %s14591_s16  ;;  %4377 = vrot.lane.b32.xlu0 %v3623_v63, %s14863_s18  ;;  %v3445_v63 = vrot.slane %v11293_v24, 1  ;;  %v3447_v12 = vrot.slane %v11338_v8, 1 }
 0x626   : > { %v11305_v14 = vpop.permute.xlu0 %4022  ;;  %v11307_v2 = vpop.permute.xlu2 %3497  ;;  %v3446_v22 = vsel %vm1363_vm6, %v3443_v9, %v3445_v63  ;;  %v2930_v9 = vld [vmem:[#allocation2 + $0x150] sm:$0xff] }
 0x627   : > { %3915 = vrot.lane.b32.xlu1 %v3441_v43, %s14601_s23  ;;  %v3572_v43 = vadd.f32 %v11238_v59, %v11110_v47  ;;  %9061 = vmatmul.msk.f32.gmra.mxu1 %vm2958_vm7, %v2930_v9 }
 0x629   : > { %v11310_v28 = vpop.permute.xlu1 %3787  ;;  %v3754_v24 = vadd.f32 %v11215_v31, %v3572_v43  ;;  %v2931_v43 = vld [vmem:[#allocation2 + $0x158] sm:$0xff] }
 0x62b   : > { %v11353_v44 = vpop.f32.mrf.mxu1  ;;  %v3868_v59 = vadd.f32 %v11248_v25, %v3754_v24  ;;  %v3573_v24 = vadd.f32 %v11246_v1, %v11127_v5 }
 0x62c   : > { %4144 = vrot.lane.b32.xlu2 %v11265_v34, %s14594_s15  ;;  %4146 = vrot.lane.b32.xlu0 %v11279_v55, %s14594_s15  ;;  %v3448_v58 = vrot.slane %v11353_v44, 1 }
 0x62e   : > { %v4251_v57 = vpop.permute.xlu0 %4250  ;;  %v11316_v7 = vpop.permute.xlu2 %4369 }
 0x62f   : > { %3799 = vrot.lane.b32.xlu1 %v11265_v34, %s14613_s19  ;;  %v4334_v17 = vadd.f32 %v4251_v57, %v4216_v52  ;;  %9062 = vmatmul.msk.f32.gmra.mxu1 %vm2958_vm7, %v2931_v43 }
 0x631   : > { %v4368_v39 = vpop.permute.xlu1 %4367 }
 0x632   : > { %v4451_v57 = vadd.f32 %v4368_v39, %v4334_v17 }
 0x633   : > { %v11374_v4 = vpop.f32.mrf.mxu1 }
 0x634   : > { %3801 = vrot.lane.b32.xlu2 %v11279_v55, %s14613_s19  ;;  %4034 = vrot.lane.b32.xlu0 %v3626_v36, %s14599_s24 }
 0x636   : > { %v11328_v60 = vpop.permute.xlu0 %3679  ;;  %v11330_v48 = vpop.permute.xlu2 %4138 }
 0x637   : > { %3507 = vrot.lane.b32.xlu1 %v3444_v19, %s9367_s14 }
 0x639   : > { %v11336_v38 = vpop.permute.xlu1 %4024 }
 0x63b   : > { %v3246_v62 = vpop.f32.mrf.mxu1 }
 0x63c   : > { %3689 = vrot.lane.b32.xlu2 %v3626_v36, %s9366_s17  ;;  %4262 = vrot.lane.b32.xlu0 %v3444_v19, %s14591_s16 }
 0x63e   : > { %v11344_v45 = vpop.permute.xlu0 %3907  ;;  %v11346_v23 = vpop.permute.xlu2 %4026 }
 0x63f   : > { %4379 = vrot.lane.b32.xlu1 %v3626_v36, %s14863_s18  ;;  %v3986_v36 = vadd.f32 %v11301_v50, %v3868_v59 }
 0x641   : > { %v4253_v3 = vpop.permute.xlu1 %4252  ;;  %v4103_v25 = vadd.f32 %v11233_v10, %v3986_v36  ;;  %v3755_v36 = vadd.f32 %v11269_v46, %v3573_v24  ;;  %v3632_v46 = vrot.slane %v11374_v4, 2  ;;  %v2934_v24 = vld [vmem:[#allocation2 + $0x170] sm:$0xff] }
 0x643   : > { %v4217_v32 = vadd.f32 %v11295_v42, %v4103_v25  ;;  %v3629_v42 = vrot.slane %v11338_v8, 2  ;;  %v3869_v62 = vadd.f32 %v11310_v28, %v3755_v36  ;;  %v3574_v36 = vadd.f32 %v11277_v53, %v11132_v21 }
 0x644   : > { %3917 = vrot.lane.b32.xlu2 %v3444_v19, %s14601_s23  ;;  %3691 = vrot.lane.b32.xlu0 %v3628_v18, %s9366_s17  ;;  %v4483_v19 = vadd.f32 %v11384_v16, %v4451_v57 }
 0x645   : > { %v4335_v6 = vadd.f32 %v4253_v3, %v4217_v32  ;;  %v3630_v3 = vrot.slane %v11353_v44, 2  ;;  %v3987_v5 = vadd.f32 %v11297_v56, %v3869_v62  ;;  %v2933_v32 = vld [vmem:[#allocation2 + $0x168] sm:$0xff]  ;;  %v3756_v62 = vadd.f32 %v11287_v0, %v3574_v36  ;;  %v2935_v0 = vld [vmem:[#allocation2 + $0x178] sm:$0xff] }
 0x646   : > { %v11358_v29 = vpop.permute.xlu0 %3791  ;;  %v11360_v33 = vpop.permute.xlu2 %4254  ;;  %v4539_v50 = vmul.f32 0.2, %v4483_v19  ;;  %vm4511_vm8 = vcmp.gt.f32.partialorder %v4483_v19, 0.0  ;;  %v3575_v36 = vadd.f32 %v11274_v51, %v11152_v35 }
 0x647   : > { %4036 = vrot.lane.b32.xlu1 %v3628_v18, %s14599_s24  ;;  %v4452_v27 = vadd.f32 %v11316_v7, %v4335_v6  ;;  %v11427_v7 = vpop.f32.mrf.mxu1  ;;  %v4104_v28 = vadd.f32 %v11305_v14, %v3987_v5  ;;  %v3633_v56 = vsel %vm1572_vm5, %v3630_v3, %v3632_v46 }
 0x648   : > { %v4567_v10 = vsel %vm4511_vm8, %v4483_v19, %v4539_v50  ;;  %v2932_v19 = vld [vmem:[#allocation2 + $0x160] sm:$0xff] }
 0x649   : > { %v11367_v40 = vpop.permute.xlu1 %4136  ;;  %v4484_v17 = vadd.f32 %v11384_v16, %v4452_v27  ;;  %9063 = vmatmul.msk.f32.gmra.mxu1 %vm2958_vm7, %v2932_v19  ;;  %v3450_v27 = vrot.slane %v11374_v4, 1 }
 0x64b   : > { %v4540_v9 = vmul.f32 0.2, %v4484_v17  ;;  %vm4512_vm9 = vcmp.gt.f32.partialorder %v4484_v17, 0.0 }
 0x64c   : > { %3919 = vrot.lane.b32.xlu0 %v3446_v22, %s14601_s23  ;;  %3509 = vrot.lane.b32.xlu2 %v3446_v22, %s9367_s14 }
 0x64d   : > { %v4568_v50 = vsel %vm4512_vm9, %v4484_v17, %v4540_v9 }
 0x64e   : > { %v11376_v15 = vpop.permute.xlu0 %3499  ;;  %v11378_v47 = vpop.permute.xlu2 %3683 }
 0x64f   : > { %4264 = vrot.lane.b32.xlu1 %v3446_v22, %s14591_s16  ;;  %v3631_v22 = vsel %vm1572_vm5, %v3629_v42, %v3630_v3  ;;  %v11450_v6 = vpop.f32.mrf.mxu1  ;;  %v4218_v42 = vadd.f32 %v11367_v40, %v4104_v28 }
 0x651   : > { %v11388_v31 = vpop.permute.xlu1 %3793  ;;  %9064 = vmatmul.msk.f32.gmra.mxu1 %vm2958_vm7, %v2933_v32  ;;  %v4336_v14 = vadd.f32 %v11360_v33, %v4218_v42  ;;  %v3870_v32 = vadd.f32 %v11255_v61, %v3756_v62  ;;  %v3634_v61 = vrot.slane %v11427_v7, 2  ;;  %v3452_v42 = vrot.slane %v11427_v7, 1 }
 0x653   : > { %v3988_v53 = vadd.f32 %v11344_v45, %v3870_v32  ;;  %v3635_v45 = vrot.slane %v11450_v6, 2 }
 0x654   : > { %4381 = vrot.lane.b32.xlu2 %v3628_v18, %s14863_s18  ;;  %3803 = vrot.lane.b32.xlu0 %v11338_v8, %s14613_s19  ;;  %v3449_v18 = vsel %vm1363_vm6, %v3447_v12, %v3448_v58 }
 0x655   : > { %v4105_v28 = vadd.f32 %v11336_v38, %v3988_v53  ;;  %v3636_v38 = vsel %vm1572_vm5, %v3634_v61, %v3635_v45 }
 0x656   : > { %v11396_v39 = vpop.permute.xlu0 %4371  ;;  %v11398_v41 = vpop.permute.xlu2 %3911 }
 0x657   : > { %4148 = vrot.lane.b32.xlu1 %v11338_v8, %s14594_s15  ;;  %v4453_v40 = vadd.f32 %v11396_v39, %v4336_v14 }
 0x659   : > { %v11405_v49 = vpop.permute.xlu1 %3681  ;;  %9065 = vmatmul.msk.f32.gmra.mxu1 %vm2958_vm7, %v2934_v24  ;;  %v4485_v3 = vadd.f32 %v11384_v16, %v4453_v40  ;;  %v4219_v24 = vadd.f32 %v11330_v48, %v4105_v28  ;;  %v3757_v48 = vadd.f32 %v11284_v20, %v3575_v36 }
 0x65b   : > { %v4541_v39 = vmul.f32 0.2, %v4485_v3  ;;  %vm4513_vm10 = vcmp.gt.f32.partialorder %v4485_v3, 0.0  ;;  %v3871_v32 = vadd.f32 %v11358_v29, %v3757_v48 }
 0x65c   : > { %4623 = vrot.lane.b32.xlu2 %v4567_v10, %s9377_s26  ;;  %3511 = vrot.lane.b32.xlu0 %v3449_v18, %s9367_s14 }
 0x65d   : > { %v4569_v46 = vsel %vm4513_vm10, %v4485_v3, %v4541_v39  ;;  %v2936_v3 = vld [vmem:[#allocation2 + $0x180] sm:$0xff] }
 0x65e   : > { %v11410_v13 = vpop.permute.xlu0 %4028  ;;  %v11412_v63 = vpop.permute.xlu2 %3795 }
 0x65f   : > { %3805 = vrot.lane.b32.xlu1 %v11353_v44, %s14613_s19 }
 0x661   : > { %v11420_v52 = vpop.permute.xlu1 %3909  ;;  %9066 = vmatmul.msk.f32.gmra.mxu1 %vm2958_vm7, %v2935_v0  ;;  %v2937_v0 = vld [vmem:[#allocation2 + $0x188] sm:$0xff] }
 0x662   : > { %v3989_v35 = vadd.f32 %v11420_v52, %v3871_v32 }
 0x664   : > { %4150 = vrot.lane.b32.xlu2 %v11353_v44, %s14594_s15  ;;  %4383 = vrot.lane.b32.xlu0 %v3631_v22, %s14863_s18  ;;  %v4106_v29 = vadd.f32 %v11346_v23, %v3989_v35  ;;  %v2938_v23 = vld [vmem:[#allocation2 + $0x190] sm:$0xff] }
 0x666   : > { %v11431_v59 = vpop.permute.xlu0 %4256  ;;  %v11433_v57 = vpop.permute.xlu2 %3503 }
 0x667   : > { %3693 = vrot.lane.b32.xlu1 %v3631_v22, %s9366_s17  ;;  %v4337_v39 = vadd.f32 %v11431_v59, %v4219_v24 }
 0x669   : > { %v11437_v25 = vpop.permute.xlu1 %3501  ;;  %9067 = vmatmul.msk.f32.gmra.mxu1 %vm2958_vm7, %v2936_v3 }
 0x66c   : > { %4038 = vrot.lane.b32.xlu2 %v3631_v22, %s14599_s24  ;;  %4625 = vrot.lane.b32.xlu0 %v4568_v50, %s9377_s26  ;;  %v3451_v22 = vsel %vm1363_vm6, %v3448_v58, %v3450_v27 }
 0x66e   : > { %v11444_v1 = vpop.permute.xlu0 %4140  ;;  %v11446_v12 = vpop.permute.xlu2 %4375 }
 0x66f   : > { %3921 = vrot.lane.b32.xlu1 %v3449_v18, %s14601_s23  ;;  %v4220_v61 = vadd.f32 %v11444_v1, %v4106_v29 }
 0x671   : > { %v11452_v10 = vpop.permute.xlu1 %4373  ;;  %9068 = vmatmul.msk.f32.gmra.mxu1 %vm2958_vm7, %v2937_v0  ;;  %v3576_v0 = vadd.f32 %v11307_v2, %v11158_v11 }
 0x673   : > { %v3758_v29 = vadd.f32 %v11328_v60, %v3576_v0 }
 0x674   : > { %4266 = vrot.lane.b32.xlu2 %v3449_v18, %s14591_s16  ;;  %4040 = vrot.lane.b32.xlu0 %v3633_v56, %s14599_s24  ;;  %v11472_v18 = vpop.f32.mrf.mxu1 }
 0x675   : > { %v3455_v28 = vrot.slane %v11472_v18, 1  ;;  %v3637_v24 = vrot.slane %v11472_v18, 2 }
 0x676   : > { %v11461_v43 = vpop.permute.xlu0 %3797  ;;  %v11463_v17 = vpop.permute.xlu2 %4032 }
 0x677   : > { %3513 = vrot.lane.b32.xlu1 %v3451_v22, %s9367_s14  ;;  %v3638_v48 = vsel %vm1572_vm5, %v3635_v45, %v3637_v24  ;;  %v3872_v24 = vadd.f32 %v11388_v31, %v3758_v29 }
 0x679   : > { %v11468_v4 = vpop.permute.xlu1 %4142  ;;  %9069 = vmatmul.msk.f32.gmra.mxu1 %vm2958_vm7, %v2938_v23  ;;  %v3990_v2 = vadd.f32 %v11398_v41, %v3872_v24  ;;  %v2941_v24 = vld [vmem:[#allocation2 + $0x1a8] sm:$0xff] }
 0x67c   : > { %3695 = vrot.lane.b32.xlu2 %v3633_v56, %s9366_s17  ;;  %4268 = vrot.lane.b32.xlu0 %v3451_v22, %s14591_s16  ;;  %v3257_v19 = vpop.f32.mrf.mxu1 }
 0x67e   : > { %v11477_v58 = vpop.permute.xlu0 %3685  ;;  %v11479_v9 = vpop.permute.xlu2 %4260 }
 0x67f   : > { %4385 = vrot.lane.b32.xlu1 %v3633_v56, %s14863_s18 }
 0x681   : > { %v11482_v33 = vpop.permute.xlu1 %4030 }
 0x684   : > { %3923 = vrot.lane.b32.xlu2 %v3451_v22, %s14601_s23  ;;  %4152 = vrot.lane.b32.xlu0 %v11427_v7, %s14594_s15  ;;  %v3453_v22 = vrot.slane %v11450_v6, 1  ;;  %v11536_v59 = vpop.f32.mrf.mxu1 }
 0x685   : > { %v3457_v60 = vrot.slane %v11536_v59, 1 }
 0x686   : > { %v11490_v50 = vpop.permute.xlu0 %3913  ;;  %v11492_v5 = vpop.permute.xlu2 %4144  ;;  %v3454_v40 = vsel %vm1363_vm6, %v3452_v42, %v3453_v22  ;;  %v3456_v36 = vsel %vm1363_vm6, %v3453_v22, %v3455_v28 }
 0x687   : > { %4627 = vrot.lane.b32.xlu1 %v4569_v46, %s9377_s26  ;;  %v4454_v46 = vadd.f32 %v11452_v10, %v4337_v39 }
 0x689   : > { %v4259_v21 = vpop.permute.xlu1 %4258  ;;  %v4486_v51 = vadd.f32 %v11384_v16, %v4454_v46 }
 0x68b   : > { %v4542_v52 = vmul.f32 0.2, %v4486_v51  ;;  %vm4514_vm11 = vcmp.gt.f32.partialorder %v4486_v51, 0.0 }
 0x68c   : > { %3807 = vrot.lane.b32.xlu2 %v11427_v7, %s14613_s19  ;;  %3809 = vrot.lane.b32.xlu0 %v11450_v6, %s14613_s19  ;;  %v11555_v39 = vpop.f32.mrf.mxu1 }
 0x68d   : > { %v4570_v3 = vsel %vm4514_vm11, %v4486_v51, %v4542_v52 }
 0x68e   : > { %v11503_v27 = vpop.permute.xlu0 %3505  ;;  %v11505_v56 = vpop.permute.xlu2 %3801 }
 0x68f   : > { %4154 = vrot.lane.b32.xlu1 %v11450_v6, %s14594_s15 }
 0x691   : > { %v11513_v14 = vpop.permute.xlu1 %3687 }
 0x694   : > { %3697 = vrot.lane.b32.xlu0 %v3636_v38, %s9366_s17  ;;  %3515 = vrot.lane.b32.xlu2 %v3454_v40, %s9367_s14  ;;  %v11575_v45 = vpop.f32.mrf.mxu1 }
 0x696   : > { %v11524_v19 = vpop.permute.xlu0 %4377  ;;  %v11526_v62 = vpop.permute.xlu2 %3689 }
 0x697   : > { %14864 = vst [vmem:[#allocation22_spill] sm:$0xff] %v11526_v62  ;;  %4042 = vrot.lane.b32.xlu1 %v3636_v38, %s14599_s24 }
 0x699   : > { %v11532_v53 = vpop.permute.xlu1 %3915 }
 0x69c   : > { %3925 = vrot.lane.b32.xlu0 %v3454_v40, %s14601_s23  ;;  %4387 = vrot.lane.b32.xlu2 %v3636_v38, %s14863_s18  ;;  %v4338_v38 = vadd.f32 %v4259_v21, %v4220_v61  ;;  %v3268_v61 = vpop.f32.mrf.mxu1 }
 0x69e   : > { %v11541_v20 = vpop.permute.xlu0 %4146  ;;  %v11543_v10 = vpop.permute.xlu2 %3917  ;;  %v4455_v18 = vadd.f32 %v11446_v12, %v4338_v38  ;;  %v2939_v38 = vld [vmem:[#allocation2 + $0x198] sm:$0xff] }
 0x69f   : > { %4270 = vrot.lane.b32.xlu1 %v3454_v40, %s14591_s16  ;;  %9070 = vmatmul.msk.f32.gmra.mxu1 %vm2958_vm7, %v2939_v38 }
 0x6a0   : > { %v4487_v22 = vadd.f32 %v11384_v16, %v4455_v18  ;;  %v3639_v18 = vrot.slane %v11536_v59, 2 }
 0x6a1   : > { %v11549_v42 = vpop.permute.xlu1 %3799 }
 0x6a2   : > { %v4543_v35 = vmul.f32 0.2, %v4487_v22  ;;  %vm4515_vm12 = vcmp.gt.f32.partialorder %v4487_v22, 0.0 }
 0x6a4   : > { %4629 = vrot.lane.b32.xlu2 %v4570_v3, %s9377_s26  ;;  %3517 = vrot.lane.b32.xlu0 %v3456_v36, %s9367_s14  ;;  %v4571_v51 = vsel %vm4515_vm12, %v4487_v22, %v4543_v35  ;;  %v3458_v3 = vrot.slane %v11555_v39, 1  ;;  %v2940_v22 = vld [vmem:[#allocation2 + $0x1a0] sm:$0xff]  ;;  %v11613_v0 = vpop.f32.mrf.mxu1 }
 0x6a6   : > { %v11558_v40 = vpop.permute.xlu0 %4034  ;;  %v11560_v1 = vpop.permute.xlu2 %3509  ;;  %v3459_v41 = vsel %vm1363_vm6, %v3457_v60, %v3458_v3 }
 0x6a7   : > { %3699 = vrot.lane.b32.xlu1 %v3638_v48, %s9366_s17  ;;  %9071 = vmatmul.msk.f32.gmra.mxu1 %vm2958_vm7, %v2940_v22 }
 0x6a9   : > { %v11565_v21 = vpop.permute.xlu1 %3507 }
 0x6aa   : > { %14865 = vst [vmem:[#allocation30_spill] sm:$0xff] %v11565_v21 }
 0x6ac   : > { %4044 = vrot.lane.b32.xlu2 %v3638_v48, %s14599_s24  ;;  %4389 = vrot.lane.b32.xlu0 %v3638_v48, %s14863_s18  ;;  %v11632_v60 = vpop.f32.mrf.mxu1 }
 0x6ae   : > { %v11570_v46 = vpop.permute.xlu0 %4262  ;;  %v11572_v32 = vpop.permute.xlu2 %4381 }
 0x6af   : > { %3927 = vrot.lane.b32.xlu1 %v3456_v36, %s14601_s23  ;;  %9072 = vmatmul.msk.f32.gmra.mxu1 %vm2958_vm7, %v2941_v24 }
 0x6b1   : > { %v11577_v12 = vpop.permute.xlu1 %4379 }
 0x6b4   : > { %4272 = vrot.lane.b32.xlu2 %v3456_v36, %s14591_s16  ;;  %4631 = vrot.lane.b32.xlu0 %v4571_v51, %s9377_s26  ;;  %v4107_v36 = vadd.f32 %v11410_v13, %v3990_v2  ;;  %v3640_v13 = vrot.slane %v11555_v39, 2  ;;  %v3577_v2 = vadd.f32 %v11376_v15, %v11182_v30  ;;  %v2942_v30 = vld [vmem:[#allocation2 + $0x1b0] sm:$0xff] }
 0x6b6   : > { %v11584_v28 = vpop.permute.xlu0 %3691  ;;  %v4624_v52 = vpop.permute.xlu2 %4623  ;;  %v4221_v31 = vadd.f32 %v11468_v4, %v4107_v36  ;;  %v3641_v29 = vsel %vm1572_vm5, %v3639_v18, %v3640_v13  ;;  %v3759_v36 = vadd.f32 %v11405_v49, %v3577_v2 }
 0x6b7   : > { %4709 = vst.msk [vmem:[#allocation2 + $0x41] sm:$0xff] %vm4708_vm13, %v4624_v52  ;;  %3811 = vrot.lane.b32.xlu1 %v11536_v59, %s14613_s19  ;;  %9073 = vmatmul.msk.f32.gmra.mxu1 %vm2958_vm7, %v2942_v30 }
 0x6b8   : > { %v4339_v35 = vadd.f32 %v11479_v9, %v4221_v31 }
 0x6b9   : > { %v11590_v11 = vpop.permute.xlu1 %4036 }
 0x6ba   : > { %v4456_v4 = vadd.f32 %v11524_v19, %v4339_v35  ;;  %v3873_v35 = vadd.f32 %v11412_v63, %v3759_v36  ;;  %v11652_v63 = vpop.f32.mrf.mxu1 }
 0x6bc   : > { %4156 = vrot.lane.b32.xlu2 %v11536_v59, %s14594_s15  ;;  %4158 = vrot.lane.b32.xlu0 %v11555_v39, %s14594_s15  ;;  %v4488_v52 = vadd.f32 %v11384_v16, %v4456_v4  ;;  %v3642_v4 = vrot.slane %v11575_v45, 2  ;;  %v3991_v15 = vadd.f32 %v11490_v50, %v3873_v35  ;;  %v3460_v50 = vrot.slane %v11575_v45, 1 }
 0x6be   : > { %v11602_v23 = vpop.permute.xlu0 %3919  ;;  %v11604_v48 = vpop.permute.xlu2 %4150  ;;  %v4544_v19 = vmul.f32 0.2, %v4488_v52  ;;  %vm4516_vm14 = vcmp.gt.f32.partialorder %v4488_v52, 0.0  ;;  %v3643_v49 = vsel %vm1572_vm5, %v3640_v13, %v3642_v4  ;;  %v3461_v13 = vsel %vm1363_vm6, %v3458_v3, %v3460_v50  ;;  %v2944_v50 = vld [vmem:[#allocation2 + $0x1c0] sm:$0xff] }
 0x6bf   : > { %3519 = vrot.lane.b32.xlu1 %v3459_v41, %s9367_s14 }
 0x6c0   : > { %v4572_v22 = vsel %vm4516_vm14, %v4488_v52, %v4544_v19 }
 0x6c1   : > { %v11611_v51 = vpop.permute.xlu1 %4264 }
 0x6c4   : > { %3813 = vrot.lane.b32.xlu2 %v11555_v39, %s14613_s19  ;;  %4046 = vrot.lane.b32.xlu0 %v3641_v29, %s14599_s24 }
 0x6c6   : > { %v11622_v61 = vpop.permute.xlu0 %3803  ;;  %v11624_v9 = vpop.permute.xlu2 %4038 }
 0x6c7   : > { %14866 = vst [vmem:[#allocation13_spill] sm:$0xff] %v11622_v61  ;;  %4391 = vrot.lane.b32.xlu1 %v3641_v29, %s14863_s18 }
 0x6c8   : > { %14867 = vst [vmem:[#allocation11_spill] sm:$0xff] %v11624_v9 }
 0x6c9   : > { %v11627_v38 = vpop.permute.xlu1 %4148 }
 0x6cc   : > { %3701 = vrot.lane.b32.xlu2 %v3641_v29, %s9366_s17  ;;  %4274 = vrot.lane.b32.xlu0 %v3459_v41, %s14591_s16  ;;  %v4108_v29 = vadd.f32 %v11482_v33, %v3991_v15  ;;  %v3279_v33 = vpop.f32.mrf.mxu1  ;;  %v3462_v15 = vrot.slane %v11613_v0, 1 }
 0x6ce   : > { %v11637_v31 = vpop.permute.xlu2 %4266  ;;  %v11639_v18 = vpop.permute.xlu0 %3511  ;;  %v4222_v2 = vadd.f32 %v11492_v5, %v4108_v29  ;;  %v2943_v5 = vld [vmem:[#allocation2 + $0x1b8] sm:$0xff]  ;;  %v3463_v29 = vrot.slane %v11632_v60, 1 }
 0x6cf   : > { %4633 = vrot.lane.b32.xlu1 %v4572_v22, %s9377_s26  ;;  %9074 = vmatmul.msk.f32.gmra.mxu1 %vm2958_vm7, %v2943_v5  ;;  %v2945_v5 = vld [vmem:[#allocation2 + $0x1c8] sm:$0xff] }
 0x6d1   : > { %v11645_v24 = vpop.permute.xlu1 %3805 }
 0x6d4   : > { %3929 = vrot.lane.b32.xlu2 %v3459_v41, %s14601_s23  ;;  %3703 = vrot.lane.b32.xlu0 %v3643_v49, %s9366_s17  ;;  %v4340_v41 = vadd.f32 %v11570_v46, %v4222_v2  ;;  %v3464_v2 = vsel %vm1363_vm6, %v3462_v15, %v3463_v29 }
 0x6d6   : > { %v11654_v52 = vpop.permute.xlu0 %4383  ;;  %v11656_v19 = vpop.permute.xlu2 %3695  ;;  %v4457_v45 = vadd.f32 %v11577_v12, %v4340_v41 }
 0x6d7   : > { %14868 = vst [vmem:[#allocation16_spill] sm:$0xff] %v11654_v52  ;;  %4048 = vrot.lane.b32.xlu1 %v3643_v49, %s14599_s24  ;;  %9075 = vmatmul.msk.f32.gmra.mxu1 %vm2958_vm7, %v2944_v50  ;;  %v11691_v41 = vpop.f32.mrf.mxu1 }
 0x6d8   : > { %v4489_v3 = vadd.f32 %v11384_v16, %v4457_v45  ;;  %v3645_v45 = vrot.slane %v11632_v60, 2 }
 0x6d9   : > { %v11661_v36 = vpop.permute.xlu1 %3693 }
 0x6da   : > { %v4545_v12 = vmul.f32 0.2, %v4489_v3  ;;  %vm4517_vm15 = vcmp.gt.f32.partialorder %v4489_v3, 0.0 }
 0x6dc   : > { %3931 = vrot.lane.b32.xlu0 %v3461_v13, %s14601_s23  ;;  %3521 = vrot.lane.b32.xlu2 %v3461_v13, %s9367_s14 }
 0x6de   : > { %v4626_v22 = vpop.permute.xlu0 %4625  ;;  %v11667_v35 = vpop.permute.xlu2 %3923 }
 0x6df   : > { %4710 = vst.msk [vmem:[#allocation2 + $0x49] sm:$0xff] %vm4708_vm13, %v4626_v22  ;;  %4276 = vrot.lane.b32.xlu1 %v3461_v13, %s14591_s16  ;;  %v3644_v22 = vrot.slane %v11613_v0, 2  ;;  %9076 = vmatmul.msk.f32.gmra.mxu1 %vm2958_vm7, %v2945_v5  ;;  %v11714_v9 = vpop.f32.mrf.mxu1 }
 0x6e1   : > { %v11673_v46 = vpop.permute.xlu1 %3921 }
 0x6e2   : > { %14869 = vst [vmem:[#allocation31_spill] sm:$0xff] %v11673_v46  ;;  %v2946_v46 = vld [vmem:[#allocation2 + $0x1d0] sm:$0xff] }
 0x6e4   : > { %4393 = vrot.lane.b32.xlu2 %v3643_v49, %s14863_s18  ;;  %3815 = vrot.lane.b32.xlu0 %v11613_v0, %s14613_s19  ;;  %v4573_v49 = vsel %vm4517_vm15, %v4489_v3, %v4545_v12  ;;  %v3646_v12 = vsel %vm1572_vm5, %v3644_v22, %v3645_v45 }
 0x6e6   : > { %v11679_v4 = vpop.permute.xlu0 %4040  ;;  %v3808_v30 = vpop.permute.xlu2 %3807 }
 0x6e7   : > { %4160 = vrot.lane.b32.xlu1 %v11613_v0, %s14594_s15  ;;  %9077 = vmatmul.msk.f32.gmra.mxu1 %vm2958_vm7, %v2946_v46  ;;  %v11726_v62 = vpop.f32.mrf.mxu1 }
 0x6e9   : > { %v11686_v16 = vpop.permute.xlu1 %3513 }
 0x6ec   : > { %4635 = vrot.lane.b32.xlu2 %v4573_v49, %s9377_s26  ;;  %3523 = vrot.lane.b32.xlu0 %v3464_v2, %s9367_s14  ;;  %v3647_v49 = vrot.slane %v11652_v63, 2 }
 0x6ee   : > { %v11693_v13 = vpop.permute.xlu0 %4268  ;;  %v11695_v33 = vpop.permute.xlu2 %3515  ;;  %v3648_v22 = vsel %vm1572_vm5, %v3645_v45, %v3647_v49 }
 0x6ef   : > { %14870 = vst [vmem:[#allocation29_spill] sm:$0xff] %v11693_v13  ;;  %3817 = vrot.lane.b32.xlu1 %v11632_v60, %s14613_s19 }
 0x6f1   : > { %v11701_v3 = vpop.permute.xlu1 %4385 }
 0x6f2   : > { %14871 = vst [vmem:[#allocation19_spill] sm:$0xff] %v11701_v3 }
 0x6f4   : > { %4162 = vrot.lane.b32.xlu2 %v11632_v60, %s14594_s15  ;;  %4395 = vrot.lane.b32.xlu0 %v3646_v12, %s14863_s18 }
 0x6f6   : > { %v11708_v15 = vpop.permute.xlu0 %4152  ;;  %v11710_v50 = vpop.permute.xlu2 %4387 }
 0x6f7   : > { %14872 = vst [vmem:[#allocation39_spill] sm:$0xff] %v11708_v15  ;;  %3705 = vrot.lane.b32.xlu1 %v3646_v12, %s9366_s17  ;;  %v3465_v15 = vrot.slane %v11652_v63, 1  ;;  %v3290_v63 = vpop.f32.mrf.mxu1 }
 0x6f8   : > { %14873 = vst [vmem:[#allocation23_spill] sm:$0xff] %v11710_v50  ;;  %v3582_v63 = vadd.f32 %v11560_v1, %v11279_v55 }
 0x6f9   : > { %v4628_v61 = vpop.permute.xlu1 %4627 }
 0x6fa   : > { %4711 = vst.msk [vmem:[#allocation2 + $0x61] sm:$0xff] %vm4708_vm13, %v4628_v61  ;;  %v3466_v61 = vsel %vm1363_vm6, %v3463_v29, %v3465_v15  ;;  %v2947_v29 = vld [vmem:[#allocation2 + $0x1d8] sm:$0xff] }
 0x6fb   : > { %9078 = vmatmul.msk.f32.gmra.mxu1 %vm2958_vm7, %v2947_v29 }
 0x6fc   : > { %4050 = vrot.lane.b32.xlu2 %v3646_v12, %s14599_s24  ;;  %4052 = vrot.lane.b32.xlu0 %v3648_v22, %s14599_s24 }
 0x6fe   : > { %v11721_v5 = vpop.permute.xlu0 %3809  ;;  %v4630_v50 = vpop.permute.xlu2 %4629 }
 0x6ff   : > { %4712 = vst.msk [vmem:[#allocation2 + $0x69] sm:$0xff] %vm4708_vm13, %v4630_v50  ;;  %3933 = vrot.lane.b32.xlu1 %v3464_v2, %s14601_s23  ;;  %v3583_v50 = vadd.f32 %v11639_v18, %v11338_v8  ;;  %v3764_v18 = vadd.f32 %v11584_v28, %v3582_v63  ;;  %v3649_v28 = vrot.slane %v11691_v41, 2 }
 0x701   : > { %v4155_v3 = vpop.permute.xlu1 %4154  ;;  %v3878_v21 = vadd.f32 %v11645_v24, %v3764_v18  ;;  %v3650_v24 = vrot.slane %v11714_v9, 2 }
 0x703   : > { %v3651_v29 = vsel %vm1572_vm5, %v3649_v28, %v3650_v24 }
 0x704   : > { %4278 = vrot.lane.b32.xlu2 %v3464_v2, %s14591_s16  ;;  %4280 = vrot.lane.b32.xlu0 %v3466_v61, %s14591_s16  ;;  %v3765_v2 = vadd.f32 %v11661_v36, %v3583_v50  ;;  %v2948_v36 = vld [vmem:[#allocation2 + $0x1e0] sm:$0xff] }
 0x705   : > { %9079 = vmatmul.msk.f32.gmra.mxu1 %vm2958_vm7, %v2948_v36  ;;  %v3468_v36 = vrot.slane %v11714_v9, 1 }
 0x706   : > { %v11731_v46 = vpop.permute.xlu0 %3697  ;;  %v4045_v45 = vpop.permute.xlu2 %4044  ;;  %v3879_v13 = vadd.f32 %v3808_v30, %v3765_v2  ;;  %v3996_v30 = vadd.f32 %v11667_v35, %v3878_v21  ;;  %v2949_v2 = vld [vmem:[#allocation2 + $0x1e8] sm:$0xff] }
 0x707   : > { %3525 = vrot.lane.b32.xlu1 %v3466_v61, %s9367_s14 }
 0x709   : > { %v4043_v12 = vpop.permute.xlu1 %4042 }
 0x70c   : > { %3707 = vrot.lane.b32.xlu2 %v3648_v22, %s9366_s17  ;;  %4164 = vrot.lane.b32.xlu0 %v11691_v41, %s14594_s15 }
 0x70d   : > { %9080 = vmatmul.msk.f32.gmra.mxu1 %vm2958_vm7, %v2949_v2 }
 0x70e   : > { %v3926_v15 = vpop.permute.xlu0 %3925  ;;  %v4273_v49 = vpop.permute.xlu2 %4272 }
 0x70f   : > { %4397 = vrot.lane.b32.xlu1 %v3648_v22, %s14863_s18  ;;  %v3997_v52 = vadd.f32 %v3926_v15, %v3879_v13 }
 0x711   : > { %v11744_v8 = vpop.permute.xlu1 %4270  ;;  %v4114_v50 = vadd.f32 %v4043_v12, %v3997_v52  ;;  %v3584_v12 = vadd.f32 %v11686_v16, %v11353_v44 }
 0x714   : > { %3935 = vrot.lane.b32.xlu2 %v3466_v61, %s14601_s23  ;;  %3821 = vrot.lane.b32.xlu0 %v11714_v9, %s14613_s19  ;;  %v4113_v61 = vadd.f32 %v11679_v4, %v3996_v30  ;;  %v3766_v4 = vadd.f32 %v11656_v19, %v3584_v12 }
 0x716   : > { %v3518_v22 = vpop.permute.xlu0 %3517  ;;  %v4157_v55 = vpop.permute.xlu2 %4156  ;;  %v4227_v35 = vadd.f32 %v4155_v3, %v4113_v61  ;;  %v3467_v3 = vrot.slane %v11691_v41, 1 }
 0x717   : > { %v3586_v1 = vadd.f32 %v3518_v22, %v11450_v6  ;;  %v11754_v13 = vadd.f32 %v4157_v55, %v4114_v50  ;;  %4166 = vrot.lane.b32.xlu1 %v11714_v9, %s14594_s15  ;;  %v11764_v6 = vpop.f32.mrf.mxu1  ;;  %v3880_v50 = vadd.f32 %v11721_v5, %v3766_v4  ;;  %v2950_v55 = vld [vmem:[#allocation2 + $0x1f0] sm:$0xff]  ;;  %v3585_v5 = vadd.f32 %v11695_v33, %v11427_v7  ;;  %v2951_v33 = vld [vmem:[#allocation2 + $0x1f8] sm:$0xff] }
 0x718   : > { %v4345_v15 = vadd.f32 %v4273_v49, %v4227_v35  ;;  %v3469_v22 = vsel %vm1363_vm6, %v3467_v3, %v3468_v36  ;;  %9081 = vmatmul.msk.f32.gmra.mxu1 %vm2958_vm7, %v2950_v55 }
 0x719   : > { %v3700_v52 = vpop.permute.xlu1 %3699 }
 0x71a   : > { %v3768_v21 = vadd.f32 %v3700_v52, %v3586_v1  ;;  %v3470_v52 = vrot.slane %v11726_v62, 1 }
 0x71c   : > { %3819 = vrot.lane.b32.xlu2 %v11691_v41, %s14613_s19  ;;  %3709 = vrot.lane.b32.xlu0 %v3651_v29, %s9366_s17  ;;  %v3471_v35 = vsel %vm1363_vm6, %v3468_v36, %v3470_v52 }
 0x71e   : > { %v4390_v63 = vpop.permute.xlu0 %4389  ;;  %v3814_v18 = vpop.permute.xlu2 %3813 }
 0x71f   : > { %v11771_v44 = vadd.f32 %v4390_v63, %v4345_v15  ;;  %v11773_v16 = vadd.f32 %v3814_v18, %v3768_v21  ;;  %4054 = vrot.lane.b32.xlu1 %v3651_v29, %s14599_s24  ;;  %v11782_v1 = vpop.f32.mrf.mxu1  ;;  %v3652_v21 = vrot.slane %v11726_v62, 2 }
 0x720   : > { %9082 = vmatmul.msk.f32.gmra.mxu1 %vm2958_vm7, %v2951_v33  ;;  %v2954_v33 = vld [vmem:[#allocation2 + $0x210] sm:$0xff] }
 0x721   : > { %v3928_v30 = vpop.permute.xlu1 %3927  ;;  %v3653_v63 = vsel %vm1572_vm5, %v3650_v24, %v3652_v21  ;;  %v2953_v21 = vld [vmem:[#allocation2 + $0x208] sm:$0xff] }
 0x722   : > { %v3998_v49 = vadd.f32 %v3928_v30, %v3880_v50 }
 0x724   : > { %3937 = vrot.lane.b32.xlu0 %v3469_v22, %s14601_s23  ;;  %3527 = vrot.lane.b32.xlu2 %v3469_v22, %s9367_s14  ;;  %v4115_v19 = vadd.f32 %v4045_v45, %v3998_v49  ;;  %v3767_v45 = vadd.f32 %v11731_v46, %v3585_v5 }
 0x726   : > { %v4632_v28 = vpop.permute.xlu0 %4631  ;;  %v3702_v61 = vpop.permute.xlu2 %3701 }
 0x727   : > { %4713 = vst.msk [vmem:[#allocation2 + $0x81] sm:$0xff] %vm4708_vm13, %v4632_v28  ;;  %4282 = vrot.lane.b32.xlu1 %v3469_v22, %s14591_s16  ;;  %v11797_v7 = vpop.f32.mrf.mxu1  ;;  %v2952_v22 = vld [vmem:[#allocation2 + $0x200] sm:$0xff]  ;;  %v3654_v28 = vrot.slane %v11764_v6, 2 }
 0x728   : > { %9083 = vmatmul.msk.f32.gmra.mxu1 %vm2958_vm7, %v2952_v22 }
 0x729   : > { %v3812_v12 = vpop.permute.xlu1 %3811 }
 0x72a   : > { %v3881_v2 = vadd.f32 %v3812_v12, %v3767_v45  ;;  %v3472_v45 = vrot.slane %v11764_v6, 1 }
 0x72c   : > { %4399 = vrot.lane.b32.xlu2 %v3651_v29, %s14863_s18  ;;  %3529 = vrot.lane.b32.xlu0 %v3471_v35, %s9367_s14 }
 0x72e   : > { %v4159_v15 = vpop.permute.xlu0 %4158  ;;  %v3930_v4 = vpop.permute.xlu2 %3929 }
 0x72f   : > { %v4229_v18 = vadd.f32 %v4159_v15, %v4115_v19  ;;  %v3999_v3 = vadd.f32 %v3930_v4, %v3881_v2  ;;  %3711 = vrot.lane.b32.xlu1 %v3653_v63, %s9366_s17  ;;  %v3301_v30 = vpop.f32.mrf.mxu1 }
 0x730   : > { %9084 = vmatmul.msk.f32.gmra.mxu1 %vm2958_vm7, %v2953_v21 }
 0x731   : > { %v3520_v62 = vpop.permute.xlu1 %3519 }
 0x732   : > { %v3587_v46 = vadd.f32 %v3520_v62, %v11536_v59 }
 0x734   : > { %4056 = vrot.lane.b32.xlu2 %v3653_v63, %s14599_s24  ;;  %4401 = vrot.lane.b32.xlu0 %v3653_v63, %s14863_s18  ;;  %v3769_v29 = vadd.f32 %v3702_v61, %v3587_v46  ;;  %v3655_v61 = vrot.slane %v11782_v1, 2 }
 0x736   : > { %v4047_v36 = vpop.permute.xlu0 %4046  ;;  %v3522_v50 = vpop.permute.xlu2 %3521 }
 0x737   : > { %v4116_v24 = vadd.f32 %v4047_v36, %v3999_v3  ;;  %3939 = vrot.lane.b32.xlu1 %v3471_v35, %s14601_s23  ;;  %v11815_v12 = vpop.f32.mrf.mxu1  ;;  %v3588_v2 = vadd.f32 %v3522_v50, %v11555_v39  ;;  %v3657_v50 = vrot.slane %v11797_v7, 2 }
 0x738   : > { %9085 = vmatmul.msk.f32.gmra.mxu1 %vm2958_vm7, %v2954_v33 }
 0x739   : > { %v4392_v49 = vpop.permute.xlu1 %4391 }
 0x73c   : > { %4284 = vrot.lane.b32.xlu2 %v3471_v35, %s14591_s16  ;;  %4170 = vrot.lane.b32.xlu0 %v11782_v1, %s14594_s15  ;;  %v3473_v35 = vrot.slane %v11782_v1, 1 }
 0x73e   : > { %v4275_v59 = vpop.permute.xlu0 %4274  ;;  %v4394_v19 = vpop.permute.xlu2 %4393  ;;  %v3474_v63 = vsel %vm1363_vm6, %v3472_v45, %v3473_v35 }
 0x73f   : > { %v4346_v55 = vadd.f32 %v4275_v59, %v11754_v13  ;;  %3823 = vrot.lane.b32.xlu1 %v11764_v6, %s14613_s19  ;;  %v3656_v13 = vsel %vm1572_vm5, %v3654_v28, %v3655_v61  ;;  %v11830_v46 = vpop.f32.mrf.mxu1  ;;  %v3658_v28 = vsel %vm1572_vm5, %v3655_v61, %v3657_v50 }
 0x741   : > { %v11813_v52 = vadd.f32 %v4392_v49, %v4346_v55  ;;  %v4634_v5 = vpop.permute.xlu1 %4633 }
 0x742   : > { %4714 = vst.msk [vmem:[#allocation2 + $0x89] sm:$0xff] %vm4708_vm13, %v4634_v5 }
 0x744   : > { %4168 = vrot.lane.b32.xlu2 %v11764_v6, %s14594_s15  ;;  %4058 = vrot.lane.b32.xlu0 %v3656_v13, %s14599_s24 }
 0x746   : > { %v3704_v15 = vpop.permute.xlu0 %3703  ;;  %v4636_v4 = vpop.permute.xlu2 %4635 }
 0x747   : > { %v3770_v3 = vadd.f32 %v3704_v15, %v3588_v2  ;;  %4715 = vst.msk [vmem:[#allocation2 + $0xa1] sm:$0xff] %vm4708_vm13, %v4636_v4  ;;  %3531 = vrot.lane.b32.xlu1 %v3474_v63, %s9367_s14  ;;  %v11843_v21 = vpop.f32.mrf.mxu1 }
 0x749   : > { %v4049_v62 = vpop.permute.xlu1 %4048 }
 0x74c   : > { %3825 = vrot.lane.b32.xlu2 %v11782_v1, %s14613_s19  ;;  %4286 = vrot.lane.b32.xlu0 %v3474_v63, %s14591_s16 }
 0x74e   : > { %v3932_v39 = vpop.permute.xlu0 %3931  ;;  %v4163_v36 = vpop.permute.xlu2 %4162 }
 0x74f   : > { %v4000_v30 = vadd.f32 %v3932_v39, %v11773_v16  ;;  %4403 = vrot.lane.b32.xlu1 %v3656_v13, %s14863_s18  ;;  %v3475_v16 = vrot.slane %v11797_v7, 1 }
 0x751   : > { %v4117_v49 = vadd.f32 %v4049_v62, %v4000_v30  ;;  %v4277_v22 = vpop.permute.xlu1 %4276  ;;  %v3476_v62 = vsel %vm1363_vm6, %v3473_v35, %v3475_v16  ;;  %v3477_v35 = vrot.slane %v11815_v12, 1 }
 0x752   : > { %v4347_v59 = vadd.f32 %v4277_v22, %v4229_v18 }
 0x753   : > { %v4231_v55 = vadd.f32 %v4163_v36, %v4117_v49 }
 0x754   : > { %v11839_v5 = vadd.f32 %v4394_v19, %v4347_v59  ;;  %3713 = vrot.lane.b32.xlu2 %v3656_v13, %s9366_s17  ;;  %3715 = vrot.lane.b32.xlu0 %v3658_v28, %s9366_s17  ;;  %v3312_v19 = vpop.f32.mrf.mxu1 }
 0x756   : > { %v3816_v45 = vpop.permute.xlu0 %3815  ;;  %v4051_v2 = vpop.permute.xlu2 %4050 }
 0x757   : > { %v3883_v15 = vadd.f32 %v3816_v45, %v3769_v29  ;;  %4060 = vrot.lane.b32.xlu1 %v3658_v28, %s14599_s24 }
 0x759   : > { %v4161_v4 = vpop.permute.xlu1 %4160 }
 0x75a   : > { %v4230_v18 = vadd.f32 %v4161_v4, %v4116_v24  ;;  %v3659_v4 = vrot.slane %v11815_v12, 2 }
 0x75c   : > { %3941 = vrot.lane.b32.xlu2 %v3474_v63, %s14601_s23  ;;  %3943 = vrot.lane.b32.xlu0 %v3476_v62, %s14601_s23  ;;  %v3478_v63 = vrot.slane %v11830_v46, 1  ;;  %v11864_v22 = vpop.f32.mrf.mxu1 }
 0x75e   : > { %v4279_v61 = vpop.permute.xlu2 %4278  ;;  %v3524_v13 = vpop.permute.xlu0 %3523  ;;  %v3479_v49 = vsel %vm1363_vm6, %v3477_v35, %v3478_v63 }
 0x75f   : > { %v4348_v33 = vadd.f32 %v4279_v61, %v4230_v18  ;;  %4288 = vrot.lane.b32.xlu1 %v3476_v62, %s14591_s16  ;;  %v3589_v50 = vadd.f32 %v3524_v13, %v11613_v0  ;;  %v3660_v0 = vrot.slane %v11830_v46, 2 }
 0x761   : > { %v3818_v39 = vpop.permute.xlu1 %3817  ;;  %v3661_v61 = vsel %vm1572_vm5, %v3659_v4, %v3660_v0 }
 0x762   : > { %v3884_v36 = vadd.f32 %v3818_v39, %v3770_v3  ;;  %v3662_v39 = vrot.slane %v11843_v21, 2 }
 0x764   : > { %3533 = vrot.lane.b32.xlu2 %v3476_v62, %s9367_s14  ;;  %3827 = vrot.lane.b32.xlu0 %v11815_v12, %s14613_s19  ;;  %v11876_v35 = vpop.f32.mrf.mxu1 }
 0x766   : > { %v4396_v7 = vpop.permute.xlu0 %4395  ;;  %v3708_v29 = vpop.permute.xlu2 %3707 }
 0x767   : > { %v11854_v24 = vadd.f32 %v4396_v7, %v4348_v33  ;;  %4172 = vrot.lane.b32.xlu1 %v11815_v12, %s14594_s15 }
 0x769   : > { %v3706_v30 = vpop.permute.xlu1 %3705 }
 0x76a   : > { %v3771_v3 = vadd.f32 %v3706_v30, %v3589_v50  ;;  %v3663_v30 = vsel %vm1572_vm5, %v3660_v0, %v3662_v39 }
 0x76c   : > { %4405 = vrot.lane.b32.xlu2 %v3658_v28, %s14863_s18  ;;  %3535 = vrot.lane.b32.xlu0 %v3479_v49, %s9367_s14 }
 0x76e   : > { %v4053_v59 = vpop.permute.xlu0 %4052  ;;  %v3936_v45 = vpop.permute.xlu2 %3935 }
 0x76f   : > { %v4002_v16 = vadd.f32 %v3936_v45, %v3884_v36  ;;  %3829 = vrot.lane.b32.xlu1 %v11830_v46, %s14613_s19 }
 0x771   : > { %v3934_v18 = vpop.permute.xlu1 %3933  ;;  %v4119_v62 = vadd.f32 %v4053_v59, %v4002_v16  ;;  %v3480_v16 = vrot.slane %v11843_v21, 1 }
 0x772   : > { %v4001_v19 = vadd.f32 %v3934_v18, %v3883_v15  ;;  %v11886_v18 = vpop.f32.mrf.mxu1 }
 0x774   : > { %4174 = vrot.lane.b32.xlu2 %v11830_v46, %s14594_s15  ;;  %4407 = vrot.lane.b32.xlu0 %v3661_v61, %s14863_s18  ;;  %v4118_v28 = vadd.f32 %v4051_v2, %v4001_v19 }
 0x776   : > { %v4281_v13 = vpop.permute.xlu0 %4280  ;;  %v3820_v33 = vpop.permute.xlu2 %3819 }
 0x777   : > { %v4349_v36 = vadd.f32 %v4281_v13, %v4231_v55  ;;  %v3885_v7 = vadd.f32 %v3820_v33, %v3771_v3  ;;  %3717 = vrot.lane.b32.xlu1 %v3661_v61, %s9366_s17 }
 0x779   : > { %v3526_v50 = vpop.permute.xlu1 %3525 }
 0x77a   : > { %v3590_v15 = vadd.f32 %v3526_v50, %v11632_v60  ;;  %v3481_v60 = vsel %vm1363_vm6, %v3478_v63, %v3480_v16 }
 0x77c   : > { %4062 = vrot.lane.b32.xlu2 %v3661_v61, %s14599_s24  ;;  %4064 = vrot.lane.b32.xlu0 %v3663_v30, %s14599_s24  ;;  %v3772_v2 = vadd.f32 %v3708_v29, %v3590_v15 }
 0x77e   : > { %v4165_v59 = vpop.permute.xlu0 %4164  ;;  %v3528_v45 = vpop.permute.xlu2 %3527 }
 0x77f   : > { %v4232_v55 = vadd.f32 %v4165_v59, %v4118_v28  ;;  %3945 = vrot.lane.b32.xlu1 %v3479_v49, %s14601_s23  ;;  %v3323_v28 = vpop.f32.mrf.mxu1  ;;  %v3591_v13 = vadd.f32 %v3528_v45, %v11691_v41  ;;  %v3664_v41 = vrot.slane %v11864_v22, 2  ;;  %v3665_v59 = vrot.slane %v11876_v35, 2 }
 0x781   : > { %v4398_v3 = vpop.permute.xlu1 %4397 }
 0x782   : > { %v11884_v4 = vadd.f32 %v4398_v3, %v4349_v36  ;;  %v3666_v3 = vsel %vm1572_vm5, %v3664_v41, %v3665_v59 }
 0x784   : > { %4290 = vrot.lane.b32.xlu2 %v3479_v49, %s14591_s16  ;;  %4292 = vrot.lane.b32.xlu0 %v3481_v60, %s14591_s16 }
 0x786   : > { %v3822_v0 = vpop.permute.xlu0 %3821  ;;  %v4400_v29 = vpop.permute.xlu2 %4399 }
 0x787   : > { %v3886_v19 = vadd.f32 %v3822_v0, %v3772_v2  ;;  %3537 = vrot.lane.b32.xlu1 %v3481_v60, %s9367_s14  ;;  %v11897_v36 = vpop.f32.mrf.mxu1 }
 0x789   : > { %v4167_v21 = vpop.permute.xlu1 %4166 }
 0x78a   : > { %v4233_v61 = vadd.f32 %v4167_v21, %v4119_v62 }
 0x78c   : > { %3719 = vrot.lane.b32.xlu2 %v3663_v30, %s9366_s17  ;;  %4176 = vrot.lane.b32.xlu0 %v11864_v22, %s14594_s15 }
 0x78e   : > { %v3710_v63 = vpop.permute.xlu0 %3709  ;;  %v4057_v33 = vpop.permute.xlu2 %4056 }
 0x78f   : > { %v3773_v49 = vadd.f32 %v3710_v63, %v3591_v13  ;;  %4409 = vrot.lane.b32.xlu1 %v3663_v30, %s14863_s18  ;;  %v3483_v13 = vrot.slane %v11876_v35, 1 }
 0x791   : > { %v4055_v39 = vpop.permute.xlu1 %4054 }
 0x794   : > { %3947 = vrot.lane.b32.xlu2 %v3481_v60, %s14601_s23  ;;  %3833 = vrot.lane.b32.xlu0 %v11876_v35, %s14613_s19 }
 0x796   : > { %v3938_v62 = vpop.permute.xlu0 %3937  ;;  %v4285_v50 = vpop.permute.xlu2 %4284 }
 0x797   : > { %v4003_v15 = vadd.f32 %v3938_v62, %v3885_v7  ;;  %v4351_v2 = vadd.f32 %v4285_v50, %v4233_v61  ;;  %4178 = vrot.lane.b32.xlu1 %v11876_v35, %s14594_s15  ;;  %v11912_v7 = vpop.f32.mrf.mxu1 }
 0x799   : > { %v4283_v30 = vpop.permute.xlu1 %4282  ;;  %v4120_v45 = vadd.f32 %v4055_v39, %v4003_v15  ;;  %v3485_v15 = vrot.slane %v11886_v18, 1 }
 0x79a   : > { %v4350_v16 = vadd.f32 %v4283_v30, %v4232_v55  ;;  %v3482_v55 = vrot.slane %v11864_v22, 1 }
 0x79c   : > { %v11907_v60 = vadd.f32 %v4400_v29, %v4350_v16  ;;  %3831 = vrot.lane.b32.xlu2 %v11864_v22, %s14613_s19  ;;  %3721 = vrot.lane.b32.xlu0 %v3666_v3, %s9366_s17  ;;  %v3484_v39 = vsel %vm1363_vm6, %v3482_v55, %v3483_v13  ;;  %v3667_v16 = vrot.slane %v11886_v18, 2 }
 0x79e   : > { %v3530_v0 = vpop.permute.xlu0 %3529  ;;  %v4169_v21 = vpop.permute.xlu2 %4168 }
 0x79f   : > { %v3592_v61 = vadd.f32 %v3530_v0, %v11714_v9  ;;  %v4234_v28 = vadd.f32 %v4169_v21, %v4120_v45  ;;  %4066 = vrot.lane.b32.xlu1 %v3666_v3, %s14599_s24  ;;  %v11927_v30 = vpop.f32.mrf.mxu1  ;;  %v3486_v21 = vsel %vm1363_vm6, %v3483_v13, %v3485_v15 }
 0x7a1   : > { %v3712_v29 = vpop.permute.xlu1 %3711 }
 0x7a2   : > { %v3774_v63 = vadd.f32 %v3712_v29, %v3592_v61  ;;  %v3668_v29 = vsel %vm1572_vm5, %v3665_v59, %v3667_v16 }
 0x7a4   : > { %3949 = vrot.lane.b32.xlu0 %v3484_v39, %s14601_s23  ;;  %3539 = vrot.lane.b32.xlu2 %v3484_v39, %s9367_s14 }
 0x7a6   : > { %v4402_v62 = vpop.permute.xlu0 %4401  ;;  %v3826_v50 = vpop.permute.xlu2 %3825 }
 0x7a7   : > { %v11922_v9 = vadd.f32 %v4402_v62, %v4351_v2  ;;  %v11924_v41 = vadd.f32 %v3826_v50, %v3774_v63  ;;  %4294 = vrot.lane.b32.xlu1 %v3484_v39, %s14591_s16  ;;  %v3334_v39 = vpop.f32.mrf.mxu1 }
 0x7a9   : > { %v3940_v45 = vpop.permute.xlu1 %3939 }
 0x7aa   : > { %v4004_v0 = vadd.f32 %v3940_v45, %v3886_v19 }
 0x7ac   : > { %4411 = vrot.lane.b32.xlu2 %v3666_v3, %s14863_s18  ;;  %3541 = vrot.lane.b32.xlu0 %v3486_v21, %s9367_s14  ;;  %v4121_v61 = vadd.f32 %v4057_v33, %v4004_v0  ;;  %v3578_v33 = vadd.f32 %v11437_v25, %v11188_v54  ;;  %v3580_v54 = vadd.f32 %v11503_v27, %v11220_v26 }
 0x7ae   : > { %v4171_v55 = vpop.permute.xlu0 %4170  ;;  %v3714_v2 = vpop.permute.xlu2 %3713  ;;  %v3760_v45 = vadd.f32 %v11378_v47, %v3578_v33  ;;  %v4013_v47 = vrot.slane %v11897_v36, 2  ;;  %v3762_v26 = vadd.f32 %v11513_v14, %v3580_v54  ;;  %v3896_v14 = vrot.slane %v11897_v36, 1  ;;  %v12014_v54 = vld [vmem:[%s14567_s6] ss:$0 sm:$0xff] }
 0x7af   : > { %v11934_v63 = vadd.f32 %v4171_v55, %v4121_v61  ;;  %3723 = vrot.lane.b32.xlu1 %v3668_v29, %s9366_s17 }
 0x7b0   : > { %v3874_v16 = vadd.f32 %v11461_v43, %v3760_v45 }
 0x7b1   : > { %v3824_v62 = vpop.permute.xlu1 %3823 }
 0x7b2   : > { %v3887_v50 = vadd.f32 %v3824_v62, %v3773_v49  ;;  %v3992_v55 = vadd.f32 %v11532_v53, %v3874_v16 }
 0x7b4   : > { %4068 = vrot.lane.b32.xlu2 %v3668_v29, %s14599_s24  ;;  %4413 = vrot.lane.b32.xlu0 %v3668_v29, %s14863_s18 }
 0x7b6   : > { %v4059_v18 = vpop.permute.xlu0 %4058  ;;  %v3942_v19 = vpop.permute.xlu2 %3941 }
 0x7b7   : > { %v4005_v3 = vadd.f32 %v3942_v19, %v3887_v50  ;;  %3951 = vrot.lane.b32.xlu1 %v3486_v21, %s14601_s23  ;;  %v4016_v19 = vrot.slane %v11927_v30, 2 }
 0x7b9   : > { %v3532_v59 = vpop.permute.xlu1 %3531  ;;  %v11942_v13 = vadd.f32 %v4059_v18, %v4005_v3 }
 0x7ba   : > { %v3593_v15 = vadd.f32 %v3532_v59, %v11764_v6  ;;  %v4014_v6 = vrot.slane %v11912_v7, 2 }
 0x7bc   : > { %4296 = vrot.lane.b32.xlu2 %v3486_v21, %s14591_s16  ;;  %4182 = vrot.lane.b32.xlu0 %v11912_v7, %s14594_s15  ;;  %v11949_v49 = vadd.f32 %v3714_v2, %v3593_v15  ;;  %v3579_v21 = vadd.f32 %v11433_v57, %v11211_v37  ;;  %v4015_v27 = vsel %vm1572_vm5, %v4013_v47, %v4014_v6 }
 0x7bd   : > { %v4109_v37 = vadd.f32 %v11463_v17, %v3992_v55  ;;  %v14878_v55 = vld [vmem:[#allocation19_spill] sm:$0xff] }
 0x7be   : > { %v4287_v0 = vpop.permute.xlu0 %4286  ;;  %v3534_v61 = vpop.permute.xlu2 %3533  ;;  %v3761_v43 = vadd.f32 %v11477_v58, %v3579_v21  ;;  %v3876_v58 = vadd.f32 %v11505_v56, %v3762_v26  ;;  %v14879_v26 = vld [vmem:[#allocation13_spill] sm:$0xff] }
 0x7bf   : > { %v4352_v25 = vadd.f32 %v4287_v0, %v4234_v28  ;;  %3835 = vrot.lane.b32.xlu1 %v11897_v36, %s14613_s19  ;;  %v3594_v57 = vadd.f32 %v3534_v61, %v11782_v1  ;;  %v4223_v18 = vadd.f32 %v11541_v20, %v4109_v37  ;;  %v11993_v20 = vpop.f32.mrf.mxu1  ;;  %v14875_v0 = vld [vmem:[#allocation16_spill] sm:$0xff] }
 0x7c0   : > { %v3875_v28 = vadd.f32 %v11549_v42, %v3761_v43  ;;  %v3897_v42 = vrot.slane %v11912_v7, 1  ;;  %v3994_v17 = vadd.f32 %v11602_v23, %v3876_v58 }
 0x7c1   : > { %v4404_v2 = vpop.permute.xlu1 %4403  ;;  %v4341_v56 = vadd.f32 %v11611_v51, %v4223_v18  ;;  %v4017_v51 = vsel %vm1572_vm5, %v4014_v6, %v4016_v19 }
 0x7c2   : > { %v11962_v29 = vadd.f32 %v4404_v2, %v4352_v25  ;;  %v3993_v50 = vadd.f32 %v11543_v10, %v3875_v28  ;;  %v3898_v3 = vsel %vm1363_vm6, %v3896_v14, %v3897_v42  ;;  %v4111_v10 = vadd.f32 %v11590_v11, %v3994_v17  ;;  %v14881_v17 = vld [vmem:[#allocation11_spill] sm:$0xff] }
 0x7c3   : > { %v4458_v15 = vadd.f32 %v11572_v32, %v4341_v56 }
 0x7c4   : > { %4180 = vrot.lane.b32.xlu2 %v11897_v36, %s14594_s15  ;;  %4070 = vrot.lane.b32.xlu0 %v4015_v27, %s14599_s24  ;;  %v4110_v33 = vadd.f32 %v11558_v40, %v3993_v50  ;;  %v3899_v40 = vrot.slane %v11927_v30, 1  ;;  %v4225_v11 = vadd.f32 %v11604_v48, %v4111_v10  ;;  %v14876_v30 = vld [vmem:[#allocation29_spill] sm:$0xff]  ;;  %v14877_v48 = vld [vmem:[#allocation22_spill] sm:$0xff]  ;;  %v4362_v50 = vrot.slane %v11993_v20, 2 }
 0x7c5   : > { %v4490_v32 = vadd.f32 %v12014_v54, %v4458_v15 }
 0x7c6   : > { %v3716_v53 = vpop.permute.xlu0 %3715  ;;  %v11972_v39 = vpop.permute.xlu2 %4405  ;;  %v4224_v23 = vadd.f32 %v11627_v38, %v4110_v33  ;;  %v14874_v38 = vld [vmem:[#allocation30_spill] sm:$0xff]  ;;  %v4343_v25 = vadd.f32 %v14876_v30, %v4225_v11 }
 0x7c7   : > { %v11975_v62 = vadd.f32 %v3716_v53, %v3594_v57  ;;  %4415 = vrot.lane.b32.xlu1 %v4015_v27, %s14863_s18  ;;  %v3581_v16 = vadd.f32 %v14874_v38, %v11265_v34  ;;  %v4546_v43 = vmul.f32 0.2, %v4490_v32  ;;  %vm4518_vm0 = vcmp.gt.f32.partialorder %v4490_v32, 0.0  ;;  %v3339_v28 = vpop.f32.mrf.mxu1  ;;  %v14880_v57 = vld [vmem:[#allocation31_spill] sm:$0xff] }
 0x7c8   : > { %v4460_v2 = vadd.f32 %v14878_v55, %v4343_v25  ;;  %v4363_v18 = vrot.slane %v3339_v28, 2  ;;  %v4246_v25 = vrot.slane %v3339_v28, 1 }
 0x7c9   : > { %v11983_v1 = vpop.permute.xlu1 %4060  ;;  %v3763_v47 = vadd.f32 %v14877_v48, %v3581_v16 }
 0x7ca   : > { %v4492_v14 = vadd.f32 %v12014_v54, %v4460_v2  ;;  %v4494_v2 = vadd.f32 %v12014_v54, %v11771_v44  ;;  %v4496_v44 = vadd.f32 %v12014_v54, %v11839_v5 }
 0x7cb   : > { %v3877_v27 = vadd.f32 %v14879_v26, %v3763_v47 }
 0x7cc   : > { %3837 = vrot.lane.b32.xlu2 %v11912_v7, %s14613_s19  ;;  %4298 = vrot.lane.b32.xlu0 %v3898_v3, %s14591_s16  ;;  %v4342_v7 = vadd.f32 %v11637_v31, %v4224_v23  ;;  %v3900_v31 = vsel %vm1363_vm6, %v3897_v42, %v3899_v40  ;;  %v4574_v42 = vsel %vm4518_vm0, %v4490_v32, %v4546_v43  ;;  %v4548_v10 = vmul.f32 0.2, %v4492_v14  ;;  %v14882_v23 = vld [vmem:[#allocation39_spill] sm:$0xff] }
 0x7cd   : > { %v3995_v53 = vadd.f32 %v14880_v57, %v3877_v27  ;;  %vm4520_vm8 = vcmp.gt.f32.partialorder %v4492_v14, 0.0  ;;  %v4245_v57 = vrot.slane %v11993_v20, 1  ;;  %vm4522_vm10 = vcmp.gt.f32.partialorder %v4494_v2, 0.0 }
 0x7ce   : > { %v11996_v36 = vpop.permute.xlu0 %3943  ;;  %v11998_v59 = vpop.permute.xlu2 %4174  ;;  %v4459_v61 = vadd.f32 %v14875_v0, %v4342_v7  ;;  %v4576_v38 = vsel %vm4520_vm8, %v4492_v14, %v4548_v10  ;;  %v14883_v0 = vld [vmem:[#allocation23_spill] sm:$0xff]  ;;  %v4495_v14 = vadd.f32 %v12014_v54, %v11813_v52  ;;  %vm4524_vm12 = vcmp.gt.f32.partialorder %v4496_v44, 0.0 }
 0x7cf   : > { %4072 = vrot.lane.b32.xlu1 %v4017_v51, %s14599_s24  ;;  %v4112_v19 = vadd.f32 %v14881_v17, %v3995_v53  ;;  %v3342_v11 = vpop.f32.mrf.mxu1  ;;  %v4498_v10 = vadd.f32 %v12014_v54, %v11884_v4 }
 0x7d0   : > { %v4491_v34 = vadd.f32 %v12014_v54, %v4459_v61  ;;  %v4248_v16 = vrot.slane %v3342_v11, 1  ;;  %v4551_v52 = vmul.f32 0.2, %v4495_v14  ;;  %vm4523_vm11 = vcmp.gt.f32.partialorder %v4495_v14, 0.0 }
 0x7d1   : > { %v12006_v45 = vpop.permute.xlu1 %4288  ;;  %v4226_v15 = vadd.f32 %v14882_v23, %v4112_v19  ;;  %v4499_v23 = vadd.f32 %v12014_v54, %v11907_v60  ;;  %vm4526_vm15 = vcmp.gt.f32.partialorder %v4498_v10, 0.0 }
 0x7d2   : > { %v4547_v58 = vmul.f32 0.2, %v4491_v34  ;;  %vm4519_vm2 = vcmp.gt.f32.partialorder %v4491_v34, 0.0 }
 0x7d3   : > { %v4344_v7 = vadd.f32 %v11744_v8, %v4226_v15  ;;  %v4249_v8 = vsel %vm1363_vm6, %v4246_v25, %v4248_v16  ;;  %v4006_v15 = vadd.f32 %v11996_v36, %v11924_v41  ;;  %v4554_v16 = vmul.f32 0.2, %v4498_v10 }
 0x7d4   : > { %3953 = vrot.lane.b32.xlu2 %v3898_v3, %s14601_s23  ;;  %3955 = vrot.lane.b32.xlu0 %v3900_v31, %s14601_s23  ;;  %v4575_v33 = vsel %vm4519_vm2, %v4491_v34, %v4547_v58  ;;  %v4365_v34 = vrot.slane %v3342_v11, 2  ;;  %vm4527_vm0 = vcmp.gt.f32.partialorder %v4499_v23, 0.0 }
 0x7d5   : > { %v4461_v61 = vadd.f32 %v14883_v0, %v4344_v7  ;;  %v4579_v7 = vsel %vm4523_vm11, %v4495_v14, %v4551_v52  ;;  %v4555_v0 = vmul.f32 0.2, %v4499_v23 }
 0x7d6   : > { %v12023_v6 = vpop.permute.xlu0 %3827  ;;  %v12025_v21 = vpop.permute.xlu2 %4062 }
 0x7d7   : > { %4300 = vrot.lane.b32.xlu1 %v3900_v31, %s14591_s16  ;;  %v4493_v47 = vadd.f32 %v12014_v54, %v4461_v61 }
 0x7d9   : > { %v12030_v37 = vpop.permute.xlu1 %4172  ;;  %v4549_v27 = vmul.f32 0.2, %v4493_v47  ;;  %vm4521_vm9 = vcmp.gt.f32.partialorder %v4493_v47, 0.0 }
 0x7da   : > { %v4236_v60 = vadd.f32 %v12030_v37, %v11942_v13  ;;  %v4501_v13 = vadd.f32 %v12014_v54, %v11962_v29 }
 0x7db   : > { %v4577_v58 = vsel %vm4521_vm9, %v4493_v47, %v4549_v27 }
 0x7dc   : > { %4417 = vrot.lane.b32.xlu2 %v4017_v51, %s14863_s18  ;;  %4637 = vrot.lane.b32.xlu0 %v4574_v42, %s9377_s26  ;;  %v4364_v51 = vsel %vm1572_vm5, %v4362_v50, %v4363_v18  ;;  %v4247_v42 = vsel %vm1363_vm6, %v4245_v57, %v4246_v25  ;;  %vm4529_vm8 = vcmp.gt.f32.partialorder %v4501_v13, 0.0 }
 0x7de   : > { %v12038_v56 = vpop.permute.xlu2 %4290  ;;  %v3536_v3 = vpop.permute.xlu0 %3535 }
 0x7df   : > { %4639 = vrot.lane.b32.xlu1 %v4575_v33, %s9377_s26  ;;  %v3595_v31 = vadd.f32 %v3536_v3, %v11815_v12  ;;  %v4366_v12 = vsel %vm1572_vm5, %v4363_v18, %v4365_v34  ;;  %v4552_v3 = vmul.f32 0.2, %v4496_v44  ;;  %v4354_v61 = vadd.f32 %v12038_v56, %v4236_v60 }
 0x7e0   : > { %v4557_v34 = vmul.f32 0.2, %v4501_v13 }
 0x7e1   : > { %v12042_v40 = vpop.permute.xlu1 %3829  ;;  %v4580_v11 = vsel %vm4524_vm12, %v4496_v44, %v4552_v3 }
 0x7e2   : > { %v4585_v27 = vsel %vm4529_vm8, %v4501_v13, %v4557_v34 }
 0x7e4   : > { %4641 = vrot.lane.b32.xlu2 %v4576_v38, %s9377_s26  ;;  %4419 = vrot.lane.b32.xlu0 %v4364_v51, %s14863_s18  ;;  %v4353_v51 = vadd.f32 %v12006_v45, %v11934_v63  ;;  %v4123_v63 = vadd.f32 %v11983_v1, %v4006_v15 }
 0x7e6   : > { %v12049_v32 = vpop.permute.xlu0 %4407  ;;  %v3720_v30 = vpop.permute.xlu2 %3719  ;;  %v4470_v45 = vadd.f32 %v11972_v39, %v4353_v51  ;;  %v4237_v37 = vadd.f32 %v11998_v59, %v4123_v63 }
 0x7e7   : > { %4184 = vrot.lane.b32.xlu1 %v11993_v20, %s14594_s15  ;;  %v4497_v20 = vadd.f32 %v12014_v54, %v11854_v24 }
 0x7e8   : > { %v4502_v1 = vadd.f32 %v12014_v54, %v4470_v45 }
 0x7e9   : > { %v3718_v48 = vpop.permute.xlu1 %3717  ;;  %v4553_v5 = vmul.f32 0.2, %v4497_v20  ;;  %vm4525_vm14 = vcmp.gt.f32.partialorder %v4497_v20, 0.0 }
 0x7ea   : > { %v3777_v55 = vadd.f32 %v3718_v48, %v3595_v31  ;;  %v4582_v31 = vsel %vm4526_vm15, %v4498_v10, %v4554_v16  ;;  %v4583_v48 = vsel %vm4527_vm0, %v4499_v23, %v4555_v0  ;;  %v4558_v29 = vmul.f32 0.2, %v4502_v1 }
 0x7eb   : > { %v4581_v4 = vsel %vm4525_vm14, %v4497_v20, %v4553_v5  ;;  %vm4530_vm9 = vcmp.gt.f32.partialorder %v4502_v1, 0.0 }
 0x7ec   : > { %4186 = vrot.lane.b32.xlu2 %v3339_v28, %s14594_s15  ;;  %4304 = vrot.lane.b32.xlu0 %v4249_v8, %s14591_s16  ;;  %v4550_v28 = vmul.f32 0.2, %v4494_v2  ;;  %v4586_v57 = vsel %vm4530_vm9, %v4502_v1, %v4558_v29 }
 0x7ee   : > { %v12060_v43 = vpop.permute.xlu0 %4064  ;;  %v12062_v26 = vpop.permute.xlu2 %3947  ;;  %v4578_v17 = vsel %vm4522_vm10, %v4494_v2, %v4550_v28 }
 0x7ef   : > { %4421 = vrot.lane.b32.xlu1 %v4366_v12, %s14863_s18 }
 0x7f1   : > { %v12067_v53 = vpop.permute.xlu1 %3945 }
 0x7f4   : > { %4302 = vrot.lane.b32.xlu2 %v4247_v42, %s14591_s16  ;;  %4643 = vrot.lane.b32.xlu0 %v4577_v58, %s9377_s26 }
 0x7f6   : > { %v4293_v50 = vpop.permute.xlu0 %4292  ;;  %v3832_v18 = vpop.permute.xlu2 %3831 }
 0x7f7   : > { %v12078_v19 = vadd.f32 %v3832_v18, %v3777_v55  ;;  %4645 = vrot.lane.b32.xlu1 %v4578_v17, %s9377_s26  ;;  %v4355_v39 = vadd.f32 %v4293_v50, %v4237_v37  ;;  %v3889_v50 = vadd.f32 %v12023_v6, %v11949_v49 }
 0x7f9   : > { %v3538_v33 = vpop.permute.xlu1 %3537  ;;  %v4007_v17 = vadd.f32 %v12067_v53, %v3889_v50 }
 0x7fa   : > { %v3596_v24 = vadd.f32 %v3538_v33, %v11830_v46  ;;  %v4500_v46 = vadd.f32 %v12014_v54, %v11922_v9  ;;  %v4471_v9 = vadd.f32 %v12049_v32, %v4354_v61 }
 0x7fc   : > { %4647 = vrot.lane.b32.xlu2 %v4579_v7, %s9377_s26  ;;  %4649 = vrot.lane.b32.xlu0 %v4580_v11, %s9377_s26  ;;  %v12092_v38 = vadd.f32 %v3720_v30, %v3596_v24  ;;  %v4556_v25 = vmul.f32 0.2, %v4500_v46  ;;  %vm4528_vm2 = vcmp.gt.f32.partialorder %v4500_v46, 0.0  ;;  %v4503_v56 = vadd.f32 %v12014_v54, %v4471_v9 }
 0x7fd   : > { %v3890_v24 = vadd.f32 %v12042_v40, %v11975_v62 }
 0x7fe   : > { %v4177_v41 = vpop.permute.xlu0 %4176  ;;  %v3540_v36 = vpop.permute.xlu2 %3539  ;;  %v4584_v47 = vsel %vm4528_vm2, %v4500_v46, %v4556_v25  ;;  %v4559_v2 = vmul.f32 0.2, %v4503_v56  ;;  %vm4531_vm10 = vcmp.gt.f32.partialorder %v4503_v56, 0.0 }
 0x7ff   : > { %4651 = vrot.lane.b32.xlu1 %v4581_v4, %s9377_s26  ;;  %v3597_v28 = vadd.f32 %v3540_v36, %v11864_v22  ;;  %v4124_v22 = vadd.f32 %v12025_v21, %v4007_v17  ;;  %v4008_v49 = vadd.f32 %v12062_v26, %v3890_v24 }
 0x800   : > { %v4587_v44 = vsel %vm4531_vm10, %v4503_v56, %v4559_v2 }
 0x801   : > { %v4410_v30 = vpop.permute.xlu1 %4409  ;;  %v4238_v33 = vadd.f32 %v4177_v41, %v4124_v22  ;;  %v4125_v11 = vadd.f32 %v12060_v43, %v4008_v49 }
 0x802   : > { %v4472_v55 = vadd.f32 %v4410_v30, %v4355_v39 }
 0x804   : > { %4653 = vrot.lane.b32.xlu2 %v4582_v31, %s9377_s26  ;;  %4655 = vrot.lane.b32.xlu0 %v4583_v48, %s9377_s26  ;;  %v4504_v12 = vadd.f32 %v12014_v54, %v4472_v55  ;;  %v2955_v31 = vld [vmem:[#allocation2 + $0x218] sm:$0xff] }
 0x805   : > { %9086 = vmatmul.msk.f32.gmra.mxu1 %vm2958_vm7, %v2955_v31 }
 0x806   : > { %v12110_v8 = vpop.permute.xlu0 %3833  ;;  %v4412_v32 = vpop.permute.xlu2 %4411  ;;  %v4560_v42 = vmul.f32 0.2, %v4504_v12  ;;  %vm4532_vm11 = vcmp.gt.f32.partialorder %v4504_v12, 0.0 }
 0x807   : > { %4657 = vrot.lane.b32.xlu1 %v4584_v47, %s9377_s26  ;;  %v3892_v37 = vadd.f32 %v12110_v8, %v12092_v38 }
 0x808   : > { %v4588_v52 = vsel %vm4532_vm11, %v4504_v12, %v4560_v42 }
 0x809   : > { %v4179_v59 = vpop.permute.xlu1 %4178 }
 0x80a   : > { %v4239_v16 = vadd.f32 %v4179_v59, %v4125_v11 }
 0x80c   : > { %4659 = vrot.lane.b32.xlu2 %v4585_v27, %s9377_s26  ;;  %4661 = vrot.lane.b32.xlu0 %v4586_v57, %s9377_s26 }
 0x80e   : > { %v3722_v58 = vpop.permute.xlu0 %3721  ;;  %v4069_v14 = vpop.permute.xlu2 %4068 }
 0x80f   : > { %v12117_v20 = vadd.f32 %v3722_v58, %v3597_v28  ;;  %4663 = vrot.lane.b32.xlu1 %v4587_v44, %s9377_s26 }
 0x811   : > { %v4067_v18 = vpop.permute.xlu1 %4066 }
 0x814   : > { %4665 = vrot.lane.b32.xlu2 %v4588_v52, %s9377_s26 }
 0x816   : > { %v3950_v3 = vpop.permute.xlu0 %3949  ;;  %v4297_v5 = vpop.permute.xlu2 %4296 }
 0x817   : > { %v4357_v46 = vadd.f32 %v4297_v5, %v4239_v16  ;;  %v4009_v25 = vadd.f32 %v3950_v3, %v12078_v19 }
 0x819   : > { %v4295_v10 = vpop.permute.xlu1 %4294  ;;  %v4126_v48 = vadd.f32 %v4067_v18, %v4009_v25 }
 0x81a   : > { %v4356_v23 = vadd.f32 %v4295_v10, %v4238_v33 }
 0x81c   : > { %v4473_v15 = vadd.f32 %v4412_v32, %v4356_v23 }
 0x81e   : > { %v4505_v6 = vadd.f32 %v12014_v54, %v4473_v15  ;;  %v3542_v51 = vpop.permute.xlu0 %3541  ;;  %v4181_v53 = vpop.permute.xlu2 %4180 }
 0x81f   : > { %v4240_v13 = vadd.f32 %v4181_v53, %v4126_v48  ;;  %v3598_v28 = vadd.f32 %v3542_v51, %v11876_v35 }
 0x820   : > { %vm4533_vm12 = vcmp.gt.f32.partialorder %v4505_v6, 0.0  ;;  %v4561_v7 = vmul.f32 0.2, %v4505_v6 }
 0x821   : > { %v3724_v21 = vpop.permute.xlu1 %3723 }
 0x822   : > { %v4589_v4 = vsel %vm4533_vm12, %v4505_v6, %v4561_v7  ;;  %v3780_v18 = vadd.f32 %v3724_v21, %v3598_v28 }
 0x823   : > { %4667 = vrot.lane.b32.xlu0 %v4589_v4, %s9377_s26 }
 0x826   : > { %v4414_v60 = vpop.permute.xlu0 %4413  ;;  %v3838_v41 = vpop.permute.xlu2 %3837 }
 0x827   : > { %v4474_v62 = vadd.f32 %v4414_v60, %v4357_v46  ;;  %v3894_v22 = vadd.f32 %v3838_v41, %v3780_v18 }
 0x829   : > { %v4506_v40 = vadd.f32 %v12014_v54, %v4474_v62  ;;  %v3952_v26 = vpop.permute.xlu1 %3951 }
 0x82a   : > { %v4010_v32 = vadd.f32 %v3952_v26, %v3892_v37 }
 0x82b   : > { %v4562_v36 = vmul.f32 0.2, %v4506_v40  ;;  %vm4534_vm14 = vcmp.gt.f32.partialorder %v4506_v40, 0.0 }
 0x82c   : > { %v4127_v19 = vadd.f32 %v4069_v14, %v4010_v32 }
 0x82d   : > { %v4590_v0 = vsel %vm4534_vm14, %v4506_v40, %v4562_v36 }
 0x82e   : > { %v4183_v63 = vpop.permute.xlu0 %4182  ;;  %v3954_v45 = vpop.permute.xlu2 %3953  ;;  %4669 = vrot.lane.b32.xlu1 %v4590_v0, %s9377_s26 }
 0x82f   : > { %v4241_v27 = vadd.f32 %v4183_v63, %v4127_v19 }
 0x831   : > { %v3836_v43 = vpop.permute.xlu1 %3835 }
 0x832   : > { %v3893_v14 = vadd.f32 %v3836_v43, %v12117_v20 }
 0x834   : > { %v4011_v3 = vadd.f32 %v3954_v45, %v3893_v14 }
 0x836   : > { %v4071_v61 = vpop.permute.xlu0 %4070  ;;  %v4418_v30 = vpop.permute.xlu2 %4417 }
 0x837   : > { %v4128_v10 = vadd.f32 %v4071_v61, %v4011_v3 }
 0x839   : > { %v4416_v9 = vpop.permute.xlu1 %4415 }
 0x83e   : > { %v4299_v1 = vpop.permute.xlu0 %4298  ;;  %v4642_v39 = vpop.permute.xlu2 %4641 }
 0x83f   : > { %v4358_v56 = vadd.f32 %v4299_v1, %v4240_v13  ;;  %4718 = vst.msk [vmem:[#allocation2 + $0xc9] sm:$0xff] %vm4708_vm13, %v4642_v39 }
 0x841   : > { %v4475_v47 = vadd.f32 %v4416_v9, %v4358_v56  ;;  %v4073_v34 = vpop.permute.xlu1 %4072 }
 0x843   : > { %v4507_v55 = vadd.f32 %v12014_v54, %v4475_v47 }
 0x845   : > { %vm4535_vm15 = vcmp.gt.f32.partialorder %v4507_v55, 0.0  ;;  %v4563_v29 = vmul.f32 0.2, %v4507_v55 }
 0x846   : > { %v3956_v59 = vpop.permute.xlu0 %3955  ;;  %v4187_v2 = vpop.permute.xlu2 %4186 }
 0x847   : > { %v4591_v12 = vsel %vm4535_vm15, %v4507_v55, %v4563_v29  ;;  %v4012_v35 = vadd.f32 %v3956_v59, %v3894_v22 }
 0x848   : > { %4671 = vrot.lane.b32.xlu2 %v4591_v12, %s9377_s26 }
 0x849   : > { %v4301_v38 = vpop.permute.xlu1 %4300  ;;  %v4129_v23 = vadd.f32 %v4073_v34, %v4012_v35 }
 0x84a   : > { %v4359_v8 = vadd.f32 %v4301_v38, %v4241_v27 }
 0x84b   : > { %v4243_v49 = vadd.f32 %v4187_v2, %v4129_v23 }
 0x84c   : > { %v4476_v57 = vadd.f32 %v4418_v30, %v4359_v8 }
 0x84e   : > { %v4508_v58 = vadd.f32 %v12014_v54, %v4476_v57  ;;  %v4638_v44 = vpop.permute.xlu0 %4637  ;;  %v4303_v42 = vpop.permute.xlu2 %4302 }
 0x84f   : > { %4716 = vst.msk [vmem:[#allocation2 + $0xa9] sm:$0xff] %vm4708_vm13, %v4638_v44 }
 0x850   : > { %vm4536_vm7 = vcmp.gt.f32.partialorder %v4508_v58, 0.0  ;;  %v4564_v50 = vmul.f32 0.2, %v4508_v58 }
 0x851   : > { %v4640_v17 = vpop.permute.xlu1 %4639 }
 0x852   : > { %4717 = vst.msk [vmem:[#allocation2 + $0xc1] sm:$0xff] %vm4708_vm13, %v4640_v17  ;;  %v4592_v52 = vsel %vm4536_vm7, %v4508_v58, %v4564_v50 }
 0x853   : > { %4673 = vrot.lane.b32.xlu0 %v4592_v52, %s9377_s26 }
 0x856   : > { %v4420_v5 = vpop.permute.xlu0 %4419  ;;  %v4648_v33 = vpop.permute.xlu2 %4647 }
 0x857   : > { %4721 = vst.msk [vmem:[#allocation2 + $0x101] sm:$0xff] %vm4708_vm13, %v4648_v33 }
 0x859   : > { %v4185_v24 = vpop.permute.xlu1 %4184 }
 0x85a   : > { %v4242_v20 = vadd.f32 %v4185_v24, %v4128_v10 }
 0x85c   : > { %v4360_v15 = vadd.f32 %v4303_v42, %v4242_v20 }
 0x85e   : > { %v4477_v6 = vadd.f32 %v4420_v5, %v4360_v15  ;;  %v4654_v51 = vpop.permute.xlu2 %4653  ;;  %v4305_v53 = vpop.permute.xlu0 %4304 }
 0x85f   : > { %4724 = vst.msk [vmem:[#allocation2 + $0x129] sm:$0xff] %vm4708_vm13, %v4654_v51  ;;  %v4361_v7 = vadd.f32 %v4305_v53, %v4243_v49 }
 0x860   : > { %v4509_v11 = vadd.f32 %v12014_v54, %v4477_v6 }
 0x861   : > { %v4422_v21 = vpop.permute.xlu1 %4421 }
 0x862   : > { %v4478_v4 = vadd.f32 %v4422_v21, %v4361_v7  ;;  %vm4537_vm0 = vcmp.gt.f32.partialorder %v4509_v11, 0.0  ;;  %v4565_v16 = vmul.f32 0.2, %v4509_v11 }
 0x864   : > { %v4510_v46 = vadd.f32 %v12014_v54, %v4478_v4  ;;  %v4593_v60 = vsel %vm4537_vm0, %v4509_v11, %v4565_v16 }
 0x865   : > { %4675 = vrot.lane.b32.xlu1 %v4593_v60, %s9377_s26 }
 0x866   : > { %v4566_v41 = vmul.f32 0.2, %v4510_v46  ;;  %v4660_v62 = vpop.permute.xlu2 %4659  ;;  %v4644_v40 = vpop.permute.xlu0 %4643  ;;  %vm4538_vm2 = vcmp.gt.f32.partialorder %v4510_v46, 0.0 }
 0x867   : > { %4727 = vst.msk [vmem:[#allocation2 + $0x161] sm:$0xff] %vm4708_vm13, %v4660_v62 }
 0x868   : > { %4719 = vst.msk [vmem:[#allocation2 + $0xe1] sm:$0xff] %vm4708_vm13, %v4644_v40  ;;  %v4594_v26 = vsel %vm4538_vm2, %v4510_v46, %v4566_v41 }
 0x869   : > { %v4646_v36 = vpop.permute.xlu1 %4645  ;;  %4677 = vrot.lane.b32.xlu2 %v4594_v26, %s9377_s26 }
 0x86a   : > { %4720 = vst.msk [vmem:[#allocation2 + $0xe9] sm:$0xff] %vm4708_vm13, %v4646_v36 }
 0x86e   : > { %v4666_v0 = vpop.permute.xlu2 %4665  ;;  %v4650_v63 = vpop.permute.xlu0 %4649 }
 0x86f   : > { %4730 = vst.msk [vmem:[#allocation2 + $0x189] sm:$0xff] %vm4708_vm13, %v4666_v0 }
 0x870   : > { %4722 = vst.msk [vmem:[#allocation2 + $0x109] sm:$0xff] %vm4708_vm13, %v4650_v63 }
 0x871   : > { %v4652_v54 = vpop.permute.xlu1 %4651 }
 0x872   : > { %4723 = vst.msk [vmem:[#allocation2 + $0x121] sm:$0xff] %vm4708_vm13, %v4652_v54 }
 0x876   : > { %v4656_v45 = vpop.permute.xlu0 %4655 }
 0x877   : > { %4725 = vst.msk [vmem:[#allocation2 + $0x141] sm:$0xff] %vm4708_vm13, %v4656_v45 }
 0x879   : > { %v4658_v43 = vpop.permute.xlu1 %4657 }
 0x87a   : > { %4726 = vst.msk [vmem:[#allocation2 + $0x149] sm:$0xff] %vm4708_vm13, %v4658_v43 }
 0x87e   : > { %v4662_v61 = vpop.permute.xlu0 %4661 }
 0x87f   : > { %4728 = vst.msk [vmem:[#allocation2 + $0x169] sm:$0xff] %vm4708_vm13, %v4662_v61 }
 0x881   : > { %v4664_v30 = vpop.permute.xlu1 %4663 }
 0x882   : > { %4729 = vst.msk [vmem:[#allocation2 + $0x181] sm:$0xff] %vm4708_vm13, %v4664_v30  ;;  %v3345_v48 = vpop.f32.mrf.mxu1 }
 0x895   : > { %v4668_v25 = vpop.permute.xlu0 %4667 }
 0x896   : > { %4731 = vst.msk [vmem:[#allocation2 + $0x1a1] sm:$0xff] %vm4708_vm13, %v4668_v25 }
 0x8a0   : > { %v4670_v9 = vpop.permute.xlu1 %4669 }
 0x8a1   : > { %4732 = vst.msk [vmem:[#allocation2 + $0x1a9] sm:$0xff] %vm4708_vm13, %v4670_v9 }
 0x8a2   : > { %v4672_v31 = vpop.permute.xlu2 %4671 }
 0x8a3   : > { %4733 = vst.msk [vmem:[#allocation2 + $0x1c1] sm:$0xff] %vm4708_vm13, %v4672_v31 }
 0x8c3   : > { %v4678_v13 = vpop.permute.xlu2 %4677 }
 0x8c4   : > { %4736 = vst.msk [vmem:[#allocation2 + $0x1e9] sm:$0xff] %vm4708_vm13, %v4678_v13 }
 0x8c5   : > { %v4674_v37 = vpop.permute.xlu0 %4673 }
 0x8c6   : > { %4734 = vst.msk [vmem:[#allocation2 + $0x1c9] sm:$0xff] %vm4708_vm13, %v4674_v37 }
 0x8d4   : > { %4739 = sbr.rel (%p8944_p12) target bundleno = 2272 (0x8e0), region = 100 }
 0x8d7   : > { %v4676_v1 = vpop.permute.xlu1 %4675 }
 0x8d8   : > { %4735 = vst.msk [vmem:[#allocation2 + $0x1e1] sm:$0xff] %vm4708_vm13, %v4676_v1 }
 0x8d9   : > { %v9378_v39 = vmov 0.0  }
 0x8da   : > { %4740 = vst.msk [vmem:[#allocation2 + $0x41] sm:$0xff] %vm4708_vm13, %v9378_v39 }
 0x8db   : > { %4741 = vst.msk [vmem:[#allocation2 + $0x49] sm:$0xff] %vm4708_vm13, %v9378_v39 }
 0x8dc   : > { %4742 = vst.msk [vmem:[#allocation2 + $0x61] sm:$0xff] %vm4708_vm13, %v9378_v39 }
 0x8dd   : > { %4743 = vst.msk [vmem:[#allocation2 + $0x69] sm:$0xff] %vm4708_vm13, %v9378_v39 }
 0x8de   : > { %4744 = vst.msk [vmem:[#allocation2 + $0x81] sm:$0xff] %vm4708_vm13, %v9378_v39 }
 0x8df   : > { %4745 = vst.msk [vmem:[#allocation2 + $0x89] sm:$0xff] %vm4708_vm13, %v9378_v39 }
 0x8e0 PF: > { %4748 = sbr.rel (%p8946_p0) target bundleno = 2284 (0x8ec), region = 104 }
 0x8e5   : > { %v9379_v56 = vmov 0.0  }
 0x8e6   : > { %4750 = vst.msk [vmem:[#allocation2 + $0x1a1] sm:$0xff] %vm4708_vm13, %v9379_v56 }
 0x8e7   : > { %4751 = vst.msk [vmem:[#allocation2 + $0x1a9] sm:$0xff] %vm4708_vm13, %v9379_v56 }
 0x8e8   : > { %4752 = vst.msk [vmem:[#allocation2 + $0x1c1] sm:$0xff] %vm4708_vm13, %v9379_v56 }
 0x8e9   : > { %4753 = vst.msk [vmem:[#allocation2 + $0x1c9] sm:$0xff] %vm4708_vm13, %v9379_v56 }
 0x8ea   : > { %4754 = vst.msk [vmem:[#allocation2 + $0x1e1] sm:$0xff] %vm4708_vm13, %v9379_v56 }
 0x8eb   : > { %4755 = vst.msk [vmem:[#allocation2 + $0x1e9] sm:$0xff] %vm4708_vm13, %v9379_v56 }
 0x8ec PF: > { %v4814_v32 = vld [vmem:[%s14568_s7 + $0x10] sm:$0xf]  ;;  %v4813_v47 = vld [vmem:[%s14568_s7 + $0x8] sm:$0xff]  ;;  %v4812_v34 = vld [vmem:[%s14568_s7] sm:$0xff]  ;;  %vm4815_vm13 = vcmask 162816   ;;  %s14886_s15 = smov 80  }
 0x8ed   : > { %9243 = vmatpush.msk.msra.mxu2 %vm1064_vm4, %v4814_v32  ;;  %9089 = vmatpush.msk.msra.mxu1 %vm1064_vm4, %v4814_v32  ;;  %v4760_v55 = vld [vmem:[#allocation2 + $0x60] sm:$0xff]  ;;  %v4761_v29 = vld [vmem:[#allocation2 + $0x68] sm:$0xff]  ;;  %v4762_v2 = vld [vmem:[#allocation2 + $0x70] sm:$0xff]  ;;  %s14887_s16 = smov 72   ;;  %s14888_s18 = smov 64  }
 0x8ee   : > { %v4756_v19 = vld [vmem:[#allocation2 + $0x40] sm:$0xff]  ;;  %v4757_v59 = vld [vmem:[#allocation2 + $0x48] sm:$0xff]  ;;  %v4758_v12 = vld [vmem:[#allocation2 + $0x50] sm:$0xff]  ;;  %s9380_s22 = smov 20  }
 0x8ef   : > { %9244 = vmatpush.msra.mxu2 %v4813_v47  ;;  %5001 = vmatpush.msra.mxu1 %v4813_v47  ;;  %v4763_v27 = vld [vmem:[#allocation2 + $0x78] sm:$0xff]  ;;  %v4764_v38 = vld [vmem:[#allocation2 + $0x80] sm:$0xff]  ;;  %v4765_v8 = vld [vmem:[#allocation2 + $0x88] sm:$0xff] }
 0x8f0   : > { %v4766_v57 = vld [vmem:[#allocation2 + $0x90] sm:$0xff]  ;;  %v4767_v28 = vld [vmem:[#allocation2 + $0x98] sm:$0xff]  ;;  %v4768_v58 = vld [vmem:[#allocation2 + $0xa0] sm:$0xff] }
 0x8f1   : > { %9245 = vmatpush.msra.mxu2 %v4812_v34  ;;  %5002 = vmatpush.msra.mxu1 %v4812_v34  ;;  %v4769_v44 = vld [vmem:[#allocation2 + $0xa8] sm:$0xff]  ;;  %v4770_v42 = vld [vmem:[#allocation2 + $0xb0] sm:$0xff]  ;;  %v4771_v14 = vld [vmem:[#allocation2 + $0xb8] sm:$0xff] }
 0x8f2   : > { %9094 = vmatmul.msk.f32.vlgmr.msra.gmra.mxu2 %vm4815_vm13, %v4760_v55  ;;  %9090 = vmatmul.msk.f32.vlgmr.msra.gmra.mxu1 %vm4815_vm13, %v4756_v19  ;;  %v4772_v50 = vld [vmem:[#allocation2 + $0xc0] sm:$0xff]  ;;  %v4773_v18 = vld [vmem:[#allocation2 + $0xc8] sm:$0xff]  ;;  %v4774_v17 = vld [vmem:[#allocation2 + $0xd0] sm:$0xff] }
 0x8f3   : > { %v4775_v52 = vld [vmem:[#allocation2 + $0xd8] sm:$0xff]  ;;  %v4776_v3 = vld [vmem:[#allocation2 + $0xe0] sm:$0xff]  ;;  %v4777_v10 = vld [vmem:[#allocation2 + $0xe8] sm:$0xff] }
 0x8f4   : > { %v4778_v11 = vld [vmem:[#allocation2 + $0xf0] sm:$0xff]  ;;  %v4779_v63 = vld [vmem:[#allocation2 + $0xf8] sm:$0xff]  ;;  %v4780_v25 = vld [vmem:[#allocation2 + $0x100] sm:$0xff] }
 0x8f5   : > { %v4781_v37 = vld [vmem:[#allocation2 + $0x108] sm:$0xff]  ;;  %v4782_v32 = vld [vmem:[#allocation2 + $0x110] sm:$0xff] }
 0x8fa   : > { %9095 = vmatmul.msk.f32.gmra.mxu2 %vm4815_vm13, %v4761_v29  ;;  %9091 = vmatmul.msk.f32.gmra.mxu1 %vm4815_vm13, %v4757_v59 }
 0x902   : > { %9096 = vmatmul.msk.f32.gmra.mxu2 %vm4815_vm13, %v4762_v2  ;;  %9092 = vmatmul.msk.f32.gmra.mxu1 %vm4815_vm13, %v4758_v12  ;;  %v4783_v12 = vld [vmem:[#allocation2 + $0x118] sm:$0xff] }
 0x90a   : > { %9097 = vmatmul.msk.f32.gmra.mxu2 %vm4815_vm13, %v4763_v27 }
 0x912   : > { %9098 = vmatmul.msk.f32.gmra.mxu2 %vm4815_vm13, %v4764_v38  ;;  %v4784_v38 = vld [vmem:[#allocation2 + $0x120] sm:$0xff] }
 0x91a   : > { %9099 = vmatmul.msk.f32.gmra.mxu2 %vm4815_vm13, %v4765_v8 }
 0x922   : > { %9100 = vmatmul.msk.f32.gmra.mxu2 %vm4815_vm13, %v4766_v57 }
 0x92a   : > { %9101 = vmatmul.msk.f32.gmra.mxu2 %vm4815_vm13, %v4767_v28 }
 0x932   : > { %9102 = vmatmul.msk.f32.gmra.mxu2 %vm4815_vm13, %v4768_v58  ;;  %v4785_v58 = vld [vmem:[#allocation2 + $0x128] sm:$0xff] }
 0x93a   : > { %9103 = vmatmul.msk.f32.gmra.mxu2 %vm4815_vm13, %v4769_v44 }
 0x942   : > { %9104 = vmatmul.msk.f32.gmra.mxu2 %vm4815_vm13, %v4770_v42 }
 0x94a   : > { %9105 = vmatmul.msk.f32.gmra.mxu2 %vm4815_vm13, %v4771_v14 }
 0x952   : > { %9106 = vmatmul.msk.f32.gmra.mxu2 %vm4815_vm13, %v4772_v50 }
 0x95a   : > { %9107 = vmatmul.msk.f32.gmra.mxu2 %vm4815_vm13, %v4773_v18  ;;  %v4786_v18 = vld [vmem:[#allocation2 + $0x130] sm:$0xff] }
 0x962   : > { %9108 = vmatmul.msk.f32.gmra.mxu2 %vm4815_vm13, %v4774_v17 }
 0x96a   : > { %9109 = vmatmul.msk.f32.gmra.mxu2 %vm4815_vm13, %v4775_v52 }
 0x96f   : > { %v12214_v22 = vpop.f32.mrf.mxu1 }
 0x970   : > { %v5218_v33 = vrot.slane %v12214_v22, 1  ;;  %v5374_v53 = vrot.slane %v12214_v22, 2 }
 0x972   : > { %9110 = vmatmul.msk.f32.gmra.mxu2 %vm4815_vm13, %v4776_v3 }
 0x975   : > { %v12217_v35 = vpop.f32.mrf.mxu2 }
 0x976   : > { %5532 = vrot.lane.b32.xlu0 %v12217_v35, %s14613_s19  ;;  %v5379_v15 = vrot.slane %v12217_v35, 2  ;;  %v5223_v21 = vrot.slane %v12217_v35, 1 }
 0x977   : > { %v12221_v5 = vpop.f32.mrf.mxu1 }
 0x978   : > { %v5219_v23 = vrot.slane %v12221_v5, 1  ;;  %v5375_v7 = vrot.slane %v12221_v5, 2 }
 0x97a   : > { %9111 = vmatmul.msk.f32.gmra.mxu2 %vm4815_vm13, %v4777_v10  ;;  %v5220_v24 = vsel %vm1363_vm6, %v5218_v33, %v5219_v23  ;;  %v5376_v46 = vsel %vm1572_vm5, %v5374_v53, %v5375_v7 }
 0x97d   : > { %v12227_v20 = vpop.f32.mrf.mxu2 }
 0x97e   : > { %14884 = vst [vmem:[#allocation5_spill] sm:$0xff] %v12227_v20  ;;  %5534 = vrot.lane.b32.xlu1 %v12227_v20, %s14613_s19  ;;  %5278 = vrot.lane.b32.xlu0 %v5220_v24, %s9367_s14  ;;  %v5380_v49 = vrot.slane %v12227_v20, 2  ;;  %v5224_v51 = vrot.slane %v12227_v20, 1 }
 0x97f   : > { %v5010_v60 = vpop.f32.mrf.mxu1 }
 0x980   : > { %v5381_v6 = vsel %vm1572_vm5, %v5379_v15, %v5380_v49  ;;  %v5225_v16 = vsel %vm1363_vm6, %v5223_v21, %v5224_v51  ;;  %v5377_v41 = vrot.slane %v5010_v60, 2  ;;  %v5221_v54 = vrot.slane %v5010_v60, 1  ;;  %v4788_v21 = vld [vmem:[#allocation2 + $0x140] sm:$0xff] }
 0x981   : > { %5438 = vrot.lane.b32.xlu2 %v5381_v6, %s9366_s17 }
 0x982   : > { %9112 = vmatmul.msk.f32.gmra.mxu2 %vm4815_vm13, %v4778_v11  ;;  %v5378_v40 = vsel %vm1572_vm5, %v5375_v7, %v5377_v41  ;;  %v5222_v61 = vsel %vm1363_vm6, %v5219_v23, %v5221_v54  ;;  %v4790_v54 = vld [vmem:[#allocation2 + $0x150] sm:$0xff] }
 0x985   : > { %v5021_v4 = vpop.f32.mrf.mxu2 }
 0x986   : > { %5282 = vrot.lane.b32.xlu1 %v5225_v16, %s9367_s14  ;;  %5434 = vrot.lane.b32.xlu0 %v5376_v46, %s9366_s17  ;;  %v5226_v26 = vrot.slane %v5021_v4, 1  ;;  %v5382_v31 = vrot.slane %v5021_v4, 2  ;;  %v4789_v46 = vld [vmem:[#allocation2 + $0x148] sm:$0xff] }
 0x988   : > { %v5227_v0 = vsel %vm1363_vm6, %v5224_v51, %v5226_v26  ;;  %v5383_v48 = vsel %vm1572_vm5, %v5380_v49, %v5382_v31  ;;  %v4787_v49 = vld [vmem:[#allocation2 + $0x138] sm:$0xff] }
 0x98a   : > { %9113 = vmatmul.msk.f32.gmra.mxu2 %vm4815_vm13, %v4779_v63 }
 0x98d   : > { %v5024_v62 = vpop.f32.mrf.mxu2 }
 0x98e   : > { %5634 = vrot.lane.b32.xlu0 %v5225_v16, %s14601_s23  ;;  %5436 = vrot.lane.b32.xlu1 %v5378_v40, %s9366_s17 }
 0x992   : > { %9114 = vmatmul.msk.f32.gmra.mxu2 %vm4815_vm13, %v4780_v25 }
 0x995   : > { %v12248_v36 = vpop.f32.mrf.mxu2 }
 0x996   : > { %5735 = vrot.lane.b32.xlu0 %v5381_v6, %s14599_s24  ;;  %5284 = vrot.lane.b32.xlu1 %v5227_v0, %s9367_s14  ;;  %v5228_v45 = vrot.slane %v12248_v36, 1  ;;  %v5384_v1 = vrot.slane %v12248_v36, 2 }
 0x997   : > { %5536 = vrot.lane.b32.xlu2 %v12248_v36, %s14613_s19 }
 0x99a   : > { %9115 = vmatmul.msk.f32.gmra.mxu2 %vm4815_vm13, %v4781_v37 }
 0x99d   : > { %v12257_v43 = vpop.f32.mrf.mxu2 }
 0x99e   : > { %14885 = vst [vmem:[#allocation15_spill] sm:$0xff] %v12257_v43  ;;  %5636 = vrot.lane.b32.xlu1 %v5227_v0, %s14601_s23  ;;  %5280 = vrot.lane.b32.xlu0 %v5222_v61, %s9367_s14  ;;  %v5229_v30 = vrot.slane %v12257_v43, 1  ;;  %v5385_v39 = vrot.slane %v12257_v43, 2 }
 0x9a0   : > { %v5230_v9 = vsel %vm1363_vm6, %v5228_v45, %v5229_v30  ;;  %v5386_v47 = vsel %vm1572_vm5, %v5384_v1, %v5385_v39 }
 0x9a1   : > { %5286 = vrot.lane.b32.xlu2 %v5230_v9, %s9367_s14 }
 0x9a2   : > { %9116 = vmatmul.msk.f32.gmra.mxu2 %vm4815_vm13, %v4782_v32 }
 0x9a5   : > { %v5032_v13 = vpop.f32.mrf.mxu2 }
 0x9a6   : > { %5737 = vrot.lane.b32.xlu1 %v5383_v48, %s14599_s24  ;;  %5440 = vrot.lane.b32.xlu0 %v5383_v48, %s9366_s17  ;;  %v5231_v34 = vrot.slane %v5032_v13, 1  ;;  %v5387_v29 = vrot.slane %v5032_v13, 2 }
 0x9a8   : > { %v5232_v19 = vsel %vm1363_vm6, %v5229_v30, %v5231_v34  ;;  %v5388_v2 = vsel %vm1572_vm5, %v5385_v39, %v5387_v29 }
 0x9a9   : > { %5638 = vrot.lane.b32.xlu2 %v5230_v9, %s14601_s23 }
 0x9aa   : > { %9117 = vmatmul.msk.f32.gmra.mxu2 %vm4815_vm13, %v4783_v12 }
 0x9ad   : > { %v5035_v56 = vpop.f32.mrf.mxu2 }
 0x9ae   : > { %5835 = vrot.lane.b32.xlu1 %v12257_v43, %s14886_s15  ;;  %5833 = vrot.lane.b32.xlu0 %v12248_v36, %s14886_s15 }
 0x9b1   : > { %5739 = vrot.lane.b32.xlu2 %v5386_v47, %s14599_s24 }
 0x9b2   : > { %9118 = vmatmul.msk.f32.gmra.mxu2 %vm4815_vm13, %v4784_v38 }
 0x9b5   : > { %v12280_v55 = vpop.f32.mrf.mxu2 }
 0x9b6   : > { %5442 = vrot.lane.b32.xlu1 %v5386_v47, %s9366_s17  ;;  %5538 = vrot.lane.b32.xlu0 %v12257_v43, %s14613_s19  ;;  %v5233_v57 = vrot.slane %v12280_v55, 1  ;;  %v5389_v14 = vrot.slane %v12280_v55, 2 }
 0x9b9   : > { %5288 = vrot.lane.b32.xlu2 %v5232_v19, %s9367_s14 }
 0x9ba   : > { %9119 = vmatmul.msk.f32.gmra.mxu2 %vm4815_vm13, %v4785_v58 }
 0x9bd   : > { %v12287_v59 = vpop.f32.mrf.mxu2 }
 0x9be   : > { %5937 = vrot.lane.b32.xlu1 %v5232_v19, %s14887_s16  ;;  %5935 = vrot.lane.b32.xlu0 %v5230_v9, %s14887_s16  ;;  %v5234_v28 = vrot.slane %v12287_v59, 1  ;;  %v5390_v50 = vrot.slane %v12287_v59, 2 }
 0x9c0   : > { %v5235_v44 = vsel %vm1363_vm6, %v5233_v57, %v5234_v28  ;;  %v5391_v17 = vsel %vm1572_vm5, %v5389_v14, %v5390_v50 }
 0x9c1   : > { %5444 = vrot.lane.b32.xlu2 %v5388_v2, %s9366_s17 }
 0x9c2   : > { %9120 = vmatmul.msk.f32.gmra.mxu2 %vm4815_vm13, %v4786_v18 }
 0x9c5   : > { %v5043_v27 = vpop.f32.mrf.mxu2 }
 0x9c6   : > { %6038 = vrot.lane.b32.xlu1 %v5388_v2, %s14888_s18  ;;  %6036 = vrot.lane.b32.xlu0 %v5386_v47, %s14888_s18  ;;  %v5236_v3 = vrot.slane %v5043_v27, 1  ;;  %v5392_v24 = vrot.slane %v5043_v27, 2 }
 0x9c8   : > { %v5237_v33 = vsel %vm1363_vm6, %v5234_v28, %v5236_v3  ;;  %v5393_v6 = vsel %vm1572_vm5, %v5390_v50, %v5392_v24  ;;  %v4793_v50 = vld [vmem:[#allocation2 + $0x168] sm:$0xff] }
 0x9c9   : > { %5837 = vrot.lane.b32.xlu2 %v12280_v55, %s14886_s15 }
 0x9ca   : > { %9121 = vmatmul.msk.f32.gmra.mxu2 %vm4815_vm13, %v4787_v49 }
 0x9cd   : > { %v5046_v8 = vpop.f32.mrf.mxu2 }
 0x9ce   : > { %5540 = vrot.lane.b32.xlu1 %v12280_v55, %s14613_s19  ;;  %5640 = vrot.lane.b32.xlu0 %v5232_v19, %s14601_s23  ;;  %v4791_v19 = vld [vmem:[#allocation2 + $0x158] sm:$0xff]  ;;  %v4792_v8 = vld [vmem:[#allocation2 + $0x160] sm:$0xff] }
 0x9d1   : > { %5542 = vrot.lane.b32.xlu2 %v12287_v59, %s14613_s19 }
 0x9d2   : > { %9122 = vmatmul.msk.f32.gmra.mxu2 %vm4815_vm13, %v4788_v21 }
 0x9d5   : > { %v12308_v42 = vpop.f32.mrf.mxu2 }
 0x9d6   : > { %5642 = vrot.lane.b32.xlu1 %v5235_v44, %s14601_s23  ;;  %5741 = vrot.lane.b32.xlu0 %v5388_v2, %s14599_s24  ;;  %v5238_v41 = vrot.slane %v12308_v42, 1  ;;  %v5394_v61 = vrot.slane %v12308_v42, 2 }
 0x9d9   : > { %5939 = vrot.lane.b32.xlu2 %v5235_v44, %s14887_s16 }
 0x9da   : > { %9123 = vmatmul.msk.f32.gmra.mxu2 %vm4815_vm13, %v4789_v46 }
 0x9db   : > { %v12330_v15 = vpop.permute.xlu2 %5438 }
 0x9dc   : > { %14890 = vst [vmem:[#allocation17_spill] sm:$0xff] %v12330_v15 }
 0x9dd   : > { %v12317_v52 = vpop.f32.mrf.mxu2 }
 0x9de   : > { %5743 = vrot.lane.b32.xlu1 %v5391_v17, %s14599_s24  ;;  %5839 = vrot.lane.b32.xlu0 %v12287_v59, %s14886_s15  ;;  %v5239_v62 = vrot.slane %v12317_v52, 1  ;;  %v5395_v30 = vrot.slane %v12317_v52, 2 }
 0x9e0   : > { %v5240_v63 = vsel %vm1363_vm6, %v5238_v41, %v5239_v62  ;;  %v5396_v48 = vsel %vm1572_vm5, %v5394_v61, %v5395_v30 }
 0x9e1   : > { %6040 = vrot.lane.b32.xlu2 %v5391_v17, %s14888_s18 }
 0x9e2   : > { %9124 = vmatmul.msk.f32.gmra.mxu2 %vm4815_vm13, %v4790_v54 }
 0x9e5   : > { %v12324_v10 = vpop.f32.mrf.mxu2 }
 0x9e6   : > { %5292 = vrot.lane.b32.xlu1 %v5237_v33, %s9367_s14  ;;  %5290 = vrot.lane.b32.xlu0 %v5235_v44, %s9367_s14  ;;  %v5241_v37 = vrot.slane %v12324_v10, 1  ;;  %v5397_v34 = vrot.slane %v12324_v10, 2 }
 0x9e8   : > { %v12328_v23 = vpop.permute.xlu0 %5532  ;;  %v5242_v56 = vsel %vm1363_vm6, %v5239_v62, %v5241_v37  ;;  %v5398_v12 = vsel %vm1572_vm5, %v5395_v30, %v5397_v34 }
 0x9e9   : > { %14889 = vst [vmem:[#allocation27_spill] sm:$0xff] %v12328_v23  ;;  %5644 = vrot.lane.b32.xlu2 %v5237_v33, %s14601_s23 }
 0x9ea   : > { %9125 = vmatmul.msk.f32.gmra.mxu2 %vm4815_vm13, %v4791_v19 }
 0x9ed   : > { %v5057_v51 = vpop.f32.mrf.mxu2 }
 0x9ee   : > { %5448 = vrot.lane.b32.xlu1 %v5393_v6, %s9366_s17  ;;  %5446 = vrot.lane.b32.xlu0 %v5391_v17, %s9366_s17 }
 0x9f0   : > { %v12337_v53 = vpop.permute.xlu1 %5534  ;;  %v12339_v7 = vpop.permute.xlu0 %5278 }
 0x9f1   : > { %5745 = vrot.lane.b32.xlu2 %v5393_v6, %s14599_s24  ;;  %v12342_v11 = vpop.permute.xlu2 %5536 }
 0x9f2   : > { %14891 = vst [vmem:[#allocation6_spill] sm:$0xff] %v12342_v11  ;;  %9126 = vmatmul.msk.f32.gmra.mxu2 %vm4815_vm13, %v4792_v8 }
 0x9f5   : > { %v12359_v40 = vpop.f32.mrf.mxu2 }
 0x9f6   : > { %5841 = vrot.lane.b32.xlu1 %v12308_v42, %s14886_s15  ;;  %5941 = vrot.lane.b32.xlu0 %v5237_v33, %s14887_s16  ;;  %v5243_v44 = vrot.slane %v12359_v40, 1  ;;  %v5399_v24 = vrot.slane %v12359_v40, 2 }
 0x9f8   : > { %v12348_v4 = vpop.permute.xlu1 %5282  ;;  %v12350_v16 = vpop.permute.xlu0 %5434 }
 0x9f9   : > { %14892 = vst [vmem:[#allocation18_spill] sm:$0xff] %v12348_v4  ;;  %5843 = vrot.lane.b32.xlu2 %v12317_v52, %s14886_s15 }
 0x9fa   : > { %14893 = vst [vmem:[#allocation7_spill] sm:$0xff] %v12350_v16  ;;  %9127 = vmatmul.msk.f32.gmra.mxu2 %vm4815_vm13, %v4793_v50  ;;  %v4796_v50 = vld [vmem:[#allocation2 + $0x180] sm:$0xff] }
 0x9fb   : > { %v12355_v60 = vpop.permute.xlu2 %5286 }
 0x9fd   : > { %v12378_v25 = vpop.f32.mrf.mxu2 }
 0x9fe   : > { %5546 = vrot.lane.b32.xlu1 %v12317_v52, %s14613_s19  ;;  %6042 = vrot.lane.b32.xlu0 %v5393_v6, %s14888_s18  ;;  %v5244_v14 = vrot.slane %v12378_v25, 1  ;;  %v5400_v49 = vrot.slane %v12378_v25, 2  ;;  %v4794_v6 = vld [vmem:[#allocation2 + $0x170] sm:$0xff] }
 0xa00   : > { %v12364_v26 = vpop.permute.xlu0 %5634  ;;  %v12366_v0 = vpop.permute.xlu1 %5436  ;;  %v5245_v3 = vsel %vm1363_vm6, %v5243_v44, %v5244_v14  ;;  %v5401_v46 = vsel %vm1572_vm5, %v5399_v24, %v5400_v49 }
 0xa01   : > { %14894 = vst [vmem:[#allocation36_spill] sm:$0xff] %v12364_v26  ;;  %5294 = vrot.lane.b32.xlu2 %v5240_v63, %s9367_s14 }
 0xa02   : > { %9128 = vmatmul.msk.f32.gmra.mxu2 %vm4815_vm13, %v4794_v6 }
 0xa03   : > { %v12371_v45 = vpop.permute.xlu2 %5638 }
 0xa04   : > { %14895 = vst [vmem:[#allocation21_spill] sm:$0xff] %v12371_v45 }
 0xa05   : > { %v5065_v32 = vpop.f32.mrf.mxu2 }
 0xa06   : > { %5943 = vrot.lane.b32.xlu1 %v5240_v63, %s14887_s16  ;;  %5544 = vrot.lane.b32.xlu0 %v12308_v42, %s14613_s19  ;;  %v5402_v37 = vrot.slane %v5065_v32, 2 }
 0xa08   : > { %v12380_v9 = vpop.permute.xlu0 %5735  ;;  %v12382_v31 = vpop.permute.xlu1 %5284 }
 0xa09   : > { %14896 = vst [vmem:[#allocation24_spill] sm:$0xff] %v12380_v9  ;;  %5450 = vrot.lane.b32.xlu2 %v5396_v48, %s9366_s17 }
 0xa0a   : > { %14897 = vst [vmem:[#allocation26_spill] sm:$0xff] %v12382_v31 }
 0xa0b   : > { %v12386_v13 = vpop.permute.xlu2 %5739 }
 0xa0c   : > { %14898 = vst [vmem:[#allocation32_spill] sm:$0xff] %v12386_v13 }
 0xa0d   : > { %v5068_v27 = vpop.f32.mrf.mxu2 }
 0xa0e   : > { %6044 = vrot.lane.b32.xlu1 %v5396_v48, %s14888_s18  ;;  %5646 = vrot.lane.b32.xlu0 %v5240_v63, %s14601_s23  ;;  %v5246_v63 = vrot.slane %v5065_v32, 1  ;;  %v4795_v27 = vld [vmem:[#allocation2 + $0x178] sm:$0xff] }
 0xa0f   : > { %9129 = vmatmul.msk.f32.gmra.mxu2 %vm4815_vm13, %v4795_v27 }
 0xa10   : > { %v12391_v1 = vpop.permute.xlu1 %5636  ;;  %v12393_v39 = vpop.permute.xlu0 %5280  ;;  %v5247_v30 = vsel %vm1363_vm6, %v5244_v14, %v5246_v63 }
 0xa11   : > { %5945 = vrot.lane.b32.xlu2 %v5242_v56, %s14887_s16 }
 0xa13   : > { %v12397_v47 = vpop.permute.xlu2 %5288 }
 0xa14   : > { %14899 = vst [vmem:[#allocation33_spill] sm:$0xff] %v12397_v47 }
 0xa15   : > { %v12434_v33 = vpop.f32.mrf.mxu2 }
 0xa16   : > { %5648 = vrot.lane.b32.xlu1 %v5242_v56, %s14601_s23  ;;  %5747 = vrot.lane.b32.xlu0 %v5396_v48, %s14599_s24  ;;  %v5248_v6 = vrot.slane %v12434_v33, 1 }
 0xa17   : > { %9130 = vmatmul.msk.f32.gmra.mxu2 %vm4815_vm13, %v4796_v50 }
 0xa18   : > { %v12403_v29 = vpop.permute.xlu1 %5737  ;;  %v12405_v2 = vpop.permute.xlu0 %5440 }
 0xa19   : > { %14900 = vst [vmem:[#allocation35_spill] sm:$0xff] %v12405_v2  ;;  %6046 = vrot.lane.b32.xlu2 %v5398_v12, %s14888_s18 }
 0xa1b   : > { %v12409_v38 = vpop.permute.xlu2 %5444 }
 0xa1c   : > { %14901 = vst [vmem:[#allocation28_spill] sm:$0xff] %v12409_v38 }
 0xa1d   : > { %v12452_v62 = vpop.f32.mrf.mxu2 }
 0xa1e   : > { %5749 = vrot.lane.b32.xlu1 %v5398_v12, %s14599_s24  ;;  %5296 = vrot.lane.b32.xlu0 %v5242_v56, %s9367_s14 }
 0xa20   : > { %v12414_v57 = vpop.permute.xlu1 %5835  ;;  %v12416_v28 = vpop.permute.xlu0 %5833 }
 0xa21   : > { %14902 = vst [vmem:[#allocation8_spill] sm:$0xff] %v12416_v28  ;;  %5548 = vrot.lane.b32.xlu2 %v12359_v40, %s14613_s19 }
 0xa23   : > { %v12420_v58 = vpop.permute.xlu2 %5837 }
 0xa24   : > { %14903 = vst [vmem:[#allocation43_spill] sm:$0xff] %v12420_v58  ;;  %v4799_v58 = vld [vmem:[#allocation2 + $0x198] sm:$0xff] }
 0xa25   : > { %v12465_v56 = vpop.f32.mrf.mxu2 }
 0xa26   : > { %5847 = vrot.lane.b32.xlu1 %v12378_v25, %s14886_s15  ;;  %5452 = vrot.lane.b32.xlu0 %v5398_v12, %s9366_s17  ;;  %v5403_v12 = vsel %vm1572_vm5, %v5400_v49, %v5402_v37  ;;  %v4797_v37 = vld [vmem:[#allocation2 + $0x188] sm:$0xff] }
 0xa27   : > { %9131 = vmatmul.msk.f32.gmra.mxu2 %vm4815_vm13, %v4797_v37 }
 0xa28   : > { %v12428_v18 = vpop.permute.xlu1 %5442  ;;  %v12430_v17 = vpop.permute.xlu0 %5538 }
 0xa29   : > { %14904 = vst [vmem:[#allocation46_spill] sm:$0xff] %v12430_v17  ;;  %5650 = vrot.lane.b32.xlu2 %v5245_v3, %s14601_s23 }
 0xa2b   : > { %v12436_v10 = vpop.permute.xlu2 %5542 }
 0xa2c   : > { %14905 = vst [vmem:[#allocation34_spill] sm:$0xff] %v12436_v10 }
 0xa2d   : > { %v5079_v32 = vpop.f32.mrf.mxu2 }
 0xa2e   : > { %5298 = vrot.lane.b32.xlu1 %v5245_v3, %s9367_s14  ;;  %5845 = vrot.lane.b32.xlu0 %v12359_v40, %s14886_s15 }
 0xa30   : > { %v12444_v51 = vpop.permute.xlu1 %5937  ;;  %v12446_v21 = vpop.permute.xlu0 %5935 }
 0xa31   : > { %14906 = vst [vmem:[#allocation40_spill] sm:$0xff] %v12446_v21  ;;  %5751 = vrot.lane.b32.xlu2 %v5401_v46, %s14599_s24 }
 0xa33   : > { %v12450_v41 = vpop.permute.xlu2 %5939 }
 0xa34   : > { %14907 = vst [vmem:[#allocation49_spill] sm:$0xff] %v12450_v41 }
 0xa35   : > { %v12500_v63 = vpop.f32.mrf.mxu2 }
 0xa36   : > { %5454 = vrot.lane.b32.xlu1 %v5401_v46, %s9366_s17  ;;  %5550 = vrot.lane.b32.xlu0 %v12378_v25, %s14613_s19  ;;  %v5409_v47 = vrot.slane %v12500_v63, 2 }
 0xa38   : > { %v12457_v54 = vpop.permute.xlu1 %6038  ;;  %v12459_v61 = vpop.permute.xlu0 %6036 }
 0xa39   : > { %14908 = vst [vmem:[#allocation41_spill] sm:$0xff] %v12459_v61  ;;  %5300 = vrot.lane.b32.xlu2 %v5247_v30, %s9367_s14  ;;  %v5407_v61 = vrot.slane %v12465_v56, 2 }
 0xa3b   : > { %v12463_v48 = vpop.permute.xlu2 %6040 }
 0xa3c   : > { %14909 = vst [vmem:[#allocation47_spill] sm:$0xff] %v12463_v48 }
 0xa3e   : > { %5949 = vrot.lane.b32.xlu1 %v5247_v30, %s14887_s16  ;;  %5947 = vrot.lane.b32.xlu0 %v5245_v3, %s14887_s16 }
 0xa40   : > { %v12469_v34 = vpop.permute.xlu1 %5540  ;;  %v12471_v19 = vpop.permute.xlu0 %5640 }
 0xa41   : > { %14910 = vst [vmem:[#allocation53_spill] sm:$0xff] %v12471_v19  ;;  %5456 = vrot.lane.b32.xlu2 %v5403_v12, %s9366_s17 }
 0xa43   : > { %v12476_v8 = vpop.permute.xlu2 %5644 }
 0xa44   : > { %14911 = vst [vmem:[#allocation42_spill] sm:$0xff] %v12476_v8  ;;  %v4798_v8 = vld [vmem:[#allocation2 + $0x190] sm:$0xff] }
 0xa45   : > { %9132 = vmatmul.msk.f32.gmra.mxu2 %vm4815_vm13, %v4798_v8 }
 0xa46   : > { %6050 = vrot.lane.b32.xlu1 %v5403_v12, %s14888_s18  ;;  %6048 = vrot.lane.b32.xlu0 %v5401_v46, %s14888_s18  ;;  %v5249_v46 = vrot.slane %v12452_v62, 1 }
 0xa48   : > { %v12480_v44 = vpop.permute.xlu1 %5642  ;;  %v12482_v14 = vpop.permute.xlu0 %5741 }
 0xa49   : > { %14912 = vst [vmem:[#allocation37_spill] sm:$0xff] %v12482_v14  ;;  %5849 = vrot.lane.b32.xlu2 %v12434_v33, %s14886_s15  ;;  %v5251_v14 = vrot.slane %v12465_v56, 1  ;;  %v4800_v56 = vld [vmem:[#allocation2 + $0x1a0] sm:$0xff] }
 0xa4b   : > { %v12487_v3 = vpop.permute.xlu2 %5745  ;;  %v5252_v41 = vsel %vm1363_vm6, %v5249_v46, %v5251_v14 }
 0xa4c   : > { %14913 = vst [vmem:[#allocation9_spill] sm:$0xff] %v12487_v3  ;;  %v5404_v3 = vrot.slane %v12434_v33, 2 }
 0xa4d   : > { %9133 = vmatmul.msk.f32.gmra.mxu2 %vm4815_vm13, %v4799_v58 }
 0xa4e   : > { %5552 = vrot.lane.b32.xlu1 %v12434_v33, %s14613_s19  ;;  %5652 = vrot.lane.b32.xlu0 %v5247_v30, %s14601_s23  ;;  %v5250_v30 = vsel %vm1363_vm6, %v5248_v6, %v5249_v46  ;;  %v12518_v6 = vpop.f32.mrf.mxu2 }
 0xa4f   : > { %v5410_v43 = vrot.slane %v12518_v6, 2 }
 0xa50   : > { %v12492_v24 = vpop.permute.xlu1 %5743  ;;  %v12494_v49 = vpop.permute.xlu0 %5839 }
 0xa51   : > { %14914 = vst [vmem:[#allocation48_spill] sm:$0xff] %v12492_v24  ;;  %5554 = vrot.lane.b32.xlu2 %v12452_v62, %s14613_s19  ;;  %v5411_v28 = vsel %vm1572_vm5, %v5409_v47, %v5410_v43 }
 0xa52   : > { %14915 = vst [vmem:[#allocation50_spill] sm:$0xff] %v12494_v49  ;;  %v5405_v49 = vrot.slane %v12452_v62, 2 }
 0xa53   : > { %v12503_v27 = vpop.permute.xlu2 %5843 }
 0xa54   : > { %14916 = vst [vmem:[#allocation55_spill] sm:$0xff] %v12503_v27  ;;  %v5406_v27 = vsel %vm1572_vm5, %v5404_v3, %v5405_v49  ;;  %v5408_v14 = vsel %vm1572_vm5, %v5405_v49, %v5407_v61  ;;  %v4801_v49 = vld [vmem:[#allocation2 + $0x1a8] sm:$0xff] }
 0xa55   : > { %9134 = vmatmul.msk.f32.gmra.mxu2 %vm4815_vm13, %v4800_v56  ;;  %v5254_v56 = vrot.slane %v12518_v6, 1 }
 0xa56   : > { %5654 = vrot.lane.b32.xlu1 %v5250_v30, %s14601_s23  ;;  %5753 = vrot.lane.b32.xlu0 %v5403_v12, %s14599_s24  ;;  %v12533_v10 = vpop.f32.mrf.mxu2 }
 0xa57   : > { %v5256_v2 = vrot.slane %v12533_v10, 1  ;;  %v5412_v11 = vrot.slane %v12533_v10, 2  ;;  %v4804_v10 = vld [vmem:[#allocation2 + $0x1c0] sm:$0xff] }
 0xa58   : > { %v12508_v32 = vpop.permute.xlu1 %5292  ;;  %v12510_v50 = vpop.permute.xlu0 %5290 }
 0xa59   : > { %5951 = vrot.lane.b32.xlu2 %v5250_v30, %s14887_s16  ;;  %v5257_v31 = vsel %vm1363_vm6, %v5254_v56, %v5256_v2  ;;  %v5413_v2 = vsel %vm1572_vm5, %v5410_v43, %v5412_v11 }
 0xa5b   : > { %v12516_v37 = vpop.permute.xlu2 %5294 }
 0xa5c   : > { %v5358_v15 = vadd.f32 %v12516_v37, %v12308_v42 }
 0xa5d   : > { %9135 = vmatmul.msk.f32.gmra.mxu2 %vm4815_vm13, %v4801_v49  ;;  %v4802_v49 = vld [vmem:[#allocation2 + $0x1b0] sm:$0xff] }
 0xa5e   : > { %5755 = vrot.lane.b32.xlu1 %v5406_v27, %s14599_s24  ;;  %5851 = vrot.lane.b32.xlu0 %v12452_v62, %s14886_s15  ;;  %v5090_v46 = vpop.f32.mrf.mxu2 }
 0xa5f   : > { %v5253_v46 = vrot.slane %v12500_v63, 1 }
 0xa60   : > { %v12524_v12 = vpop.permute.xlu1 %5448  ;;  %v12526_v48 = vpop.permute.xlu0 %5446 }
 0xa61   : > { %6052 = vrot.lane.b32.xlu2 %v5406_v27, %s14888_s18 }
 0xa63   : > { %v12530_v8 = vpop.permute.xlu2 %5450 }
 0xa65   : > { %9136 = vmatmul.msk.f32.gmra.mxu2 %vm4815_vm13, %v4802_v49 }
 0xa66   : > { %5304 = vrot.lane.b32.xlu1 %v5252_v41, %s9367_s14  ;;  %5302 = vrot.lane.b32.xlu0 %v5250_v30, %s9367_s14 }
 0xa68   : > { %v12537_v3 = vpop.permute.xlu1 %5841  ;;  %v12539_v19 = vpop.permute.xlu0 %5941 }
 0xa69   : > { %14917 = vst [vmem:[#allocation52_spill] sm:$0xff] %v12537_v3  ;;  %5656 = vrot.lane.b32.xlu2 %v5252_v41, %s14601_s23 }
 0xa6a   : > { %14918 = vst [vmem:[#allocation57_spill] sm:$0xff] %v12539_v19 }
 0xa6b   : > { %v12544_v38 = vpop.permute.xlu2 %5945 }
 0xa6c   : > { %14919 = vst [vmem:[#allocation51_spill] sm:$0xff] %v12544_v38 }
 0xa6e   : > { %5460 = vrot.lane.b32.xlu1 %v5408_v14, %s9366_s17  ;;  %5458 = vrot.lane.b32.xlu0 %v5406_v27, %s9366_s17 }
 0xa70   : > { %v12549_v30 = vpop.permute.xlu1 %5546  ;;  %v12551_v21 = vpop.permute.xlu0 %6042 }
 0xa71   : > { %14920 = vst [vmem:[#allocation45_spill] sm:$0xff] %v12551_v21  ;;  %5757 = vrot.lane.b32.xlu2 %v5408_v14, %s14599_s24  ;;  %v5255_v21 = vsel %vm1363_vm6, %v5253_v46, %v5254_v56 }
 0xa73   : > { %v12555_v19 = vpop.permute.xlu2 %6046 }
 0xa74   : > { %14921 = vst [vmem:[#allocation65_spill] sm:$0xff] %v12555_v19  ;;  %v12571_v19 = vpop.f32.mrf.mxu2 }
 0xa75   : > { %v5258_v43 = vrot.slane %v12571_v19, 1  ;;  %v5414_v42 = vrot.slane %v12571_v19, 2 }
 0xa76   : > { %5853 = vrot.lane.b32.xlu1 %v12500_v63, %s14886_s15  ;;  %5953 = vrot.lane.b32.xlu0 %v5252_v41, %s14887_s16 }
 0xa78   : > { %v12560_v58 = vpop.permute.xlu1 %5943  ;;  %v12562_v61 = vpop.permute.xlu0 %5544 }
 0xa79   : > { %14922 = vst [vmem:[#allocation56_spill] sm:$0xff] %v12560_v58  ;;  %5855 = vrot.lane.b32.xlu2 %v12518_v6, %s14886_s15 }
 0xa7b   : > { %v12567_v27 = vpop.permute.xlu2 %5548 }
 0xa7e   : > { %5558 = vrot.lane.b32.xlu1 %v12518_v6, %s14613_s19  ;;  %6054 = vrot.lane.b32.xlu0 %v5408_v14, %s14888_s18  ;;  %v12588_v14 = vpop.f32.mrf.mxu2 }
 0xa7f   : > { %v5259_v11 = vrot.slane %v12588_v14, 1  ;;  %v5415_v37 = vrot.slane %v12588_v14, 2 }
 0xa80   : > { %v12576_v41 = vpop.permute.xlu1 %6044  ;;  %v5647_v38 = vpop.permute.xlu0 %5646 }
 0xa81   : > { %14923 = vst [vmem:[#allocation10_spill] sm:$0xff] %v12576_v41  ;;  %5306 = vrot.lane.b32.xlu2 %v5255_v21, %s9367_s14  ;;  %v4803_v41 = vld [vmem:[#allocation2 + $0x1b8] sm:$0xff]  ;;  %v5260_v16 = vsel %vm1363_vm6, %v5258_v43, %v5259_v11 }
 0xa82   : > { %9137 = vmatmul.msk.f32.gmra.mxu2 %vm4815_vm13, %v4803_v41 }
 0xa83   : > { %v12581_v17 = vpop.permute.xlu2 %5650 }
 0xa86   : > { %5955 = vrot.lane.b32.xlu1 %v5255_v21, %s14887_s16  ;;  %5556 = vrot.lane.b32.xlu0 %v12500_v63, %s14613_s19  ;;  %v12603_v20 = vpop.f32.mrf.mxu2 }
 0xa88   : > { %v12590_v13 = vpop.permute.xlu1 %5648  ;;  %v5748_v46 = vpop.permute.xlu0 %5747 }
 0xa89   : > { %5462 = vrot.lane.b32.xlu2 %v5411_v28, %s9366_s17 }
 0xa8a   : > { %9138 = vmatmul.msk.f32.gmra.mxu2 %vm4815_vm13, %v4804_v10 }
 0xa8b   : > { %v5752_v49 = vpop.permute.xlu2 %5751 }
 0xa8e   : > { %6056 = vrot.lane.b32.xlu1 %v5411_v28, %s14888_s18  ;;  %5658 = vrot.lane.b32.xlu0 %v5255_v21, %s14601_s23  ;;  %v5101_v56 = vpop.f32.mrf.mxu2 }
 0xa8f   : > { %v5356_v56 = vadd.f32 %v12510_v50, %v12280_v55  ;;  %v5514_v50 = vadd.f32 %v12530_v8, %v5358_v15  ;;  %v4806_v15 = vld [vmem:[#allocation2 + $0x1d0] sm:$0xff] }
 0xa90   : > { %v12597_v45 = vpop.permute.xlu1 %5749  ;;  %v12599_v9 = vpop.permute.xlu0 %5296 }
 0xa91   : > { %5957 = vrot.lane.b32.xlu2 %v5257_v31, %s14887_s16  ;;  %v5512_v10 = vadd.f32 %v12526_v48, %v5356_v56  ;;  %v5357_v48 = vadd.f32 %v12508_v32, %v12287_v59 }
 0xa93   : > { %v12605_v47 = vpop.permute.xlu2 %5300  ;;  %v5610_v4 = vadd.f32 %v12562_v61, %v5512_v10  ;;  %v5513_v43 = vadd.f32 %v12524_v12, %v5357_v48 }
 0xa95   : > { %v5611_v59 = vadd.f32 %v12549_v30, %v5513_v43  ;;  %v5261_v30 = vrot.slane %v12603_v20, 1 }
 0xa96   : > { %5660 = vrot.lane.b32.xlu1 %v5257_v31, %s14601_s23  ;;  %5759 = vrot.lane.b32.xlu0 %v5411_v28, %s14599_s24  ;;  %v12638_v55 = vpop.f32.mrf.mxu2 }
 0xa97   : > { %v5713_v12 = vadd.f32 %v12590_v13, %v5611_v59  ;;  %v5262_v43 = vsel %vm1363_vm6, %v5259_v11, %v5261_v30 }
 0xa98   : > { %v5848_v21 = vpop.permute.xlu1 %5847  ;;  %v12611_v26 = vpop.permute.xlu0 %5452 }
 0xa99   : > { %6058 = vrot.lane.b32.xlu2 %v5413_v2, %s14888_s18 }
 0xa9b   : > { %v12615_v58 = vpop.permute.xlu2 %5456 }
 0xa9e   : > { %5761 = vrot.lane.b32.xlu1 %v5413_v2, %s14599_s24  ;;  %5308 = vrot.lane.b32.xlu0 %v5257_v31, %s9367_s14  ;;  %v4805_v31 = vld [vmem:[#allocation2 + $0x1c8] sm:$0xff] }
 0xa9f   : > { %9139 = vmatmul.msk.f32.gmra.mxu2 %vm4815_vm13, %v4805_v31  ;;  %v5612_v31 = vadd.f32 %v12567_v27, %v5514_v50  ;;  %v5416_v27 = vsel %vm1572_vm5, %v5414_v42, %v5415_v37  ;;  %v5814_v50 = vadd.f32 %v12597_v45, %v5713_v12 }
 0xaa0   : > { %v12620_v28 = vpop.permute.xlu1 %5298  ;;  %v5846_v41 = vpop.permute.xlu0 %5845 }
 0xaa1   : > { %5560 = vrot.lane.b32.xlu2 %v12571_v19, %s14613_s19  ;;  %v5714_v10 = vadd.f32 %v12581_v17, %v5612_v31  ;;  %v5912_v31 = vadd.f32 %v5848_v21, %v5814_v50 }
 0xaa3   : > { %v5850_v23 = vpop.permute.xlu2 %5849 }
 0xaa6   : > { %5859 = vrot.lane.b32.xlu1 %v12588_v14, %s14886_s15  ;;  %5464 = vrot.lane.b32.xlu0 %v5413_v2, %s9366_s17  ;;  %v5712_v2 = vadd.f32 %v5647_v38, %v5610_v4  ;;  %v5815_v38 = vadd.f32 %v5752_v49, %v5714_v10  ;;  %v5417_v10 = vrot.slane %v12603_v20, 2 }
 0xaa7   : > { %9140 = vmatmul.msk.f32.gmra.mxu2 %vm4815_vm13, %v4806_v15 }
 0xaa8   : > { %v5455_v3 = vpop.permute.xlu1 %5454  ;;  %v5551_v24 = vpop.permute.xlu0 %5550  ;;  %v5813_v61 = vadd.f32 %v5748_v46, %v5712_v2  ;;  %v5913_v17 = vadd.f32 %v5850_v23, %v5815_v38  ;;  %v5361_v38 = vadd.f32 %v12605_v47, %v12378_v25 }
 0xaa9   : > { %5662 = vrot.lane.b32.xlu2 %v5260_v16, %s14601_s23  ;;  %v12657_v2 = vpop.f32.mrf.mxu2 }
 0xaaa   : > { %v5911_v4 = vadd.f32 %v5846_v41, %v5813_v61  ;;  %v5359_v61 = vadd.f32 %v12599_v9, %v12317_v52  ;;  %v4807_v52 = vld [vmem:[#allocation2 + $0x1d8] sm:$0xff]  ;;  %v5517_v20 = vadd.f32 %v12615_v58, %v5361_v38  ;;  %v5419_v38 = vrot.slane %v12638_v55, 2 }
 0xaab   : > { %v5555_v56 = vpop.permute.xlu2 %5554 }
 0xaac   : > { %v5515_v59 = vadd.f32 %v12611_v26, %v5359_v61  ;;  %v5615_v25 = vadd.f32 %v5555_v56, %v5517_v20  ;;  %v4809_v56 = vld [vmem:[#allocation2 + $0x1e8] sm:$0xff] }
 0xaae   : > { %5310 = vrot.lane.b32.xlu1 %v5260_v16, %s9367_s14  ;;  %5857 = vrot.lane.b32.xlu0 %v12571_v19, %s14886_s15 }
 0xaaf   : > { %9141 = vmatmul.msk.f32.gmra.mxu2 %vm4815_vm13, %v4807_v52  ;;  %v5420_v52 = vrot.slane %v12657_v2, 2 }
 0xab0   : > { %v5950_v32 = vpop.permute.xlu1 %5949  ;;  %v5948_v8 = vpop.permute.xlu0 %5947 }
 0xab1   : > { %v6013_v46 = vadd.f32 %v5948_v8, %v5911_v4  ;;  %5763 = vrot.lane.b32.xlu2 %v5416_v27, %s14599_s24  ;;  %v6014_v49 = vadd.f32 %v5950_v32, %v5912_v31  ;;  %v5360_v4 = vadd.f32 %v12620_v28, %v12359_v40  ;;  %v12677_v11 = vpop.f32.mrf.mxu2  ;;  %v5613_v32 = vadd.f32 %v5551_v24, %v5515_v59 }
 0xab2   : > { %v5418_v40 = vsel %vm1572_vm5, %v5415_v37, %v5417_v10  ;;  %v4810_v10 = vld [vmem:[#allocation2 + $0x1f0] sm:$0xff]  ;;  %v5421_v20 = vsel %vm1572_vm5, %v5419_v38, %v5420_v52 }
 0xab3   : > { %v5952_v48 = vpop.permute.xlu2 %5951  ;;  %v5516_v9 = vadd.f32 %v5455_v3, %v5360_v4 }
 0xab4   : > { %v6015_v41 = vadd.f32 %v5952_v48, %v5913_v17 }
 0xab6   : > { %5466 = vrot.lane.b32.xlu1 %v5416_v27, %s9366_s17  ;;  %5562 = vrot.lane.b32.xlu0 %v12588_v14, %s14613_s19 }
 0xab8   : > { %v6051_v13 = vpop.permute.xlu1 %6050  ;;  %v6049_v42 = vpop.permute.xlu0 %6048 }
 0xab9   : > { %v12664_v23 = vadd.f32 %v6051_v13, %v6014_v49  ;;  %v12666_v45 = vadd.f32 %v6049_v42, %v6013_v46  ;;  %5312 = vrot.lane.b32.xlu2 %v5262_v43, %s9367_s14  ;;  %v5112_v17 = vpop.f32.mrf.mxu2  ;;  %v5263_v49 = vrot.slane %v12638_v55, 1  ;;  %v5264_v13 = vrot.slane %v12657_v2, 1 }
 0xabb   : > { %v6053_v21 = vpop.permute.xlu2 %6052 }
 0xabc   : > { %v12672_v15 = vadd.f32 %v6053_v21, %v6015_v41 }
 0xabe   : > { %5961 = vrot.lane.b32.xlu1 %v5262_v43, %s14887_s16  ;;  %5959 = vrot.lane.b32.xlu0 %v5260_v16, %s14887_s16  ;;  %v4808_v16 = vld [vmem:[#allocation2 + $0x1e0] sm:$0xff] }
 0xabf   : > { %9142 = vmatmul.msk.f32.gmra.mxu2 %vm4815_vm13, %v4808_v16 }
 0xac0   : > { %v5553_v26 = vpop.permute.xlu1 %5552  ;;  %v5653_v8 = vpop.permute.xlu0 %5652 }
 0xac1   : > { %v5614_v28 = vadd.f32 %v5553_v26, %v5516_v9  ;;  %v5715_v12 = vadd.f32 %v5653_v8, %v5613_v32  ;;  %5468 = vrot.lane.b32.xlu2 %v5418_v40, %s9366_s17  ;;  %v12700_v42 = vpop.f32.mrf.mxu2 }
 0xac2   : > { %v5268_v38 = vrot.slane %v12700_v42, 1 }
 0xac3   : > { %v5657_v47 = vpop.permute.xlu2 %5656 }
 0xac4   : > { %v5717_v46 = vadd.f32 %v5657_v47, %v5615_v25 }
 0xac6   : > { %6062 = vrot.lane.b32.xlu1 %v5418_v40, %s14888_s18  ;;  %6060 = vrot.lane.b32.xlu0 %v5416_v27, %s14888_s18 }
 0xac7   : > { %9143 = vmatmul.msk.f32.gmra.mxu2 %vm4815_vm13, %v4809_v56 }
 0xac8   : > { %v5655_v24 = vpop.permute.xlu1 %5654  ;;  %v5754_v3 = vpop.permute.xlu0 %5753 }
 0xac9   : > { %v5716_v58 = vadd.f32 %v5655_v24, %v5614_v28  ;;  %v5816_v50 = vadd.f32 %v5754_v3, %v5715_v12  ;;  %5861 = vrot.lane.b32.xlu2 %v12638_v55, %s14886_s15  ;;  %v12709_v32 = vpop.f32.mrf.mxu2  ;;  %v5266_v12 = vrot.slane %v12677_v11, 1 }
 0xacb   : > { %v5758_v37 = vpop.permute.xlu2 %5757  ;;  %v5267_v24 = vsel %vm1363_vm6, %v5264_v13, %v5266_v12 }
 0xacc   : > { %v5818_v48 = vadd.f32 %v5758_v37, %v5717_v46 }
 0xace   : > { %5564 = vrot.lane.b32.xlu1 %v12638_v55, %s14613_s19  ;;  %5664 = vrot.lane.b32.xlu0 %v5262_v43, %s14601_s23  ;;  %v5265_v43 = vsel %vm1363_vm6, %v5263_v49, %v5264_v13 }
 0xacf   : > { %9144 = vmatmul.msk.f32.gmra.mxu2 %vm4815_vm13, %v4810_v10 }
 0xad0   : > { %v5756_v27 = vpop.permute.xlu1 %5755  ;;  %v5852_v30 = vpop.permute.xlu0 %5851 }
 0xad1   : > { %v5817_v41 = vadd.f32 %v5756_v27, %v5716_v58  ;;  %v5914_v31 = vadd.f32 %v5852_v30, %v5816_v50  ;;  %5566 = vrot.lane.b32.xlu2 %v12657_v2, %s14613_s19  ;;  %v12721_v3 = vpop.f32.mrf.mxu2  ;;  %v5422_v58 = vrot.slane %v12677_v11, 2 }
 0xad3   : > { %v5856_v61 = vpop.permute.xlu2 %5855  ;;  %v5423_v56 = vsel %vm1572_vm5, %v5420_v52, %v5422_v58  ;;  %v5269_v52 = vrot.slane %v12709_v32, 1 }
 0xad4   : > { %v5916_v21 = vadd.f32 %v5856_v61, %v5818_v48 }
 0xad6   : > { %5666 = vrot.lane.b32.xlu1 %v5265_v43, %s14601_s23  ;;  %5765 = vrot.lane.b32.xlu0 %v5418_v40, %s14599_s24 }
 0xad8   : > { %v5305_v59 = vpop.permute.xlu1 %5304  ;;  %v5303_v4 = vpop.permute.xlu0 %5302 }
 0xad9   : > { %5963 = vrot.lane.b32.xlu2 %v5265_v43, %s14887_s16  ;;  %v5363_v26 = vadd.f32 %v5305_v59, %v12452_v62  ;;  %v5362_v8 = vadd.f32 %v5303_v4, %v12434_v33  ;;  %v5123_v27 = vpop.f32.mrf.mxu2 }
 0xadb   : > { %v5307_v9 = vpop.permute.xlu2 %5306 }
 0xadc   : > { %v5364_v46 = vadd.f32 %v5307_v9, %v12500_v63 }
 0xade   : > { %5767 = vrot.lane.b32.xlu1 %v5421_v20, %s14599_s24  ;;  %5863 = vrot.lane.b32.xlu0 %v12657_v2, %s14886_s15 }
 0xae0   : > { %v5461_v40 = vpop.permute.xlu1 %5460  ;;  %v5459_v28 = vpop.permute.xlu0 %5458 }
 0xae1   : > { %v5519_v25 = vadd.f32 %v5461_v40, %v5363_v26  ;;  %v5518_v47 = vadd.f32 %v5459_v28, %v5362_v8  ;;  %6064 = vrot.lane.b32.xlu2 %v5421_v20, %s14888_s18  ;;  %v12742_v9 = vpop.f32.mrf.mxu2  ;;  %v5270_v8 = vsel %vm1363_vm6, %v5268_v38, %v5269_v52 }
 0xae3   : > { %v5463_v17 = vpop.permute.xlu2 %5462 }
 0xae4   : > { %v5520_v16 = vadd.f32 %v5463_v17, %v5364_v46  ;;  %v5425_v46 = vrot.slane %v12709_v32, 2 }
 0xae6   : > { %5316 = vrot.lane.b32.xlu1 %v5267_v24, %s9367_s14  ;;  %5314 = vrot.lane.b32.xlu0 %v5265_v43, %s9367_s14 }
 0xae8   : > { %v5854_v33 = vpop.permute.xlu1 %5853  ;;  %v5954_v62 = vpop.permute.xlu0 %5953 }
 0xae9   : > { %v5915_v50 = vadd.f32 %v5854_v33, %v5817_v41  ;;  %v6016_v37 = vadd.f32 %v5954_v62, %v5914_v31  ;;  %5668 = vrot.lane.b32.xlu2 %v5267_v24, %s14601_s23  ;;  %v12756_v17 = vpop.f32.mrf.mxu2 }
 0xaeb   : > { %v5958_v48 = vpop.permute.xlu2 %5957 }
 0xaec   : > { %v6018_v63 = vadd.f32 %v5958_v48, %v5916_v21 }
 0xaee   : > { %5472 = vrot.lane.b32.xlu1 %v5423_v56, %s9366_s17  ;;  %5470 = vrot.lane.b32.xlu0 %v5421_v20, %s9366_s17 }
 0xaf0   : > { %v5559_v30 = vpop.permute.xlu1 %5558  ;;  %v6055_v49 = vpop.permute.xlu0 %6054 }
 0xaf1   : > { %v5617_v13 = vadd.f32 %v5559_v30, %v5519_v25  ;;  %v12730_v61 = vadd.f32 %v6055_v49, %v6016_v37  ;;  %5769 = vrot.lane.b32.xlu2 %v5423_v56, %s14599_s24  ;;  %v5271_v37 = vrot.slane %v12721_v3, 1  ;;  %v12765_v49 = vpop.f32.mrf.mxu2 }
 0xaf3   : > { %v6059_v11 = vpop.permute.xlu2 %6058  ;;  %v5272_v27 = vsel %vm1363_vm6, %v5269_v52, %v5271_v37 }
 0xaf4   : > { %v12733_v41 = vadd.f32 %v6059_v11, %v6018_v63  ;;  %v5427_v11 = vrot.slane %v12721_v3, 2 }
 0xaf6   : > { %5865 = vrot.lane.b32.xlu1 %v12700_v42, %s14886_s15  ;;  %5965 = vrot.lane.b32.xlu0 %v5267_v24, %s14887_s16 }
 0xaf8   : > { %v5956_v31 = vpop.permute.xlu1 %5955  ;;  %v5557_v21 = vpop.permute.xlu0 %5556 }
 0xaf9   : > { %v6017_v43 = vadd.f32 %v5956_v31, %v5915_v50  ;;  %v5616_v10 = vadd.f32 %v5557_v21, %v5518_v47  ;;  %5867 = vrot.lane.b32.xlu2 %v12709_v32, %s14886_s15  ;;  %v5424_v47 = vrot.slane %v12700_v42, 2 }
 0xafb   : > { %v5561_v59 = vpop.permute.xlu2 %5560  ;;  %v5426_v33 = vsel %vm1572_vm5, %v5424_v47, %v5425_v46  ;;  %v5274_v47 = vrot.slane %v12756_v17, 1 }
 0xafc   : > { %v5618_v4 = vadd.f32 %v5561_v59, %v5520_v16 }
 0xafe   : > { %5570 = vrot.lane.b32.xlu1 %v12709_v32, %s14613_s19  ;;  %6066 = vrot.lane.b32.xlu0 %v5423_v56, %s14888_s18 }
 0xb00   : > { %v6057_v20 = vpop.permute.xlu1 %6056  ;;  %v5659_v26 = vpop.permute.xlu0 %5658 }
 0xb01   : > { %v12748_v40 = vadd.f32 %v6057_v20, %v6017_v43  ;;  %v5718_v28 = vadd.f32 %v5659_v26, %v5616_v10  ;;  %5318 = vrot.lane.b32.xlu2 %v5270_v8, %s9367_s14  ;;  %v5428_v10 = vsel %vm1572_vm5, %v5425_v46, %v5427_v11 }
 0xb03   : > { %v5663_v12 = vpop.permute.xlu2 %5662 }
 0xb04   : > { %v5720_v25 = vadd.f32 %v5663_v12, %v5618_v4 }
 0xb05   : > { %v5134_v52 = vpop.f32.mrf.mxu2 }
 0xb06   : > { %5967 = vrot.lane.b32.xlu1 %v5270_v8, %s14887_s16  ;;  %5568 = vrot.lane.b32.xlu0 %v12700_v42, %s14613_s19 }
 0xb08   : > { %v5661_v16 = vpop.permute.xlu1 %5660  ;;  %v5760_v24 = vpop.permute.xlu0 %5759 }
 0xb09   : > { %v5719_v62 = vadd.f32 %v5661_v16, %v5617_v13  ;;  %v5819_v58 = vadd.f32 %v5760_v24, %v5718_v28  ;;  %5474 = vrot.lane.b32.xlu2 %v5426_v33, %s9366_s17 }
 0xb0b   : > { %v5764_v50 = vpop.permute.xlu2 %5763 }
 0xb0c   : > { %v5821_v48 = vadd.f32 %v5764_v50, %v5720_v25  ;;  %v5273_v25 = vrot.slane %v12742_v9, 1 }
 0xb0e   : > { %6068 = vrot.lane.b32.xlu1 %v5426_v33, %s14888_s18  ;;  %5670 = vrot.lane.b32.xlu0 %v5270_v8, %s14601_s23 }
 0xb10   : > { %v5762_v63 = vpop.permute.xlu1 %5761  ;;  %v5309_v56 = vpop.permute.xlu0 %5308 }
 0xb11   : > { %v5820_v30 = vadd.f32 %v5762_v63, %v5719_v62  ;;  %5969 = vrot.lane.b32.xlu2 %v5272_v27, %s14887_s16  ;;  %v5365_v31 = vadd.f32 %v5309_v56, %v12518_v6  ;;  %v5430_v63 = vrot.slane %v12756_v17, 2 }
 0xb13   : > { %v5313_v13 = vpop.permute.xlu2 %5312 }
 0xb14   : > { %v5367_v38 = vadd.f32 %v5313_v13, %v12588_v14  ;;  %v12780_v14 = vpop.f32.mrf.mxu2 }
 0xb16   : > { %5672 = vrot.lane.b32.xlu1 %v5272_v27, %s14601_s23  ;;  %5771 = vrot.lane.b32.xlu0 %v5426_v33, %s14599_s24  ;;  %v5275_v33 = vsel %vm1363_vm6, %v5273_v25, %v5274_v47 }
 0xb18   : > { %v5860_v21 = vpop.permute.xlu1 %5859  ;;  %v5465_v43 = vpop.permute.xlu0 %5464 }
 0xb19   : > { %v5918_v59 = vadd.f32 %v5860_v21, %v5820_v30  ;;  %v5521_v4 = vadd.f32 %v5465_v43, %v5365_v31  ;;  %6070 = vrot.lane.b32.xlu2 %v5428_v10, %s14888_s18  ;;  %v5276_v21 = vrot.slane %v12765_v49, 1 }
 0xb1b   : > { %v5469_v20 = vpop.permute.xlu2 %5468 }
 0xb1c   : > { %v5523_v26 = vadd.f32 %v5469_v20, %v5367_v38  ;;  %v5277_v38 = vsel %vm1363_vm6, %v5274_v47, %v5276_v21 }
 0xb1e   : > { %5773 = vrot.lane.b32.xlu1 %v5428_v10, %s14599_s24  ;;  %5320 = vrot.lane.b32.xlu0 %v5272_v27, %s9367_s14 }
 0xb20   : > { %v5311_v3 = vpop.permute.xlu1 %5310  ;;  %v5858_v8 = vpop.permute.xlu0 %5857 }
 0xb21   : > { %v5917_v6 = vadd.f32 %v5858_v8, %v5819_v58  ;;  %5572 = vrot.lane.b32.xlu2 %v12742_v9, %s14613_s19  ;;  %v5366_v46 = vadd.f32 %v5311_v3, %v12571_v19  ;;  %v5432_v3 = vrot.slane %v12765_v49, 2 }
 0xb22   : > { %v12793_v19 = vpop.f32.mrf.mxu2 }
 0xb23   : > { %v5862_v28 = vpop.permute.xlu2 %5861 }
 0xb24   : > { %v5919_v12 = vadd.f32 %v5862_v28, %v5821_v48  ;;  %v5429_v48 = vrot.slane %v12742_v9, 2 }
 0xb26   : > { %5871 = vrot.lane.b32.xlu1 %v12756_v17, %s14886_s15  ;;  %5476 = vrot.lane.b32.xlu0 %v5428_v10, %s9366_s17  ;;  %v5431_v30 = vsel %vm1572_vm5, %v5429_v48, %v5430_v63 }
 0xb28   : > { %v5467_v16 = vpop.permute.xlu1 %5466  ;;  %v5563_v24 = vpop.permute.xlu0 %5562 }
 0xb29   : > { %v5522_v62 = vadd.f32 %v5467_v16, %v5366_v46  ;;  %v5619_v58 = vadd.f32 %v5563_v24, %v5521_v4  ;;  %5674 = vrot.lane.b32.xlu2 %v5275_v33, %s14601_s23  ;;  %v5351_v46 = vadd.f32 %v12393_v39, %v12221_v5 }
 0xb2b   : > { %v5567_v50 = vpop.permute.xlu2 %5566 }
 0xb2c   : > { %v5621_v37 = vadd.f32 %v5567_v50, %v5523_v26  ;;  %v5507_v50 = vadd.f32 %v12366_v0, %v5351_v46  ;;  %v14927_v46 = vld [vmem:[#allocation52_spill] sm:$0xff] }
 0xb2e   : > { %5322 = vrot.lane.b32.xlu1 %v5275_v33, %s9367_s14  ;;  %5869 = vrot.lane.b32.xlu0 %v12742_v9, %s14886_s15 }
 0xb30   : > { %v5962_v56 = vpop.permute.xlu1 %5961  ;;  %v5960_v27 = vpop.permute.xlu0 %5959 }
 0xb31   : > { %v6020_v13 = vadd.f32 %v5962_v56, %v5918_v59  ;;  %v6019_v11 = vadd.f32 %v5960_v27, %v5917_v6  ;;  %5775 = vrot.lane.b32.xlu2 %v5431_v30, %s14599_s24  ;;  %v12807_v59 = vpop.f32.mrf.mxu2 }
 0xb33   : > { %v5964_v31 = vpop.permute.xlu2 %5963 }
 0xb34   : > { %v6021_v43 = vadd.f32 %v5964_v31, %v5919_v12  ;;  %v5433_v12 = vsel %vm1572_vm5, %v5430_v63, %v5432_v3  ;;  %v5354_v31 = vadd.f32 %v12355_v60, %v12248_v36  ;;  %v5350_v36 = vadd.f32 %v12339_v7, %v12214_v22  ;;  %v12853_v60 = vld [vmem:[%s14569_s8] ss:$0 sm:$0xff]  ;;  %v14925_v7 = vld [vmem:[#allocation7_spill] sm:$0xff] }
 0xb36   : > { %5478 = vrot.lane.b32.xlu1 %v5431_v30, %s9366_s17  ;;  %5574 = vrot.lane.b32.xlu0 %v12756_v17, %s14613_s19 }
 0xb38   : > { %v6063_v10 = vpop.permute.xlu1 %6062  ;;  %v6061_v4 = vpop.permute.xlu0 %6060 }
 0xb39   : > { %v12802_v52 = vadd.f32 %v6063_v10, %v6020_v13  ;;  %v12804_v20 = vadd.f32 %v6061_v4, %v6019_v11  ;;  %5324 = vrot.lane.b32.xlu2 %v5277_v38, %s9367_s14  ;;  %v5145_v16 = vpop.f32.mrf.mxu2  ;;  %v5630_v11 = vrot.slane %v12793_v19, 1  ;;  %v5510_v4 = vadd.f32 %v12428_v18, %v5354_v31 }
 0xb3b   : > { %v6065_v26 = vpop.permute.xlu2 %6064 }
 0xb3c   : > { %v12810_v8 = vadd.f32 %v6065_v26, %v6021_v43 }
 0xb3e   : > { %5973 = vrot.lane.b32.xlu1 %v5277_v38, %s14887_s16  ;;  %5971 = vrot.lane.b32.xlu0 %v5275_v33, %s14887_s16 }
 0xb40   : > { %v5565_v6 = vpop.permute.xlu1 %5564  ;;  %v5665_v28 = vpop.permute.xlu0 %5664 }
 0xb41   : > { %v5620_v25 = vadd.f32 %v5565_v6, %v5522_v62  ;;  %v5721_v47 = vadd.f32 %v5665_v28, %v5619_v58  ;;  %5480 = vrot.lane.b32.xlu2 %v5433_v12, %s9366_s17  ;;  %v5605_v62 = vadd.f32 %v12337_v53, %v5507_v50  ;;  %v5629_v53 = vrot.slane %v12780_v14, 1  ;;  %v14924_v6 = vld [vmem:[#allocation18_spill] sm:$0xff] }
 0xb42   : > { %v5352_v22 = vadd.f32 %v14924_v6, %v12217_v35  ;;  %v5506_v28 = vadd.f32 %v14925_v7, %v5350_v36  ;;  %v14930_v35 = vld [vmem:[#allocation56_spill] sm:$0xff] }
 0xb43   : > { %v5669_v24 = vpop.permute.xlu2 %5668  ;;  %v5707_v39 = vadd.f32 %v12391_v1, %v5605_v62  ;;  %v14939_v6 = vld [vmem:[#allocation8_spill] sm:$0xff] }
 0xb44   : > { %v5723_v49 = vadd.f32 %v5669_v24, %v5621_v37  ;;  %v14928_v24 = vld [vmem:[#allocation17_spill] sm:$0xff] }
 0xb45   : > { %v5808_v1 = vadd.f32 %v12403_v29, %v5707_v39  ;;  %v5608_v29 = vadd.f32 %v12469_v34, %v5510_v4  ;;  %v5731_v34 = vrot.slane %v12793_v19, 2  ;;  %v14935_v4 = vld [vmem:[#allocation26_spill] sm:$0xff] }
 0xb46   : > { %6074 = vrot.lane.b32.xlu1 %v5433_v12, %s14888_s18  ;;  %5676 = vrot.lane.b32.xlu0 %v5277_v38, %s14601_s23  ;;  %v5631_v38 = vsel %vm1363_vm6, %v5629_v53, %v5630_v11  ;;  %v5632_v53 = vrot.slane %v12807_v59, 1 }
 0xb47   : > { %v5906_v43 = vadd.f32 %v12414_v57, %v5808_v1 }
 0xb48   : > { %v5667_v33 = vpop.permute.xlu1 %5666  ;;  %v5766_v48 = vpop.permute.xlu0 %5765 }
 0xb49   : > { %v5722_v56 = vadd.f32 %v5667_v33, %v5620_v25  ;;  %v5822_v63 = vadd.f32 %v5766_v48, %v5721_v47  ;;  %5873 = vrot.lane.b32.xlu2 %v12780_v14, %s14886_s15  ;;  %v6008_v26 = vadd.f32 %v12444_v51, %v5906_v43  ;;  %v5710_v51 = vadd.f32 %v12480_v44, %v5608_v29 }
 0xb4b   : > { %v5770_v58 = vpop.permute.xlu2 %5769  ;;  %v6109_v57 = vadd.f32 %v12457_v54, %v6008_v26  ;;  %v14936_v26 = vld [vmem:[#allocation24_spill] sm:$0xff] }
 0xb4c   : > { %v5824_v5 = vadd.f32 %v5770_v58, %v5723_v49  ;;  %v14929_v49 = vld [vmem:[#allocation27_spill] sm:$0xff] }
 0xb4d   : > { %v6137_v54 = vadd.f32 %v12853_v60, %v6109_v57  ;;  %v5604_v50 = vadd.f32 %v14929_v49, %v5506_v28  ;;  %v14937_v57 = vld [vmem:[#allocation21_spill] sm:$0xff] }
 0xb4e   : > { %5576 = vrot.lane.b32.xlu1 %v12780_v14, %s14613_s19  ;;  %5777 = vrot.lane.b32.xlu0 %v5433_v12, %s14599_s24  ;;  %v14926_v12 = vld [vmem:[#allocation48_spill] sm:$0xff] }
 0xb4f   : > { %v5811_v25 = vadd.f32 %v14926_v12, %v5710_v51  ;;  %v6185_v39 = vmul.f32 0.2, %v6137_v54  ;;  %vm6161_vm8 = vcmp.gt.f32.partialorder %v6137_v54, 0.0  ;;  %v5633_v12 = vsel %vm1363_vm6, %v5630_v11, %v5632_v53  ;;  %v14950_v53 = vld [vmem:[#allocation49_spill] sm:$0xff] }
 0xb50   : > { %v5768_v0 = vpop.permute.xlu1 %5767  ;;  %v5864_v37 = vpop.permute.xlu0 %5863 }
 0xb51   : > { %v12828_v27 = vadd.f32 %v5768_v0, %v5722_v56  ;;  %v12830_v13 = vadd.f32 %v5864_v37, %v5822_v63  ;;  %5578 = vrot.lane.b32.xlu2 %v12793_v19, %s14613_s19  ;;  %v5909_v16 = vadd.f32 %v14927_v46, %v5811_v25  ;;  %v14931_v63 = vld [vmem:[#allocation36_spill] sm:$0xff]  ;;  %v14932_v0 = vld [vmem:[#allocation10_spill] sm:$0xff]  ;;  %v6209_v28 = vsel %vm6161_vm8, %v6137_v54, %v6185_v39 }
 0xb52   : > { %v5706_v62 = vadd.f32 %v14931_v63, %v5604_v50  ;;  %v14940_v25 = vld [vmem:[#allocation32_spill] sm:$0xff] }
 0xb53   : > { %v5868_v21 = vpop.permute.xlu2 %5867  ;;  %v6011_v33 = vadd.f32 %v14930_v35, %v5909_v16  ;;  %v14945_v50 = vld [vmem:[#allocation28_spill] sm:$0xff] }
 0xb54   : > { %v12840_v10 = vadd.f32 %v5868_v21, %v5824_v5  ;;  %v14933_v21 = vld [vmem:[#allocation6_spill] sm:$0xff]  ;;  %v5807_v29 = vadd.f32 %v14936_v26, %v5706_v62  ;;  %v14948_v62 = vld [vmem:[#allocation53_spill] sm:$0xff] }
 0xb55   : > { %v6112_v37 = vadd.f32 %v14932_v0, %v6011_v33  ;;  %v14946_v33 = vld [vmem:[#allocation43_spill] sm:$0xff]  ;;  %v14949_v0 = vld [vmem:[#allocation34_spill] sm:$0xff] }
 0xb56   : > { %5678 = vrot.lane.b32.xlu1 %v5631_v38, %s14601_s23  ;;  %6072 = vrot.lane.b32.xlu0 %v5431_v30, %s14888_s18  ;;  %v5730_v30 = vrot.slane %v12780_v14, 2  ;;  %v5508_v14 = vadd.f32 %v14928_v24, %v5352_v22  ;;  %v5905_v22 = vadd.f32 %v14939_v6, %v5807_v29  ;;  %v14953_v26 = vld [vmem:[#allocation42_spill] sm:$0xff] }
 0xb57   : > { %v6140_v7 = vadd.f32 %v12853_v60, %v6112_v37 }
 0xb58   : > { %v5317_v18 = vpop.permute.xlu1 %5316  ;;  %v5315_v3 = vpop.permute.xlu0 %5314  ;;  %v5732_v44 = vsel %vm1572_vm5, %v5730_v30, %v5731_v34  ;;  %v5606_v43 = vadd.f32 %v14933_v21, %v5508_v14  ;;  %v14944_v14 = vld [vmem:[#allocation40_spill] sm:$0xff] }
 0xb59   : > { %5975 = vrot.lane.b32.xlu2 %v5631_v38, %s14887_s16  ;;  %v5369_v48 = vadd.f32 %v5317_v18, %v12657_v2  ;;  %v5368_v56 = vadd.f32 %v5315_v3, %v12638_v55  ;;  %v14934_v2 = vld [vmem:[#allocation5_spill] sm:$0xff]  ;;  %v14938_v3 = vld [vmem:[#allocation35_spill] sm:$0xff]  ;;  %v6007_v49 = vadd.f32 %v14944_v14, %v5905_v22  ;;  %v6188_v39 = vmul.f32 0.2, %v6140_v7 }
 0xb5a   : > { %v5353_v55 = vadd.f32 %v14935_v4, %v14934_v2  ;;  %v5708_v18 = vadd.f32 %v14937_v57, %v5606_v43  ;;  %vm6164_vm9 = vcmp.gt.f32.partialorder %v6140_v7, 0.0  ;;  %v14951_v43 = vld [vmem:[#allocation37_spill] sm:$0xff] }
 0xb5b   : > { %v5319_v47 = vpop.permute.xlu2 %5318  ;;  %v14955_v22 = vld [vmem:[#allocation9_spill] sm:$0xff] }
 0xb5c   : > { %v5370_v38 = vadd.f32 %v5319_v47, %v12700_v42  ;;  %v5509_v51 = vadd.f32 %v14938_v3, %v5353_v55  ;;  %v5809_v46 = vadd.f32 %v14940_v25, %v5708_v18  ;;  %v14941_v42 = vld [vmem:[#allocation15_spill] sm:$0xff]  ;;  %v14942_v47 = vld [vmem:[#allocation33_spill] sm:$0xff]  ;;  %v14954_v18 = vld [vmem:[#allocation50_spill] sm:$0xff] }
 0xb5d   : > { %v5355_v16 = vadd.f32 %v14942_v47, %v14941_v42  ;;  %v14952_v55 = vld [vmem:[#allocation47_spill] sm:$0xff] }
 0xb5e   : > { %5779 = vrot.lane.b32.xlu1 %v5732_v44, %s14599_s24  ;;  %5875 = vrot.lane.b32.xlu0 %v12793_v19, %s14886_s15  ;;  %v5907_v54 = vadd.f32 %v14946_v33, %v5809_v46  ;;  %v14957_v46 = vld [vmem:[#allocation55_spill] sm:$0xff] }
 0xb5f   : > { %v5511_v35 = vadd.f32 %v14945_v50, %v5355_v16 }
 0xb60   : > { %v5473_v58 = vpop.permute.xlu1 %5472  ;;  %v5471_v5 = vpop.permute.xlu0 %5470  ;;  %v6009_v21 = vadd.f32 %v14950_v53, %v5907_v54 }
 0xb61   : > { %v12880_v1 = vadd.f32 %v5473_v58, %v5369_v48  ;;  %v12882_v31 = vadd.f32 %v5471_v5, %v5368_v56  ;;  %6076 = vrot.lane.b32.xlu2 %v5732_v44, %s14888_s18  ;;  %v14943_v44 = vld [vmem:[#allocation46_spill] sm:$0xff]  ;;  %v14947_v56 = vld [vmem:[#allocation41_spill] sm:$0xff]  ;;  %v5733_v5 = vrot.slane %v12807_v59, 2  ;;  %v5609_v37 = vadd.f32 %v14949_v0, %v5511_v35 }
 0xb62   : > { %v5607_v24 = vadd.f32 %v14943_v44, %v5509_v51  ;;  %v6108_v63 = vadd.f32 %v14947_v56, %v6007_v49  ;;  %v6212_v51 = vsel %vm6164_vm9, %v6140_v7, %v6188_v39  ;;  %v14958_v7 = vld [vmem:[#allocation45_spill] sm:$0xff]  ;;  %v14959_v44 = vld [vmem:[#allocation51_spill] sm:$0xff] }
 0xb63   : > { %v5475_v36 = vpop.permute.xlu2 %5474  ;;  %v5711_v29 = vadd.f32 %v14953_v26, %v5609_v37  ;;  %v5734_v6 = vsel %vm1572_vm5, %v5731_v34, %v5733_v5  ;;  %v14960_v49 = vld [vmem:[#allocation65_spill] sm:$0xff] }
 0xb64   : > { %v12892_v30 = vadd.f32 %v5475_v36, %v5370_v38  ;;  %v5709_v58 = vadd.f32 %v14948_v62, %v5607_v24  ;;  %v6110_v38 = vadd.f32 %v14952_v55, %v6009_v21  ;;  %v5147_v36 = vpop.f32.mrf.mxu2  ;;  %v6136_v59 = vadd.f32 %v12853_v60, %v6108_v63 }
 0xb65   : > { %v5930_v39 = vrot.slane %v5147_v36, 1 }
 0xb66   : > { %6258 = vrot.lane.b32.xlu1 %v6209_v28, %s9380_s22  ;;  %5977 = vrot.lane.b32.xlu0 %v5633_v12, %s14887_s16  ;;  %v5810_v2 = vadd.f32 %v14951_v43, %v5709_v58  ;;  %v5812_v28 = vadd.f32 %v14955_v22, %v5711_v29  ;;  %v6184_v34 = vmul.f32 0.2, %v6136_v59  ;;  %vm6160_vm10 = vcmp.gt.f32.partialorder %v6136_v59, 0.0 }
 0xb68   : > { %v12906_v48 = vpop.permute.xlu1 %5865  ;;  %v12908_v11 = vpop.permute.xlu0 %5965  ;;  %v5908_v3 = vadd.f32 %v14954_v18, %v5810_v2  ;;  %v5910_v42 = vadd.f32 %v14957_v46, %v5812_v28  ;;  %v6208_v54 = vsel %vm6160_vm10, %v6136_v59, %v6184_v34  ;;  %v6142_v2 = vadd.f32 %v12853_v60, %v12666_v45 }
 0xb69   : > { %5680 = vrot.lane.b32.xlu2 %v5633_v12, %s14601_s23  ;;  %v14956_v12 = vld [vmem:[#allocation57_spill] sm:$0xff]  ;;  %v6031_v59 = vrot.slane %v5147_v36, 2 }
 0xb6a   : > { %v6010_v25 = vadd.f32 %v14956_v12, %v5908_v3  ;;  %v6012_v24 = vadd.f32 %v14959_v44, %v5910_v42  ;;  %v6190_v29 = vmul.f32 0.2, %v6142_v2  ;;  %vm6166_vm15 = vcmp.gt.f32.partialorder %v6142_v2, 0.0 }
 0xb6b   : > { %v5970_v4 = vpop.permute.xlu2 %5969  ;;  %v6022_v44 = vadd.f32 %v12908_v11, %v12830_v13  ;;  %v6149_v13 = vadd.f32 %v12853_v60, %v12802_v52  ;;  %v5921_v11 = vadd.f32 %v12906_v48, %v12828_v27 }
 0xb6c   : > { %v12920_v57 = vadd.f32 %v5970_v4, %v12840_v10  ;;  %v6138_v10 = vadd.f32 %v12853_v60, %v6110_v38  ;;  %v6111_v19 = vadd.f32 %v14958_v7, %v6010_v25  ;;  %v6113_v50 = vadd.f32 %v14960_v49, %v6012_v24  ;;  %v12944_v56 = vpop.f32.mrf.mxu2 }
 0xb6d   : > { %v5931_v0 = vrot.slane %v12944_v56, 1  ;;  %v6032_v18 = vrot.slane %v12944_v56, 2  ;;  %v6214_v28 = vsel %vm6166_vm15, %v6142_v2, %v6190_v29  ;;  %v6148_v7 = vadd.f32 %v12853_v60, %v12804_v20 }
 0xb6e   : > { %6264 = vrot.lane.b32.xlu1 %v6212_v51, %s9380_s22  ;;  %6078 = vrot.lane.b32.xlu0 %v5734_v6, %s14888_s18  ;;  %v6186_v35 = vmul.f32 0.2, %v6138_v10  ;;  %v6139_v33 = vadd.f32 %v12853_v60, %v6111_v19  ;;  %vm6162_vm11 = vcmp.gt.f32.partialorder %v6138_v10, 0.0  ;;  %v6141_v63 = vadd.f32 %v12853_v60, %v6113_v50 }
 0xb6f   : > { %v5932_v4 = vsel %vm1363_vm6, %v5930_v39, %v5931_v0  ;;  %v6143_v51 = vadd.f32 %v12853_v60, %v12664_v23  ;;  %v6033_v22 = vsel %vm1572_vm5, %v6031_v59, %v6032_v18  ;;  %vm6172_vm8 = vcmp.gt.f32.partialorder %v6148_v7, 0.0 }
 0xb70   : > { %v12933_v47 = vpop.permute.xlu1 %5570  ;;  %v12935_v16 = vpop.permute.xlu0 %6066  ;;  %v6210_v5 = vsel %vm6162_vm11, %v6138_v10, %v6186_v35  ;;  %v6187_v53 = vmul.f32 0.2, %v6139_v33  ;;  %vm6163_vm12 = vcmp.gt.f32.partialorder %v6139_v33, 0.0  ;;  %v6189_v43 = vmul.f32 0.2, %v6141_v63 }
 0xb71   : > { %5781 = vrot.lane.b32.xlu2 %v5734_v6, %s14599_s24  ;;  %vm6165_vm14 = vcmp.gt.f32.partialorder %v6141_v63, 0.0  ;;  %v6145_v6 = vadd.f32 %v12853_v60, %v12730_v61  ;;  %v6191_v25 = vmul.f32 0.2, %v6143_v51  ;;  %vm6167_vm7 = vcmp.gt.f32.partialorder %v6143_v51, 0.0 }
 0xb72   : > { %v6211_v55 = vsel %vm6163_vm12, %v6139_v33, %v6187_v53  ;;  %v6213_v26 = vsel %vm6165_vm14, %v6141_v63, %v6189_v43  ;;  %v6146_v61 = vadd.f32 %v12853_v60, %v12748_v40  ;;  %v6196_v35 = vmul.f32 0.2, %v6148_v7 }
 0xb73   : > { %v12940_v14 = vpop.permute.xlu2 %6070  ;;  %v6193_v10 = vmul.f32 0.2, %v6145_v6  ;;  %vm6169_vm0 = vcmp.gt.f32.partialorder %v6145_v6, 0.0  ;;  %v6215_v19 = vsel %vm6167_vm7, %v6143_v51, %v6191_v25  ;;  %v6123_v33 = vadd.f32 %v12935_v16, %v6022_v44 }
 0xb74   : > { %v5153_v46 = vpop.f32.mrf.mxu2  ;;  %v6194_v24 = vmul.f32 0.2, %v6146_v61  ;;  %vm6170_vm2 = vcmp.gt.f32.partialorder %v6146_v61, 0.0  ;;  %vm6173_vm9 = vcmp.gt.f32.partialorder %v6149_v13, 0.0 }
 0xb75   : > { %v5933_v42 = vrot.slane %v5153_v46, 1  ;;  %v6217_v34 = vsel %vm6169_vm0, %v6145_v6, %v6193_v10  ;;  %v6151_v63 = vadd.f32 %v12853_v60, %v6123_v33 }
 0xb76   : > { %5877 = vrot.lane.b32.xlu1 %v5147_v36, %s14886_s15  ;;  %6256 = vrot.lane.b32.xlu0 %v6208_v54, %s9380_s22  ;;  %v6034_v54 = vrot.slane %v5153_v46, 2 }
 0xb77   : > { %v5934_v40 = vsel %vm1363_vm6, %v5931_v0, %v5933_v42  ;;  %v6199_v53 = vmul.f32 0.2, %v6151_v63  ;;  %vm6175_vm10 = vcmp.gt.f32.partialorder %v6151_v63, 0.0  ;;  %v6125_v42 = vadd.f32 %v12940_v14, %v12920_v57 }
 0xb78   : > { %v12949_v62 = vpop.permute.xlu1 %5967  ;;  %v5569_v58 = vpop.permute.xlu0 %5568  ;;  %v6035_v52 = vsel %vm1572_vm5, %v6032_v18, %v6034_v54 }
 0xb79   : > { %v5622_v37 = vadd.f32 %v5569_v58, %v12882_v31  ;;  %6260 = vrot.lane.b32.xlu2 %v6210_v5, %s9380_s22  ;;  %v6220_v58 = vsel %vm6172_vm8, %v6148_v7, %v6196_v35  ;;  %v6023_v16 = vadd.f32 %v12949_v62, %v5921_v11  ;;  %v6144_v5 = vadd.f32 %v12853_v60, %v12672_v15 }
 0xb7b   : > { %v12954_v21 = vpop.permute.xlu2 %5572  ;;  %v6192_v2 = vmul.f32 0.2, %v6144_v5  ;;  %vm6168_vm11 = vcmp.gt.f32.partialorder %v6144_v5, 0.0 }
 0xb7e   : > { %5979 = vrot.lane.b32.xlu1 %v5932_v4, %s14887_s16  ;;  %6262 = vrot.lane.b32.xlu0 %v6211_v55, %s9380_s22  ;;  %v6223_v55 = vsel %vm6175_vm10, %v6151_v63, %v6199_v53 }
 0xb80   : > { %v6069_v38 = vpop.permute.xlu1 %6068  ;;  %v5671_v31 = vpop.permute.xlu0 %5670 }
 0xb81   : > { %v12962_v3 = vadd.f32 %v5671_v31, %v5622_v37  ;;  %6266 = vrot.lane.b32.xlu2 %v6213_v26, %s9380_s22  ;;  %v6197_v37 = vmul.f32 0.2, %v6149_v13  ;;  %v6124_v27 = vadd.f32 %v6069_v38, %v6023_v16  ;;  %v6147_v38 = vadd.f32 %v12853_v60, %v12733_v41 }
 0xb82   : > { %v6216_v26 = vsel %vm6168_vm11, %v6144_v5, %v6192_v2 }
 0xb83   : > { %v12965_v45 = vpop.permute.xlu2 %5674  ;;  %v6152_v15 = vadd.f32 %v12853_v60, %v6124_v27  ;;  %v6221_v4 = vsel %vm6173_vm9, %v6149_v13, %v6197_v37  ;;  %v6195_v18 = vmul.f32 0.2, %v6147_v38  ;;  %vm6171_vm14 = vcmp.gt.f32.partialorder %v6147_v38, 0.0 }
 0xb84   : > { %vm6329_vm9 = vcmask 228512  }
 0xb85   : > { %v6200_v29 = vmul.f32 0.2, %v6152_v15  ;;  %vm6176_vm12 = vcmp.gt.f32.partialorder %v6152_v15, 0.0  ;;  %v6219_v25 = vsel %vm6171_vm14, %v6147_v38, %v6195_v18 }
 0xb86   : > { %6080 = vrot.lane.b32.xlu1 %v6033_v22, %s14888_s18  ;;  %6268 = vrot.lane.b32.xlu0 %v6214_v28, %s9380_s22  ;;  %v6150_v22 = vadd.f32 %v12853_v60, %v12810_v8  ;;  %v6153_v8 = vadd.f32 %v12853_v60, %v6125_v42 }
 0xb87   : > { %v6224_v51 = vsel %vm6176_vm12, %v6152_v15, %v6200_v29 }
 0xb88   : > { %v12974_v36 = vpop.permute.xlu1 %5672  ;;  %v12976_v12 = vpop.permute.xlu0 %5771  ;;  %vm6174_vm15 = vcmp.gt.f32.partialorder %v6150_v22, 0.0  ;;  %v6201_v57 = vmul.f32 0.2, %v6153_v8  ;;  %vm6177_vm7 = vcmp.gt.f32.partialorder %v6153_v8, 0.0 }
 0xb89   : > { %5879 = vrot.lane.b32.xlu2 %v12944_v56, %s14886_s15  ;;  %v6218_v56 = vsel %vm6170_vm2, %v6146_v61, %v6194_v24  ;;  %v6198_v61 = vmul.f32 0.2, %v6150_v22  ;;  %v5624_v24 = vadd.f32 %v12954_v21, %v12892_v30 }
 0xb8b   : > { %v12980_v23 = vpop.permute.xlu2 %5775  ;;  %v5726_v14 = vadd.f32 %v12965_v45, %v5624_v24 }
 0xb8e   : > { %6270 = vrot.lane.b32.xlu1 %v6215_v19, %s9380_s22  ;;  %6274 = vrot.lane.b32.xlu0 %v6217_v34, %s9380_s22  ;;  %v6222_v34 = vsel %vm6174_vm15, %v6150_v22, %v6198_v61 }
 0xb90   : > { %v12990_v49 = vpop.permute.xlu1 %5773  ;;  %v12992_v50 = vpop.permute.xlu0 %5320 }
 0xb91   : > { %5981 = vrot.lane.b32.xlu2 %v5934_v40, %s14887_s16 }
 0xb93   : > { %v5325_v20 = vpop.permute.xlu2 %5324 }
 0xb94   : > { %v5373_v48 = vadd.f32 %v5325_v20, %v12756_v17 }
 0xb96   : > { %6276 = vrot.lane.b32.xlu1 %v6218_v56, %s9380_s22  ;;  %6280 = vrot.lane.b32.xlu0 %v6220_v58, %s9380_s22 }
 0xb98   : > { %v5872_v39 = vpop.permute.xlu1 %5871  ;;  %v13007_v0 = vpop.permute.xlu0 %5476 }
 0xb99   : > { %6082 = vrot.lane.b32.xlu2 %v6035_v52, %s14888_s18  ;;  %v5825_v52 = vadd.f32 %v12976_v12, %v12962_v3  ;;  %v5371_v12 = vadd.f32 %v12992_v50, %v12709_v32 }
 0xb9b   : > { %v5481_v43 = vpop.permute.xlu2 %5480  ;;  %v5527_v29 = vadd.f32 %v13007_v0, %v5371_v12 }
 0xb9c   : > { %v13012_v62 = vadd.f32 %v5481_v43, %v5373_v48 }
 0xb9e   : > { %6282 = vrot.lane.b32.xlu1 %v6221_v4, %s9380_s22  ;;  %6286 = vrot.lane.b32.xlu0 %v6223_v55, %s9380_s22  ;;  %v4811_v55 = vld [vmem:[#allocation2 + $0x1f8] sm:$0xff] }
 0xb9f   : > { %9145 = vmatmul.msk.f32.gmra.mxu2 %vm4815_vm13, %v4811_v55 }
 0xba0   : > { %v5323_v31 = vpop.permute.xlu1 %5322  ;;  %v5870_v17 = vpop.permute.xlu0 %5869 }
 0xba1   : > { %6272 = vrot.lane.b32.xlu2 %v6216_v26, %s9380_s22  ;;  %v5372_v6 = vadd.f32 %v5323_v31, %v12742_v9  ;;  %v5623_v9 = vadd.f32 %v12933_v47, %v12880_v1  ;;  %v5827_v1 = vadd.f32 %v12980_v23, %v5726_v14  ;;  %v5923_v53 = vadd.f32 %v5870_v17, %v5825_v52 }
 0xba3   : > { %v5874_v59 = vpop.permute.xlu2 %5873  ;;  %v5725_v44 = vadd.f32 %v12974_v36, %v5623_v9  ;;  %v6225_v36 = vsel %vm6177_vm7, %v6153_v8, %v6201_v57 }
 0xba4   : > { %v5925_v20 = vadd.f32 %v5874_v59, %v5827_v1  ;;  %v4759_v59 = vld [vmem:[#allocation2 + $0x58] sm:$0xff] }
 0xba5   : > { %v5826_v40 = vadd.f32 %v12990_v49, %v5725_v44  ;;  %9093 = vmatmul.msk.f32.gmra.mxu1 %vm4815_vm13, %v4759_v59 }
 0xba6   : > { %6288 = vrot.lane.b32.xlu1 %v6224_v51, %s9380_s22 }
 0xba7   : > { %v5924_v33 = vadd.f32 %v5872_v39, %v5826_v40 }
 0xba8   : > { %v5479_v28 = vpop.permute.xlu1 %5478  ;;  %v13024_v41 = vpop.permute.xlu0 %5574 }
 0xba9   : > { %v13026_v10 = vadd.f32 %v5479_v28, %v5372_v6  ;;  %6278 = vrot.lane.b32.xlu2 %v6219_v25, %s9380_s22  ;;  %v5625_v18 = vadd.f32 %v13024_v41, %v5527_v29 }
 0xbab   : > { %v13029_v46 = vpop.permute.xlu2 %5578 }
 0xbac   : > { %v5627_v44 = vadd.f32 %v13029_v46, %v13012_v62 }
 0xbb0   : > { %v5974_v7 = vpop.permute.xlu1 %5973  ;;  %v5972_v19 = vpop.permute.xlu0 %5971 }
 0xbb1   : > { %6284 = vrot.lane.b32.xlu2 %v6222_v34, %s9380_s22  ;;  %v6026_v47 = vadd.f32 %v5974_v7, %v5924_v33  ;;  %v6025_v27 = vadd.f32 %v5972_v19, %v5923_v53 }
 0xbb3   : > { %v5976_v35 = vpop.permute.xlu2 %5975 }
 0xbb4   : > { %v6027_v11 = vadd.f32 %v5976_v35, %v5925_v20 }
 0xbb8   : > { %v6075_v54 = vpop.permute.xlu1 %6074  ;;  %v5677_v56 = vpop.permute.xlu0 %5676 }
 0xbb9   : > { %v6127_v13 = vadd.f32 %v6075_v54, %v6026_v47  ;;  %6290 = vrot.lane.b32.xlu2 %v6225_v36, %s9380_s22  ;;  %v5727_v22 = vadd.f32 %v5677_v56, %v5625_v18 }
 0xbbb   : > { %v6155_v30 = vadd.f32 %v12853_v60, %v6127_v13  ;;  %v6077_v21 = vpop.permute.xlu2 %6076 }
 0xbbc   : > { %v6128_v49 = vadd.f32 %v6077_v21, %v6027_v11 }
 0xbbd   : > { %v6203_v63 = vmul.f32 0.2, %v6155_v30  ;;  %vm6179_vm0 = vcmp.gt.f32.partialorder %v6155_v30, 0.0 }
 0xbbe   : > { %v6156_v45 = vadd.f32 %v12853_v60, %v6128_v49 }
 0xbbf   : > { %v6227_v58 = vsel %vm6179_vm0, %v6155_v30, %v6203_v63 }
 0xbc0   : > { %v6204_v16 = vmul.f32 0.2, %v6156_v45  ;;  %v5577_v23 = vpop.permute.xlu1 %5576  ;;  %6294 = vrot.lane.b32.xlu1 %v6227_v58, %s9380_s22  ;;  %v5778_v5 = vpop.permute.xlu0 %5777  ;;  %vm6180_vm2 = vcmp.gt.f32.partialorder %v6156_v45, 0.0 }
 0xbc1   : > { %v5828_v28 = vadd.f32 %v5778_v5, %v5727_v22  ;;  %v5626_v57 = vadd.f32 %v5577_v23, %v13026_v10 }
 0xbc2   : > { %v6228_v39 = vsel %vm6180_vm2, %v6156_v45, %v6204_v16 }
 0xbc3   : > { %v5681_v37 = vpop.permute.xlu2 %5680  ;;  %6296 = vrot.lane.b32.xlu2 %v6228_v39, %s9380_s22 }
 0xbc4   : > { %v5729_v40 = vadd.f32 %v5681_v37, %v5627_v44 }
 0xbc8   : > { %v5679_v48 = vpop.permute.xlu1 %5678  ;;  %v6073_v43 = vpop.permute.xlu0 %6072 }
 0xbc9   : > { %v6126_v2 = vadd.f32 %v6073_v43, %v6025_v27  ;;  %v5728_v47 = vadd.f32 %v5679_v48, %v5626_v57 }
 0xbcb   : > { %v6154_v15 = vadd.f32 %v12853_v60, %v6126_v2  ;;  %v5782_v4 = vpop.permute.xlu2 %5781 }
 0xbcc   : > { %v5830_v35 = vadd.f32 %v5782_v4, %v5729_v40 }
 0xbcd   : > { %v6202_v38 = vmul.f32 0.2, %v6154_v15  ;;  %vm6178_vm8 = vcmp.gt.f32.partialorder %v6154_v15, 0.0 }
 0xbcf   : > { %v6226_v31 = vsel %vm6178_vm8, %v6154_v15, %v6202_v38 }
 0xbd0   : > { %v5780_v26 = vpop.permute.xlu1 %5779  ;;  %6292 = vrot.lane.b32.xlu0 %v6226_v31, %s9380_s22  ;;  %v5876_v3 = vpop.permute.xlu0 %5875 }
 0xbd1   : > { %v5926_v32 = vadd.f32 %v5876_v3, %v5828_v28  ;;  %v5829_v54 = vadd.f32 %v5780_v26, %v5728_v47 }
 0xbd3   : > { %v6261_v17 = vpop.permute.xlu2 %6260 }
 0xbd4   : > { %6332 = vst.msk [vmem:[#allocation2 + $0x81] sm:$0xff] %vm6329_vm9, %v6261_v17 }
 0xbd8   : > { %v6259_v51 = vpop.permute.xlu1 %6258  ;;  %v5978_v6 = vpop.permute.xlu0 %5977 }
 0xbd9   : > { %6331 = vst.msk [vmem:[#allocation2 + $0x69] sm:$0xff] %vm6329_vm9, %v6259_v51  ;;  %v6028_v50 = vadd.f32 %v5978_v6, %v5926_v32 }
 0xbdb   : > { %v6267_v25 = vpop.permute.xlu2 %6266 }
 0xbdc   : > { %6335 = vst.msk [vmem:[#allocation2 + $0xa9] sm:$0xff] %vm6329_vm9, %v6267_v25 }
 0xbe0   : > { %v6265_v61 = vpop.permute.xlu1 %6264  ;;  %v6079_v42 = vpop.permute.xlu0 %6078 }
 0xbe1   : > { %6334 = vst.msk [vmem:[#allocation2 + $0xa1] sm:$0xff] %vm6329_vm9, %v6265_v61  ;;  %v6129_v0 = vadd.f32 %v6079_v42, %v6028_v50 }
 0xbe3   : > { %v6157_v9 = vadd.f32 %v12853_v60, %v6129_v0  ;;  %v5880_v8 = vpop.permute.xlu2 %5879 }
 0xbe4   : > { %v5928_v14 = vadd.f32 %v5880_v8, %v5830_v35 }
 0xbe5   : > { %v6205_v41 = vmul.f32 0.2, %v6157_v9  ;;  %vm6181_vm13 = vcmp.gt.f32.partialorder %v6157_v9, 0.0 }
 0xbe7   : > { %v6229_v7 = vsel %vm6181_vm13, %v6157_v9, %v6205_v41 }
 0xbe8   : > { %v5878_v19 = vpop.permute.xlu1 %5877  ;;  %6298 = vrot.lane.b32.xlu0 %v6229_v7, %s9380_s22  ;;  %v6257_v34 = vpop.permute.xlu0 %6256 }
 0xbe9   : > { %6330 = vst.msk [vmem:[#allocation2 + $0x61] sm:$0xff] %vm6329_vm9, %v6257_v34  ;;  %v5927_v13 = vadd.f32 %v5878_v19, %v5829_v54 }
 0xbeb   : > { %v5982_v24 = vpop.permute.xlu2 %5981 }
 0xbec   : > { %v6030_v20 = vadd.f32 %v5982_v24, %v5928_v14 }
 0xbf0   : > { %v5980_v33 = vpop.permute.xlu1 %5979  ;;  %v6263_v1 = vpop.permute.xlu0 %6262 }
 0xbf1   : > { %6333 = vst.msk [vmem:[#allocation2 + $0x89] sm:$0xff] %vm6329_vm9, %v6263_v1  ;;  %v6029_v30 = vadd.f32 %v5980_v33, %v5927_v13 }
 0xbf3   : > { %v6083_v56 = vpop.permute.xlu2 %6082 }
 0xbf4   : > { %v6131_v36 = vadd.f32 %v6083_v56, %v6030_v20 }
 0xbf6   : > { %v6159_v11 = vadd.f32 %v12853_v60, %v6131_v36 }
 0xbf8   : > { %v6207_v62 = vmul.f32 0.2, %v6159_v11  ;;  %v6081_v46 = vpop.permute.xlu1 %6080  ;;  %v6269_v21 = vpop.permute.xlu0 %6268  ;;  %vm6183_vm10 = vcmp.gt.f32.partialorder %v6159_v11, 0.0 }
 0xbf9   : > { %v6130_v49 = vadd.f32 %v6081_v46, %v6029_v30  ;;  %6336 = vst.msk [vmem:[#allocation2 + $0xc1] sm:$0xff] %vm6329_vm9, %v6269_v21 }
 0xbfa   : > { %v6231_v10 = vsel %vm6183_vm10, %v6159_v11, %v6207_v62 }
 0xbfb   : > { %v6158_v63 = vadd.f32 %v12853_v60, %v6130_v49  ;;  %6302 = vrot.lane.b32.xlu2 %v6231_v10, %s9380_s22  ;;  %v6273_v45 = vpop.permute.xlu2 %6272 }
 0xbfc   : > { %6338 = vst.msk [vmem:[#allocation2 + $0xe1] sm:$0xff] %vm6329_vm9, %v6273_v45 }
 0xbfd   : > { %v6206_v58 = vmul.f32 0.2, %v6158_v63  ;;  %vm6182_vm11 = vcmp.gt.f32.partialorder %v6158_v63, 0.0 }
 0xbff   : > { %v6230_v16 = vsel %vm6182_vm11, %v6158_v63, %v6206_v58 }
 0xc00   : > { %6300 = vrot.lane.b32.xlu1 %v6230_v16, %s9380_s22  ;;  %v6271_v23 = vpop.permute.xlu1 %6270  ;;  %v6275_v5 = vpop.permute.xlu0 %6274 }
 0xc01   : > { %6337 = vst.msk [vmem:[#allocation2 + $0xc9] sm:$0xff] %vm6329_vm9, %v6271_v23 }
 0xc02   : > { %6339 = vst.msk [vmem:[#allocation2 + $0xe9] sm:$0xff] %vm6329_vm9, %v6275_v5 }
 0xc03   : > { %v6279_v39 = vpop.permute.xlu2 %6278 }
 0xc04   : > { %6341 = vst.msk [vmem:[#allocation2 + $0x109] sm:$0xff] %vm6329_vm9, %v6279_v39 }
 0xc08   : > { %v6277_v60 = vpop.permute.xlu1 %6276  ;;  %v6281_v52 = vpop.permute.xlu0 %6280 }
 0xc09   : > { %6340 = vst.msk [vmem:[#allocation2 + $0x101] sm:$0xff] %vm6329_vm9, %v6277_v60 }
 0xc0a   : > { %6342 = vst.msk [vmem:[#allocation2 + $0x121] sm:$0xff] %vm6329_vm9, %v6281_v52 }
 0xc0b   : > { %v6285_v37 = vpop.permute.xlu2 %6284 }
 0xc0c   : > { %6344 = vst.msk [vmem:[#allocation2 + $0x141] sm:$0xff] %vm6329_vm9, %v6285_v37 }
 0xc10   : > { %v6283_v53 = vpop.permute.xlu1 %6282  ;;  %v6287_v27 = vpop.permute.xlu0 %6286 }
 0xc11   : > { %6343 = vst.msk [vmem:[#allocation2 + $0x129] sm:$0xff] %vm6329_vm9, %v6283_v53 }
 0xc12   : > { %6345 = vst.msk [vmem:[#allocation2 + $0x149] sm:$0xff] %vm6329_vm9, %v6287_v27 }
 0xc13   : > { %v6291_v48 = vpop.permute.xlu2 %6290 }
 0xc14   : > { %6347 = vst.msk [vmem:[#allocation2 + $0x169] sm:$0xff] %vm6329_vm9, %v6291_v48 }
 0xc18   : > { %v6289_v43 = vpop.permute.xlu1 %6288 }
 0xc19   : > { %6346 = vst.msk [vmem:[#allocation2 + $0x161] sm:$0xff] %vm6329_vm9, %v6289_v43 }
 0xc1d   : > { %v6297_v2 = vpop.permute.xlu2 %6296 }
 0xc1e   : > { %6350 = vst.msk [vmem:[#allocation2 + $0x1a1] sm:$0xff] %vm6329_vm9, %v6297_v2 }
 0xc22   : > { %v5156_v55 = vpop.f32.mrf.mxu2  ;;  %v5013_v38 = vpop.f32.mrf.mxu1 }
 0xc32   : > { %v6295_v15 = vpop.permute.xlu1 %6294 }
 0xc33   : > { %6349 = vst.msk [vmem:[#allocation2 + $0x189] sm:$0xff] %vm6329_vm9, %v6295_v15 }
 0xc42   : > { %v6293_v4 = vpop.permute.xlu0 %6292 }
 0xc43   : > { %6348 = vst.msk [vmem:[#allocation2 + $0x181] sm:$0xff] %vm6329_vm9, %v6293_v4 }
 0xc55   : > { %v6303_v31 = vpop.permute.xlu2 %6302 }
 0xc56   : > { %6353 = vst.msk [vmem:[#allocation2 + $0x1c9] sm:$0xff] %vm6329_vm9, %v6303_v31 }
 0xc5a   : > { %v6299_v26 = vpop.permute.xlu0 %6298 }
 0xc5b   : > { %6351 = vst.msk [vmem:[#allocation2 + $0x1a9] sm:$0xff] %vm6329_vm9, %v6299_v26 }
 0xc6f   : > { %6356 = sbr.rel (%p8944_p12) target bundleno = 3193 (0xc79), region = 108 }
 0xc72   : > { %v6301_v3 = vpop.permute.xlu1 %6300 }
 0xc73   : > { %6352 = vst.msk [vmem:[#allocation2 + $0x1c1] sm:$0xff] %vm6329_vm9, %v6301_v3 }
 0xc74   : > { %v9381_v12 = vmov 0.0  }
 0xc75   : > { %6357 = vst.msk [vmem:[#allocation2 + $0x61] sm:$0xff] %vm6329_vm9, %v9381_v12 }
 0xc76   : > { %6358 = vst.msk [vmem:[#allocation2 + $0x69] sm:$0xff] %vm6329_vm9, %v9381_v12 }
 0xc77   : > { %6359 = vst.msk [vmem:[#allocation2 + $0x81] sm:$0xff] %vm6329_vm9, %v9381_v12 }
 0xc78   : > { %6360 = vst.msk [vmem:[#allocation2 + $0x89] sm:$0xff] %vm6329_vm9, %v9381_v12 }
 0xc79 PF: > { %6363 = sbr.rel (%p8946_p0) target bundleno = 3203 (0xc83), region = 112 }
 0xc7e   : > { %v9382_v17 = vmov 0.0  }
 0xc7f   : > { %6365 = vst.msk [vmem:[#allocation2 + $0x1a1] sm:$0xff] %vm6329_vm9, %v9382_v17 }
 0xc80   : > { %6366 = vst.msk [vmem:[#allocation2 + $0x1a9] sm:$0xff] %vm6329_vm9, %v9382_v17 }
 0xc81   : > { %6367 = vst.msk [vmem:[#allocation2 + $0x1c1] sm:$0xff] %vm6329_vm9, %v9382_v17 }
 0xc82   : > { %6368 = vst.msk [vmem:[#allocation2 + $0x1c9] sm:$0xff] %vm6329_vm9, %v9382_v17 }
 0xc83 PF: > { %v6420_v29 = vld [vmem:[%s14570_s9 + $0x18] sm:$0xf]  ;;  %v6419_v59 = vld [vmem:[%s14570_s9 + $0x10] sm:$0xff]  ;;  %v6418_v18 = vld [vmem:[%s14570_s9 + $0x8] sm:$0xff]  ;;  %vm6421_vm12 = vcmask 228352   ;;  %s14961_s23 = smov 80  }
 0xc84   : > { %9148 = vmatpush.msk.msrb.mxu2 %vm1064_vm4, %v6420_v29  ;;  %9246 = vmatpush.msk.msra.mxu3 %vm1064_vm4, %v6420_v29  ;;  %v6417_v51 = vld [vmem:[%s14570_s9] sm:$0xff]  ;;  %v6387_v22 = vld [vmem:[#allocation2 + $0xf0] sm:$0xff]  ;;  %v6370_v28 = vld [vmem:[#allocation2 + $0x68] sm:$0xff]  ;;  %s14962_s24 = smov 96   ;;  %s14964_s15 = smov 88  }
 0xc85   : > { %v6369_v6 = vld [vmem:[#allocation2 + $0x60] sm:$0xff]  ;;  %v6388_v25 = vld [vmem:[#allocation2 + $0xf8] sm:$0xff]  ;;  %v6371_v32 = vld [vmem:[#allocation2 + $0x70] sm:$0xff]  ;;  %s14971_s16 = smov 72   ;;  %s14985_s18 = smov 64  }
 0xc86   : > { %6582 = vmatpush.msrb.mxu2 %v6419_v59  ;;  %9247 = vmatpush.msra.mxu3 %v6419_v59  ;;  %v6389_v50 = vld [vmem:[#allocation2 + $0x100] sm:$0xff]  ;;  %v6372_v61 = vld [vmem:[#allocation2 + $0x78] sm:$0xff]  ;;  %v6390_v42 = vld [vmem:[#allocation2 + $0x108] sm:$0xff]  ;;  %s9383_s22 = smov 28  }
 0xc87   : > { %v6373_v0 = vld [vmem:[#allocation2 + $0x80] sm:$0xff]  ;;  %v6391_v9 = vld [vmem:[#allocation2 + $0x110] sm:$0xff]  ;;  %v6374_v8 = vld [vmem:[#allocation2 + $0x88] sm:$0xff] }
 0xc88   : > { %6583 = vmatpush.msrb.mxu2 %v6418_v18  ;;  %9248 = vmatpush.msra.mxu3 %v6418_v18  ;;  %v6392_v41 = vld [vmem:[#allocation2 + $0x118] sm:$0xff]  ;;  %v6375_v7 = vld [vmem:[#allocation2 + $0x90] sm:$0xff]  ;;  %v6393_v19 = vld [vmem:[#allocation2 + $0x120] sm:$0xff] }
 0xc89   : > { %v6376_v34 = vld [vmem:[#allocation2 + $0x98] sm:$0xff]  ;;  %v6394_v44 = vld [vmem:[#allocation2 + $0x128] sm:$0xff]  ;;  %v6377_v24 = vld [vmem:[#allocation2 + $0xa0] sm:$0xff] }
 0xc8a   : > { %6584 = vmatpush.msrb.mxu2 %v6417_v51  ;;  %9249 = vmatpush.msra.mxu3 %v6417_v51  ;;  %v6395_v40 = vld [vmem:[#allocation2 + $0x130] sm:$0xff]  ;;  %v6378_v35 = vld [vmem:[#allocation2 + $0xa8] sm:$0xff]  ;;  %v6380_v14 = vld [vmem:[#allocation2 + $0xb8] sm:$0xff] }
 0xc8b   : > { %9149 = vmatmul.msk.f32.vlgmr.msrb.gmra.mxu2 %vm6421_vm12, %v6369_v6  ;;  %9167 = vmatmul.msk.f32.vlgmr.msra.gmra.mxu3 %vm6421_vm12, %v6387_v22  ;;  %v6379_v57 = vld [vmem:[#allocation2 + $0xb0] sm:$0xff]  ;;  %v6396_v33 = vld [vmem:[#allocation2 + $0x138] sm:$0xff]  ;;  %v6381_v1 = vld [vmem:[#allocation2 + $0xc0] sm:$0xff] }
 0xc8c   : > { %v6397_v47 = vld [vmem:[#allocation2 + $0x140] sm:$0xff]  ;;  %v6382_v20 = vld [vmem:[#allocation2 + $0xc8] sm:$0xff]  ;;  %v6383_v54 = vld [vmem:[#allocation2 + $0xd0] sm:$0xff] }
 0xc8d   : > { %v6398_v56 = vld [vmem:[#allocation2 + $0x148] sm:$0xff]  ;;  %v6384_v36 = vld [vmem:[#allocation2 + $0xd8] sm:$0xff]  ;;  %v6385_v13 = vld [vmem:[#allocation2 + $0xe0] sm:$0xff] }
 0xc8e   : > { %v6386_v62 = vld [vmem:[#allocation2 + $0xe8] sm:$0xff]  ;;  %v6399_v46 = vld [vmem:[#allocation2 + $0x150] sm:$0xff]  ;;  %v6400_v48 = vld [vmem:[#allocation2 + $0x158] sm:$0xff] }
 0xc8f   : > { %v6401_v3 = vld [vmem:[#allocation2 + $0x160] sm:$0xff]  ;;  %v6402_v6 = vld [vmem:[#allocation2 + $0x168] sm:$0xff] }
 0xc93   : > { %9150 = vmatmul.msk.f32.gmra.mxu2 %vm6421_vm12, %v6370_v28  ;;  %9168 = vmatmul.msk.f32.gmra.mxu3 %vm6421_vm12, %v6388_v25 }
 0xc9b   : > { %9151 = vmatmul.msk.f32.gmra.mxu2 %vm6421_vm12, %v6371_v32  ;;  %9169 = vmatmul.msk.f32.gmra.mxu3 %vm6421_vm12, %v6389_v50 }
 0xca3   : > { %9152 = vmatmul.msk.f32.gmra.mxu2 %vm6421_vm12, %v6372_v61  ;;  %9170 = vmatmul.msk.f32.gmra.mxu3 %vm6421_vm12, %v6390_v42 }
 0xcab   : > { %9153 = vmatmul.msk.f32.gmra.mxu2 %vm6421_vm12, %v6373_v0  ;;  %9171 = vmatmul.msk.f32.gmra.mxu3 %vm6421_vm12, %v6391_v9 }
 0xcb3   : > { %9154 = vmatmul.msk.f32.gmra.mxu2 %vm6421_vm12, %v6374_v8  ;;  %9172 = vmatmul.msk.f32.gmra.mxu3 %vm6421_vm12, %v6392_v41 }
 0xcbb   : > { %9155 = vmatmul.msk.f32.gmra.mxu2 %vm6421_vm12, %v6375_v7  ;;  %9173 = vmatmul.msk.f32.gmra.mxu3 %vm6421_vm12, %v6393_v19  ;;  %v6403_v7 = vld [vmem:[#allocation2 + $0x170] sm:$0xff] }
 0xcc3   : > { %9156 = vmatmul.msk.f32.gmra.mxu2 %vm6421_vm12, %v6376_v34  ;;  %9174 = vmatmul.msk.f32.gmra.mxu3 %vm6421_vm12, %v6394_v44 }
 0xccb   : > { %9157 = vmatmul.msk.f32.gmra.mxu2 %vm6421_vm12, %v6377_v24  ;;  %9175 = vmatmul.msk.f32.gmra.mxu3 %vm6421_vm12, %v6395_v40 }
 0xcd3   : > { %9158 = vmatmul.msk.f32.gmra.mxu2 %vm6421_vm12, %v6378_v35  ;;  %9176 = vmatmul.msk.f32.gmra.mxu3 %vm6421_vm12, %v6396_v33 }
 0xcdb   : > { %9159 = vmatmul.msk.f32.gmra.mxu2 %vm6421_vm12, %v6379_v57  ;;  %9177 = vmatmul.msk.f32.gmra.mxu3 %vm6421_vm12, %v6397_v47 }
 0xce3   : > { %9160 = vmatmul.msk.f32.gmra.mxu2 %vm6421_vm12, %v6380_v14  ;;  %9178 = vmatmul.msk.f32.gmra.mxu3 %vm6421_vm12, %v6398_v56 }
 0xceb   : > { %9161 = vmatmul.msk.f32.gmra.mxu2 %vm6421_vm12, %v6381_v1  ;;  %9179 = vmatmul.msk.f32.gmra.mxu3 %vm6421_vm12, %v6399_v46 }
 0xcf3   : > { %9162 = vmatmul.msk.f32.gmra.mxu2 %vm6421_vm12, %v6382_v20  ;;  %9180 = vmatmul.msk.f32.gmra.mxu3 %vm6421_vm12, %v6400_v48  ;;  %v6406_v48 = vld [vmem:[#allocation2 + $0x188] sm:$0xff] }
 0xcfb   : > { %9163 = vmatmul.msk.f32.gmra.mxu2 %vm6421_vm12, %v6383_v54  ;;  %9181 = vmatmul.msk.f32.gmra.mxu3 %vm6421_vm12, %v6401_v3 }
 0xd03   : > { %9164 = vmatmul.msk.f32.gmra.mxu2 %vm6421_vm12, %v6384_v36  ;;  %9182 = vmatmul.msk.f32.gmra.mxu3 %vm6421_vm12, %v6402_v6 }
 0xd0b   : > { %9165 = vmatmul.msk.f32.gmra.mxu2 %vm6421_vm12, %v6385_v13  ;;  %9183 = vmatmul.msk.f32.gmra.mxu3 %vm6421_vm12, %v6403_v7 }
 0xd0e   : > { %v13146_v11 = vpop.f32.mrf.mxu2  ;;  %v13148_v30 = vpop.f32.mrf.mxu3 }
 0xd0f   : > { %v6768_v21 = vrot.slane %v13146_v11, 1  ;;  %v6898_v49 = vrot.slane %v13146_v11, 2 }
 0xd13   : > { %9166 = vmatmul.msk.f32.gmra.mxu2 %vm6421_vm12, %v6386_v62 }
 0xd16   : > { %v13154_v10 = vpop.f32.mrf.mxu2  ;;  %v6639_v63 = vpop.f32.mrf.mxu3 }
 0xd17   : > { %v6769_v45 = vrot.slane %v13154_v10, 1  ;;  %v6899_v58 = vrot.slane %v13154_v10, 2 }
 0xd19   : > { %v6770_v16 = vsel %vm1363_vm6, %v6768_v21, %v6769_v45  ;;  %v6900_v23 = vsel %vm1572_vm5, %v6898_v49, %v6899_v58  ;;  %v6404_v49 = vld [vmem:[#allocation2 + $0x178] sm:$0xff] }
 0xd1a   : > { %6818 = vrot.lane.b32.xlu0 %v6770_v16, %s9367_s14  ;;  %6948 = vrot.lane.b32.xlu2 %v6900_v23, %s9366_s17  ;;  %v6405_v23 = vld [vmem:[#allocation2 + $0x180] sm:$0xff] }
 0xd1b   : > { %9184 = vmatmul.msk.f32.gmra.mxu3 %vm6421_vm12, %v6404_v49  ;;  %v6411_v49 = vld [vmem:[#allocation2 + $0x1b0] sm:$0xff] }
 0xd1e   : > { %v6592_v5 = vpop.f32.mrf.mxu2  ;;  %v13162_v39 = vpop.f32.mrf.mxu3 }
 0xd1f   : > { %7295 = vrot.lane.b32.xlu1 %v13162_v39, %s14961_s23  ;;  %v6771_v60 = vrot.slane %v6592_v5, 1  ;;  %v6793_v43 = vrot.slane %v13162_v39, 1  ;;  %v6901_v2 = vrot.slane %v6592_v5, 2  ;;  %v6923_v12 = vrot.slane %v13162_v39, 2 }
 0xd21   : > { %v6772_v53 = vsel %vm1363_vm6, %v6769_v45, %v6771_v60  ;;  %v6902_v38 = vsel %vm1572_vm5, %v6899_v58, %v6901_v2 }
 0xd22   : > { %7046 = vrot.lane.b32.xlu0 %v13162_v39, %s14613_s19 }
 0xd23   : > { %9185 = vmatmul.msk.f32.gmra.mxu3 %vm6421_vm12, %v6405_v23 }
 0xd26   : > { %v6595_v52 = vpop.f32.mrf.mxu2  ;;  %v13168_v37 = vpop.f32.mrf.mxu3 }
 0xd27   : > { %7048 = vrot.lane.b32.xlu1 %v13168_v37, %s14613_s19  ;;  %7297 = vrot.lane.b32.xlu2 %v13168_v37, %s14961_s23  ;;  %v6794_v27 = vrot.slane %v13168_v37, 1  ;;  %v6924_v26 = vrot.slane %v13168_v37, 2 }
 0xd29   : > { %v13182_v55 = vsel %vm1363_vm6, %v6793_v43, %v6794_v27  ;;  %v13196_v29 = vsel %vm1572_vm5, %v6923_v12, %v6924_v26 }
 0xd2a   : > { %6820 = vrot.lane.b32.xlu0 %v6772_v53, %s9367_s14  ;;  %14963 = vst [vmem:[#allocation59_spill] sm:$0xff] %v13196_v29 }
 0xd2b   : > { %9186 = vmatmul.msk.f32.gmra.mxu3 %vm6421_vm12, %v6406_v48 }
 0xd2e   : > { %v13179_v15 = vpop.f32.mrf.mxu2  ;;  %v6647_v4 = vpop.f32.mrf.mxu3 }
 0xd2f   : > { %6838 = vrot.lane.b32.xlu1 %v13182_v55, %s9367_s14  ;;  %7132 = vrot.lane.b32.xlu2 %v13182_v55, %s14962_s24  ;;  %v6796_v31 = vrot.slane %v6647_v4, 1  ;;  %v6926_v51 = vrot.slane %v6647_v4, 2  ;;  %v6773_v25 = vrot.slane %v13179_v15, 1  ;;  %v6903_v42 = vrot.slane %v13179_v15, 2 }
 0xd31   : > { %v13199_v59 = vsel %vm1363_vm6, %v6794_v27, %v6796_v31  ;;  %v13209_v28 = vsel %vm1572_vm5, %v6924_v26, %v6926_v51  ;;  %v6407_v26 = vld [vmem:[#allocation2 + $0x190] sm:$0xff] }
 0xd32   : > { %6950 = vrot.lane.b32.xlu0 %v6902_v38, %s9366_s17  ;;  %14965 = vst [vmem:[#allocation61_spill] sm:$0xff] %v13209_v28 }
 0xd33   : > { %9187 = vmatmul.msk.f32.gmra.mxu3 %vm6421_vm12, %v6407_v26 }
 0xd36   : > { %v13193_v17 = vpop.f32.mrf.mxu2  ;;  %v6650_v18 = vpop.f32.mrf.mxu3 }
 0xd37   : > { %7217 = vrot.lane.b32.xlu1 %v13196_v29, %s14964_s15  ;;  %6840 = vrot.lane.b32.xlu2 %v13199_v59, %s9367_s14  ;;  %v6774_v32 = vrot.slane %v13193_v17, 1  ;;  %v6904_v0 = vrot.slane %v13193_v17, 2 }
 0xd39   : > { %v6775_v61 = vsel %vm1363_vm6, %v6773_v25, %v6774_v32  ;;  %v6905_v8 = vsel %vm1572_vm5, %v6903_v42, %v6904_v0 }
 0xd3a   : > { %6968 = vrot.lane.b32.xlu0 %v13196_v29, %s9366_s17 }
 0xd3e   : > { %v6603_v22 = vpop.f32.mrf.mxu2  ;;  %v13230_v41 = vpop.f32.mrf.mxu3 }
 0xd3f   : > { %7219 = vrot.lane.b32.xlu2 %v13209_v28, %s14964_s15  ;;  %7030 = vrot.lane.b32.xlu1 %v13179_v15, %s14613_s19  ;;  %v6906_v19 = vrot.slane %v6603_v22, 2  ;;  %v6776_v40 = vrot.slane %v6603_v22, 1  ;;  %v6928_v33 = vrot.slane %v13230_v41, 2  ;;  %v6798_v47 = vrot.slane %v13230_v41, 1 }
 0xd41   : > { %v6907_v24 = vsel %vm1572_vm5, %v6904_v0, %v6906_v19  ;;  %v6777_v57 = vsel %vm1363_vm6, %v6774_v32, %v6776_v40  ;;  %v6408_v32 = vld [vmem:[#allocation2 + $0x198] sm:$0xff]  ;;  %v6409_v19 = vld [vmem:[#allocation2 + $0x1a0] sm:$0xff] }
 0xd42   : > { %7134 = vrot.lane.b32.xlu0 %v13199_v59, %s14962_s24  ;;  %9188 = vmatmul.msk.f32.gmra.mxu3 %vm6421_vm12, %v6408_v32 }
 0xd46   : > { %v6606_v50 = vpop.f32.mrf.mxu2  ;;  %v13239_v44 = vpop.f32.mrf.mxu3 }
 0xd47   : > { %6970 = vrot.lane.b32.xlu1 %v13209_v28, %s9366_s17  ;;  %7032 = vrot.lane.b32.xlu2 %v13193_v17, %s14613_s19  ;;  %v6929_v1 = vrot.slane %v13239_v44, 2  ;;  %v6799_v20 = vrot.slane %v13239_v44, 1 }
 0xd49   : > { %v13258_v54 = vsel %vm1572_vm5, %v6928_v33, %v6929_v1  ;;  %v13264_v13 = vsel %vm1363_vm6, %v6798_v47, %v6799_v20  ;;  %v6410_v47 = vld [vmem:[#allocation2 + $0x1a8] sm:$0xff] }
 0xd4a   : > { %7116 = vrot.lane.b32.xlu0 %v6775_v61, %s14962_s24  ;;  %14966 = vst [vmem:[#allocation64_spill] sm:$0xff] %v13258_v54  ;;  %9189 = vmatmul.msk.f32.gmra.mxu3 %vm6421_vm12, %v6409_v19 }
 0xd4e   : > { %v13227_v9 = vpop.f32.mrf.mxu2  ;;  %v6658_v14 = vpop.f32.mrf.mxu3 }
 0xd4f   : > { %7201 = vrot.lane.b32.xlu2 %v6905_v8, %s14964_s15  ;;  %6822 = vrot.lane.b32.xlu1 %v6775_v61, %s9367_s14  ;;  %v6801_v62 = vrot.slane %v6658_v14, 1  ;;  %v6778_v58 = vrot.slane %v13227_v9, 1  ;;  %v6931_v60 = vrot.slane %v6658_v14, 2  ;;  %v6908_v43 = vrot.slane %v13227_v9, 2 }
 0xd51   : > { %v13269_v46 = vsel %vm1363_vm6, %v6799_v20, %v6801_v62  ;;  %v13302_v27 = vsel %vm1572_vm5, %v6929_v1, %v6931_v60 }
 0xd52   : > { %7299 = vrot.lane.b32.xlu0 %v13230_v41, %s14961_s23  ;;  %14968 = vst [vmem:[#allocation70_spill] sm:$0xff] %v13302_v27  ;;  %9190 = vmatmul.msk.f32.gmra.mxu3 %vm6421_vm12, %v6410_v47 }
 0xd56   : > { %v13237_v34 = vpop.f32.mrf.mxu2  ;;  %v6661_v36 = vpop.f32.mrf.mxu3 }
 0xd57   : > { %7050 = vrot.lane.b32.xlu2 %v13230_v41, %s14613_s19  ;;  %6952 = vrot.lane.b32.xlu1 %v6905_v8, %s9366_s17  ;;  %v6779_v16 = vrot.slane %v13237_v34, 1  ;;  %v6909_v2 = vrot.slane %v13237_v34, 2 }
 0xd59   : > { %v6780_v5 = vsel %vm1363_vm6, %v6778_v58, %v6779_v16  ;;  %v13315_v31 = vsel %vm1572_vm5, %v6908_v43, %v6909_v2 }
 0xd5a   : > { %7203 = vrot.lane.b32.xlu0 %v6907_v24, %s14964_s15  ;;  %9191 = vmatmul.msk.f32.gmra.mxu3 %vm6421_vm12, %v6411_v49 }
 0xd5e   : > { %v13246_v35 = vpop.f32.mrf.mxu2  ;;  %v13322_v12 = vpop.f32.mrf.mxu3 }
 0xd5f   : > { %6954 = vrot.lane.b32.xlu2 %v6907_v24, %s9366_s17  ;;  %6824 = vrot.lane.b32.xlu1 %v6777_v57, %s9367_s14  ;;  %v6781_v6 = vrot.slane %v13246_v35, 1  ;;  %v6911_v42 = vrot.slane %v13246_v35, 2  ;;  %v6803_v35 = vrot.slane %v13322_v12, 1  ;;  %v6933_v23 = vrot.slane %v13322_v12, 2 }
 0xd61   : > { %v6782_v25 = vsel %vm1363_vm6, %v6779_v16, %v6781_v6  ;;  %v13350_v8 = vsel %vm1572_vm5, %v6909_v2, %v6911_v42 }
 0xd62   : > { %7052 = vrot.lane.b32.xlu0 %v13239_v44, %s14613_s19  ;;  %14975 = vst [vmem:[#allocation14_spill] sm:$0xff] %v13350_v8 }
 0xd66   : > { %v6617_v56 = vpop.f32.mrf.mxu2  ;;  %v13352_v7 = vpop.f32.mrf.mxu3 }
 0xd67   : > { %6972 = vrot.lane.b32.xlu2 %v13258_v54, %s9366_s17  ;;  %7118 = vrot.lane.b32.xlu1 %v6777_v57, %s14962_s24  ;;  %v6804_v57 = vrot.slane %v13352_v7, 1 }
 0xd69   : > { %v13374_v1 = vsel %vm1363_vm6, %v6803_v35, %v6804_v57  ;;  %v6412_v35 = vld [vmem:[#allocation2 + $0x1b8] sm:$0xff] }
 0xd6a   : > { %6842 = vrot.lane.b32.xlu0 %v13264_v13, %s9367_s14  ;;  %9192 = vmatmul.msk.f32.gmra.mxu3 %vm6421_vm12, %v6412_v35 }
 0xd6e   : > { %v13271_v21 = vpop.f32.mrf.mxu2  ;;  %v6669_v33 = vpop.f32.mrf.mxu3 }
 0xd6f   : > { %7138 = vrot.lane.b32.xlu2 %v13269_v46, %s14962_s24  ;;  %7301 = vrot.lane.b32.xlu1 %v13239_v44, %s14961_s23  ;;  %v6806_v60 = vrot.slane %v6669_v33, 1  ;;  %v6936_v32 = vrot.slane %v6669_v33, 2 }
 0xd71   : > { %v13407_v2 = vsel %vm1363_vm6, %v6804_v57, %v6806_v60  ;;  %v6783_v60 = vrot.slane %v13271_v21, 1 }
 0xd72   : > { %7221 = vrot.lane.b32.xlu0 %v13258_v54, %s14964_s15 }
 0xd74   : > { %v13286_v45 = vpop.permute.xlu2 %6948 }
 0xd76   : > { %v13280_v63 = vpop.f32.mrf.mxu2  ;;  %v6672_v62 = vpop.f32.mrf.mxu3 }
 0xd77   : > { %7136 = vrot.lane.b32.xlu1 %v13264_v13, %s14962_s24  ;;  %7285 = vrot.lane.b32.xlu2 %v13237_v34, %s14961_s23  ;;  %v6913_v62 = vrot.slane %v13271_v21, 2  ;;  %v6914_v49 = vrot.slane %v13280_v63, 2 }
 0xd79   : > { %v13447_v35 = vsel %vm1572_vm5, %v6913_v62, %v6914_v49 }
 0xd7a   : > { %7034 = vrot.lane.b32.xlu0 %v13227_v9, %s14613_s19  ;;  %14981 = vst [vmem:[#allocation74_spill] sm:$0xff] %v13447_v35 }
 0xd7e   : > { %v13294_v52 = vpop.f32.mrf.mxu2 }
 0xd7f   : > { %7283 = vrot.lane.b32.xlu1 %v13227_v9, %s14961_s23  ;;  %6826 = vrot.lane.b32.xlu2 %v6780_v5, %s9367_s14 }
 0xd81   : > { %v13299_v53 = vpop.permute.xlu2 %7297 }
 0xd82   : > { %14967 = vst [vmem:[#allocation58_spill] sm:$0xff] %v13299_v53  ;;  %6974 = vrot.lane.b32.xlu0 %v13302_v27, %s9366_s17 }
 0xd86   : > { %v6628_v4 = vpop.f32.mrf.mxu2 }
 0xd87   : > { %6844 = vrot.lane.b32.xlu1 %v13269_v46, %s9367_s14  ;;  %7120 = vrot.lane.b32.xlu2 %v6780_v5, %s14962_s24 }
 0xd89   : > { %v13312_v38 = vpop.permute.xlu2 %7132 }
 0xd8a   : > { %14969 = vst [vmem:[#allocation63_spill] sm:$0xff] %v13312_v38  ;;  %6956 = vrot.lane.b32.xlu0 %v13315_v31, %s9366_s17 }
 0xd8c   : > { %v13320_v3 = vpop.permute.xlu0 %6818 }
 0xd8f   : > { %7223 = vrot.lane.b32.xlu1 %v13302_v27, %s14964_s15  ;;  %7303 = vrot.lane.b32.xlu2 %v13322_v12, %s14961_s23 }
 0xd91   : > { %v13328_v18 = vpop.permute.xlu1 %7295  ;;  %v13330_v51 = vpop.permute.xlu2 %6840 }
 0xd92   : > { %14970 = vst [vmem:[#allocation62_spill] sm:$0xff] %v13328_v18  ;;  %7369 = vrot.lane.b32.xlu0 %v6780_v5, %s14971_s16  ;;  %v6934_v5 = vrot.slane %v13352_v7, 2 }
 0xd94   : > { %v13334_v22 = vpop.permute.xlu0 %7046  ;;  %v13401_v43 = vsel %vm1572_vm5, %v6933_v23, %v6934_v5  ;;  %v13424_v19 = vsel %vm1572_vm5, %v6934_v5, %v6936_v32  ;;  %v6413_v23 = vld [vmem:[#allocation2 + $0x1c0] sm:$0xff]  ;;  %v6784_v32 = vrot.slane %v13280_v63, 1 }
 0xd95   : > { %14972 = vst [vmem:[#allocation54_spill] sm:$0xff] %v13334_v22  ;;  %9193 = vmatmul.msk.f32.gmra.mxu3 %vm6421_vm12, %v6413_v23  ;;  %v6414_v23 = vld [vmem:[#allocation2 + $0x1c8] sm:$0xff] }
 0xd96   : > { %14978 = vst [vmem:[#allocation12_spill] sm:$0xff] %v13401_v43 }
 0xd97   : > { %7036 = vrot.lane.b32.xlu1 %v13237_v34, %s14613_s19  ;;  %6828 = vrot.lane.b32.xlu2 %v6782_v25, %s9367_s14  ;;  %14979 = vst [vmem:[#allocation71_spill] sm:$0xff] %v13424_v19 }
 0xd99   : > { %v13341_v50 = vpop.permute.xlu1 %7048  ;;  %v13343_v61 = vpop.permute.xlu2 %7219 }
 0xd9a   : > { %14973 = vst [vmem:[#allocation73_spill] sm:$0xff] %v13341_v50  ;;  %7122 = vrot.lane.b32.xlu0 %v6782_v25, %s14962_s24 }
 0xd9b   : > { %14974 = vst [vmem:[#allocation67_spill] sm:$0xff] %v13343_v61 }
 0xd9c   : > { %v13347_v0 = vpop.permute.xlu0 %6820 }
 0xd9d   : > { %9194 = vmatmul.msk.f32.gmra.mxu3 %vm6421_vm12, %v6414_v23 }
 0xd9f   : > { %7205 = vrot.lane.b32.xlu1 %v13315_v31, %s14964_s15  ;;  %7207 = vrot.lane.b32.xlu2 %v13350_v8, %s14964_s15 }
 0xda1   : > { %v13359_v24 = vpop.permute.xlu1 %6838  ;;  %v13361_v40 = vpop.permute.xlu2 %7032 }
 0xda2   : > { %7305 = vrot.lane.b32.xlu0 %v13352_v7, %s14961_s23 }
 0xda4   : > { %v13367_v14 = vpop.permute.xlu0 %6950 }
 0xda7   : > { %7054 = vrot.lane.b32.xlu1 %v13322_v12, %s14613_s19  ;;  %7056 = vrot.lane.b32.xlu2 %v13352_v7, %s14613_s19 }
 0xda9   : > { %v13377_v20 = vpop.permute.xlu1 %7217  ;;  %v13379_v56 = vpop.permute.xlu2 %7201 }
 0xdaa   : > { %14976 = vst [vmem:[#allocation69_spill] sm:$0xff] %v13377_v20  ;;  %7140 = vrot.lane.b32.xlu0 %v13374_v1, %s14962_s24 }
 0xdac   : > { %v13383_v36 = vpop.permute.xlu0 %6968 }
 0xdaf   : > { %6958 = vrot.lane.b32.xlu1 %v13350_v8, %s9366_s17  ;;  %6846 = vrot.lane.b32.xlu2 %v13374_v1, %s9367_s14 }
 0xdb1   : > { %v13390_v58 = vpop.permute.xlu1 %7030  ;;  %v13392_v16 = vpop.permute.xlu2 %7050 }
 0xdb2   : > { %7287 = vrot.lane.b32.xlu0 %v13271_v21, %s14961_s23 }
 0xdb4   : > { %v13398_v48 = vpop.permute.xlu0 %7134 }
 0xdb5   : > { %14977 = vst [vmem:[#allocation66_spill] sm:$0xff] %v13398_v48  ;;  %v6785_v48 = vsel %vm1363_vm6, %v6783_v60, %v6784_v32  ;;  %v13469_v60 = vpop.f32.mrf.mxu3 }
 0xdb7   : > { %7371 = vrot.lane.b32.xlu1 %v6782_v25, %s14971_s16  ;;  %7225 = vrot.lane.b32.xlu2 %v13401_v43, %s14964_s15 }
 0xdb9   : > { %v13409_v4 = vpop.permute.xlu1 %6970  ;;  %v13411_v26 = vpop.permute.xlu2 %6954 }
 0xdba   : > { %6848 = vrot.lane.b32.xlu0 %v13407_v2, %s9367_s14 }
 0xdbc   : > { %v13415_v6 = vpop.permute.xlu0 %7116 }
 0xdbd   : > { %v13489_v27 = vpop.f32.mrf.mxu3 }
 0xdbf   : > { %6976 = vrot.lane.b32.xlu1 %v13401_v43, %s9366_s17  ;;  %7038 = vrot.lane.b32.xlu2 %v13271_v21, %s14613_s19 }
 0xdc1   : > { %v6823_v25 = vpop.permute.xlu1 %6822  ;;  %v13421_v42 = vpop.permute.xlu2 %6972 }
 0xdc2   : > { %7227 = vrot.lane.b32.xlu0 %v13424_v19, %s14964_s15 }
 0xdc4   : > { %v13429_v57 = vpop.permute.xlu0 %7299 }
 0xdc5   : > { %14980 = vst [vmem:[#allocation80_spill] sm:$0xff] %v13429_v57  ;;  %v6786_v57 = vrot.slane %v13294_v52, 1 }
 0xdc7   : > { %7142 = vrot.lane.b32.xlu1 %v13407_v2, %s14962_s24  ;;  %6978 = vrot.lane.b32.xlu2 %v13424_v19, %s9366_s17  ;;  %v13474_v38 = vsel %vm1363_vm6, %v6784_v32, %v6786_v57  ;;  %v6888_v19 = vadd.f32 %v13359_v24, %v13162_v39  ;;  %v6916_v32 = vrot.slane %v13294_v52, 2  ;;  %v6808_v24 = vrot.slane %v13469_v60, 1 }
 0xdc9   : > { %v6953_v33 = vpop.permute.xlu1 %6952  ;;  %v13435_v47 = vpop.permute.xlu2 %7138  ;;  %v7018_v43 = vadd.f32 %v13383_v36, %v6888_v19  ;;  %v13498_v39 = vsel %vm1572_vm5, %v6914_v49, %v6916_v32  ;;  %v6809_v36 = vrot.slane %v13489_v27, 1 }
 0xdca   : > { %7040 = vrot.lane.b32.xlu0 %v13280_v63, %s14613_s19  ;;  %14983 = vst [vmem:[#allocation86_spill] sm:$0xff] %v13498_v39  ;;  %v13526_v32 = vpop.f32.mrf.mxu2 }
 0xdcc   : > { %v13441_v5 = vpop.permute.xlu0 %7203 }
 0xdcf   : > { %7289 = vrot.lane.b32.xlu1 %v13280_v63, %s14961_s23  ;;  %6960 = vrot.lane.b32.xlu2 %v13447_v35, %s9366_s17 }
 0xdd1   : > { %v13453_v53 = vpop.permute.xlu1 %6824  ;;  %v13455_v61 = vpop.permute.xlu2 %7285 }
 0xdd2   : > { %6830 = vrot.lane.b32.xlu0 %v6785_v48, %s9367_s14 }
 0xdd4   : > { %v13459_v18 = vpop.permute.xlu0 %7052 }
 0xdd7   : > { %7373 = vrot.lane.b32.xlu2 %v6785_v48, %s14971_s16  ;;  %7124 = vrot.lane.b32.xlu1 %v6785_v48, %s14962_s24  ;;  %v6415_v48 = vld [vmem:[#allocation2 + $0x1d0] sm:$0xff] }
 0xdd8   : > { %9195 = vmatmul.msk.f32.gmra.mxu3 %vm6421_vm12, %v6415_v48  ;;  %v7100_v48 = vadd.f32 %v13392_v16, %v7018_v43  ;;  %v6938_v16 = vrot.slane %v13469_v60, 2 }
 0xdd9   : > { %v13464_v62 = vpop.permute.xlu1 %7118  ;;  %v6827_v50 = vpop.permute.xlu2 %6826 }
 0xdda   : > { %7209 = vrot.lane.b32.xlu0 %v13447_v35, %s14964_s15 }
 0xddc   : > { %v13471_v20 = vpop.permute.xlu0 %6842 }
 0xddf   : > { %7307 = vrot.lane.b32.xlu1 %v13469_v60, %s14961_s23  ;;  %7126 = vrot.lane.b32.xlu2 %v13474_v38, %s14962_s24 }
 0xde1   : > { %v13481_v23 = vpop.permute.xlu1 %7301  ;;  %v7121_v22 = vpop.permute.xlu2 %7120 }
 0xde2   : > { %14982 = vst [vmem:[#allocation20_spill] sm:$0xff] %v13481_v23  ;;  %7058 = vrot.lane.b32.xlu0 %v13469_v60, %s14613_s19  ;;  %v6880_v23 = vadd.f32 %v6823_v25, %v13179_v15  ;;  %v6939_v15 = vrot.slane %v13489_v27, 2  ;;  %v13509_v25 = vsel %vm1363_vm6, %v6808_v24, %v6809_v36 }
 0xde4   : > { %v7222_v57 = vpop.permute.xlu0 %7221  ;;  %v7010_v19 = vadd.f32 %v6953_v33, %v6880_v23  ;;  %v13520_v23 = vsel %vm1572_vm5, %v6938_v16, %v6939_v15 }
 0xde7   : > { %7309 = vrot.lane.b32.xlu2 %v13489_v27, %s14961_s23  ;;  %6832 = vrot.lane.b32.xlu1 %v13474_v38, %s9367_s14 }
 0xde9   : > { %v7137_v54 = vpop.permute.xlu1 %7136  ;;  %v7304_v28 = vpop.permute.xlu2 %7303 }
 0xdea   : > { %v7186_v52 = vadd.f32 %v7137_v54, %v7100_v48  ;;  %6962 = vrot.lane.b32.xlu0 %v13498_v39, %s9366_s17  ;;  %v6680_v54 = vpop.f32.mrf.mxu3 }
 0xdec   : > { %v7271_v29 = vadd.f32 %v7222_v57, %v7186_v52  ;;  %v7035_v35 = vpop.permute.xlu0 %7034  ;;  %v6878_v57 = vadd.f32 %v13320_v3, %v13146_v11  ;;  %v6882_v3 = vadd.f32 %v6827_v50, %v13227_v9  ;;  %v6941_v9 = vrot.slane %v6680_v54, 2 }
 0xded   : > { %v7092_v8 = vadd.f32 %v7035_v35, %v7010_v19 }
 0xdee   : > { %v13506_v43 = vadd.f32 %v7304_v28, %v7271_v29  ;;  %v6811_v29 = vrot.slane %v6680_v54, 1 }
 0xdef   : > { %7144 = vrot.lane.b32.xlu2 %v13509_v25, %s14962_s24  ;;  %7211 = vrot.lane.b32.xlu1 %v13498_v39, %s14964_s15  ;;  %v13515_v33 = vadd.f32 %v7121_v22, %v7092_v8  ;;  %v7008_v8 = vadd.f32 %v13286_v45, %v6878_v57 }
 0xdf0   : > { %14984 = vst [vmem:[#allocation76_spill] sm:$0xff] %v13506_v43  ;;  %v13533_v22 = vsel %vm1363_vm6, %v6809_v36, %v6811_v29 }
 0xdf1   : > { %v7284_v49 = vpop.permute.xlu1 %7283  ;;  %v13517_v35 = vpop.permute.xlu2 %6828  ;;  %v7090_v11 = vadd.f32 %v13390_v58, %v7008_v8 }
 0xdf2   : > { %6980 = vrot.lane.b32.xlu0 %v13520_v23, %s9366_s17  ;;  %v6683_v48 = vpop.f32.mrf.mxu3 }
 0xdf3   : > { %v7176_v43 = vadd.f32 %v13415_v6, %v7090_v11 }
 0xdf4   : > { %v6975_v28 = vpop.permute.xlu0 %6974 }
 0xdf5   : > { %v7261_v45 = vadd.f32 %v13379_v56, %v7176_v43  ;;  %v6791_v56 = vrot.slane %v13148_v30, 1 }
 0xdf7   : > { %7060 = vrot.lane.b32.xlu1 %v13489_v27, %s14613_s19  ;;  %7291 = vrot.lane.b32.xlu2 %v13526_v32, %s14961_s23  ;;  %v7343_v6 = vadd.f32 %v7284_v49, %v7261_v45 }
 0xdf9   : > { %v6845_v52 = vpop.permute.xlu1 %6844  ;;  %v7208_v24 = vpop.permute.xlu2 %7207 }
 0xdfa   : > { %v6891_v19 = vadd.f32 %v6845_v52, %v13239_v44  ;;  %7146 = vrot.lane.b32.xlu0 %v13533_v22, %s14962_s24  ;;  %v13542_v36 = vpop.f32.mrf.mxu3  ;;  %v13548_v44 = vpop.f32.mrf.mxu2 }
 0xdfb   : > { %v6789_v52 = vrot.slane %v13548_v44, 1 }
 0xdfc   : > { %v6957_v16 = vpop.permute.xlu0 %6956  ;;  %v7021_v48 = vadd.f32 %v6975_v28, %v6891_v19  ;;  %v6881_v28 = vadd.f32 %v13453_v53, %v13193_v17  ;;  %v13561_v19 = vsel %vm1572_vm5, %v6939_v15, %v6941_v9  ;;  %v6889_v17 = vadd.f32 %v13330_v51, %v13168_v37 }
 0xdfd   : > { %v7012_v39 = vadd.f32 %v6957_v16, %v6882_v3  ;;  %v13576_v15 = vsel %vm1363_vm6, %v6789_v52, %v6791_v56  ;;  %v6788_v16 = vrot.slane %v13526_v32, 1 }
 0xdfe   : > { %v7011_v43 = vadd.f32 %v13411_v26, %v6881_v28  ;;  %v7019_v3 = vadd.f32 %v13409_v4, %v6889_v17 }
 0xdff   : > { %6850 = vrot.lane.b32.xlu1 %v13509_v25, %s9367_s14  ;;  %6852 = vrot.lane.b32.xlu2 %v13533_v22, %s9367_s14  ;;  %v13588_v37 = vsel %vm1363_vm6, %v6788_v16, %v6789_v52 }
 0xe01   : > { %v7224_v58 = vpop.permute.xlu1 %7223  ;;  %v7057_v29 = vpop.permute.xlu2 %7056 }
 0xe02   : > { %v13551_v50 = vadd.f32 %v7057_v29, %v7021_v48  ;;  %7293 = vrot.lane.b32.xlu0 %v13548_v44, %s14961_s23  ;;  %v13569_v54 = vpop.f32.mrf.mxu3  ;;  %v7101_v48 = vadd.f32 %v13459_v18, %v7019_v3 }
 0xe04   : > { %v7370_v57 = vpop.permute.xlu0 %7369  ;;  %v7187_v29 = vadd.f32 %v13435_v47, %v7101_v48  ;;  %v6921_v47 = vrot.slane %v13148_v30, 2 }
 0xe05   : > { %v13557_v8 = vadd.f32 %v7370_v57, %v7343_v6  ;;  %v6890_v57 = vadd.f32 %v13471_v20, %v13230_v41 }
 0xe06   : > { %v7272_v18 = vadd.f32 %v7224_v58, %v7187_v29 }
 0xe07   : > { %7229 = vrot.lane.b32.xlu1 %v13520_v23, %s14964_s15  ;;  %7231 = vrot.lane.b32.xlu2 %v13561_v19, %s14964_s15  ;;  %v7020_v58 = vadd.f32 %v13421_v42, %v6890_v57 }
 0xe09   : > { %v7037_v53 = vpop.permute.xlu1 %7036  ;;  %v13573_v49 = vpop.permute.xlu2 %6846 }
 0xe0a   : > { %v7093_v11 = vadd.f32 %v7037_v53, %v7011_v43  ;;  %6836 = vrot.lane.b32.xlu0 %v13576_v15, %s9367_s14  ;;  %v13596_v28 = vpop.f32.mrf.mxu3 }
 0xe0c   : > { %v7123_v26 = vpop.permute.xlu0 %7122 }
 0xe0d   : > { %v7179_v45 = vadd.f32 %v7123_v26, %v7093_v11  ;;  %v6918_v11 = vrot.slane %v13526_v32, 2  ;;  %v6883_v26 = vadd.f32 %v13517_v35, %v13237_v34 }
 0xe0f   : > { %7042 = vrot.lane.b32.xlu1 %v13526_v32, %s14613_s19  ;;  %7044 = vrot.lane.b32.xlu2 %v13548_v44, %s14613_s19  ;;  %v13590_v51 = vadd.f32 %v7208_v24, %v7179_v45  ;;  %v6919_v24 = vrot.slane %v13548_v44, 2 }
 0xe11   : > { %v7206_v4 = vpop.permute.xlu1 %7205  ;;  %v7226_v9 = vpop.permute.xlu2 %7225  ;;  %v13612_v20 = vsel %vm1572_vm5, %v6919_v24, %v6921_v47  ;;  %v13622_v42 = vsel %vm1572_vm5, %v6918_v11, %v6919_v24  ;;  %v6814_v24 = vrot.slane %v13569_v54, 1  ;;  %v6892_v47 = vadd.f32 %v13573_v49, %v13322_v12 }
 0xe12   : > { %v7263_v6 = vadd.f32 %v7206_v4, %v13515_v33  ;;  %7128 = vrot.lane.b32.xlu0 %v13588_v37, %s14962_s24  ;;  %v6879_v33 = vadd.f32 %v13347_v0, %v13154_v10  ;;  %v6694_v3 = vpop.f32.mrf.mxu3 }
 0xe14   : > { %v7306_v56 = vpop.permute.xlu0 %7305  ;;  %v7009_v17 = vadd.f32 %v13367_v14, %v6879_v33 }
 0xe15   : > { %v13600_v52 = vadd.f32 %v7306_v56, %v7272_v18  ;;  %v6813_v56 = vrot.slane %v13542_v36, 1 }
 0xe16   : > { %v7091_v0 = vadd.f32 %v13361_v40, %v7009_v17  ;;  %v6943_v17 = vrot.slane %v13542_v36, 2 }
 0xe17   : > { %6982 = vrot.lane.b32.xlu1 %v13561_v19, %s9366_s17  ;;  %6834 = vrot.lane.b32.xlu2 %v13588_v37, %s9367_s14 }
 0xe19   : > { %v7055_v43 = vpop.permute.xlu1 %7054  ;;  %v7039_v41 = vpop.permute.xlu2 %7038 }
 0xe1a   : > { %v7102_v53 = vadd.f32 %v7055_v43, %v7020_v58  ;;  %v13615_v30 = vadd.f32 %v7039_v41, %v7012_v39  ;;  %7215 = vrot.lane.b32.xlu0 %v13612_v20, %s14964_s15  ;;  %v7177_v39 = vadd.f32 %v13464_v62, %v7091_v0  ;;  %v13645_v57 = vpop.f32.mrf.mxu3  ;;  %v13659_v43 = vsel %vm1363_vm6, %v6813_v56, %v6814_v24 }
 0xe1c   : > { %v7141_v16 = vpop.permute.xlu0 %7140  ;;  %v7262_v40 = vadd.f32 %v13441_v5, %v7177_v39 }
 0xe1d   : > { %v7188_v10 = vadd.f32 %v7141_v16, %v7102_v53  ;;  %v6944_v53 = vrot.slane %v13569_v54, 2 }
 0xe1e   : > { %v7344_v62 = vadd.f32 %v13455_v61, %v7262_v40 }
 0xe1f   : > { %6964 = vrot.lane.b32.xlu1 %v13622_v42, %s9366_s17  ;;  %6966 = vrot.lane.b32.xlu2 %v13612_v20, %s9366_s17  ;;  %v13628_v14 = vadd.f32 %v7226_v9, %v7188_v10  ;;  %v13670_v12 = vsel %vm1572_vm5, %v6943_v17, %v6944_v53  ;;  %v6816_v10 = vrot.slane %v13596_v28, 1 }
 0xe21   : > { %v6959_v48 = vpop.permute.xlu1 %6958  ;;  %v6979_v45 = vpop.permute.xlu2 %6978  ;;  %v13682_v40 = vsel %vm1363_vm6, %v6814_v24, %v6816_v10 }
 0xe22   : > { %v7013_v29 = vadd.f32 %v6959_v48, %v6883_v26  ;;  %7311 = vrot.lane.b32.xlu0 %v13542_v36, %s14961_s23  ;;  %v13667_v3 = vpop.f32.mrf.mxu3  ;;  %v6946_v48 = vrot.slane %v13596_v28, 2 }
 0xe24   : > { %v7288_v4 = vpop.permute.xlu0 %7287 }
 0xe25   : > { %v7345_v18 = vadd.f32 %v7288_v4, %v7263_v6 }
 0xe27   : > { %7130 = vrot.lane.b32.xlu1 %v13576_v15, %s14962_s24  ;;  %7213 = vrot.lane.b32.xlu2 %v13622_v42, %s14964_s15 }
 0xe29   : > { %v7372_v9 = vpop.permute.xlu1 %7371  ;;  %v6961_v34 = vpop.permute.xlu2 %6960 }
 0xe2a   : > { %v13641_v35 = vadd.f32 %v7372_v9, %v7344_v62  ;;  %7064 = vrot.lane.b32.xlu0 %v13569_v54, %s14613_s19  ;;  %v6702_v4 = vpop.f32.mrf.mxu3  ;;  %v13689_v9 = vsel %vm1572_vm5, %v6944_v53, %v6946_v48 }
 0xe2c   : > { %v6849_v5 = vpop.permute.xlu0 %6848 }
 0xe2d   : > { %v6893_v6 = vadd.f32 %v6849_v5, %v13352_v7 }
 0xe2f   : > { %7313 = vrot.lane.b32.xlu1 %v13569_v54, %s14961_s23  ;;  %7062 = vrot.lane.b32.xlu2 %v13542_v36, %s14613_s19  ;;  %v13654_v61 = vadd.f32 %v6979_v45, %v6893_v6 }
 0xe31   : > { %v6977_v33 = vpop.permute.xlu1 %6976  ;;  %v7374_v58 = vpop.permute.xlu2 %7373 }
 0xe32   : > { %v7022_v7 = vadd.f32 %v6977_v33, %v6892_v47  ;;  %v13661_v41 = vadd.f32 %v7374_v58, %v7345_v18  ;;  %6854 = vrot.lane.b32.xlu0 %v13659_v43, %s9367_s14  ;;  %v6705_v56 = vpop.f32.mrf.mxu3 }
 0xe34   : > { %v7228_v11 = vpop.permute.xlu0 %7227 }
 0xe37   : > { %7148 = vrot.lane.b32.xlu1 %v13659_v43, %s14962_s24  ;;  %6984 = vrot.lane.b32.xlu2 %v13670_v12, %s9366_s17 }
 0xe39   : > { %v7143_v49 = vpop.permute.xlu1 %7142  ;;  %v7127_v16 = vpop.permute.xlu2 %7126 }
 0xe3a   : > { %v7189_v0 = vadd.f32 %v7143_v49, %v13551_v50  ;;  %7233 = vrot.lane.b32.xlu0 %v13670_v12, %s14964_s15  ;;  %v7112_v49 = vrot.slane %v13667_v3, 1 }
 0xe3c   : > { %v7041_v39 = vpop.permute.xlu0 %7040  ;;  %v7274_v26 = vadd.f32 %v7228_v11, %v7189_v0  ;;  %v7111_v11 = vrot.slane %v13645_v57, 1  ;;  %v7114_v0 = vrot.slane %v6702_v4, 1 }
 0xe3d   : > { %v7095_v45 = vadd.f32 %v7041_v39, %v7013_v29 }
 0xe3e   : > { %v7113_v10 = vsel %vm1363_vm6, %v7111_v11, %v7112_v49 }
 0xe3f   : > { %6856 = vrot.lane.b32.xlu1 %v13682_v40, %s9367_s14  ;;  %7150 = vrot.lane.b32.xlu2 %v13682_v40, %s14962_s24  ;;  %v7181_v18 = vadd.f32 %v7127_v16, %v7095_v45  ;;  %v7199_v45 = vrot.slane %v6702_v4, 2 }
 0xe41   : > { %v7290_v50 = vpop.permute.xlu1 %7289  ;;  %v7310_v62 = vpop.permute.xlu2 %7309 }
 0xe42   : > { %v13692_v5 = vadd.f32 %v7290_v50, %v13590_v51  ;;  %v13694_v28 = vadd.f32 %v7310_v62, %v7274_v26  ;;  %6986 = vrot.lane.b32.xlu0 %v13689_v9, %s9366_s17  ;;  %v7197_v26 = vrot.slane %v13667_v3, 2  ;;  %v7115_v62 = vsel %vm1363_vm6, %v7112_v49, %v7114_v0 }
 0xe44   : > { %v6831_v29 = vpop.permute.xlu0 %6830  ;;  %v13740_v56 = vsel %vm1572_vm5, %v7197_v26, %v7199_v45 }
 0xe45   : > { %v6884_v6 = vadd.f32 %v6831_v29, %v13271_v21 }
 0xe47   : > { %7235 = vrot.lane.b32.xlu1 %v13689_v9, %s14964_s15  ;;  %7379 = vrot.lane.b32.xlu2 %v13576_v15, %s14971_s16  ;;  %v13703_v24 = vadd.f32 %v6961_v34, %v6884_v6 }
 0xe49   : > { %v7125_v47 = vpop.permute.xlu1 %7124  ;;  %v7145_v51 = vpop.permute.xlu2 %7144 }
 0xe4a   : > { %v7180_v33 = vadd.f32 %v7125_v47, %v13615_v30  ;;  %7375 = vrot.lane.b32.xlu0 %v13474_v38, %s14971_s16 }
 0xe4c   : > { %v7210_v58 = vpop.permute.xlu0 %7209 }
 0xe4d   : > { %v7265_v17 = vadd.f32 %v7210_v58, %v7180_v33 }
 0xe4f   : > { %7377 = vrot.lane.b32.xlu1 %v13588_v37, %s14971_s16  ;;  %7315 = vrot.lane.b32.xlu2 %v13645_v57, %s14961_s23 }
 0xe51   : > { %v7308_v21 = vpop.permute.xlu1 %7307  ;;  %v7292_v53 = vpop.permute.xlu2 %7291 }
 0xe52   : > { %v13713_v15 = vadd.f32 %v7308_v21, %v13628_v14  ;;  %v13715_v34 = vadd.f32 %v7292_v53, %v7265_v17  ;;  %7317 = vrot.lane.b32.xlu0 %v13667_v3, %s14961_s23 }
 0xe54   : > { %v7059_v30 = vpop.permute.xlu0 %7058 }
 0xe55   : > { %v7104_v38 = vadd.f32 %v7059_v30, %v7022_v7  ;;  %v7196_v7 = vrot.slane %v13645_v57, 2 }
 0xe57   : > { %7066 = vrot.lane.b32.xlu1 %v13645_v57, %s14613_s19  ;;  %7068 = vrot.lane.b32.xlu2 %v13667_v3, %s14613_s19  ;;  %v7190_v37 = vadd.f32 %v7145_v51, %v7104_v38  ;;  %v13734_v29 = vsel %vm1572_vm5, %v7196_v7, %v7197_v26 }
 0xe59   : > { %v6833_v14 = vpop.permute.xlu1 %6832  ;;  %v13725_v16 = vpop.permute.xlu2 %6852 }
 0xe5a   : > { %v6885_v39 = vadd.f32 %v6833_v14, %v13280_v63  ;;  %7152 = vrot.lane.b32.xlu0 %v7113_v10, %s14962_s24 }
 0xe5c   : > { %v6963_v48 = vpop.permute.xlu0 %6962 }
 0xe5d   : > { %v7015_v50 = vadd.f32 %v6963_v48, %v6885_v39 }
 0xe5f   : > { %7154 = vrot.lane.b32.xlu1 %v7115_v62, %s14962_s24  ;;  %7237 = vrot.lane.b32.xlu2 %v13734_v29, %s14964_s15 }
 0xe61   : > { %v7212_v63 = vpop.permute.xlu1 %7211  ;;  %v7232_v6 = vpop.permute.xlu2 %7231 }
 0xe62   : > { %v7266_v57 = vadd.f32 %v7212_v63, %v7181_v18  ;;  %7239 = vrot.lane.b32.xlu0 %v13740_v56, %s14964_s15 }
 0xe64   : > { %v6981_v3 = vpop.permute.xlu0 %6980 }
 0xe67   : > { %7383 = vrot.lane.b32.xlu1 %v13199_v59, %s14971_s16  ;;  %7385 = vrot.lane.b32.xlu2 %v13264_v13, %s14971_s16 }
 0xe69   : > { %v7061_v4 = vpop.permute.xlu1 %7060  ;;  %v7045_v47 = vpop.permute.xlu2 %7044 }
 0xe6a   : > { %v7105_v51 = vadd.f32 %v7061_v4, %v13654_v61  ;;  %v7097_v33 = vadd.f32 %v7045_v47, %v7015_v50  ;;  %7381 = vrot.lane.b32.xlu0 %v13182_v55, %s14971_s16  ;;  %v13760_v61 = vpop.f32.mrf.mxu3 }
 0xe6c   : > { %v7147_v58 = vpop.permute.xlu0 %7146 }
 0xe6d   : > { %v7191_v18 = vadd.f32 %v7147_v58, %v7105_v51  ;;  %v14987_v51 = vld [vmem:[#allocation74_spill] sm:$0xff] }
 0xe6e   : > { %v14988_v58 = vld [vmem:[#allocation86_spill] sm:$0xff] }
 0xe6f   : > { %7389 = vrot.lane.b32.xlu1 %v13374_v1, %s14971_s16  ;;  %7391 = vrot.lane.b32.xlu2 %v13407_v2, %s14971_s16  ;;  %v13755_v59 = vadd.f32 %v7232_v6, %v7191_v18 }
 0xe71   : > { %v6851_v17 = vpop.permute.xlu1 %6850  ;;  %v6835_v13 = vpop.permute.xlu2 %6834 }
 0xe72   : > { %v6894_v21 = vadd.f32 %v6851_v17, %v13469_v60  ;;  %7387 = vrot.lane.b32.xlu0 %v13269_v46, %s14971_s16  ;;  %v13769_v11 = vpop.f32.mrf.mxu3 }
 0xe73   : > { %v7365_v39 = vrot.slane %v13769_v11, 1 }
 0xe74   : > { %v7294_v55 = vpop.permute.xlu0 %7293  ;;  %v7024_v53 = vadd.f32 %v6981_v3, %v6894_v21  ;;  %v14986_v3 = vld [vmem:[#allocation14_spill] sm:$0xff] }
 0xe75   : > { %v7348_v30 = vadd.f32 %v7294_v55, %v7266_v57  ;;  %v14989_v55 = vld [vmem:[#allocation59_spill] sm:$0xff] }
 0xe77   : > { %7319 = vrot.lane.b32.xlu1 %v13760_v61, %s14961_s23  ;;  %7397 = vrot.lane.b32.xlu2 %v13659_v43, %s14971_s16 }
 0xe79   : > { %v7230_v1 = vpop.permute.xlu1 %7229  ;;  %v6967_v2 = vpop.permute.xlu2 %6966 }
 0xe7a   : > { %v7275_v38 = vadd.f32 %v7230_v1, %v7190_v37  ;;  %7393 = vrot.lane.b32.xlu0 %v13509_v25, %s14971_s16  ;;  %v13782_v7 = vpop.f32.mrf.mxu3 }
 0xe7b   : > { %v7367_v45 = vrot.slane %v13782_v7, 1 }
 0xe7c   : > { %v6837_v60 = vpop.permute.xlu0 %6836 }
 0xe7d   : > { %v6887_v46 = vadd.f32 %v6837_v60, %v13548_v44  ;;  %v7364_v44 = vrot.slane %v13760_v61, 1  ;;  %v7368_v57 = vsel %vm1363_vm6, %v7365_v39, %v7367_v45 }
 0xe7f   : > { %v13771_v49 = vadd.f32 %v6967_v2, %v6887_v46  ;;  %7395 = vrot.lane.b32.xlu1 %v13533_v22, %s14971_s16  ;;  %7321 = vrot.lane.b32.xlu2 %v13769_v11, %s14961_s23  ;;  %v6895_v22 = vadd.f32 %v13725_v16, %v13489_v27  ;;  %v6886_v27 = vadd.f32 %v6835_v13, %v13526_v32 }
 0xe81   : > { %v7043_v43 = vpop.permute.xlu1 %7042  ;;  %v7214_v14 = vpop.permute.xlu2 %7213 }
 0xe82   : > { %v7096_v37 = vadd.f32 %v7043_v43, %v13703_v24  ;;  %7399 = vrot.lane.b32.xlu0 %v13682_v40, %s14971_s16  ;;  %v7366_v40 = vsel %vm1363_vm6, %v7364_v44, %v7365_v39  ;;  %v14991_v43 = vld [vmem:[#allocation64_spill] sm:$0xff]  ;;  %v14994_v39 = vld [vmem:[#allocation71_spill] sm:$0xff] }
 0xe84   : > { %v7129_v25 = vpop.permute.xlu0 %7128 }
 0xe85   : > { %v7182_v0 = vadd.f32 %v7129_v25, %v7096_v37 }
 0xe87   : > { %v13784_v26 = vadd.f32 %v7214_v14, %v7182_v0  ;;  %7401 = vrot.lane.b32.xlu1 %v7113_v10, %s14971_s16  ;;  %7403 = vrot.lane.b32.xlu2 %v7115_v62, %s14971_s16 }
 0xe89   : > { %v6983_v24 = vpop.permute.xlu1 %6982  ;;  %v7063_v48 = vpop.permute.xlu2 %7062 }
 0xe8a   : > { %v7025_v50 = vadd.f32 %v6983_v24, %v6895_v22  ;;  %v7106_v63 = vadd.f32 %v7063_v48, %v7024_v53  ;;  %7405 = vrot.lane.b32.xlu0 %v7366_v40, %s14971_s16  ;;  %v14995_v40 = vld [vmem:[#allocation54_spill] sm:$0xff] }
 0xe8c   : > { %v7216_v6 = vpop.permute.xlu0 %7215 }
 0xe8f   : > { %7407 = vrot.lane.b32.xlu1 %v7368_v57, %s14971_s16  ;;  %7454 = vrot.lane.b32.xlu2 %v13315_v31, %s14985_s18 }
 0xe91   : > { %v6965_v16 = vpop.permute.xlu1 %6964  ;;  %v6985_v10 = vpop.permute.xlu2 %6984 }
 0xe92   : > { %v7016_v62 = vadd.f32 %v6965_v16, %v6886_v27  ;;  %7456 = vrot.lane.b32.xlu0 %v14986_v3, %s14985_s18  ;;  %v14997_v3 = vld [vmem:[#allocation69_spill] sm:$0xff] }
 0xe94   : > { %v7312_v4 = vpop.permute.xlu0 %7311  ;;  %v7098_v45 = vadd.f32 %v14995_v40, %v7016_v62 }
 0xe95   : > { %v13800_v47 = vadd.f32 %v7312_v4, %v7275_v38 }
 0xe97   : > { %7458 = vrot.lane.b32.xlu1 %v14987_v51, %s14985_s18  ;;  %7460 = vrot.lane.b32.xlu2 %v14988_v58, %s14985_s18  ;;  %v14998_v51 = vld [vmem:[#allocation80_spill] sm:$0xff] }
 0xe99   : > { %v7131_v18 = vpop.permute.xlu1 %7130  ;;  %v7151_v17 = vpop.permute.xlu2 %7150 }
 0xe9a   : > { %v7183_v31 = vadd.f32 %v7131_v18, %v7097_v33  ;;  %7462 = vrot.lane.b32.xlu0 %v13622_v42, %s14985_s18  ;;  %v14990_v42 = vld [vmem:[#allocation61_spill] sm:$0xff] }
 0xe9c   : > { %v13808_v32 = vadd.f32 %v7216_v6, %v7183_v31  ;;  %v7065_v13 = vpop.permute.xlu0 %7064  ;;  %v14996_v6 = vld [vmem:[#allocation63_spill] sm:$0xff] }
 0xe9d   : > { %v7107_v21 = vadd.f32 %v7065_v13, %v7025_v50  ;;  %v7184_v57 = vadd.f32 %v14996_v6, %v7098_v45 }
 0xe9f   : > { %7464 = vrot.lane.b32.xlu1 %v13612_v20, %s14985_s18  ;;  %7466 = vrot.lane.b32.xlu2 %v14989_v55, %s14985_s18  ;;  %v7193_v53 = vadd.f32 %v7151_v17, %v7107_v21  ;;  %v14992_v20 = vld [vmem:[#allocation70_spill] sm:$0xff]  ;;  %v7269_v4 = vadd.f32 %v14997_v3, %v7184_v57  ;;  %v14999_v57 = vld [vmem:[#allocation73_spill] sm:$0xff] }
 0xea0   : > { %v15001_v3 = vld [vmem:[#allocation66_spill] sm:$0xff] }
 0xea1   : > { %v7314_v1 = vpop.permute.xlu1 %7313  ;;  %v7380_v2 = vpop.permute.xlu2 %7379 }
 0xea2   : > { %v13815_v38 = vadd.f32 %v7314_v1, %v13755_v59  ;;  %v13817_v33 = vadd.f32 %v7380_v2, %v7348_v30  ;;  %7468 = vrot.lane.b32.xlu0 %v14990_v42, %s14985_s18  ;;  %v14993_v59 = vld [vmem:[#allocation12_spill] sm:$0xff] }
 0xea4   : > { %v6855_v60 = vpop.permute.xlu0 %6854 }
 0xea5   : > { %v6896_v46 = vadd.f32 %v6855_v60, %v13542_v36 }
 0xea7   : > { %7470 = vrot.lane.b32.xlu1 %v14991_v43, %s14985_s18  ;;  %7472 = vrot.lane.b32.xlu2 %v14992_v20, %s14985_s18  ;;  %v7026_v14 = vadd.f32 %v6985_v10, %v6896_v46  ;;  %v7450_v10 = vrot.slane %v13769_v11, 2 }
 0xea9   : > { %v7149_v37 = vpop.permute.xlu1 %7148  ;;  %v7316_v25 = vpop.permute.xlu2 %7315 }
 0xeaa   : > { %v7192_v0 = vadd.f32 %v7149_v37, %v7106_v63  ;;  %7474 = vrot.lane.b32.xlu0 %v14993_v59, %s14985_s18 }
 0xeac   : > { %v7234_v30 = vpop.permute.xlu0 %7233 }
 0xead   : > { %v7277_v44 = vadd.f32 %v7234_v30, %v7192_v0 }
 0xeaf   : > { %7476 = vrot.lane.b32.xlu1 %v14994_v39, %s14985_s18  ;;  %7478 = vrot.lane.b32.xlu2 %v13520_v23, %s14985_s18  ;;  %v13832_v36 = vadd.f32 %v7316_v25, %v7277_v44  ;;  %v13880_v39 = vld [vmem:[%s14571_s10] ss:$0 sm:$0xff] }
 0xeb1   : > { %v6857_v22 = vpop.permute.xlu1 %6856  ;;  %v7069_v24 = vpop.permute.xlu2 %7068 }
 0xeb2   : > { %v6897_v48 = vadd.f32 %v6857_v22, %v13569_v54  ;;  %7480 = vrot.lane.b32.xlu0 %v13561_v19, %s14985_s18  ;;  %v7449_v54 = vrot.slane %v13760_v61, 2  ;;  %v7351_v61 = vadd.f32 %v14998_v51, %v7269_v4 }
 0xeb4   : > { %v6987_v50 = vpop.permute.xlu0 %6986 }
 0xeb5   : > { %v7027_v63 = vadd.f32 %v6987_v50, %v6897_v48 }
 0xeb7   : > { %7482 = vrot.lane.b32.xlu1 %v13670_v12, %s14985_s18  ;;  %7484 = vrot.lane.b32.xlu2 %v13689_v9, %s14985_s18  ;;  %v7109_v23 = vadd.f32 %v7069_v24, %v7027_v63  ;;  %v7452_v12 = vrot.slane %v13782_v7, 2  ;;  %v7451_v9 = vsel %vm1572_vm5, %v7449_v54, %v7450_v10 }
 0xeb9   : > { %v7236_v27 = vpop.permute.xlu1 %7235  ;;  %v7238_v16 = vpop.permute.xlu2 %7237  ;;  %v7453_v18 = vsel %vm1572_vm5, %v7450_v10, %v7452_v12  ;;  %v15000_v10 = vld [vmem:[#allocation62_spill] sm:$0xff] }
 0xeba   : > { %v7278_v19 = vadd.f32 %v7236_v27, %v7193_v53  ;;  %7486 = vrot.lane.b32.xlu0 %v13734_v29, %s14985_s18  ;;  %v7099_v27 = vadd.f32 %v14999_v57, %v13771_v49 }
 0xebc   : > { %v7376_v62 = vpop.permute.xlu0 %7375  ;;  %v7185_v4 = vadd.f32 %v15001_v3, %v7099_v27 }
 0xebd   : > { %v7432_v50 = vadd.f32 %v7376_v62, %v13692_v5 }
 0xebf   : > { %7488 = vrot.lane.b32.xlu1 %v13740_v56, %s14985_s18  ;;  %7490 = vrot.lane.b32.xlu2 %v7451_v9, %s14985_s18 }
 0xec1   : > { %v7378_v58 = vpop.permute.xlu1 %7377  ;;  %v7386_v11 = vpop.permute.xlu2 %7385 }
 0xec2   : > { %v13856_v29 = vadd.f32 %v7378_v58, %v13715_v34  ;;  %v13858_v17 = vadd.f32 %v7386_v11, %v7351_v61  ;;  %7492 = vrot.lane.b32.xlu0 %v7453_v18, %s14985_s18  ;;  %v15002_v61 = vld [vmem:[#allocation67_spill] sm:$0xff] }
 0xec3   : > { %v7270_v49 = vadd.f32 %v15002_v61, %v7185_v4 }
 0xec4   : > { %v7318_v7 = vpop.permute.xlu0 %7317 }
 0xec5   : > { %v7360_v31 = vadd.f32 %v7318_v7, %v7278_v19  ;;  %v7349_v19 = vadd.f32 %v15000_v10, %v13784_v26  ;;  %v15003_v7 = vld [vmem:[#allocation20_spill] sm:$0xff]  ;;  %v15004_v10 = vld [vmem:[#allocation58_spill] sm:$0xff] }
 0xec6   : > { %v7352_v26 = vadd.f32 %v15003_v7, %v7270_v49 }
 0xec9   : > { %v7067_v13 = vpop.permute.xlu1 %7066  ;;  %v7392_v21 = vpop.permute.xlu2 %7391 }
 0xeca   : > { %v7108_v56 = vadd.f32 %v7067_v13, %v7026_v14  ;;  %v13862_v55 = vadd.f32 %v7392_v21, %v13600_v52 }
 0xecc   : > { %v7153_v53 = vpop.permute.xlu0 %7152 }
 0xecd   : > { %v7194_v1 = vadd.f32 %v7153_v53, %v7108_v56 }
 0xecf   : > { %v13864_v2 = vadd.f32 %v7238_v16, %v7194_v1 }
 0xed1   : > { %v7155_v42 = vpop.permute.xlu1 %7154  ;;  %v7398_v60 = vpop.permute.xlu2 %7397 }
 0xed2   : > { %v7195_v34 = vadd.f32 %v7155_v42, %v7109_v23  ;;  %v13867_v46 = vadd.f32 %v7398_v60, %v13800_v47 }
 0xed4   : > { %v7240_v43 = vpop.permute.xlu0 %7239 }
 0xed5   : > { %v7280_v20 = vadd.f32 %v7240_v43, %v7195_v34 }
 0xed9   : > { %v13869_v37 = vpop.permute.xlu1 %7383  ;;  %v7322_v25 = vpop.permute.xlu2 %7321 }
 0xeda   : > { %v13871_v0 = vadd.f32 %v7322_v25, %v7280_v20 }
 0xedc   : > { %v7382_v14 = vpop.permute.xlu0 %7381 }
 0xedd   : > { %v7435_v62 = vadd.f32 %v7382_v14, %v7349_v19  ;;  %v7350_v19 = vadd.f32 %v15004_v10, %v13808_v32 }
 0xee1   : > { %v13873_v52 = vpop.permute.xlu1 %7389  ;;  %v7404_v59 = vpop.permute.xlu2 %7403 }
 0xee2   : > { %v13875_v30 = vadd.f32 %v7404_v59, %v7360_v31 }
 0xee4   : > { %v7388_v44 = vpop.permute.xlu0 %7387 }
 0xee5   : > { %v7438_v13 = vadd.f32 %v7388_v44, %v7352_v26 }
 0xee9   : > { %v13882_v47 = vpop.permute.xlu1 %7319  ;;  %v7455_v22 = vpop.permute.xlu2 %7454 }
 0xeea   : > { %v7514_v24 = vadd.f32 %v7455_v22, %v13557_v8  ;;  %v7361_v32 = vadd.f32 %v13882_v47, %v13864_v2 }
 0xeec   : > { %v7538_v48 = vadd.f32 %v13880_v39, %v7514_v24  ;;  %v7394_v40 = vpop.permute.xlu0 %7393  ;;  %v6416_v24 = vld [vmem:[#allocation2 + $0x1d8] sm:$0xff] }
 0xeed   : > { %v7441_v25 = vadd.f32 %v7394_v40, %v13713_v15  ;;  %9196 = vmatmul.msk.f32.gmra.mxu3 %vm6421_vm12, %v6416_v24 }
 0xeee   : > { %v7578_v45 = vmul.f32 0.2, %v7538_v48  ;;  %vm7558_vm14 = vcmp.gt.f32.partialorder %v7538_v48, 0.0 }
 0xef0   : > { %v7598_v63 = vsel %vm7558_vm14, %v7538_v48, %v7578_v45 }
 0xef1   : > { %v13887_v23 = vpop.permute.xlu1 %7395  ;;  %7638 = vrot.lane.b32.xlu1 %v7598_v63, %s9383_s22  ;;  %v7461_v6 = vpop.permute.xlu2 %7460 }
 0xef2   : > { %v7517_v16 = vadd.f32 %v7461_v6, %v7432_v50  ;;  %v7442_v24 = vadd.f32 %v13887_v23, %v13694_v28 }
 0xef4   : > { %v7541_v8 = vadd.f32 %v13880_v39, %v7517_v16  ;;  %v7400_v54 = vpop.permute.xlu0 %7399 }
 0xef6   : > { %v7581_v5 = vmul.f32 0.2, %v7541_v8  ;;  %vm7561_vm15 = vcmp.gt.f32.partialorder %v7541_v8, 0.0 }
 0xef8   : > { %v7601_v12 = vsel %vm7561_vm15, %v7541_v8, %v7581_v5 }
 0xef9   : > { %v13896_v9 = vpop.permute.xlu1 %7401  ;;  %7644 = vrot.lane.b32.xlu1 %v7601_v12, %s9383_s22  ;;  %v7467_v51 = vpop.permute.xlu2 %7466  ;;  %v7436_v12 = vadd.f32 %v13869_v37, %v7350_v19 }
 0xefa   : > { %v7520_v58 = vadd.f32 %v7467_v51, %v7435_v62  ;;  %v7445_v28 = vadd.f32 %v13896_v9, %v13832_v36 }
 0xefc   : > { %v7544_v11 = vadd.f32 %v13880_v39, %v7520_v58  ;;  %v13901_v18 = vpop.permute.xlu0 %7405 }
 0xefd   : > { %v7447_v37 = vadd.f32 %v13901_v18, %v7361_v32 }
 0xefe   : > { %v7584_v31 = vmul.f32 0.2, %v7544_v11  ;;  %vm7564_vm7 = vcmp.gt.f32.partialorder %v7544_v11, 0.0 }
 0xf00   : > { %v7604_v21 = vsel %vm7564_vm7, %v7544_v11, %v7584_v31 }
 0xf01   : > { %v13904_v56 = vpop.permute.xlu1 %7407  ;;  %7650 = vrot.lane.b32.xlu1 %v7604_v21, %s9383_s22  ;;  %v7473_v53 = vpop.permute.xlu2 %7472 }
 0xf02   : > { %v7523_v1 = vadd.f32 %v7473_v53, %v7438_v13  ;;  %v15005_v53 = vld [vmem:[#allocation76_spill] sm:$0xff]  ;;  %v7448_v36 = vadd.f32 %v13904_v56, %v13871_v0 }
 0xf04   : > { %v7547_v42 = vadd.f32 %v13880_v39, %v7523_v1  ;;  %v7457_v60 = vpop.permute.xlu0 %7456  ;;  %v7439_v1 = vadd.f32 %v13873_v52, %v15005_v53 }
 0xf05   : > { %v7515_v34 = vadd.f32 %v7457_v60, %v13641_v35 }
 0xf06   : > { %v7587_v43 = vmul.f32 0.2, %v7547_v42  ;;  %vm7567_vm0 = vcmp.gt.f32.partialorder %v7547_v42, 0.0 }
 0xf07   : > { %v7539_v20 = vadd.f32 %v13880_v39, %v7515_v34 }
 0xf08   : > { %v7607_v14 = vsel %vm7567_vm0, %v7547_v42, %v7587_v43 }
 0xf09   : > { %v7579_v59 = vmul.f32 0.2, %v7539_v20  ;;  %v7459_v44 = vpop.permute.xlu1 %7458  ;;  %7656 = vrot.lane.b32.xlu1 %v7607_v14, %s9383_s22  ;;  %v7479_v22 = vpop.permute.xlu2 %7478  ;;  %vm7559_vm2 = vcmp.gt.f32.partialorder %v7539_v20, 0.0 }
 0xf0a   : > { %v7516_v48 = vadd.f32 %v7459_v44, %v13661_v41  ;;  %v7526_v45 = vadd.f32 %v7479_v22, %v7441_v25  ;;  %v7444_v41 = vadd.f32 %v7400_v54, %v13815_v38 }
 0xf0b   : > { %v7599_v35 = vsel %vm7559_vm2, %v7539_v20, %v7579_v59 }
 0xf0c   : > { %v7540_v50 = vadd.f32 %v13880_v39, %v7516_v48  ;;  %v7550_v63 = vadd.f32 %v13880_v39, %v7526_v45  ;;  %v7463_v6 = vpop.permute.xlu0 %7462  ;;  %7640 = vrot.lane.b32.xlu2 %v7599_v35, %s9383_s22 }
 0xf0d   : > { %v7518_v15 = vadd.f32 %v7463_v6, %v13856_v29 }
 0xf0e   : > { %v7580_v40 = vmul.f32 0.2, %v7540_v50  ;;  %v7590_v57 = vmul.f32 0.2, %v7550_v63  ;;  %vm7560_vm8 = vcmp.gt.f32.partialorder %v7540_v50, 0.0  ;;  %vm7570_vm9 = vcmp.gt.f32.partialorder %v7550_v63, 0.0 }
 0xf0f   : > { %v7542_v27 = vadd.f32 %v13880_v39, %v7518_v15 }
 0xf10   : > { %v7600_v16 = vsel %vm7560_vm8, %v7540_v50, %v7580_v40  ;;  %v7610_v8 = vsel %vm7570_vm9, %v7550_v63, %v7590_v57 }
 0xf11   : > { %v7582_v3 = vmul.f32 0.2, %v7542_v27  ;;  %v7465_v4 = vpop.permute.xlu1 %7464  ;;  %7642 = vrot.lane.b32.xlu0 %v7600_v16, %s9383_s22  ;;  %7662 = vrot.lane.b32.xlu1 %v7610_v8, %s9383_s22  ;;  %v7485_v29 = vpop.permute.xlu2 %7484  ;;  %vm7562_vm13 = vcmp.gt.f32.partialorder %v7542_v27, 0.0 }
 0xf12   : > { %v7519_v5 = vadd.f32 %v7465_v4, %v13817_v33  ;;  %v7529_v62 = vadd.f32 %v7485_v29, %v7444_v41 }
 0xf13   : > { %v7602_v51 = vsel %vm7562_vm13, %v7542_v27, %v7582_v3 }
 0xf14   : > { %v7543_v38 = vadd.f32 %v13880_v39, %v7519_v5  ;;  %v7553_v54 = vadd.f32 %v13880_v39, %v7529_v62  ;;  %v7469_v61 = vpop.permute.xlu0 %7468  ;;  %7646 = vrot.lane.b32.xlu2 %v7602_v51, %s9383_s22 }
 0xf15   : > { %v7521_v49 = vadd.f32 %v7469_v61, %v7436_v12 }
 0xf16   : > { %v7583_v58 = vmul.f32 0.2, %v7543_v38  ;;  %v7593_v11 = vmul.f32 0.2, %v7553_v54  ;;  %vm7563_vm10 = vcmp.gt.f32.partialorder %v7543_v38, 0.0  ;;  %vm7573_vm11 = vcmp.gt.f32.partialorder %v7553_v54, 0.0 }
 0xf17   : > { %v7545_v33 = vadd.f32 %v13880_v39, %v7521_v49 }
 0xf18   : > { %v7603_v7 = vsel %vm7563_vm10, %v7543_v38, %v7583_v58  ;;  %v7613_v26 = vsel %vm7573_vm11, %v7553_v54, %v7593_v11  ;;  %vm7699_vm11 = vcmask 294112  }
 0xf19   : > { %v7585_v31 = vmul.f32 0.2, %v7545_v33  ;;  %v7471_v13 = vpop.permute.xlu1 %7470  ;;  %7648 = vrot.lane.b32.xlu0 %v7603_v7, %s9383_s22  ;;  %7668 = vrot.lane.b32.xlu1 %v7613_v26, %s9383_s22  ;;  %v7491_v21 = vpop.permute.xlu2 %7490  ;;  %vm7565_vm12 = vcmp.gt.f32.partialorder %v7545_v33, 0.0 }
 0xf1a   : > { %v7522_v2 = vadd.f32 %v7471_v13, %v13858_v17  ;;  %v7532_v47 = vadd.f32 %v7491_v21, %v7447_v37 }
 0xf1b   : > { %v7605_v42 = vsel %vm7565_vm12, %v7545_v33, %v7585_v31 }
 0xf1c   : > { %v7546_v60 = vadd.f32 %v13880_v39, %v7522_v2  ;;  %v7556_v18 = vadd.f32 %v13880_v39, %v7532_v47  ;;  %v7475_v34 = vpop.permute.xlu0 %7474  ;;  %7652 = vrot.lane.b32.xlu2 %v7605_v42, %s9383_s22 }
 0xf1d   : > { %v7524_v43 = vadd.f32 %v7475_v34, %v7439_v1 }
 0xf1e   : > { %v7586_v20 = vmul.f32 0.2, %v7546_v60  ;;  %v7596_v25 = vmul.f32 0.2, %v7556_v18  ;;  %vm7566_vm14 = vcmp.gt.f32.partialorder %v7546_v60, 0.0  ;;  %vm7576_vm15 = vcmp.gt.f32.partialorder %v7556_v18, 0.0 }
 0xf1f   : > { %v7548_v14 = vadd.f32 %v13880_v39, %v7524_v43 }
 0xf20   : > { %v7606_v17 = vsel %vm7566_vm14, %v7546_v60, %v7586_v20  ;;  %v7616_v59 = vsel %vm7576_vm15, %v7556_v18, %v7596_v25 }
 0xf21   : > { %v7588_v44 = vmul.f32 0.2, %v7548_v14  ;;  %v7477_v22 = vpop.permute.xlu1 %7476  ;;  %7654 = vrot.lane.b32.xlu0 %v7606_v17, %s9383_s22  ;;  %7674 = vrot.lane.b32.xlu1 %v7616_v59, %s9383_s22  ;;  %vm7568_vm7 = vcmp.gt.f32.partialorder %v7548_v14, 0.0 }
 0xf22   : > { %v7525_v52 = vadd.f32 %v7477_v22, %v13862_v55 }
 0xf23   : > { %v7608_v48 = vsel %vm7568_vm7, %v7548_v14, %v7588_v44 }
 0xf24   : > { %v7549_v45 = vadd.f32 %v13880_v39, %v7525_v52  ;;  %v7481_v35 = vpop.permute.xlu0 %7480  ;;  %7658 = vrot.lane.b32.xlu2 %v7608_v48, %s9383_s22 }
 0xf25   : > { %v7527_v50 = vadd.f32 %v7481_v35, %v7442_v24 }
 0xf26   : > { %v7589_v63 = vmul.f32 0.2, %v7549_v45  ;;  %vm7569_vm0 = vcmp.gt.f32.partialorder %v7549_v45, 0.0 }
 0xf27   : > { %v7551_v6 = vadd.f32 %v13880_v39, %v7527_v50 }
 0xf28   : > { %v7609_v15 = vsel %vm7569_vm0, %v7549_v45, %v7589_v63 }
 0xf29   : > { %v7591_v40 = vmul.f32 0.2, %v7551_v6  ;;  %v7483_v57 = vpop.permute.xlu1 %7482  ;;  %7660 = vrot.lane.b32.xlu0 %v7609_v15, %s9383_s22  ;;  %vm7571_vm2 = vcmp.gt.f32.partialorder %v7551_v6, 0.0 }
 0xf2a   : > { %v7528_v55 = vadd.f32 %v7483_v57, %v13867_v46 }
 0xf2b   : > { %v7611_v23 = vsel %vm7571_vm2, %v7551_v6, %v7591_v40 }
 0xf2c   : > { %v7552_v27 = vadd.f32 %v13880_v39, %v7528_v55  ;;  %v7487_v41 = vpop.permute.xlu0 %7486  ;;  %7664 = vrot.lane.b32.xlu2 %v7611_v23, %s9383_s22 }
 0xf2d   : > { %v7530_v16 = vadd.f32 %v7487_v41, %v7445_v28 }
 0xf2e   : > { %v7592_v8 = vmul.f32 0.2, %v7552_v27  ;;  %vm7572_vm8 = vcmp.gt.f32.partialorder %v7552_v27, 0.0 }
 0xf2f   : > { %v7554_v10 = vadd.f32 %v13880_v39, %v7530_v16 }
 0xf30   : > { %v7612_v19 = vsel %vm7572_vm8, %v7552_v27, %v7592_v8 }
 0xf31   : > { %v7594_v3 = vmul.f32 0.2, %v7554_v10  ;;  %v7489_v4 = vpop.permute.xlu1 %7488  ;;  %7666 = vrot.lane.b32.xlu0 %v7612_v19, %s9383_s22  ;;  %vm7574_vm9 = vcmp.gt.f32.partialorder %v7554_v10, 0.0 }
 0xf32   : > { %v7531_v46 = vadd.f32 %v7489_v4, %v13875_v30 }
 0xf33   : > { %v7614_v9 = vsel %vm7574_vm9, %v7554_v10, %v7594_v3 }
 0xf34   : > { %v7555_v29 = vadd.f32 %v13880_v39, %v7531_v46  ;;  %v7493_v5 = vpop.permute.xlu0 %7492  ;;  %7670 = vrot.lane.b32.xlu2 %v7614_v9, %s9383_s22 }
 0xf35   : > { %v7533_v62 = vadd.f32 %v7493_v5, %v7448_v36 }
 0xf36   : > { %v7595_v12 = vmul.f32 0.2, %v7555_v29  ;;  %vm7575_vm13 = vcmp.gt.f32.partialorder %v7555_v29, 0.0 }
 0xf37   : > { %v7557_v51 = vadd.f32 %v13880_v39, %v7533_v62 }
 0xf38   : > { %v7615_v38 = vsel %vm7575_vm13, %v7555_v29, %v7595_v12 }
 0xf39   : > { %v7597_v54 = vmul.f32 0.2, %v7557_v51  ;;  %7672 = vrot.lane.b32.xlu0 %v7615_v38, %s9383_s22  ;;  %vm7577_vm10 = vcmp.gt.f32.partialorder %v7557_v51, 0.0 }
 0xf3b   : > { %v7617_v30 = vsel %vm7577_vm10, %v7557_v51, %v7597_v54 }
 0xf3c   : > { %7676 = vrot.lane.b32.xlu2 %v7617_v30, %s9383_s22 }
 0xf63   : > { %v7639_v0 = vpop.permute.xlu1 %7638 }
 0xf64   : > { %7700 = vst.msk [vmem:[#allocation2 + $0x81] sm:$0xff] %vm7699_vm11, %v7639_v0 }
 0xf66   : > { %v7641_v56 = vpop.permute.xlu2 %7640 }
 0xf67   : > { %7701 = vst.msk [vmem:[#allocation2 + $0x89] sm:$0xff] %vm7699_vm11, %v7641_v56 }
 0xf6b   : > { %v7645_v61 = vpop.permute.xlu1 %7644 }
 0xf6c   : > { %7703 = vst.msk [vmem:[#allocation2 + $0xa9] sm:$0xff] %vm7699_vm11, %v7645_v61 }
 0xf6e   : > { %v7647_v32 = vpop.permute.xlu2 %7646 }
 0xf6f   : > { %7704 = vst.msk [vmem:[#allocation2 + $0xc1] sm:$0xff] %vm7699_vm11, %v7647_v32 }
 0xf70   : > { %v6716_v13 = vpop.f32.mrf.mxu3 }
 0xf73   : > { %v7651_v39 = vpop.permute.xlu1 %7650 }
 0xf74   : > { %7706 = vst.msk [vmem:[#allocation2 + $0xe1] sm:$0xff] %vm7699_vm11, %v7651_v39 }
 0xf76   : > { %v7653_v49 = vpop.permute.xlu2 %7652 }
 0xf77   : > { %7707 = vst.msk [vmem:[#allocation2 + $0xe9] sm:$0xff] %vm7699_vm11, %v7653_v49 }
 0xf7b   : > { %v7657_v58 = vpop.permute.xlu1 %7656 }
 0xf7c   : > { %7709 = vst.msk [vmem:[#allocation2 + $0x109] sm:$0xff] %vm7699_vm11, %v7657_v58 }
 0xf7e   : > { %v7659_v11 = vpop.permute.xlu2 %7658 }
 0xf7f   : > { %7710 = vst.msk [vmem:[#allocation2 + $0x121] sm:$0xff] %vm7699_vm11, %v7659_v11 }
 0xf83   : > { %v7643_v33 = vpop.permute.xlu0 %7642  ;;  %v7663_v37 = vpop.permute.xlu1 %7662 }
 0xf84   : > { %7702 = vst.msk [vmem:[#allocation2 + $0xa1] sm:$0xff] %vm7699_vm11, %v7643_v33 }
 0xf85   : > { %7712 = vst.msk [vmem:[#allocation2 + $0x141] sm:$0xff] %vm7699_vm11, %v7663_v37 }
 0xf86   : > { %v7665_v7 = vpop.permute.xlu2 %7664 }
 0xf87   : > { %7713 = vst.msk [vmem:[#allocation2 + $0x149] sm:$0xff] %vm7699_vm11, %v7665_v7 }
 0xf8b   : > { %v7649_v26 = vpop.permute.xlu0 %7648  ;;  %v7669_v31 = vpop.permute.xlu1 %7668 }
 0xf8c   : > { %7705 = vst.msk [vmem:[#allocation2 + $0xc9] sm:$0xff] %vm7699_vm11, %v7649_v26 }
 0xf8d   : > { %7715 = vst.msk [vmem:[#allocation2 + $0x169] sm:$0xff] %vm7699_vm11, %v7669_v31 }
 0xf8e   : > { %v7671_v21 = vpop.permute.xlu2 %7670 }
 0xf8f   : > { %7716 = vst.msk [vmem:[#allocation2 + $0x181] sm:$0xff] %vm7699_vm11, %v7671_v21 }
 0xf93   : > { %v7655_v2 = vpop.permute.xlu0 %7654  ;;  %v7675_v47 = vpop.permute.xlu1 %7674 }
 0xf94   : > { %7708 = vst.msk [vmem:[#allocation2 + $0x101] sm:$0xff] %vm7699_vm11, %v7655_v2 }
 0xf95   : > { %7718 = vst.msk [vmem:[#allocation2 + $0x1a1] sm:$0xff] %vm7699_vm11, %v7675_v47 }
 0xf96   : > { %v7677_v53 = vpop.permute.xlu2 %7676 }
 0xf97   : > { %7719 = vst.msk [vmem:[#allocation2 + $0x1a9] sm:$0xff] %vm7699_vm11, %v7677_v53 }
 0xf9b   : > { %v7661_v1 = vpop.permute.xlu0 %7660 }
 0xf9c   : > { %7711 = vst.msk [vmem:[#allocation2 + $0x129] sm:$0xff] %vm7699_vm11, %v7661_v1 }
 0xfa3   : > { %v7667_v42 = vpop.permute.xlu0 %7666 }
 0xfa4   : > { %7714 = vst.msk [vmem:[#allocation2 + $0x161] sm:$0xff] %vm7699_vm11, %v7667_v42 }
 0xfa8   : > { %7722 = sbr.rel (%p8944_p12) target bundleno = 4016 (0xfb0), region = 116 }
 0xfab   : > { %v7673_v60 = vpop.permute.xlu0 %7672 }
 0xfac   : > { %7717 = vst.msk [vmem:[#allocation2 + $0x189] sm:$0xff] %vm7699_vm11, %v7673_v60 }
 0xfad   : > { %v9384_v18 = vmov 0.0  }
 0xfae   : > { %7723 = vst.msk [vmem:[#allocation2 + $0x81] sm:$0xff] %vm7699_vm11, %v9384_v18 }
 0xfaf   : > { %7724 = vst.msk [vmem:[#allocation2 + $0x89] sm:$0xff] %vm7699_vm11, %v9384_v18 }
 0xfb0 PF: > { %7727 = sbr.rel (%p8946_p0) target bundleno = 4024 (0xfb8), region = 120 }
 0xfb5   : > { %v9385_v34 = vmov 0.0  }
 0xfb6   : > { %7729 = vst.msk [vmem:[#allocation2 + $0x1a1] sm:$0xff] %vm7699_vm11, %v9385_v34 }
 0xfb7   : > { %7730 = vst.msk [vmem:[#allocation2 + $0x1a9] sm:$0xff] %vm7699_vm11, %v9385_v34 }
 0xfb8 PF: > { %v7775_v43 = vld [vmem:[%s14572_s11 + $0x20] sm:$0xf]  ;;  %v7774_v20 = vld [vmem:[%s14572_s11 + $0x18] sm:$0xff]  ;;  %v7773_v25 = vld [vmem:[%s14572_s11 + $0x10] sm:$0xff]  ;;  %s9386_s19 = smov 124   ;;  %s9387_s23 = smov 116  }
 0xfb9   : > { %9199 = vmatpush.msk.msrb.mxu3 %vm1064_vm4, %v7775_v43  ;;  %v7772_v14 = vld [vmem:[%s14572_s11 + $0x8] sm:$0xff]  ;;  %v7771_v17 = vld [vmem:[%s14572_s11] sm:$0xff]  ;;  %v7733_v22 = vld [vmem:[#allocation2 + $0x90] sm:$0xff]  ;;  %s9388_s24 = smov 108   ;;  %s15006_s15 = smov 104  }
 0xfba   : > { %v7731_v59 = vld [vmem:[#allocation2 + $0x80] sm:$0xff]  ;;  %v7732_v44 = vld [vmem:[#allocation2 + $0x88] sm:$0xff]  ;;  %v7734_v52 = vld [vmem:[#allocation2 + $0x98] sm:$0xff]  ;;  %s9389_s16 = smov 100   ;;  %s15007_s18 = smov 96  }
 0xfbb   : > { %7911 = vmatpush.msrb.mxu3 %v7774_v20  ;;  %v7735_v24 = vld [vmem:[#allocation2 + $0xa0] sm:$0xff]  ;;  %v7736_v48 = vld [vmem:[#allocation2 + $0xa8] sm:$0xff]  ;;  %v7737_v45 = vld [vmem:[#allocation2 + $0xb0] sm:$0xff] }
 0xfbc   : > { %v7738_v35 = vld [vmem:[#allocation2 + $0xb8] sm:$0xff]  ;;  %v7739_v50 = vld [vmem:[#allocation2 + $0xc0] sm:$0xff]  ;;  %v7740_v63 = vld [vmem:[#allocation2 + $0xc8] sm:$0xff] }
 0xfbd   : > { %7912 = vmatpush.msrb.mxu3 %v7773_v25  ;;  %v7741_v6 = vld [vmem:[#allocation2 + $0xd0] sm:$0xff]  ;;  %v7742_v15 = vld [vmem:[#allocation2 + $0xd8] sm:$0xff]  ;;  %v7743_v40 = vld [vmem:[#allocation2 + $0xe0] sm:$0xff] }
 0xfbe   : > { %v7744_v57 = vld [vmem:[#allocation2 + $0xe8] sm:$0xff]  ;;  %v7745_v55 = vld [vmem:[#allocation2 + $0xf0] sm:$0xff]  ;;  %v7746_v28 = vld [vmem:[#allocation2 + $0xf8] sm:$0xff] }
 0xfbf   : > { %7913 = vmatpush.msrb.mxu3 %v7772_v14  ;;  %v7747_v23 = vld [vmem:[#allocation2 + $0x100] sm:$0xff]  ;;  %v7748_v41 = vld [vmem:[#allocation2 + $0x108] sm:$0xff]  ;;  %v7749_v4 = vld [vmem:[#allocation2 + $0x110] sm:$0xff] }
 0xfc0   : > { %v7750_v62 = vld [vmem:[#allocation2 + $0x118] sm:$0xff]  ;;  %v7751_v54 = vld [vmem:[#allocation2 + $0x120] sm:$0xff]  ;;  %v7752_v0 = vld [vmem:[#allocation2 + $0x128] sm:$0xff] }
 0xfc1   : > { %7914 = vmatpush.msrb.mxu3 %v7771_v17  ;;  %v7753_v39 = vld [vmem:[#allocation2 + $0x130] sm:$0xff]  ;;  %v7754_v2 = vld [vmem:[#allocation2 + $0x138] sm:$0xff]  ;;  %v7755_v53 = vld [vmem:[#allocation2 + $0x140] sm:$0xff] }
 0xfc2   : > { %9200 = vmatmul.msk.f32.vlgmr.msrb.gmra.mxu3 %vm624_vm1, %v7731_v59  ;;  %v7756_v18 = vld [vmem:[#allocation2 + $0x148] sm:$0xff]  ;;  %v7757_v17 = vld [vmem:[#allocation2 + $0x150] sm:$0xff] }
 0xfca   : > { %9201 = vmatmul.msk.f32.gmra.mxu3 %vm624_vm1, %v7732_v44 }
 0xfd2   : > { %9202 = vmatmul.msk.f32.gmra.mxu3 %vm624_vm1, %v7733_v22 }
 0xfda   : > { %9203 = vmatmul.msk.f32.gmra.mxu3 %vm624_vm1, %v7734_v52 }
 0xfe2   : > { %9204 = vmatmul.msk.f32.gmra.mxu3 %vm624_vm1, %v7735_v24 }
 0xfea   : > { %9205 = vmatmul.msk.f32.gmra.mxu3 %vm624_vm1, %v7736_v48  ;;  %v7758_v48 = vld [vmem:[#allocation2 + $0x158] sm:$0xff] }
 0xff2   : > { %9206 = vmatmul.msk.f32.gmra.mxu3 %vm624_vm1, %v7737_v45 }
 0xffa   : > { %9207 = vmatmul.msk.f32.gmra.mxu3 %vm624_vm1, %v7738_v35 }
0x1002   : > { %9208 = vmatmul.msk.f32.gmra.mxu3 %vm624_vm1, %v7739_v50  ;;  %v7759_v50 = vld [vmem:[#allocation2 + $0x160] sm:$0xff] }
0x100a   : > { %9209 = vmatmul.msk.f32.gmra.mxu3 %vm624_vm1, %v7740_v63 }
0x1012   : > { %9210 = vmatmul.msk.f32.gmra.mxu3 %vm624_vm1, %v7741_v6 }
0x101a   : > { %9211 = vmatmul.msk.f32.gmra.mxu3 %vm624_vm1, %v7742_v15 }
0x1022   : > { %9212 = vmatmul.msk.f32.gmra.mxu3 %vm624_vm1, %v7743_v40  ;;  %v7760_v40 = vld [vmem:[#allocation2 + $0x168] sm:$0xff] }
0x102a   : > { %9213 = vmatmul.msk.f32.gmra.mxu3 %vm624_vm1, %v7744_v57 }
0x1032   : > { %9214 = vmatmul.msk.f32.gmra.mxu3 %vm624_vm1, %v7745_v55 }
0x103a   : > { %9215 = vmatmul.msk.f32.gmra.mxu3 %vm624_vm1, %v7746_v28 }
0x1042   : > { %9216 = vmatmul.msk.f32.gmra.mxu3 %vm624_vm1, %v7747_v23 }
0x1045   : > { %v14027_v27 = vpop.f32.mrf.mxu3 }
0x1046   : > { %v8170_v8 = vrot.slane %v14027_v27, 2  ;;  %v8066_v19 = vrot.slane %v14027_v27, 1 }
0x104a   : > { %9217 = vmatmul.msk.f32.gmra.mxu3 %vm624_vm1, %v7748_v41  ;;  %v7761_v41 = vld [vmem:[#allocation2 + $0x170] sm:$0xff] }
0x104d   : > { %v14030_v16 = vpop.f32.mrf.mxu3 }
0x104e   : > { %v8171_v10 = vrot.slane %v14030_v16, 2  ;;  %v8067_v3 = vrot.slane %v14030_v16, 1 }
0x1050   : > { %v8172_v46 = vsel %vm1572_vm5, %v8170_v8, %v8171_v10  ;;  %v8068_v36 = vsel %vm1363_vm6, %v8066_v19, %v8067_v3 }
0x1051   : > { %8210 = vrot.lane.b32.xlu1 %v8172_v46, %s9367_s14  ;;  %8106 = vrot.lane.b32.xlu0 %v8068_v36, %s9386_s19 }
0x1052   : > { %9218 = vmatmul.msk.f32.gmra.mxu3 %vm624_vm1, %v7749_v4  ;;  %v7762_v4 = vld [vmem:[#allocation2 + $0x178] sm:$0xff] }
0x1055   : > { %v7922_v9 = vpop.f32.mrf.mxu3 }
0x1056   : > { %v8069_v29 = vrot.slane %v7922_v9, 1  ;;  %v8173_v5 = vrot.slane %v7922_v9, 2 }
0x1058   : > { %v8174_v12 = vsel %vm1572_vm5, %v8171_v10, %v8173_v5  ;;  %v8070_v51 = vsel %vm1363_vm6, %v8067_v3, %v8069_v29  ;;  %v7763_v5 = vld [vmem:[#allocation2 + $0x180] sm:$0xff] }
0x1059   : > { %8212 = vrot.lane.b32.xlu2 %v8174_v12, %s9367_s14  ;;  %8108 = vrot.lane.b32.xlu0 %v8070_v51, %s9386_s19 }
0x105a   : > { %9219 = vmatmul.msk.f32.gmra.mxu3 %vm624_vm1, %v7750_v62 }
0x105d   : > { %v7925_v38 = vpop.f32.mrf.mxu3 }
0x1062   : > { %9220 = vmatmul.msk.f32.gmra.mxu3 %vm624_vm1, %v7751_v54  ;;  %v7764_v54 = vld [vmem:[#allocation2 + $0x188] sm:$0xff] }
0x1065   : > { %v14047_v30 = vpop.f32.mrf.mxu3 }
0x1066   : > { %8276 = vrot.lane.b32.xlu2 %v14047_v30, %s9387_s23  ;;  %v8071_v61 = vrot.slane %v14047_v30, 1  ;;  %v8175_v11 = vrot.slane %v14047_v30, 2 }
0x106a   : > { %9221 = vmatmul.msk.f32.gmra.mxu3 %vm624_vm1, %v7752_v0 }
0x106d   : > { %v14052_v56 = vpop.f32.mrf.mxu3 }
0x106e   : > { %8278 = vrot.lane.b32.xlu0 %v14052_v56, %s9387_s23  ;;  %v8072_v32 = vrot.slane %v14052_v56, 1  ;;  %v8176_v58 = vrot.slane %v14052_v56, 2 }
0x1070   : > { %v8073_v49 = vsel %vm1363_vm6, %v8071_v61, %v8072_v32  ;;  %v8177_v37 = vsel %vm1572_vm5, %v8175_v11, %v8176_v58 }
0x1071   : > { %8110 = vrot.lane.b32.xlu1 %v8073_v49, %s9386_s19 }
0x1072   : > { %9222 = vmatmul.msk.f32.gmra.mxu3 %vm624_vm1, %v7753_v39 }
0x1075   : > { %v7933_v33 = vpop.f32.mrf.mxu3 }
0x1076   : > { %v8178_v7 = vrot.slane %v7933_v33, 2  ;;  %8214 = vrot.lane.b32.xlu0 %v8177_v37, %s9367_s14  ;;  %v8074_v31 = vrot.slane %v7933_v33, 1 }
0x1078   : > { %v8179_v26 = vsel %vm1572_vm5, %v8176_v58, %v8178_v7  ;;  %v8075_v21 = vsel %vm1363_vm6, %v8072_v32, %v8074_v31 }
0x1079   : > { %8415 = vrot.lane.b32.xlu1 %v8177_v37, %s9388_s24  ;;  %8417 = vrot.lane.b32.xlu2 %v8179_v26, %s9388_s24 }
0x107a   : > { %9223 = vmatmul.msk.f32.gmra.mxu3 %vm624_vm1, %v7754_v2 }
0x107d   : > { %v7936_v13 = vpop.f32.mrf.mxu3 }
0x107e   : > { %8346 = vrot.lane.b32.xlu0 %v8073_v49, %s9366_s17  ;;  %v7765_v49 = vld [vmem:[#allocation2 + $0x190] sm:$0xff] }
0x1081   : > { %8112 = vrot.lane.b32.xlu1 %v8075_v21, %s9386_s19 }
0x1082   : > { %9224 = vmatmul.msk.f32.gmra.mxu3 %vm624_vm1, %v7755_v53 }
0x1085   : > { %v14072_v47 = vpop.f32.mrf.mxu3 }
0x1086   : > { %8481 = vrot.lane.b32.xlu2 %v14072_v47, %s15006_s15  ;;  %v8180_v34 = vrot.slane %v14072_v47, 2  ;;  %v8076_v43 = vrot.slane %v14072_v47, 1 }
0x1089   : > { %8216 = vrot.lane.b32.xlu1 %v8179_v26, %s9367_s14 }
0x108a   : > { %9225 = vmatmul.msk.f32.gmra.mxu3 %vm624_vm1, %v7756_v18 }
0x108d   : > { %v14078_v1 = vpop.f32.mrf.mxu3 }
0x108e   : > { %8483 = vrot.lane.b32.xlu0 %v14078_v1, %s15006_s15  ;;  %8282 = vrot.lane.b32.xlu2 %v14078_v1, %s9387_s23  ;;  %v8181_v42 = vrot.slane %v14078_v1, 2  ;;  %v8077_v60 = vrot.slane %v14078_v1, 1 }
0x1090   : > { %v8182_v25 = vsel %vm1572_vm5, %v8180_v34, %v8181_v42  ;;  %v8078_v14 = vsel %vm1363_vm6, %v8076_v43, %v8077_v60  ;;  %v7767_v34 = vld [vmem:[#allocation2 + $0x1a0] sm:$0xff] }
0x1091   : > { %8348 = vrot.lane.b32.xlu1 %v8075_v21, %s9366_s17  ;;  %v7766_v21 = vld [vmem:[#allocation2 + $0x198] sm:$0xff] }
0x1092   : > { %9226 = vmatmul.msk.f32.gmra.mxu3 %vm624_vm1, %v7757_v17 }
0x1095   : > { %v7944_v20 = vpop.f32.mrf.mxu3 }
0x1096   : > { %8419 = vrot.lane.b32.xlu0 %v8182_v25, %s9388_s24  ;;  %8114 = vrot.lane.b32.xlu2 %v8078_v14, %s9386_s19  ;;  %v8183_v44 = vrot.slane %v7944_v20, 2  ;;  %v8079_v24 = vrot.slane %v7944_v20, 1 }
0x1098   : > { %v8184_v22 = vsel %vm1572_vm5, %v8181_v42, %v8183_v44  ;;  %v8080_v45 = vsel %vm1363_vm6, %v8077_v60, %v8079_v24  ;;  %v7768_v24 = vld [vmem:[#allocation2 + $0x1a8] sm:$0xff] }
0x1099   : > { %8280 = vrot.lane.b32.xlu1 %v14072_v47, %s9387_s23 }
0x109a   : > { %9227 = vmatmul.msk.f32.gmra.mxu3 %vm624_vm1, %v7758_v48 }
0x109d   : > { %v7947_v59 = vpop.f32.mrf.mxu3 }
0x109e   : > { %8551 = vrot.lane.b32.xlu0 %v8078_v14, %s9389_s16  ;;  %8218 = vrot.lane.b32.xlu2 %v8182_v25, %s9367_s14 }
0x10a1   : > { %8620 = vrot.lane.b32.xlu1 %v8182_v25, %s15007_s18 }
0x10a2   : > { %9228 = vmatmul.msk.f32.gmra.mxu3 %vm624_vm1, %v7759_v50 }
0x10a5   : > { %v14101_v52 = vpop.f32.mrf.mxu3 }
0x10a6   : > { %8350 = vrot.lane.b32.xlu2 %v8078_v14, %s9366_s17  ;;  %8220 = vrot.lane.b32.xlu0 %v8184_v22, %s9367_s14  ;;  %v8081_v6 = vrot.slane %v14101_v52, 1  ;;  %v8185_v28 = vrot.slane %v14101_v52, 2 }
0x10a9   : > { %8421 = vrot.lane.b32.xlu1 %v8184_v22, %s9388_s24 }
0x10aa   : > { %9229 = vmatmul.msk.f32.gmra.mxu3 %vm624_vm1, %v7760_v40 }
0x10ad   : > { %v14108_v35 = vpop.f32.mrf.mxu3 }
0x10ae   : > { %8352 = vrot.lane.b32.xlu0 %v8080_v45, %s9366_s17  ;;  %8116 = vrot.lane.b32.xlu2 %v8080_v45, %s9386_s19  ;;  %v8082_v15 = vrot.slane %v14108_v35, 1  ;;  %v8186_v23 = vrot.slane %v14108_v35, 2 }
0x10b0   : > { %v8083_v57 = vsel %vm1363_vm6, %v8081_v6, %v8082_v15  ;;  %v8187_v8 = vsel %vm1572_vm5, %v8185_v28, %v8186_v23  ;;  %v7769_v28 = vld [vmem:[#allocation2 + $0x1b0] sm:$0xff] }
0x10b1   : > { %8553 = vrot.lane.b32.xlu1 %v8080_v45, %s9389_s16 }
0x10b2   : > { %9230 = vmatmul.msk.f32.gmra.mxu3 %vm624_vm1, %v7761_v41 }
0x10b3   : > { %v14136_v19 = vpop.permute.xlu2 %8212 }
0x10b5   : > { %v7955_v63 = vpop.f32.mrf.mxu3 }
0x10b6   : > { %8622 = vrot.lane.b32.xlu2 %v8184_v22, %s15007_s18  ;;  %8284 = vrot.lane.b32.xlu0 %v14101_v52, %s9387_s23  ;;  %v8188_v3 = vrot.slane %v7955_v63, 2  ;;  %v8084_v29 = vrot.slane %v7955_v63, 1 }
0x10b8   : > { %v8189_v46 = vsel %vm1572_vm5, %v8186_v23, %v8188_v3  ;;  %v8085_v12 = vsel %vm1363_vm6, %v8082_v15, %v8084_v29 }
0x10b9   : > { %8485 = vrot.lane.b32.xlu1 %v14101_v52, %s15006_s15 }
0x10ba   : > { %9231 = vmatmul.msk.f32.gmra.mxu3 %vm624_vm1, %v7762_v4 }
0x10bd   : > { %v7958_v55 = vpop.f32.mrf.mxu3 }
0x10be   : > { %8487 = vrot.lane.b32.xlu2 %v14108_v35, %s15006_s15  ;;  %8118 = vrot.lane.b32.xlu0 %v8083_v57, %s9386_s19 }
0x10c0   : > { %v14145_v9 = vpop.permute.xlu2 %8276 }
0x10c1   : > { %8286 = vrot.lane.b32.xlu1 %v14108_v35, %s9387_s23 }
0x10c2   : > { %9232 = vmatmul.msk.f32.gmra.mxu3 %vm624_vm1, %v7763_v5 }
0x10c3   : > { %v8107_v62 = vpop.permute.xlu0 %8106  ;;  %v8211_v0 = vpop.permute.xlu1 %8210 }
0x10c4   : > { %v8154_v63 = vadd.f32 %v8107_v62, %v14027_v27 }
0x10c5   : > { %v14132_v10 = vpop.f32.mrf.mxu3 }
0x10c6   : > { %8423 = vrot.lane.b32.xlu2 %v8187_v8, %s9388_s24  ;;  %8624 = vrot.lane.b32.xlu0 %v8187_v8, %s15007_s18  ;;  %v8190_v37 = vrot.slane %v14132_v10, 2  ;;  %v8086_v26 = vrot.slane %v14132_v10, 1  ;;  %v8258_v55 = vadd.f32 %v8211_v0, %v8154_v63 }
0x10c8   : > { %v8324_v23 = vadd.f32 %v14145_v9, %v8258_v55 }
0x10c9   : > { %8222 = vrot.lane.b32.xlu1 %v8187_v8, %s9367_s14 }
0x10ca   : > { %9233 = vmatmul.msk.f32.gmra.mxu3 %vm624_vm1, %v7764_v54 }
0x10cb   : > { %v14156_v61 = vpop.permute.xlu0 %8108 }
0x10cd   : > { %v14141_v36 = vpop.f32.mrf.mxu3 }
0x10ce   : > { %8555 = vrot.lane.b32.xlu2 %v8083_v57, %s9389_s16  ;;  %8425 = vrot.lane.b32.xlu0 %v8189_v46, %s9388_s24  ;;  %v8191_v7 = vrot.slane %v14141_v36, 2  ;;  %v8087_v31 = vrot.slane %v14141_v36, 1 }
0x10d0   : > { %v8192_v53 = vsel %vm1572_vm5, %v8190_v37, %v8191_v7  ;;  %v8088_v42 = vsel %vm1363_vm6, %v8086_v26, %v8087_v31 }
0x10d1   : > { %8354 = vrot.lane.b32.xlu1 %v8083_v57, %s9366_s17 }
0x10d2   : > { %9234 = vmatmul.msk.f32.gmra.mxu3 %vm624_vm1, %v7765_v49 }
0x10d3   : > { %v14152_v38 = vpop.permute.xlu2 %8417 }
0x10d5   : > { %v7966_v51 = vpop.f32.mrf.mxu3 }
0x10d6   : > { %8224 = vrot.lane.b32.xlu2 %v8189_v46, %s9367_s14  ;;  %8557 = vrot.lane.b32.xlu0 %v8085_v12, %s9389_s16  ;;  %v8089_v59 = vrot.slane %v7966_v51, 1  ;;  %v8193_v44 = vrot.slane %v7966_v51, 2 }
0x10d8   : > { %v8194_v6 = vsel %vm1572_vm5, %v8191_v7, %v8193_v44 }
0x10d9   : > { %8120 = vrot.lane.b32.xlu1 %v8085_v12, %s9386_s19 }
0x10da   : > { %9235 = vmatmul.msk.f32.gmra.mxu3 %vm624_vm1, %v7766_v21 }
0x10dd   : > { %v7969_v32 = vpop.f32.mrf.mxu3 }
0x10de   : > { %8356 = vrot.lane.b32.xlu2 %v8085_v12, %s9366_s17  ;;  %8489 = vrot.lane.b32.xlu0 %v14132_v10, %s15006_s15  ;;  %v8155_v32 = vadd.f32 %v14156_v61, %v14030_v16  ;;  %v8704_v61 = vld [vmem:[%s9623_s21] sm:$0xff] }
0x10e0   : > { %v14161_v39 = vpop.permute.xlu2 %8481  ;;  %v14167_v11 = vpop.permute.xlu0 %8278 }
0x10e1   : > { %8626 = vrot.lane.b32.xlu1 %v8189_v46, %s15007_s18 }
0x10e2   : > { %9236 = vmatmul.msk.f32.gmra.mxu3 %vm624_vm1, %v7767_v34 }
0x10e3   : > { %v14165_v58 = vpop.permute.xlu1 %8110 }
0x10e5   : > { %v14179_v13 = vpop.f32.mrf.mxu3 }
0x10e6   : > { %8288 = vrot.lane.b32.xlu2 %v14132_v10, %s9387_s23  ;;  %8290 = vrot.lane.b32.xlu0 %v14141_v36, %s9387_s23  ;;  %v8195_v51 = vrot.slane %v14179_v13, 2  ;;  %v8091_v37 = vrot.slane %v14179_v13, 1 }
0x10e8   : > { %v8283_v33 = vpop.permute.xlu2 %8282  ;;  %v14184_v60 = vpop.permute.xlu0 %8214 }
0x10e9   : > { %8491 = vrot.lane.b32.xlu1 %v14141_v36, %s15006_s15 }
0x10ea   : > { %9237 = vmatmul.msk.f32.gmra.mxu3 %vm624_vm1, %v7768_v24 }
0x10eb   : > { %v8416_v2 = vpop.permute.xlu1 %8415 }
0x10ed   : > { %v14190_v20 = vpop.f32.mrf.mxu3 }
0x10ee   : > { %8226 = vrot.lane.b32.xlu0 %v8192_v53, %s9367_s14  ;;  %8122 = vrot.lane.b32.xlu2 %v8088_v42, %s9386_s19  ;;  %v8196_v54 = vrot.slane %v14190_v20, 2  ;;  %v8092_v7 = vrot.slane %v14190_v20, 1 }
0x10f0   : > { %v8115_v18 = vpop.permute.xlu2 %8114  ;;  %v8347_v14 = vpop.permute.xlu0 %8346  ;;  %v8197_v26 = vsel %vm1572_vm5, %v8195_v51, %v8196_v54  ;;  %v8093_v34 = vsel %vm1363_vm6, %v8091_v37, %v8092_v7 }
0x10f1   : > { %8427 = vrot.lane.b32.xlu1 %v8192_v53, %s9388_s24  ;;  %v8158_v25 = vadd.f32 %v8115_v18, %v14072_v47  ;;  %v8090_v47 = vsel %vm1363_vm6, %v8087_v31, %v8089_v59  ;;  %v8394_v8 = vadd.f32 %v8347_v14, %v8324_v23  ;;  %v8259_v31 = vadd.f32 %v14136_v19, %v8155_v32 }
0x10f2   : > { %9238 = vmatmul.msk.f32.gmra.mxu3 %vm624_vm1, %v7769_v28 }
0x10f3   : > { %v8113_v43 = vpop.permute.xlu1 %8112  ;;  %v8463_v46 = vadd.f32 %v8416_v2, %v8394_v8  ;;  %v8325_v2 = vadd.f32 %v14167_v11, %v8259_v31 }
0x10f4   : > { %v8157_v48 = vadd.f32 %v8113_v43, %v14052_v56 }
0x10f5   : > { %v14203_v15 = vpop.f32.mrf.mxu3  ;;  %v8529_v9 = vadd.f32 %v14161_v39, %v8463_v46  ;;  %v14235_v39 = vld [vmem:[%s14573_s12] ss:$0 sm:$0xff] }
0x10f6   : > { %8358 = vrot.lane.b32.xlu0 %v8088_v42, %s9366_s17  ;;  %8628 = vrot.lane.b32.xlu2 %v8192_v53, %s15007_s18  ;;  %v8198_v44 = vrot.slane %v14203_v15, 2 }
0x10f8   : > { %v8219_v17 = vpop.permute.xlu2 %8218 }
0x10f9   : > { %v14195_v22 = vadd.f32 %v8219_v17, %v8158_v25  ;;  %8559 = vrot.lane.b32.xlu1 %v8088_v42, %s9389_s16 }
0x10fb   : > { %v8217_v45 = vpop.permute.xlu1 %8216 }
0x10fc   : > { %v8261_v50 = vadd.f32 %v8217_v45, %v8157_v48 }
0x10fd   : > { %v7980_v41 = vpop.f32.mrf.mxu3 }
0x10fe   : > { %8429 = vrot.lane.b32.xlu2 %v8194_v6, %s9388_s24  ;;  %8124 = vrot.lane.b32.xlu0 %v8090_v47, %s9386_s19  ;;  %v14207_v40 = vadd.f32 %v8283_v33, %v8261_v50  ;;  %v8156_v50 = vadd.f32 %v14165_v58, %v14047_v30  ;;  %v8094_v30 = vrot.slane %v14203_v15, 1  ;;  %v8705_v58 = vld [vmem:[%s9623_s21 + $0x8] sm:$0xff] }
0x1100   : > { %v8484_v57 = vpop.permute.xlu0 %8483  ;;  %v14209_v56 = vpop.permute.xlu2 %8350  ;;  %v8095_v46 = vsel %vm1363_vm6, %v8092_v7, %v8094_v30 }
0x1101   : > { %8228 = vrot.lane.b32.xlu1 %v8194_v6, %s9367_s14 }
0x1103   : > { %v8349_v27 = vpop.permute.xlu1 %8348 }
0x1104   : > { %v8395_v43 = vadd.f32 %v8349_v27, %v8325_v2 }
0x1105   : > { %v14228_v0 = vpop.f32.mrf.mxu3 }
0x1106   : > { %8561 = vrot.lane.b32.xlu2 %v8090_v47, %s9389_s16  ;;  %8630 = vrot.lane.b32.xlu0 %v8194_v6, %s15007_s18 }
0x1108   : > { %v14216_v3 = vpop.permute.xlu0 %8419  ;;  %v8117_v4 = vpop.permute.xlu2 %8116 }
0x1109   : > { %8360 = vrot.lane.b32.xlu1 %v8090_v47, %s9366_s17  ;;  %v8159_v16 = vadd.f32 %v8117_v4, %v14078_v1  ;;  %v8464_v1 = vadd.f32 %v14152_v38, %v8395_v43  ;;  %v8199_v38 = vsel %vm1572_vm5, %v8196_v54, %v8198_v44  ;;  %v8260_v47 = vadd.f32 %v14184_v60, %v8156_v50 }
0x110b   : > { %v8281_v29 = vpop.permute.xlu1 %8280  ;;  %v8530_v24 = vadd.f32 %v8484_v57, %v8464_v1 }
0x110c   : > { %v8326_v27 = vadd.f32 %v8281_v29, %v8260_v47 }
0x110d   : > { %v14256_v17 = vpop.f32.mrf.mxu3 }
0x110e   : > { %8493 = vrot.lane.b32.xlu2 %v14179_v13, %s15006_s15  ;;  %8495 = vrot.lane.b32.xlu0 %v14190_v20, %s15006_s15  ;;  %v8396_v4 = vadd.f32 %v14209_v56, %v8326_v27 }
0x1110   : > { %v8552_v5 = vpop.permute.xlu0 %8551  ;;  %v8623_v62 = vpop.permute.xlu2 %8622  ;;  %v8465_v15 = vadd.f32 %v14216_v3, %v8396_v4  ;;  %v8096_v3 = vrot.slane %v14228_v0, 1 }
0x1111   : > { %v8599_v12 = vadd.f32 %v8552_v5, %v8529_v9  ;;  %8292 = vrot.lane.b32.xlu1 %v14179_v13, %s9387_s23 }
0x1113   : > { %v8621_v49 = vpop.permute.xlu1 %8620 }
0x1114   : > { %v8668_v33 = vadd.f32 %v8621_v49, %v8599_v12  ;;  %v8097_v49 = vrot.slane %v14256_v17, 1 }
0x1115   : > { %v14272_v63 = vpop.f32.mrf.mxu3 }
0x1116   : > { %v8688_v21 = vadd.f32 %v14235_v39, %v8668_v33  ;;  %8294 = vrot.lane.b32.xlu2 %v14190_v20, %s9387_s23  ;;  %8431 = vrot.lane.b32.xlu0 %v8197_v26, %s9388_s24  ;;  %v8099_v30 = vrot.slane %v14272_v63, 1 }
0x1118   : > { %v8720_v53 = vmul.f32 0.2, %v8688_v21  ;;  %v8221_v42 = vpop.permute.xlu0 %8220  ;;  %v14248_v18 = vpop.permute.xlu2 %8487 }
0x1119   : > { %v14251_v19 = vadd.f32 %v8221_v42, %v8159_v16  ;;  %8126 = vrot.lane.b32.xlu1 %v8093_v34, %s9386_s19  ;;  %v8098_v16 = vsel %vm1363_vm6, %v8096_v3, %v8097_v49  ;;  %v8200_v42 = vrot.slane %v14228_v0, 2 }
0x111a   : > { %v8736_v25 = vadd.f32 %v8720_v53, %v8704_v61 }
0x111b   : > { %v14254_v14 = vpop.permute.xlu1 %8421 }
0x111c   : > { %8752 = vst.msk [vmem:[%s9538_s30] sm:$0xff] %vm679_vm3, %v8736_v25 }
0x111d   : > { %v7991_v9 = vpop.f32.mrf.mxu3 }
0x111e   : > { %8230 = vrot.lane.b32.xlu2 %v8197_v26, %s9367_s14  ;;  %8563 = vrot.lane.b32.xlu0 %v8093_v34, %s9389_s16 }
0x1120   : > { %v14263_v11 = vpop.permute.xlu0 %8352  ;;  %v14265_v59 = vpop.permute.xlu2 %8423 }
0x1121   : > { %8632 = vrot.lane.b32.xlu1 %v8197_v26, %s15007_s18  ;;  %v8706_v26 = vld [vmem:[%s9623_s21 + $0x10] sm:$0xff]  ;;  %v8397_v44 = vadd.f32 %v14263_v11, %v14207_v40 }
0x1123   : > { %v8554_v48 = vpop.permute.xlu1 %8553 }
0x1124   : > { %v8600_v45 = vadd.f32 %v8554_v48, %v8530_v24 }
0x1125   : > { %v14293_v56 = vpop.f32.mrf.mxu3 }
0x1126   : > { %v8669_v6 = vadd.f32 %v8623_v62, %v8600_v45  ;;  %8362 = vrot.lane.b32.xlu2 %v8093_v34, %s9366_s17  ;;  %8232 = vrot.lane.b32.xlu0 %v8199_v38, %s9367_s14  ;;  %v8201_v34 = vrot.slane %v14256_v17, 2  ;;  %v8203_v45 = vrot.slane %v14272_v63, 2 }
0x1128   : > { %v8689_v55 = vadd.f32 %v14235_v39, %v8669_v6  ;;  %v14278_v57 = vpop.permute.xlu0 %8284  ;;  %v8556_v28 = vpop.permute.xlu2 %8555  ;;  %v8202_v25 = vsel %vm1572_vm5, %v8200_v42, %v8201_v34  ;;  %v8204_v47 = vsel %vm1572_vm5, %v8201_v34, %v8203_v45 }
0x1129   : > { %8433 = vrot.lane.b32.xlu1 %v8199_v38, %s9388_s24  ;;  %v8328_v3 = vadd.f32 %v14278_v57, %v14195_v22  ;;  %v8205_v22 = vrot.slane %v14293_v56, 2 }
0x112a   : > { %v8721_v23 = vmul.f32 0.2, %v8689_v55 }
0x112b   : > { %v8486_v41 = vpop.permute.xlu1 %8485 }
0x112c   : > { %v8737_v8 = vadd.f32 %v8721_v23, %v8705_v58  ;;  %v8531_v5 = vadd.f32 %v8486_v41, %v8465_v15  ;;  %v8100_v23 = vsel %vm1363_vm6, %v8097_v49, %v8099_v30 }
0x112d   : > { %v14310_v61 = vpop.f32.mrf.mxu3 }
0x112e   : > { %8753 = vst.msk [vmem:[%s9538_s30 + $0x8] sm:$0xff] %vm679_vm3, %v8737_v8  ;;  %8364 = vrot.lane.b32.xlu0 %v8095_v46, %s9366_s17  ;;  %8128 = vrot.lane.b32.xlu2 %v8095_v46, %s9386_s19  ;;  %v8601_v12 = vadd.f32 %v8556_v28, %v8531_v5  ;;  %v8206_v57 = vrot.slane %v14310_v61, 2 }
0x1130   : > { %v8119_v60 = vpop.permute.xlu0 %8118  ;;  %v8225_v29 = vpop.permute.xlu2 %8224 }
0x1131   : > { %8565 = vrot.lane.b32.xlu1 %v8095_v46, %s9389_s16  ;;  %v8160_v33 = vadd.f32 %v8119_v60, %v14101_v52 }
0x1133   : > { %v14291_v62 = vpop.permute.xlu1 %8286 }
0x1135   : > { %v14326_v1 = vpop.f32.mrf.mxu3 }
0x1136   : > { %8634 = vrot.lane.b32.xlu2 %v8199_v38, %s15007_s18  ;;  %8296 = vrot.lane.b32.xlu0 %v14228_v0, %s9387_s23  ;;  %v8466_v38 = vadd.f32 %v14254_v14, %v8397_v44 }
0x1138   : > { %v8625_v51 = vpop.permute.xlu0 %8624  ;;  %v14298_v54 = vpop.permute.xlu2 %8356  ;;  %v8532_v11 = vadd.f32 %v14248_v18, %v8466_v38  ;;  %v8707_v18 = vld [vmem:[%s9623_s21 + $0x18] sm:$0xff] }
0x1139   : > { %v8670_v32 = vadd.f32 %v8625_v51, %v8601_v12  ;;  %8497 = vrot.lane.b32.xlu1 %v14228_v0, %s15006_s15 }
0x113b   : > { %v8690_v37 = vadd.f32 %v14235_v39, %v8670_v32  ;;  %v8223_v7 = vpop.permute.xlu1 %8222 }
0x113c   : > { %v14307_v31 = vadd.f32 %v8223_v7, %v8160_v33 }
0x113d   : > { %v8722_v21 = vmul.f32 0.2, %v8690_v37  ;;  %v8002_v55 = vpop.f32.mrf.mxu3 }
0x113e   : > { %8499 = vrot.lane.b32.xlu2 %v14256_v17, %s15006_s15  ;;  %8130 = vrot.lane.b32.xlu0 %v8098_v16, %s9386_s19 }
0x113f   : > { %v8738_v2 = vadd.f32 %v8722_v21, %v8706_v26  ;;  %v8101_v21 = vrot.slane %v14293_v56, 1 }
0x1140   : > { %v14315_v53 = vpop.permute.xlu0 %8425  ;;  %v14317_v52 = vpop.permute.xlu2 %8288 }
0x1141   : > { %8754 = vst.msk [vmem:[%s9538_s30 + $0x10] sm:$0xff] %vm679_vm3, %v8738_v2  ;;  %8298 = vrot.lane.b32.xlu1 %v14256_v17, %s9387_s23 }
0x1143   : > { %v8355_v43 = vpop.permute.xlu1 %8354 }
0x1144   : > { %v8398_v33 = vadd.f32 %v8355_v43, %v8328_v3 }
0x1145   : > { %v14343_v41 = vpop.f32.mrf.mxu3 }
0x1146   : > { %8435 = vrot.lane.b32.xlu2 %v8202_v25, %s9388_s24  ;;  %8636 = vrot.lane.b32.xlu0 %v8202_v25, %s15007_s18 }
0x1148   : > { %v8558_v24 = vpop.permute.xlu0 %8557  ;;  %v8123_v48 = vpop.permute.xlu2 %8122 }
0x1149   : > { %8234 = vrot.lane.b32.xlu1 %v8202_v25, %s9367_s14  ;;  %v8602_v14 = vadd.f32 %v8558_v24, %v8532_v11  ;;  %v8162_v5 = vadd.f32 %v8123_v48, %v14132_v10  ;;  %v8467_v10 = vadd.f32 %v14265_v59, %v8398_v33  ;;  %v8207_v59 = vsel %vm1572_vm5, %v8205_v22, %v8206_v57 }
0x114a   : > { %v8329_v24 = vadd.f32 %v14291_v62, %v14251_v19 }
0x114b   : > { %v8121_v50 = vpop.permute.xlu1 %8120 }
0x114c   : > { %v8161_v6 = vadd.f32 %v8121_v50, %v14108_v35  ;;  %v8399_v38 = vadd.f32 %v14298_v54, %v8329_v24 }
0x114d   : > { %v14356_v15 = vpop.f32.mrf.mxu3 }
0x114e   : > { %8567 = vrot.lane.b32.xlu2 %v8098_v16, %s9389_s16  ;;  %8437 = vrot.lane.b32.xlu0 %v8204_v47, %s9388_s24  ;;  %v8265_v40 = vadd.f32 %v8225_v29, %v8161_v6  ;;  %v8708_v6 = vld [vmem:[%s9623_s21 + $0x20] sm:$0xff] }
0x1150   : > { %v8490_v28 = vpop.permute.xlu0 %8489  ;;  %v8629_v27 = vpop.permute.xlu2 %8628 }
0x1151   : > { %8366 = vrot.lane.b32.xlu1 %v8098_v16, %s9366_s17  ;;  %v8102_v16 = vrot.slane %v14310_v61, 1  ;;  %v8533_v2 = vadd.f32 %v8490_v28, %v8467_v10 }
0x1153   : > { %v8627_v35 = vpop.permute.xlu1 %8626  ;;  %v8103_v43 = vsel %vm1363_vm6, %v8101_v21, %v8102_v16 }
0x1154   : > { %v8671_v58 = vadd.f32 %v8627_v35, %v8602_v14  ;;  %v8104_v14 = vrot.slane %v14326_v1, 1 }
0x1155   : > { %v14369_v37 = vpop.f32.mrf.mxu3 }
0x1156   : > { %v8691_v8 = vadd.f32 %v14235_v39, %v8671_v58  ;;  %8236 = vrot.lane.b32.xlu2 %v8204_v47, %s9367_s14  ;;  %8569 = vrot.lane.b32.xlu0 %v8100_v23, %s9389_s16 }
0x1158   : > { %v8723_v4 = vmul.f32 0.2, %v8691_v8  ;;  %v8291_v46 = vpop.permute.xlu0 %8290  ;;  %v14349_v63 = vpop.permute.xlu2 %8429  ;;  %v8709_v8 = vld [vmem:[%s9623_s21 + $0x28] sm:$0xff] }
0x1159   : > { %v14351_v9 = vadd.f32 %v8291_v46, %v8265_v40  ;;  %8132 = vrot.lane.b32.xlu1 %v8100_v23, %s9386_s19  ;;  %v8468_v40 = vadd.f32 %v14315_v53, %v8399_v38  ;;  %v8208_v53 = vrot.slane %v14326_v1, 2  ;;  %v8105_v46 = vsel %vm1363_vm6, %v8102_v16, %v8104_v14  ;;  %v7770_v16 = vld [vmem:[#allocation2 + $0x1b8] sm:$0xff] }
0x115a   : > { %v8739_v60 = vadd.f32 %v8723_v4, %v8707_v18  ;;  %9239 = vmatmul.msk.f32.gmra.mxu3 %vm624_vm1, %v7770_v16  ;;  %v8341_v38 = vrot.slane %v14343_v41, 1 }
0x115b   : > { %v8492_v29 = vpop.permute.xlu1 %8491  ;;  %v8209_v4 = vsel %vm1572_vm5, %v8206_v57, %v8208_v53 }
0x115c   : > { %8755 = vst.msk [vmem:[%s9538_s30 + $0x18] sm:$0xff] %vm679_vm3, %v8739_v60  ;;  %v8534_v30 = vadd.f32 %v8492_v29, %v8468_v40 }
0x115d   : > { %v8013_v25 = vpop.f32.mrf.mxu3 }
0x115e   : > { %8368 = vrot.lane.b32.xlu2 %v8100_v23, %s9366_s17  ;;  %8501 = vrot.lane.b32.xlu0 %v14293_v56, %s15006_s15 }
0x1160   : > { %v8227_v12 = vpop.permute.xlu0 %8226  ;;  %v8562_v51 = vpop.permute.xlu2 %8561 }
0x1161   : > { %v14362_v32 = vadd.f32 %v8227_v12, %v8162_v5  ;;  %8638 = vrot.lane.b32.xlu1 %v8204_v47, %s15007_s18  ;;  %v8604_v62 = vadd.f32 %v8562_v51, %v8534_v30  ;;  %v8330_v12 = vadd.f32 %v14317_v52, %v14307_v31  ;;  %v8344_v30 = vrot.slane %v14369_v37, 1 }
0x1163   : > { %v14367_v49 = vpop.permute.xlu1 %8427 }
0x1166   : > { %8300 = vrot.lane.b32.xlu2 %v14293_v56, %s9387_s23  ;;  %8302 = vrot.lane.b32.xlu0 %v14310_v61, %s9387_s23 }
0x1168   : > { %v8359_v7 = vpop.permute.xlu0 %8358  ;;  %v14376_v26 = vpop.permute.xlu2 %8493 }
0x1169   : > { %8503 = vrot.lane.b32.xlu1 %v14310_v61, %s15006_s15  ;;  %v8400_v51 = vadd.f32 %v8359_v7, %v8330_v12 }
0x116b   : > { %v8560_v42 = vpop.permute.xlu1 %8559  ;;  %v8469_v10 = vadd.f32 %v14367_v49, %v8400_v51  ;;  %v8411_v49 = vrot.slane %v14356_v15, 2 }
0x116c   : > { %v8603_v34 = vadd.f32 %v8560_v42, %v8533_v2  ;;  %v14439_v42 = vpop.f32.mrf.mxu3 }
0x116d   : > { %v8535_v52 = vadd.f32 %v14376_v26, %v8469_v10 }
0x116e   : > { %v8672_v44 = vadd.f32 %v8629_v27, %v8603_v34  ;;  %8238 = vrot.lane.b32.xlu0 %v8207_v59, %s9367_s14  ;;  %8134 = vrot.lane.b32.xlu2 %v8103_v43, %s9386_s19 }
0x1170   : > { %v8692_v48 = vadd.f32 %v14235_v39, %v8672_v44  ;;  %v8125_v45 = vpop.permute.xlu0 %8124  ;;  %v8295_v50 = vpop.permute.xlu2 %8294  ;;  %v8710_v44 = vld [vmem:[%s9623_s21 + $0x30] sm:$0xff] }
0x1171   : > { %v8163_v47 = vadd.f32 %v8125_v45, %v14141_v36  ;;  %8439 = vrot.lane.b32.xlu1 %v8207_v59, %s9388_s24 }
0x1172   : > { %v8724_v55 = vmul.f32 0.2, %v8692_v48 }
0x1173   : > { %v8229_v11 = vpop.permute.xlu1 %8228 }
0x1174   : > { %v8740_v28 = vadd.f32 %v8724_v55, %v8708_v6  ;;  %v8267_v27 = vadd.f32 %v8229_v11, %v8163_v47  ;;  %v8342_v6 = vrot.slane %v14356_v15, 1  ;;  %v8018_v11 = vpop.f32.mrf.mxu3 }
0x1176   : > { %8756 = vst.msk [vmem:[%s9538_s30 + $0x20] sm:$0xff] %vm679_vm3, %v8740_v28  ;;  %8370 = vrot.lane.b32.xlu0 %v8103_v43, %s9366_s17  ;;  %8640 = vrot.lane.b32.xlu2 %v8207_v59, %s15007_s18  ;;  %v14400_v19 = vadd.f32 %v8295_v50, %v8267_v27  ;;  %v8343_v28 = vsel %vm1363_vm6, %v8341_v38, %v8342_v6 }
0x1177   : > { %v8345_v14 = vsel %vm1363_vm6, %v8342_v6, %v8344_v30 }
0x1178   : > { %v8631_v36 = vpop.permute.xlu0 %8630  ;;  %v8231_v54 = vpop.permute.xlu2 %8230 }
0x1179   : > { %v8673_v35 = vadd.f32 %v8631_v36, %v8604_v62  ;;  %8571 = vrot.lane.b32.xlu1 %v8103_v43, %s9389_s16 }
0x117b   : > { %v8693_v58 = vadd.f32 %v14235_v39, %v8673_v35  ;;  %v8361_v23 = vpop.permute.xlu1 %8360 }
0x117c   : > { %v8401_v47 = vadd.f32 %v8361_v23, %v14351_v9  ;;  %v8021_v53 = vpop.f32.mrf.mxu3 }
0x117d   : > { %v8725_v18 = vmul.f32 0.2, %v8693_v58 }
0x117e   : > { %8441 = vrot.lane.b32.xlu2 %v8209_v4, %s9388_s24  ;;  %8136 = vrot.lane.b32.xlu0 %v8105_v46, %s9386_s19  ;;  %v8470_v27 = vadd.f32 %v14349_v63, %v8401_v47 }
0x117f   : > { %v8741_v60 = vadd.f32 %v8725_v18, %v8709_v8  ;;  %v8546_v8 = vrot.slane %v14439_v42, 1  ;;  %v8547_v18 = vrot.slane %v8018_v11, 1 }
0x1180   : > { %v8496_v29 = vpop.permute.xlu0 %8495  ;;  %v14411_v5 = vpop.permute.xlu2 %8362 }
0x1181   : > { %8757 = vst.msk [vmem:[%s9538_s30 + $0x28] sm:$0xff] %vm679_vm3, %v8741_v60  ;;  %8240 = vrot.lane.b32.xlu1 %v8209_v4, %s9367_s14  ;;  %v8536_v62 = vadd.f32 %v8496_v29, %v8470_v27 }
0x1183   : > { %v14416_v1 = vpop.permute.xlu1 %8292 }
0x1184   : > { %v8332_v23 = vadd.f32 %v14416_v1, %v14362_v32 }
0x1186   : > { %8573 = vrot.lane.b32.xlu2 %v8105_v46, %s9389_s16  ;;  %8642 = vrot.lane.b32.xlu0 %v8209_v4, %s15007_s18  ;;  %v8711_v4 = vld [vmem:[%s9623_s21 + $0x38] sm:$0xff]  ;;  %v8402_v51 = vadd.f32 %v14411_v5, %v8332_v23  ;;  %v8616_v5 = vrot.slane %v8018_v11, 2 }
0x1188   : > { %v14422_v3 = vpop.permute.xlu0 %8431  ;;  %v8129_v33 = vpop.permute.xlu2 %8128 }
0x1189   : > { %8372 = vrot.lane.b32.xlu1 %v8105_v46, %s9366_s17  ;;  %v8165_v25 = vadd.f32 %v8129_v33, %v14190_v20  ;;  %v8413_v20 = vrot.slane %v14369_v37, 2  ;;  %v8549_v46 = vrot.slane %v8021_v53, 1  ;;  %v8548_v33 = vsel %vm1363_vm6, %v8546_v8, %v8547_v18 }
0x118b   : > { %v8127_v22 = vpop.permute.xlu1 %8126  ;;  %v8414_v9 = vsel %vm1572_vm5, %v8411_v49, %v8413_v20  ;;  %v8550_v10 = vsel %vm1363_vm6, %v8547_v18, %v8549_v46 }
0x118c   : > { %v8164_v57 = vadd.f32 %v8127_v22, %v14179_v13  ;;  %v8410_v13 = vrot.slane %v14343_v41, 2  ;;  %v8471_v22 = vadd.f32 %v14422_v3, %v8402_v51 }
0x118e   : > { %8505 = vrot.lane.b32.xlu2 %v14343_v41, %s15006_s15  ;;  %8507 = vrot.lane.b32.xlu0 %v14356_v15, %s15006_s15  ;;  %v14431_v31 = vadd.f32 %v8231_v54, %v8164_v57  ;;  %v8412_v26 = vsel %vm1572_vm5, %v8410_v13, %v8411_v49  ;;  %v8615_v57 = vrot.slane %v14439_v42, 2 }
0x1190   : > { %v8564_v7 = vpop.permute.xlu0 %8563  ;;  %v8635_v21 = vpop.permute.xlu2 %8634  ;;  %v8617_v16 = vsel %vm1572_vm5, %v8615_v57, %v8616_v5  ;;  %v8714_v57 = vld [vmem:[%s9623_s21 + $0x50] sm:$0xff] }
0x1191   : > { %v8605_v2 = vadd.f32 %v8564_v7, %v8535_v52  ;;  %8304 = vrot.lane.b32.xlu1 %v14343_v41, %s9387_s23 }
0x1193   : > { %v8633_v34 = vpop.permute.xlu1 %8632 }
0x1194   : > { %v8674_v59 = vadd.f32 %v8633_v34, %v8605_v2 }
0x1196   : > { %v8694_v43 = vadd.f32 %v14235_v39, %v8674_v59  ;;  %8306 = vrot.lane.b32.xlu2 %v14356_v15, %s9387_s23  ;;  %8443 = vrot.lane.b32.xlu0 %v8412_v26, %s9388_s24 }
0x1198   : > { %v8726_v24 = vmul.f32 0.2, %v8694_v43  ;;  %v8233_v48 = vpop.permute.xlu0 %8232  ;;  %v14448_v45 = vpop.permute.xlu2 %8499  ;;  %v8712_v43 = vld [vmem:[%s9623_s21 + $0x40] sm:$0xff] }
0x1199   : > { %v14450_v50 = vadd.f32 %v8233_v48, %v8165_v25  ;;  %8644 = vrot.lane.b32.xlu1 %v8412_v26, %s15007_s18 }
0x119a   : > { %v8742_v55 = vadd.f32 %v8726_v24, %v8710_v44 }
0x119b   : > { %v14456_v40 = vpop.permute.xlu1 %8433 }
0x119c   : > { %8758 = vst.msk [vmem:[%s9538_s30 + $0x30] sm:$0xff] %vm679_vm3, %v8742_v55 }
0x119e   : > { %8575 = vrot.lane.b32.xlu0 %v8343_v28, %s9389_s16  ;;  %8374 = vrot.lane.b32.xlu2 %v8343_v28, %s9366_s17 }
0x11a0   : > { %v8365_v41 = vpop.permute.xlu0 %8364  ;;  %v14465_v15 = vpop.permute.xlu2 %8435 }
0x11a1   : > { %8445 = vrot.lane.b32.xlu1 %v8414_v9, %s9388_s24  ;;  %v8403_v47 = vadd.f32 %v8365_v41, %v14400_v19  ;;  %v8713_v19 = vld [vmem:[%s9623_s21 + $0x48] sm:$0xff] }
0x11a3   : > { %v8566_v36 = vpop.permute.xlu1 %8565 }
0x11a4   : > { %v8606_v54 = vadd.f32 %v8566_v36, %v8536_v62 }
0x11a6   : > { %v8675_v63 = vadd.f32 %v8635_v21, %v8606_v54  ;;  %8376 = vrot.lane.b32.xlu0 %v8345_v14, %s9366_s17  ;;  %8511 = vrot.lane.b32.xlu2 %v8018_v11, %s15006_s15  ;;  %v8618_v21 = vrot.slane %v8021_v53, 2  ;;  %v8472_v11 = vadd.f32 %v14456_v40, %v8403_v47 }
0x11a8   : > { %v8695_v35 = vadd.f32 %v14235_v39, %v8675_v63  ;;  %v14474_v58 = vpop.permute.xlu0 %8296  ;;  %v8568_v37 = vpop.permute.xlu2 %8567  ;;  %v8619_v49 = vsel %vm1572_vm5, %v8616_v5, %v8618_v21 }
0x11a9   : > { %8577 = vrot.lane.b32.xlu1 %v8345_v14, %s9389_s16 }
0x11aa   : > { %v8727_v60 = vmul.f32 0.2, %v8695_v35 }
0x11ab   : > { %v8498_v29 = vpop.permute.xlu1 %8497 }
0x11ac   : > { %v8743_v12 = vadd.f32 %v8727_v60, %v8711_v4  ;;  %v8537_v52 = vadd.f32 %v8498_v29, %v8471_v22 }
0x11ae   : > { %8759 = vst.msk [vmem:[%s9538_s30 + $0x38] sm:$0xff] %vm679_vm3, %v8743_v12  ;;  %8579 = vrot.lane.b32.xlu2 %v8548_v33, %s9389_s16  ;;  %8581 = vrot.lane.b32.xlu0 %v8550_v10, %s9389_s16  ;;  %v8607_v2 = vadd.f32 %v8568_v37, %v8537_v52 }
0x11b0   : > { %v8131_v32 = vpop.permute.xlu0 %8130  ;;  %v8237_v1 = vpop.permute.xlu2 %8236 }
0x11b1   : > { %8509 = vrot.lane.b32.xlu1 %v14439_v42, %s15006_s15  ;;  %v8166_v42 = vadd.f32 %v8131_v32, %v14228_v0 }
0x11b3   : > { %v8299_v7 = vpop.permute.xlu1 %8298 }
0x11b4   : > { %v8335_v10 = vadd.f32 %v8299_v7, %v14450_v50 }
0x11b6   : > { %8646 = vrot.lane.b32.xlu2 %v8414_v9, %s15007_s18  ;;  %8648 = vrot.lane.b32.xlu0 %v8617_v16, %s15007_s18  ;;  %v8538_v9 = vadd.f32 %v14448_v45, %v8472_v11  ;;  %v8334_v45 = vadd.f32 %v14474_v58, %v14431_v31 }
0x11b8   : > { %v8637_v13 = vpop.permute.xlu0 %8636  ;;  %v8369_v3 = vpop.permute.xlu2 %8368 }
0x11b9   : > { %v8676_v34 = vadd.f32 %v8637_v13, %v8607_v2  ;;  %8650 = vrot.lane.b32.xlu1 %v8619_v49, %s15007_s18  ;;  %v8405_v22 = vadd.f32 %v8369_v3, %v8335_v10  ;;  %v8715_v49 = vld [vmem:[%s9623_s21 + $0x58] sm:$0xff] }
0x11bb   : > { %v8696_v59 = vadd.f32 %v14235_v39, %v8676_v34  ;;  %v8235_v26 = vpop.permute.xlu1 %8234 }
0x11bc   : > { %v14500_v25 = vadd.f32 %v8235_v26, %v8166_v42 }
0x11bd   : > { %v8728_v44 = vmul.f32 0.2, %v8696_v59 }
0x11bf   : > { %v8744_v24 = vadd.f32 %v8728_v44, %v8712_v43 }
0x11c0   : > { %v8438_v48 = vpop.permute.xlu0 %8437  ;;  %v8301_v38 = vpop.permute.xlu2 %8300 }
0x11c1   : > { %8760 = vst.msk [vmem:[%s9538_s30 + $0x40] sm:$0xff] %vm679_vm3, %v8744_v24  ;;  %v8474_v58 = vadd.f32 %v8438_v48, %v8405_v22  ;;  %v8336_v43 = vadd.f32 %v8301_v38, %v14500_v25 }
0x11c3   : > { %v8367_v6 = vpop.permute.xlu1 %8366 }
0x11c4   : > { %v8404_v18 = vadd.f32 %v8367_v6, %v8334_v45 }
0x11c6   : > { %v8473_v4 = vadd.f32 %v14465_v15, %v8404_v18 }
0x11c8   : > { %v8570_v55 = vpop.permute.xlu0 %8569  ;;  %v14505_v20 = vpop.permute.xlu2 %8134 }
0x11c9   : > { %v8608_v36 = vadd.f32 %v8570_v55, %v8538_v9  ;;  %v8168_v25 = vadd.f32 %v14505_v20, %v14293_v56 }
0x11cb   : > { %v8133_v0 = vpop.permute.xlu1 %8132 }
0x11cc   : > { %v8167_v28 = vadd.f32 %v8133_v0, %v14256_v17 }
0x11ce   : > { %v8271_v27 = vadd.f32 %v8237_v1, %v8167_v28 }
0x11d0   : > { %v8502_v30 = vpop.permute.xlu0 %8501  ;;  %v8641_v62 = vpop.permute.xlu2 %8640 }
0x11d1   : > { %v8539_v60 = vadd.f32 %v8502_v30, %v8473_v4 }
0x11d3   : > { %v8639_v54 = vpop.permute.xlu1 %8638 }
0x11d4   : > { %v8677_v14 = vadd.f32 %v8639_v54, %v8608_v36 }
0x11d6   : > { %v8697_v63 = vadd.f32 %v14235_v39, %v8677_v14 }
0x11d8   : > { %v8729_v41 = vmul.f32 0.2, %v8697_v63  ;;  %v8303_v53 = vpop.permute.xlu0 %8302  ;;  %v8442_v35 = vpop.permute.xlu2 %8441 }
0x11d9   : > { %v8337_v0 = vadd.f32 %v8303_v53, %v8271_v27 }
0x11da   : > { %v8745_v37 = vadd.f32 %v8729_v41, %v8713_v19  ;;  %v8716_v19 = vld [vmem:[%s9623_s21 + $0x60] sm:$0xff] }
0x11db   : > { %v8504_v23 = vpop.permute.xlu1 %8503 }
0x11dc   : > { %8761 = vst.msk [vmem:[%s9538_s30 + $0x48] sm:$0xff] %vm679_vm3, %v8745_v37  ;;  %v8540_v52 = vadd.f32 %v8504_v23, %v8474_v58 }
0x11dd   : > { %v8024_v54 = vpop.f32.mrf.mxu3 }
0x11e0   : > { %v8239_v40 = vpop.permute.xlu0 %8238  ;;  %v8574_v17 = vpop.permute.xlu2 %8573 }
0x11e1   : > { %v8610_v16 = vadd.f32 %v8574_v17, %v8540_v52  ;;  %v8272_v37 = vadd.f32 %v8239_v40, %v8168_v25  ;;  %v8717_v40 = vld [vmem:[%s9623_s21 + $0x68] sm:$0xff]  ;;  %v8718_v52 = vld [vmem:[%s9623_s21 + $0x70] sm:$0xff] }
0x11e3   : > { %v8440_v8 = vpop.permute.xlu1 %8439 }
0x11e8   : > { %v8371_v46 = vpop.permute.xlu0 %8370  ;;  %v8506_v29 = vpop.permute.xlu2 %8505 }
0x11e9   : > { %v8406_v44 = vadd.f32 %v8371_v46, %v8336_v43 }
0x11eb   : > { %v8572_v12 = vpop.permute.xlu1 %8571  ;;  %v8475_v6 = vadd.f32 %v8440_v8, %v8406_v44 }
0x11ec   : > { %v8609_v51 = vadd.f32 %v8572_v12, %v8539_v60 }
0x11ed   : > { %v8541_v55 = vadd.f32 %v8506_v29, %v8475_v6 }
0x11ee   : > { %v8678_v33 = vadd.f32 %v8641_v62, %v8609_v51 }
0x11f0   : > { %v8698_v32 = vadd.f32 %v14235_v39, %v8678_v33  ;;  %v8137_v1 = vpop.permute.xlu0 %8136  ;;  %v8307_v21 = vpop.permute.xlu2 %8306 }
0x11f1   : > { %v8169_v38 = vadd.f32 %v8137_v1, %v14310_v61 }
0x11f2   : > { %v8730_v31 = vmul.f32 0.2, %v8698_v32 }
0x11f3   : > { %v8241_v5 = vpop.permute.xlu1 %8240 }
0x11f4   : > { %v8746_v15 = vadd.f32 %v8730_v31, %v8714_v57  ;;  %v8273_v23 = vadd.f32 %v8241_v5, %v8169_v38 }
0x11f6   : > { %8762 = vst.msk [vmem:[%s9538_s30 + $0x50] sm:$0xff] %vm679_vm3, %v8746_v15  ;;  %v8339_v56 = vadd.f32 %v8307_v21, %v8273_v23 }
0x11f8   : > { %v8643_v2 = vpop.permute.xlu0 %8642  ;;  %v8375_v3 = vpop.permute.xlu2 %8374 }
0x11f9   : > { %v8679_v13 = vadd.f32 %v8643_v2, %v8610_v16 }
0x11fb   : > { %v8699_v50 = vadd.f32 %v14235_v39, %v8679_v13  ;;  %v8373_v7 = vpop.permute.xlu1 %8372 }
0x11fc   : > { %v8407_v9 = vadd.f32 %v8373_v7, %v8337_v0 }
0x11fd   : > { %v8731_v34 = vmul.f32 0.2, %v8699_v50  ;;  %v8719_v50 = vld [vmem:[%s9623_s21 + $0x78] sm:$0xff] }
0x11fe   : > { %v8476_v63 = vadd.f32 %v8442_v35, %v8407_v9 }
0x11ff   : > { %v8747_v42 = vadd.f32 %v8731_v34, %v8715_v49 }
0x1200   : > { %v8508_v59 = vpop.permute.xlu0 %8507  ;;  %v8512_v48 = vpop.permute.xlu2 %8511 }
0x1201   : > { %8763 = vst.msk [vmem:[%s9538_s30 + $0x58] sm:$0xff] %vm679_vm3, %v8747_v42  ;;  %v8542_v17 = vadd.f32 %v8508_v59, %v8476_v63 }
0x1203   : > { %v8305_v26 = vpop.permute.xlu1 %8304 }
0x1204   : > { %v8338_v45 = vadd.f32 %v8305_v26, %v8272_v37 }
0x1206   : > { %v8408_v46 = vadd.f32 %v8375_v3, %v8338_v45 }
0x1208   : > { %v8444_v24 = vpop.permute.xlu0 %8443  ;;  %v8580_v30 = vpop.permute.xlu2 %8579 }
0x1209   : > { %v8477_v29 = vadd.f32 %v8444_v24, %v8408_v46 }
0x120b   : > { %v8645_v47 = vpop.permute.xlu1 %8644 }
0x1210   : > { %v8576_v11 = vpop.permute.xlu0 %8575  ;;  %v8647_v4 = vpop.permute.xlu2 %8646 }
0x1211   : > { %v8611_v28 = vadd.f32 %v8576_v11, %v8541_v55 }
0x1213   : > { %v8680_v62 = vadd.f32 %v8645_v47, %v8611_v28  ;;  %v8446_v36 = vpop.permute.xlu1 %8445 }
0x1215   : > { %v8700_v14 = vadd.f32 %v14235_v39, %v8680_v62 }
0x1217   : > { %v8732_v41 = vmul.f32 0.2, %v8700_v14 }
0x1218   : > { %v8377_v27 = vpop.permute.xlu0 %8376 }
0x1219   : > { %v8748_v53 = vadd.f32 %v8732_v41, %v8716_v19  ;;  %v8409_v61 = vadd.f32 %v8377_v27, %v8339_v56 }
0x121b   : > { %8764 = vst.msk [vmem:[%s9538_s30 + $0x60] sm:$0xff] %vm679_vm3, %v8748_v53  ;;  %v8578_v8 = vpop.permute.xlu1 %8577  ;;  %v8478_v33 = vadd.f32 %v8446_v36, %v8409_v61 }
0x121c   : > { %v8612_v18 = vadd.f32 %v8578_v8, %v8542_v17 }
0x121d   : > { %v8544_v22 = vadd.f32 %v8512_v48, %v8478_v33 }
0x121e   : > { %v8681_v20 = vadd.f32 %v8647_v4, %v8612_v18 }
0x1220   : > { %v8701_v35 = vadd.f32 %v14235_v39, %v8681_v20  ;;  %v8582_v60 = vpop.permute.xlu0 %8581 }
0x1221   : > { %v8614_v58 = vadd.f32 %v8582_v60, %v8544_v22 }
0x1222   : > { %v8733_v12 = vmul.f32 0.2, %v8701_v35 }
0x1223   : > { %v8510_v51 = vpop.permute.xlu1 %8509 }
0x1224   : > { %v8749_v10 = vadd.f32 %v8733_v12, %v8717_v40  ;;  %v8543_v32 = vadd.f32 %v8510_v51, %v8477_v29 }
0x1226   : > { %8765 = vst.msk [vmem:[%s9538_s30 + $0x68] sm:$0xff] %vm679_vm3, %v8749_v10  ;;  %v8613_v1 = vadd.f32 %v8580_v30, %v8543_v32 }
0x1228   : > { %v8649_v57 = vpop.permute.xlu0 %8648 }
0x1229   : > { %v8682_v31 = vadd.f32 %v8649_v57, %v8613_v1 }
0x122b   : > { %v8702_v5 = vadd.f32 %v14235_v39, %v8682_v31  ;;  %v8651_v15 = vpop.permute.xlu1 %8650 }
0x122c   : > { %v8683_v21 = vadd.f32 %v8651_v15, %v8614_v58 }
0x122d   : > { %v8734_v16 = vmul.f32 0.2, %v8702_v5 }
0x122e   : > { %v8703_v2 = vadd.f32 %v14235_v39, %v8683_v21 }
0x122f   : > { %v8750_v13 = vadd.f32 %v8734_v16, %v8718_v52 }
0x1230   : > { %v8735_v7 = vmul.f32 0.2, %v8703_v2 }
0x1231   : > { %8766 = vst.msk [vmem:[%s9538_s30 + $0x70] sm:$0xff] %vm679_vm3, %v8750_v13 }
0x1232   : > { %v8751_v49 = vadd.f32 %v8735_v7, %v8719_v50 }
0x1234   : > { %8767 = vst.msk [vmem:[%s9538_s30 + $0x78] sm:$0xff] %vm679_vm3, %v8751_v49 }
0x1235 PF: > { %s23_s29 = sadd.s32 1, %s9361_s29   ;;  %s15008_s17 = sld [smem:[#allocation3_spill]] }
0x1236   : > { %p20_p1 = scmp.ge.s32.totalorder %s23_s29, 6   ;;  %s15009_s14 = sld [smem:[#allocation4_spill]] }
0x1237   : > { %s15010_s25 = smov %s9353_s27  ;;  %s15011_s26 = smov %s9357_s28 }
0x1238   :  { %22 = sbr.rel (!%p20_p1) target bundleno = 3 (0x3), region = 168 }
0x123b   : > { %s15012_s27 = smov %s15008_s17 }
0x123c   : > { %s15013_s28 = smov %s15009_s14 }

</bundles_post_ra>
